<compile_context>
chip_gen: v6e
topology: v6e:2x2x1
jax: 0.10.0
libtpu: 0.0.40
codegen_flags: <defaults>
</compile_context>

<pallas_src>
import functools

import jax
import jax.numpy as jnp
from jax import lax
from jax.experimental import pallas as pl
from jax.experimental.pallas import tpu as pltpu

_EPS = 1e-5


def _round_up(x, m):
    return (x + m - 1) // m * m


def _resnet_block_kernel(x_ref, w1_ref, w2_ref, out_ref, pad_ref,
                         *, H, W, Wpad, mxu_dtype):
    # x_ref:   ((H+3)*Wpad, Cp)  flat zero-padded, channel-padded input image (f32)
    # w*_ref:  (9, Cp, Cp)       conv weights in mxu_dtype, tap k = dh*3 + dw
    # out_ref: (H*Wpad, Cp)      flat output grid; cols >= W are garbage (discarded)
    # pad_ref: ((H+3)*Wpad, Cp)  f32 scratch: zero-padded conv2 input / conv1 accum
    Cp = x_ref.shape[-1]
    L = H * Wpad                       # rows of the flat (H, Wpad) output grid
    top = Wpad + 1                     # interior offset inside the padded image
    inv_cnt = 1.0 / float(H * W)

    # Valid-column mask of the flat row-major (H, Wpad) grid, built in-kernel from a
    # 2-D iota (replaces the old (L,1) VMEM mask input).  The float floor-division is
    # exact for these integer magnitudes (<< 2^24, offset keeps floor on the right side).
    row = lax.broadcasted_iota(jnp.int32, (L, 1), 0).astype(jnp.float32)
    q = jnp.floor(row * (1.0 / Wpad) + 0.5 / Wpad)       # == row // Wpad exactly
    col = row - q * float(Wpad)                          # exact column index
    maskf = (col < (W - 0.5)).astype(jnp.float32)        # (L, 1)

    def conv3x3(src_ref, w_ref):
        # 9 shifted taps; each tap is ONE contiguous row-slice of the flat padded
        # image.  Operands are fed to the MXU in mxu_dtype (bf16 by default) and
        # accumulated in f32; the 9 dots share a single accumulator so they can chain
        # through the MXU result path (v7x MRB in-place accumulate).
        acc = None
        for dh in range(3):
            for dw in range(3):
                tap = src_ref[pl.ds(dh * Wpad + dw, L), :].astype(mxu_dtype)
                d = jnp.dot(tap, w_ref[dh * 3 + dw],
                            preferred_element_type=jnp.float32)
                acc = d if acc is None else acc + d
        return acc

    def masked_stats(load):
        # Two-pass per-channel statistics over the H*W valid pixels (cancellation-safe
        # vs E[x^2]-E[x]^2).  Each pass re-reads the VMEM ref so no (L, Cp) temporary
        # stays live across phases.
        mean = jnp.sum(load() * maskf, axis=0, keepdims=True) * inv_cnt
        d = (load() - mean) * maskf
        var = jnp.sum(d * d, axis=0, keepdims=True) * inv_cnt
        return mean, lax.rsqrt(var + _EPS)

    # ---- conv1 -> InstanceNorm -> ReLU, accumulated & normalized in place in pad_ref.
    # Zero only the top / bottom+slack border rows; the interior store below covers the
    # rest (dead/wrap columns are re-zeroed by the masked normalize).
    # TODO(synk): this border zeroing only needs to run once per core lifetime; guard it
    # with a per-core first-iteration check once the row-band grid axis is added.
    pad_ref[pl.ds(0, top), :] = jnp.zeros((top, Cp), jnp.float32)
    tail = pad_ref.shape[0] - (top + L)
    pad_ref[pl.ds(top + L, tail), :] = jnp.zeros((tail, Cp), jnp.float32)

    # Raw conv1 output straight into the pad interior (no separate h1 temporary, no
    # extra full-image store; bias omitted: cancelled exactly by the IN mean).
    pad_ref[pl.ds(top, L), :] = conv3x3(x_ref, w1_ref)

    load_h1 = lambda: pad_ref[pl.ds(top, L), :]
    mean1, inv_std1 = masked_stats(load_h1)
    # Normalize + ReLU + zero the dead/wrap columns in place (conv2 must read 0 there).
    pad_ref[pl.ds(top, L), :] = (
        jnp.maximum((load_h1() - mean1) * inv_std1, 0.0) * maskf)

    # ---- conv2 -> InstanceNorm -> residual add, accumulated & normalized in out_ref.
    out_ref[...] = conv3x3(pad_ref, w2_ref).astype(out_ref.dtype)

    load_h2 = lambda: out_ref[...].astype(jnp.float32)
    mean2, inv_std2 = masked_stats(load_h2)
    x_res = x_ref[pl.ds(top, L), :]
    out_ref[...] = ((load_h2() - mean2) * inv_std2 + x_res).astype(out_ref.dtype)


def resnet_block_flat(x_flat, w1p, w2p, *, H, W, Wpad, mxu_dtype):
    """Run the block on packed inputs.

    x_flat: (N, (H+3)*Wpad, Cp) f32 flat zero/channel-padded images.
    w1p/w2p: (9, Cp, Cp) packed conv weights (already in mxu_dtype).
    Returns the flat (N, H*Wpad, Cp) f32 output; columns >= W of each Wpad-group and
    channels >= C are dead and must be discarded (or ignored) by the caller.  A stack
    of ResnetBlocks should chain in this layout so the NCHW plumbing is paid once.
    """
    N, HWp, Cp = x_flat.shape
    L = H * Wpad
    kernel = functools.partial(_resnet_block_kernel, H=H, W=W, Wpad=Wpad,
                               mxu_dtype=mxu_dtype)
    # TODO(synk): at CycleGAN sizes (C=256, 64x64 spatial) add a row-band grid axis with
    # a 1-row halo and two-phase InstanceNorm (band-accumulated sums, then a normalize
    # sweep) so the working set fits v7x's 64 MiB VMEM and both TCs get work at N=1.
    # TODO(synk): single-buffer the constant-index weight blocks (pl.Buffered(1)) when
    # VMEM headroom becomes load-bearing at production sizes.
    # TODO(synk): for C <= 128 on v6e/v7x, fuse taps along the contraction dim to fill
    # the 256-wide MXU (needs materialized shifted LHS copies; skipped here).
    return pl.pallas_call(
        kernel,
        out_shape=jax.ShapeDtypeStruct((N, L, Cp), x_flat.dtype),
        grid_spec=pltpu.PrefetchScalarGridSpec(
            num_scalar_prefetch=0,
            grid=(N,),
            in_specs=[
                pl.BlockSpec((pl.Squeezed(), HWp, Cp), lambda n: (n, 0, 0)),
                pl.BlockSpec((9, Cp, Cp), lambda n: (0, 0, 0)),
                pl.BlockSpec((9, Cp, Cp), lambda n: (0, 0, 0)),
            ],
            out_specs=pl.BlockSpec((pl.Squeezed(), L, Cp), lambda n: (n, 0, 0)),
            scratch_shapes=[pltpu.VMEM((HWp, Cp), jnp.float32)],
        ),
        compiler_params=pltpu.CompilerParams(
            dimension_semantics=("parallel",),          # batch elems independent
            vmem_limit_bytes=64 * 1024 * 1024,
        ),
    )(x_flat, w1p, w2p)


def resnet_block(x_nchw, w1, b1, w2, b2, *, use_bf16_mxu=True):
    """ResnetBlock forward. x_nchw: (N, C, H, W) f32; w1/w2: HWIO (3,3,C,C); b1/b2: (C,).

    b1/b2 are accepted for API parity but unused: with InstanceNorm2d(affine=False) the
    conv bias is constant over (H, W) and exactly cancelled by the mean subtraction.
    With use_bf16_mxu=True the conv operands are fed to the MXU as bf16 with f32
    accumulation (~3x MXU throughput); use_bf16_mxu=False keeps full f32 semantics.
    """
    del b1, b2
    N, C, H, W = x_nchw.shape
    mxu_dtype = jnp.bfloat16 if use_bf16_mxu else jnp.float32
    Cp = _round_up(C, 128)            # lane-dense channel dim
    Wpad = _round_up(W + 2, 8)        # 1px halo + sublane alignment (+ dead cols)
    Hpad = H + 3                      # halo top/bottom + 1 slack row (tap overrun)
    HWp = Hpad * Wpad

    # NCHW -> NHWC, zero-pad spatially and in channels, flatten spatial dims so every
    # conv tap is a contiguous row-slice inside the kernel.  A stack of ResnetBlocks
    # should call resnet_block_flat directly and pay this plumbing once per stack.
    x = jnp.transpose(x_nchw, (0, 2, 3, 1))
    x_p = jnp.pad(x, ((0, 0), (1, Hpad - H - 1), (1, Wpad - W - 1), (0, Cp - C)))
    x_flat = x_p.reshape(N, HWp, Cp)

    def pack_w(w):
        wp = jnp.pad(w, ((0, 0), (0, 0), (0, Cp - C), (0, Cp - C)))
        return wp.reshape(9, Cp, Cp).astype(mxu_dtype)

    out_flat = resnet_block_flat(x_flat, pack_w(w1), pack_w(w2),
                                 H=H, W=W, Wpad=Wpad, mxu_dtype=mxu_dtype)
    out = out_flat.reshape(N, H, Wpad, Cp)[:, :, :W, :C]
    return jnp.transpose(out, (0, 3, 1, 2))             # NHWC -> NCHW


def _reference(x_nchw, w1, b1, w2, b2):
    """Pure-JAX reference (lax conv at HIGHEST precision) for correctness checking."""
    def conv(x, w, b):
        y = lax.conv_general_dilated(
            x, w, window_strides=(1, 1), padding="SAME",
            dimension_numbers=("NHWC", "HWIO", "NHWC"),
            precision=lax.Precision.HIGHEST)
        return y + b

    def inorm(h):
        mean = jnp.mean(h, axis=(1, 2), keepdims=True)
        var = jnp.mean(jnp.square(h - mean), axis=(1, 2), keepdims=True)
        return (h - mean) * lax.rsqrt(var + _EPS)

    x = jnp.transpose(x_nchw, (0, 2, 3, 1))
    h = jnp.maximum(inorm(conv(x, w1, b1)), 0.0)
    h = inorm(conv(h, w2, b2))
    return jnp.transpose(x + h, (0, 3, 1, 2))


if __name__ == "__main__":
    key = jax.random.PRNGKey(0)
    k1, k2, k3, k4, k5 = jax.random.split(key, 5)

    N, C, H, W = 2, 4, 16, 16  # dim = 4
    x = jax.random.normal(k1, (N, C, H, W), jnp.float32)

    # Deterministic Conv2d-style init (uniform in +/- 1/sqrt(fan_in)).
    fan_in = C * 3 * 3
    bound = 1.0 / (fan_in ** 0.5)
    w1 = jax.random.uniform(k2, (3, 3, C, C), jnp.float32, -bound, bound)
    b1 = jax.random.uniform(k3, (C,), jnp.float32, -bound, bound)
    w2 = jax.random.uniform(k4, (3, 3, C, C), jnp.float32, -bound, bound)
    b2 = jax.random.uniform(k5, (C,), jnp.float32, -bound, bound)

    ref = _reference(x, w1, b1, w2, b2)

    # f32 MXU path: matches the module's f32 semantics to tight tolerance.
    out_f32 = resnet_block(x, w1, b1, w2, b2, use_bf16_mxu=False)
    jax.block_until_ready(out_f32)
    assert out_f32.shape == (N, C, H, W)
    assert jnp.allclose(out_f32, ref, atol=1e-4, rtol=1e-4), \
        float(jnp.max(jnp.abs(out_f32 - ref)))

    # bf16-MXU path (default / production): bf16 operands + f32 accumulation through two
    # convs and two InstanceNorms; tolerance sized for bf16 operand rounding.  The exact
    # semantic check is the f32 path above.
    out_bf16 = resnet_block(x, w1, b1, w2, b2, use_bf16_mxu=True)
    jax.block_until_ready(out_bf16)
    assert out_bf16.shape == (N, C, H, W)
    assert jnp.allclose(out_bf16, ref, atol=7.5e-2, rtol=7.5e-2), \
        float(jnp.max(jnp.abs(out_bf16 - ref)))

    print("KERNEL_OK")
</pallas_src>

<mosaic_0001>
module attributes {stable_mosaic.version = 11 : i64} {
  func.func @_resnet_block_kernel(%arg0: i32, %arg1: memref<1x456x128xf32, #tpu.memory_space<vmem>>, %arg2: memref<9x128x128xf32, #tpu.memory_space<vmem>>, %arg3: memref<9x128x128xf32, #tpu.memory_space<vmem>>, %arg4: memref<1x384x128xf32, #tpu.memory_space<vmem>>, %arg5: memref<456x128xf32, #tpu.memory_space<vmem>>) attributes {dimension_semantics = [#tpu.dimension_semantics<parallel>], iteration_bounds = array<i64: 2>, scalar_prefetch = 0 : i64, scratch_operands = 1 : i64, tpu.core_type = #tpu.core_type<tc>, window_params = [{transform_indices = @transform_0, window_bounds = array<i64: 1, 456, 128>}, {pipeline_mode = #tpu.pipeline_mode<synchronous>, transform_indices = @transform_1, window_bounds = array<i64: 9, 128, 128>}, {pipeline_mode = #tpu.pipeline_mode<synchronous>, transform_indices = @transform_2, window_bounds = array<i64: 9, 128, 128>}, {transform_indices = @transform_3, window_bounds = array<i64: 1, 384, 128>}]} {
    %0 = tpu.iota {dimensions = array<i32: 0>} : vector<384x1xi32>
    %1 = arith.sitofp %0 : vector<384x1xi32> to vector<384x1xf32>
    %cst = arith.constant 0.0416666679 : f32
    %2 = vector.broadcast %cst : f32 to vector<384x1xf32>
    %3 = arith.mulf %1, %2 : vector<384x1xf32>
    %cst_0 = arith.constant 0.020833334 : f32
    %4 = vector.broadcast %cst_0 : f32 to vector<384x1xf32>
    %5 = arith.addf %3, %4 : vector<384x1xf32>
    %6 = math.floor %5 : vector<384x1xf32>
    %cst_1 = arith.constant 2.400000e+01 : f32
    %7 = vector.broadcast %cst_1 : f32 to vector<384x1xf32>
    %8 = arith.mulf %6, %7 : vector<384x1xf32>
    %9 = arith.subf %1, %8 : vector<384x1xf32>
    %cst_2 = arith.constant 1.550000e+01 : f32
    %10 = vector.broadcast %cst_2 : f32 to vector<384x1xf32>
    %11 = arith.cmpf olt, %9, %10 : vector<384x1xf32>
    %12 = arith.extui %11 : vector<384x1xi1> to vector<384x1xi32>
    %13 = arith.sitofp %12 : vector<384x1xi32> to vector<384x1xf32>
    %cst_3 = arith.constant 0.000000e+00 : f32
    %14 = vector.broadcast %cst_3 : f32 to vector<25x128xf32>
    %c0 = arith.constant 0 : index
    %c0_4 = arith.constant 0 : index
    %15 = vector.load %arg5[%c0, %c0_4] : memref<456x128xf32, #tpu.memory_space<vmem>>, vector<25x128xf32>
    tpu.vector_store %arg5[%c0, %c0_4], %14 {strides = array<i32>} : memref<456x128xf32, #tpu.memory_space<vmem>>, vector<25x128xf32>,
    %cst_5 = arith.constant 0.000000e+00 : f32
    %16 = vector.broadcast %cst_5 : f32 to vector<47x128xf32>
    %c409 = arith.constant 409 : index
    %c0_6 = arith.constant 0 : index
    %17 = vector.load %arg5[%c409, %c0_6] : memref<456x128xf32, #tpu.memory_space<vmem>>, vector<47x128xf32>
    tpu.vector_store %arg5[%c409, %c0_6], %16 {strides = array<i32>} : memref<456x128xf32, #tpu.memory_space<vmem>>, vector<47x128xf32>,
    %c0_7 = arith.constant 0 : index
    %c0_8 = arith.constant 0 : index
    %c0_9 = arith.constant 0 : index
    %18 = vector.load %arg1[%c0_7, %c0_8, %c0_9] : memref<1x456x128xf32, #tpu.memory_space<vmem>>, vector<1x384x128xf32>
    %19 = vector.shape_cast %18 : vector<1x384x128xf32> to vector<384x128xf32>
    %c0_10 = arith.constant 0 : index
    %c0_11 = arith.constant 0 : index
    %c0_12 = arith.constant 0 : index
    %20 = vector.load %arg2[%c0_10, %c0_11, %c0_12] : memref<9x128x128xf32, #tpu.memory_space<vmem>>, vector<1x128x128xf32>
    %21 = vector.shape_cast %20 : vector<1x128x128xf32> to vector<128x128xf32>
    %cst_13 = arith.constant dense<0.000000e+00> : vector<384x128xf32>
    %22 = tpu.matmul %19, %21, %cst_13 {dimension_numbers = #tpu.dot_dimension_numbers<[1], [0], [0], [1], [0, 0, 1, 1], [], []>} : vector<384x128xf32>, vector<128x128xf32>, vector<384x128xf32> -> vector<384x128xf32>
    %c0_14 = arith.constant 0 : index
    %c1 = arith.constant 1 : index
    %c0_15 = arith.constant 0 : index
    %23 = vector.load %arg1[%c0_14, %c1, %c0_15] : memref<1x456x128xf32, #tpu.memory_space<vmem>>, vector<1x384x128xf32>
    %24 = vector.shape_cast %23 : vector<1x384x128xf32> to vector<384x128xf32>
    %c1_16 = arith.constant 1 : index
    %c0_17 = arith.constant 0 : index
    %c0_18 = arith.constant 0 : index
    %25 = vector.load %arg2[%c1_16, %c0_17, %c0_18] : memref<9x128x128xf32, #tpu.memory_space<vmem>>, vector<1x128x128xf32>
    %26 = vector.shape_cast %25 : vector<1x128x128xf32> to vector<128x128xf32>
    %cst_19 = arith.constant dense<0.000000e+00> : vector<384x128xf32>
    %27 = tpu.matmul %24, %26, %cst_19 {dimension_numbers = #tpu.dot_dimension_numbers<[1], [0], [0], [1], [0, 0, 1, 1], [], []>} : vector<384x128xf32>, vector<128x128xf32>, vector<384x128xf32> -> vector<384x128xf32>
    %28 = arith.addf %22, %27 : vector<384x128xf32>
    %c0_20 = arith.constant 0 : index
    %c2 = arith.constant 2 : index
    %c0_21 = arith.constant 0 : index
    %29 = vector.load %arg1[%c0_20, %c2, %c0_21] : memref<1x456x128xf32, #tpu.memory_space<vmem>>, vector<1x384x128xf32>
    %30 = vector.shape_cast %29 : vector<1x384x128xf32> to vector<384x128xf32>
    %c2_22 = arith.constant 2 : index
    %c0_23 = arith.constant 0 : index
    %c0_24 = arith.constant 0 : index
    %31 = vector.load %arg2[%c2_22, %c0_23, %c0_24] : memref<9x128x128xf32, #tpu.memory_space<vmem>>, vector<1x128x128xf32>
    %32 = vector.shape_cast %31 : vector<1x128x128xf32> to vector<128x128xf32>
    %cst_25 = arith.constant dense<0.000000e+00> : vector<384x128xf32>
    %33 = tpu.matmul %30, %32, %cst_25 {dimension_numbers = #tpu.dot_dimension_numbers<[1], [0], [0], [1], [0, 0, 1, 1], [], []>} : vector<384x128xf32>, vector<128x128xf32>, vector<384x128xf32> -> vector<384x128xf32>
    %34 = arith.addf %28, %33 : vector<384x128xf32>
    %c0_26 = arith.constant 0 : index
    %c24 = arith.constant 24 : index
    %c0_27 = arith.constant 0 : index
    %35 = vector.load %arg1[%c0_26, %c24, %c0_27] : memref<1x456x128xf32, #tpu.memory_space<vmem>>, vector<1x384x128xf32>
    %36 = vector.shape_cast %35 : vector<1x384x128xf32> to vector<384x128xf32>
    %c3 = arith.constant 3 : index
    %c0_28 = arith.constant 0 : index
    %c0_29 = arith.constant 0 : index
    %37 = vector.load %arg2[%c3, %c0_28, %c0_29] : memref<9x128x128xf32, #tpu.memory_space<vmem>>, vector<1x128x128xf32>
    %38 = vector.shape_cast %37 : vector<1x128x128xf32> to vector<128x128xf32>
    %cst_30 = arith.constant dense<0.000000e+00> : vector<384x128xf32>
    %39 = tpu.matmul %36, %38, %cst_30 {dimension_numbers = #tpu.dot_dimension_numbers<[1], [0], [0], [1], [0, 0, 1, 1], [], []>} : vector<384x128xf32>, vector<128x128xf32>, vector<384x128xf32> -> vector<384x128xf32>
    %40 = arith.addf %34, %39 : vector<384x128xf32>
    %c0_31 = arith.constant 0 : index
    %c25 = arith.constant 25 : index
    %c0_32 = arith.constant 0 : index
    %41 = vector.load %arg1[%c0_31, %c25, %c0_32] : memref<1x456x128xf32, #tpu.memory_space<vmem>>, vector<1x384x128xf32>
    %42 = vector.shape_cast %41 : vector<1x384x128xf32> to vector<384x128xf32>
    %c4 = arith.constant 4 : index
    %c0_33 = arith.constant 0 : index
    %c0_34 = arith.constant 0 : index
    %43 = vector.load %arg2[%c4, %c0_33, %c0_34] : memref<9x128x128xf32, #tpu.memory_space<vmem>>, vector<1x128x128xf32>
    %44 = vector.shape_cast %43 : vector<1x128x128xf32> to vector<128x128xf32>
    %cst_35 = arith.constant dense<0.000000e+00> : vector<384x128xf32>
    %45 = tpu.matmul %42, %44, %cst_35 {dimension_numbers = #tpu.dot_dimension_numbers<[1], [0], [0], [1], [0, 0, 1, 1], [], []>} : vector<384x128xf32>, vector<128x128xf32>, vector<384x128xf32> -> vector<384x128xf32>
    %46 = arith.addf %40, %45 : vector<384x128xf32>
    %c0_36 = arith.constant 0 : index
    %c26 = arith.constant 26 : index
    %c0_37 = arith.constant 0 : index
    %47 = vector.load %arg1[%c0_36, %c26, %c0_37] : memref<1x456x128xf32, #tpu.memory_space<vmem>>, vector<1x384x128xf32>
    %48 = vector.shape_cast %47 : vector<1x384x128xf32> to vector<384x128xf32>
    %c5 = arith.constant 5 : index
    %c0_38 = arith.constant 0 : index
    %c0_39 = arith.constant 0 : index
    %49 = vector.load %arg2[%c5, %c0_38, %c0_39] : memref<9x128x128xf32, #tpu.memory_space<vmem>>, vector<1x128x128xf32>
    %50 = vector.shape_cast %49 : vector<1x128x128xf32> to vector<128x128xf32>
    %cst_40 = arith.constant dense<0.000000e+00> : vector<384x128xf32>
    %51 = tpu.matmul %48, %50, %cst_40 {dimension_numbers = #tpu.dot_dimension_numbers<[1], [0], [0], [1], [0, 0, 1, 1], [], []>} : vector<384x128xf32>, vector<128x128xf32>, vector<384x128xf32> -> vector<384x128xf32>
    %52 = arith.addf %46, %51 : vector<384x128xf32>
    %c0_41 = arith.constant 0 : index
    %c48 = arith.constant 48 : index
    %c0_42 = arith.constant 0 : index
    %53 = vector.load %arg1[%c0_41, %c48, %c0_42] : memref<1x456x128xf32, #tpu.memory_space<vmem>>, vector<1x384x128xf32>
    %54 = vector.shape_cast %53 : vector<1x384x128xf32> to vector<384x128xf32>
    %c6 = arith.constant 6 : index
    %c0_43 = arith.constant 0 : index
    %c0_44 = arith.constant 0 : index
    %55 = vector.load %arg2[%c6, %c0_43, %c0_44] : memref<9x128x128xf32, #tpu.memory_space<vmem>>, vector<1x128x128xf32>
    %56 = vector.shape_cast %55 : vector<1x128x128xf32> to vector<128x128xf32>
    %cst_45 = arith.constant dense<0.000000e+00> : vector<384x128xf32>
    %57 = tpu.matmul %54, %56, %cst_45 {dimension_numbers = #tpu.dot_dimension_numbers<[1], [0], [0], [1], [0, 0, 1, 1], [], []>} : vector<384x128xf32>, vector<128x128xf32>, vector<384x128xf32> -> vector<384x128xf32>
    %58 = arith.addf %52, %57 : vector<384x128xf32>
    %c0_46 = arith.constant 0 : index
    %c49 = arith.constant 49 : index
    %c0_47 = arith.constant 0 : index
    %59 = vector.load %arg1[%c0_46, %c49, %c0_47] : memref<1x456x128xf32, #tpu.memory_space<vmem>>, vector<1x384x128xf32>
    %60 = vector.shape_cast %59 : vector<1x384x128xf32> to vector<384x128xf32>
    %c7 = arith.constant 7 : index
    %c0_48 = arith.constant 0 : index
    %c0_49 = arith.constant 0 : index
    %61 = vector.load %arg2[%c7, %c0_48, %c0_49] : memref<9x128x128xf32, #tpu.memory_space<vmem>>, vector<1x128x128xf32>
    %62 = vector.shape_cast %61 : vector<1x128x128xf32> to vector<128x128xf32>
    %cst_50 = arith.constant dense<0.000000e+00> : vector<384x128xf32>
    %63 = tpu.matmul %60, %62, %cst_50 {dimension_numbers = #tpu.dot_dimension_numbers<[1], [0], [0], [1], [0, 0, 1, 1], [], []>} : vector<384x128xf32>, vector<128x128xf32>, vector<384x128xf32> -> vector<384x128xf32>
    %64 = arith.addf %58, %63 : vector<384x128xf32>
    %c0_51 = arith.constant 0 : index
    %c50 = arith.constant 50 : index
    %c0_52 = arith.constant 0 : index
    %65 = vector.load %arg1[%c0_51, %c50, %c0_52] : memref<1x456x128xf32, #tpu.memory_space<vmem>>, vector<1x384x128xf32>
    %66 = vector.shape_cast %65 : vector<1x384x128xf32> to vector<384x128xf32>
    %c8 = arith.constant 8 : index
    %c0_53 = arith.constant 0 : index
    %c0_54 = arith.constant 0 : index
    %67 = vector.load %arg2[%c8, %c0_53, %c0_54] : memref<9x128x128xf32, #tpu.memory_space<vmem>>, vector<1x128x128xf32>
    %68 = vector.shape_cast %67 : vector<1x128x128xf32> to vector<128x128xf32>
    %cst_55 = arith.constant dense<0.000000e+00> : vector<384x128xf32>
    %69 = tpu.matmul %66, %68, %cst_55 {dimension_numbers = #tpu.dot_dimension_numbers<[1], [0], [0], [1], [0, 0, 1, 1], [], []>} : vector<384x128xf32>, vector<128x128xf32>, vector<384x128xf32> -> vector<384x128xf32>
    %70 = arith.addf %64, %69 : vector<384x128xf32>
    %c25_56 = arith.constant 25 : index
    %c0_57 = arith.constant 0 : index
    %71 = vector.load %arg5[%c25_56, %c0_57] : memref<456x128xf32, #tpu.memory_space<vmem>>, vector<384x128xf32>
    tpu.vector_store %arg5[%c25_56, %c0_57], %70 {strides = array<i32>} : memref<456x128xf32, #tpu.memory_space<vmem>>, vector<384x128xf32>,
    %c25_58 = arith.constant 25 : index
    %c0_59 = arith.constant 0 : index
    %72 = vector.load %arg5[%c25_58, %c0_59] : memref<456x128xf32, #tpu.memory_space<vmem>>, vector<384x128xf32>
    %73 = vector.broadcast %13 : vector<384x1xf32> to vector<384x128xf32>
    %74 = arith.mulf %72, %73 : vector<384x128xf32>
    %cst_60 = arith.constant dense<0.000000e+00> : vector<128xf32>
    %75 = vector.multi_reduction <add>, %74, %cst_60 [0] : vector<384x128xf32> to vector<128xf32>
    %76 = vector.shape_cast %75 : vector<128xf32> to vector<1x128xf32>
    %cst_61 = arith.constant 3.906250e-03 : f32
    %77 = vector.broadcast %cst_61 : f32 to vector<1x128xf32>
    %78 = arith.mulf %76, %77 : vector<1x128xf32>
    %c25_62 = arith.constant 25 : index
    %c0_63 = arith.constant 0 : index
    %79 = vector.load %arg5[%c25_62, %c0_63] : memref<456x128xf32, #tpu.memory_space<vmem>>, vector<384x128xf32>
    %80 = vector.broadcast %78 : vector<1x128xf32> to vector<384x128xf32>
    %81 = arith.subf %79, %80 : vector<384x128xf32>
    %82 = vector.broadcast %13 : vector<384x1xf32> to vector<384x128xf32>
    %83 = arith.mulf %81, %82 : vector<384x128xf32>
    %84 = arith.mulf %83, %83 : vector<384x128xf32>
    %cst_64 = arith.constant dense<0.000000e+00> : vector<128xf32>
    %85 = vector.multi_reduction <add>, %84, %cst_64 [0] : vector<384x128xf32> to vector<128xf32>
    %86 = vector.shape_cast %85 : vector<128xf32> to vector<1x128xf32>
    %cst_65 = arith.constant 3.906250e-03 : f32
    %87 = vector.broadcast %cst_65 : f32 to vector<1x128xf32>
    %88 = arith.mulf %86, %87 : vector<1x128xf32>
    %cst_66 = arith.constant 9.99999974E-6 : f32
    %89 = vector.broadcast %cst_66 : f32 to vector<1x128xf32>
    %90 = arith.addf %88, %89 : vector<1x128xf32>
    %91 = math.rsqrt %90 : vector<1x128xf32>
    %c25_67 = arith.constant 25 : index
    %c0_68 = arith.constant 0 : index
    %92 = vector.load %arg5[%c25_67, %c0_68] : memref<456x128xf32, #tpu.memory_space<vmem>>, vector<384x128xf32>
    %93 = vector.broadcast %78 : vector<1x128xf32> to vector<384x128xf32>
    %94 = arith.subf %92, %93 : vector<384x128xf32>
    %95 = vector.broadcast %91 : vector<1x128xf32> to vector<384x128xf32>
    %96 = arith.mulf %94, %95 : vector<384x128xf32>
    %cst_69 = arith.constant 0.000000e+00 : f32
    %97 = vector.broadcast %cst_69 : f32 to vector<384x128xf32>
    %98 = arith.maximumf %96, %97 : vector<384x128xf32>
    %99 = vector.broadcast %13 : vector<384x1xf32> to vector<384x128xf32>
    %100 = arith.mulf %98, %99 : vector<384x128xf32>
    %c25_70 = arith.constant 25 : index
    %c0_71 = arith.constant 0 : index
    %101 = vector.load %arg5[%c25_70, %c0_71] : memref<456x128xf32, #tpu.memory_space<vmem>>, vector<384x128xf32>
    tpu.vector_store %arg5[%c25_70, %c0_71], %100 {strides = array<i32>} : memref<456x128xf32, #tpu.memory_space<vmem>>, vector<384x128xf32>,
    %c0_72 = arith.constant 0 : index
    %c0_73 = arith.constant 0 : index
    %102 = vector.load %arg5[%c0_72, %c0_73] : memref<456x128xf32, #tpu.memory_space<vmem>>, vector<384x128xf32>
    %c0_74 = arith.constant 0 : index
    %c0_75 = arith.constant 0 : index
    %c0_76 = arith.constant 0 : index
    %103 = vector.load %arg3[%c0_74, %c0_75, %c0_76] : memref<9x128x128xf32, #tpu.memory_space<vmem>>, vector<1x128x128xf32>
    %104 = vector.shape_cast %103 : vector<1x128x128xf32> to vector<128x128xf32>
    %cst_77 = arith.constant dense<0.000000e+00> : vector<384x128xf32>
    %105 = tpu.matmul %102, %104, %cst_77 {dimension_numbers = #tpu.dot_dimension_numbers<[1], [0], [0], [1], [0, 0, 1, 1], [], []>} : vector<384x128xf32>, vector<128x128xf32>, vector<384x128xf32> -> vector<384x128xf32>
    %c1_78 = arith.constant 1 : index
    %c0_79 = arith.constant 0 : index
    %106 = vector.load %arg5[%c1_78, %c0_79] : memref<456x128xf32, #tpu.memory_space<vmem>>, vector<384x128xf32>
    %c1_80 = arith.constant 1 : index
    %c0_81 = arith.constant 0 : index
    %c0_82 = arith.constant 0 : index
    %107 = vector.load %arg3[%c1_80, %c0_81, %c0_82] : memref<9x128x128xf32, #tpu.memory_space<vmem>>, vector<1x128x128xf32>
    %108 = vector.shape_cast %107 : vector<1x128x128xf32> to vector<128x128xf32>
    %cst_83 = arith.constant dense<0.000000e+00> : vector<384x128xf32>
    %109 = tpu.matmul %106, %108, %cst_83 {dimension_numbers = #tpu.dot_dimension_numbers<[1], [0], [0], [1], [0, 0, 1, 1], [], []>} : vector<384x128xf32>, vector<128x128xf32>, vector<384x128xf32> -> vector<384x128xf32>
    %110 = arith.addf %105, %109 : vector<384x128xf32>
    %c2_84 = arith.constant 2 : index
    %c0_85 = arith.constant 0 : index
    %111 = vector.load %arg5[%c2_84, %c0_85] : memref<456x128xf32, #tpu.memory_space<vmem>>, vector<384x128xf32>
    %c2_86 = arith.constant 2 : index
    %c0_87 = arith.constant 0 : index
    %c0_88 = arith.constant 0 : index
    %112 = vector.load %arg3[%c2_86, %c0_87, %c0_88] : memref<9x128x128xf32, #tpu.memory_space<vmem>>, vector<1x128x128xf32>
    %113 = vector.shape_cast %112 : vector<1x128x128xf32> to vector<128x128xf32>
    %cst_89 = arith.constant dense<0.000000e+00> : vector<384x128xf32>
    %114 = tpu.matmul %111, %113, %cst_89 {dimension_numbers = #tpu.dot_dimension_numbers<[1], [0], [0], [1], [0, 0, 1, 1], [], []>} : vector<384x128xf32>, vector<128x128xf32>, vector<384x128xf32> -> vector<384x128xf32>
    %115 = arith.addf %110, %114 : vector<384x128xf32>
    %c24_90 = arith.constant 24 : index
    %c0_91 = arith.constant 0 : index
    %116 = vector.load %arg5[%c24_90, %c0_91] : memref<456x128xf32, #tpu.memory_space<vmem>>, vector<384x128xf32>
    %c3_92 = arith.constant 3 : index
    %c0_93 = arith.constant 0 : index
    %c0_94 = arith.constant 0 : index
    %117 = vector.load %arg3[%c3_92, %c0_93, %c0_94] : memref<9x128x128xf32, #tpu.memory_space<vmem>>, vector<1x128x128xf32>
    %118 = vector.shape_cast %117 : vector<1x128x128xf32> to vector<128x128xf32>
    %cst_95 = arith.constant dense<0.000000e+00> : vector<384x128xf32>
    %119 = tpu.matmul %116, %118, %cst_95 {dimension_numbers = #tpu.dot_dimension_numbers<[1], [0], [0], [1], [0, 0, 1, 1], [], []>} : vector<384x128xf32>, vector<128x128xf32>, vector<384x128xf32> -> vector<384x128xf32>
    %120 = arith.addf %115, %119 : vector<384x128xf32>
    %c25_96 = arith.constant 25 : index
    %c0_97 = arith.constant 0 : index
    %121 = vector.load %arg5[%c25_96, %c0_97] : memref<456x128xf32, #tpu.memory_space<vmem>>, vector<384x128xf32>
    %c4_98 = arith.constant 4 : index
    %c0_99 = arith.constant 0 : index
    %c0_100 = arith.constant 0 : index
    %122 = vector.load %arg3[%c4_98, %c0_99, %c0_100] : memref<9x128x128xf32, #tpu.memory_space<vmem>>, vector<1x128x128xf32>
    %123 = vector.shape_cast %122 : vector<1x128x128xf32> to vector<128x128xf32>
    %cst_101 = arith.constant dense<0.000000e+00> : vector<384x128xf32>
    %124 = tpu.matmul %121, %123, %cst_101 {dimension_numbers = #tpu.dot_dimension_numbers<[1], [0], [0], [1], [0, 0, 1, 1], [], []>} : vector<384x128xf32>, vector<128x128xf32>, vector<384x128xf32> -> vector<384x128xf32>
    %125 = arith.addf %120, %124 : vector<384x128xf32>
    %c26_102 = arith.constant 26 : index
    %c0_103 = arith.constant 0 : index
    %126 = vector.load %arg5[%c26_102, %c0_103] : memref<456x128xf32, #tpu.memory_space<vmem>>, vector<384x128xf32>
    %c5_104 = arith.constant 5 : index
    %c0_105 = arith.constant 0 : index
    %c0_106 = arith.constant 0 : index
    %127 = vector.load %arg3[%c5_104, %c0_105, %c0_106] : memref<9x128x128xf32, #tpu.memory_space<vmem>>, vector<1x128x128xf32>
    %128 = vector.shape_cast %127 : vector<1x128x128xf32> to vector<128x128xf32>
    %cst_107 = arith.constant dense<0.000000e+00> : vector<384x128xf32>
    %129 = tpu.matmul %126, %128, %cst_107 {dimension_numbers = #tpu.dot_dimension_numbers<[1], [0], [0], [1], [0, 0, 1, 1], [], []>} : vector<384x128xf32>, vector<128x128xf32>, vector<384x128xf32> -> vector<384x128xf32>
    %130 = arith.addf %125, %129 : vector<384x128xf32>
    %c48_108 = arith.constant 48 : index
    %c0_109 = arith.constant 0 : index
    %131 = vector.load %arg5[%c48_108, %c0_109] : memref<456x128xf32, #tpu.memory_space<vmem>>, vector<384x128xf32>
    %c6_110 = arith.constant 6 : index
    %c0_111 = arith.constant 0 : index
    %c0_112 = arith.constant 0 : index
    %132 = vector.load %arg3[%c6_110, %c0_111, %c0_112] : memref<9x128x128xf32, #tpu.memory_space<vmem>>, vector<1x128x128xf32>
    %133 = vector.shape_cast %132 : vector<1x128x128xf32> to vector<128x128xf32>
    %cst_113 = arith.constant dense<0.000000e+00> : vector<384x128xf32>
    %134 = tpu.matmul %131, %133, %cst_113 {dimension_numbers = #tpu.dot_dimension_numbers<[1], [0], [0], [1], [0, 0, 1, 1], [], []>} : vector<384x128xf32>, vector<128x128xf32>, vector<384x128xf32> -> vector<384x128xf32>
    %135 = arith.addf %130, %134 : vector<384x128xf32>
    %c49_114 = arith.constant 49 : index
    %c0_115 = arith.constant 0 : index
    %136 = vector.load %arg5[%c49_114, %c0_115] : memref<456x128xf32, #tpu.memory_space<vmem>>, vector<384x128xf32>
    %c7_116 = arith.constant 7 : index
    %c0_117 = arith.constant 0 : index
    %c0_118 = arith.constant 0 : index
    %137 = vector.load %arg3[%c7_116, %c0_117, %c0_118] : memref<9x128x128xf32, #tpu.memory_space<vmem>>, vector<1x128x128xf32>
    %138 = vector.shape_cast %137 : vector<1x128x128xf32> to vector<128x128xf32>
    %cst_119 = arith.constant dense<0.000000e+00> : vector<384x128xf32>
    %139 = tpu.matmul %136, %138, %cst_119 {dimension_numbers = #tpu.dot_dimension_numbers<[1], [0], [0], [1], [0, 0, 1, 1], [], []>} : vector<384x128xf32>, vector<128x128xf32>, vector<384x128xf32> -> vector<384x128xf32>
    %140 = arith.addf %135, %139 : vector<384x128xf32>
    %c50_120 = arith.constant 50 : index
    %c0_121 = arith.constant 0 : index
    %141 = vector.load %arg5[%c50_120, %c0_121] : memref<456x128xf32, #tpu.memory_space<vmem>>, vector<384x128xf32>
    %c8_122 = arith.constant 8 : index
    %c0_123 = arith.constant 0 : index
    %c0_124 = arith.constant 0 : index
    %142 = vector.load %arg3[%c8_122, %c0_123, %c0_124] : memref<9x128x128xf32, #tpu.memory_space<vmem>>, vector<1x128x128xf32>
    %143 = vector.shape_cast %142 : vector<1x128x128xf32> to vector<128x128xf32>
    %cst_125 = arith.constant dense<0.000000e+00> : vector<384x128xf32>
    %144 = tpu.matmul %141, %143, %cst_125 {dimension_numbers = #tpu.dot_dimension_numbers<[1], [0], [0], [1], [0, 0, 1, 1], [], []>} : vector<384x128xf32>, vector<128x128xf32>, vector<384x128xf32> -> vector<384x128xf32>
    %145 = arith.addf %140, %144 : vector<384x128xf32>
    %c0_126 = arith.constant 0 : index
    %c0_127 = arith.constant 0 : index
    %c0_128 = arith.constant 0 : index
    %146 = vector.load %arg4[%c0_126, %c0_127, %c0_128] : memref<1x384x128xf32, #tpu.memory_space<vmem>>, vector<1x384x128xf32>
    %147 = vector.shape_cast %146 : vector<1x384x128xf32> to vector<384x128xf32>
    %148 = vector.shape_cast %145 : vector<384x128xf32> to vector<1x384x128xf32>
    tpu.vector_store %arg4[%c0_126, %c0_127, %c0_128], %148 {strides = array<i32>} : memref<1x384x128xf32, #tpu.memory_space<vmem>>, vector<1x384x128xf32>,
    %c0_129 = arith.constant 0 : index
    %c0_130 = arith.constant 0 : index
    %c0_131 = arith.constant 0 : index
    %149 = vector.load %arg4[%c0_129, %c0_130, %c0_131] : memref<1x384x128xf32, #tpu.memory_space<vmem>>, vector<1x384x128xf32>
    %150 = vector.shape_cast %149 : vector<1x384x128xf32> to vector<384x128xf32>
    %151 = vector.broadcast %13 : vector<384x1xf32> to vector<384x128xf32>
    %152 = arith.mulf %150, %151 : vector<384x128xf32>
    %cst_132 = arith.constant dense<0.000000e+00> : vector<128xf32>
    %153 = vector.multi_reduction <add>, %152, %cst_132 [0] : vector<384x128xf32> to vector<128xf32>
    %154 = vector.shape_cast %153 : vector<128xf32> to vector<1x128xf32>
    %cst_133 = arith.constant 3.906250e-03 : f32
    %155 = vector.broadcast %cst_133 : f32 to vector<1x128xf32>
    %156 = arith.mulf %154, %155 : vector<1x128xf32>
    %c0_134 = arith.constant 0 : index
    %c0_135 = arith.constant 0 : index
    %c0_136 = arith.constant 0 : index
    %157 = vector.load %arg4[%c0_134, %c0_135, %c0_136] : memref<1x384x128xf32, #tpu.memory_space<vmem>>, vector<1x384x128xf32>
    %158 = vector.shape_cast %157 : vector<1x384x128xf32> to vector<384x128xf32>
    %159 = vector.broadcast %156 : vector<1x128xf32> to vector<384x128xf32>
    %160 = arith.subf %158, %159 : vector<384x128xf32>
    %161 = vector.broadcast %13 : vector<384x1xf32> to vector<384x128xf32>
    %162 = arith.mulf %160, %161 : vector<384x128xf32>
    %163 = arith.mulf %162, %162 : vector<384x128xf32>
    %cst_137 = arith.constant dense<0.000000e+00> : vector<128xf32>
    %164 = vector.multi_reduction <add>, %163, %cst_137 [0] : vector<384x128xf32> to vector<128xf32>
    %165 = vector.shape_cast %164 : vector<128xf32> to vector<1x128xf32>
    %cst_138 = arith.constant 3.906250e-03 : f32
    %166 = vector.broadcast %cst_138 : f32 to vector<1x128xf32>
    %167 = arith.mulf %165, %166 : vector<1x128xf32>
    %cst_139 = arith.constant 9.99999974E-6 : f32
    %168 = vector.broadcast %cst_139 : f32 to vector<1x128xf32>
    %169 = arith.addf %167, %168 : vector<1x128xf32>
    %170 = math.rsqrt %169 : vector<1x128xf32>
    %c0_140 = arith.constant 0 : index
    %c25_141 = arith.constant 25 : index
    %c0_142 = arith.constant 0 : index
    %171 = vector.load %arg1[%c0_140, %c25_141, %c0_142] : memref<1x456x128xf32, #tpu.memory_space<vmem>>, vector<1x384x128xf32>
    %172 = vector.shape_cast %171 : vector<1x384x128xf32> to vector<384x128xf32>
    %c0_143 = arith.constant 0 : index
    %c0_144 = arith.constant 0 : index
    %c0_145 = arith.constant 0 : index
    %173 = vector.load %arg4[%c0_143, %c0_144, %c0_145] : memref<1x384x128xf32, #tpu.memory_space<vmem>>, vector<1x384x128xf32>
    %174 = vector.shape_cast %173 : vector<1x384x128xf32> to vector<384x128xf32>
    %175 = vector.broadcast %156 : vector<1x128xf32> to vector<384x128xf32>
    %176 = arith.subf %174, %175 : vector<384x128xf32>
    %177 = vector.broadcast %170 : vector<1x128xf32> to vector<384x128xf32>
    %178 = arith.mulf %176, %177 : vector<384x128xf32>
    %179 = arith.addf %178, %172 : vector<384x128xf32>
    %c0_146 = arith.constant 0 : index
    %c0_147 = arith.constant 0 : index
    %c0_148 = arith.constant 0 : index
    %180 = vector.load %arg4[%c0_146, %c0_147, %c0_148] : memref<1x384x128xf32, #tpu.memory_space<vmem>>, vector<1x384x128xf32>
    %181 = vector.shape_cast %180 : vector<1x384x128xf32> to vector<384x128xf32>
    %182 = vector.shape_cast %179 : vector<384x128xf32> to vector<1x384x128xf32>
    tpu.vector_store %arg4[%c0_146, %c0_147, %c0_148], %182 {strides = array<i32>} : memref<1x384x128xf32, #tpu.memory_space<vmem>>, vector<1x384x128xf32>,
    return
  }
  func.func @transform_0(%arg0: i32) -> (i32, i32, i32) {
    %c0_i32 = arith.constant 0 : i32
    %c0_i32_0 = arith.constant 0 : i32
    %c0_i32_1 = arith.constant 0 : i32
    return %arg0, %c0_i32, %c0_i32_0 : i32, i32, i32
  }
  func.func @transform_1(%arg0: i32) -> (i32, i32, i32) {
    %c0_i32 = arith.constant 0 : i32
    %c0_i32_0 = arith.constant 0 : i32
    %c0_i32_1 = arith.constant 0 : i32
    %c0_i32_2 = arith.constant 0 : i32
    return %c0_i32, %c0_i32_0, %c0_i32_1 : i32, i32, i32
  }
  func.func @transform_2(%arg0: i32) -> (i32, i32, i32) {
    %c0_i32 = arith.constant 0 : i32
    %c0_i32_0 = arith.constant 0 : i32
    %c0_i32_1 = arith.constant 0 : i32
    %c0_i32_2 = arith.constant 0 : i32
    return %c0_i32, %c0_i32_0, %c0_i32_1 : i32, i32, i32
  }
  func.func @transform_3(%arg0: i32) -> (i32, i32, i32) {
    %c0_i32 = arith.constant 0 : i32
    %c0_i32_0 = arith.constant 0 : i32
    %c0_i32_1 = arith.constant 0 : i32
    return %arg0, %c0_i32, %c0_i32_0 : i32, i32, i32
  }
}

</mosaic_0001>

<bundles_post_ra>
// kernel: tpu_custom_call.1
= control target key start
LH: loop header
LB: loop body
LE: loop exit
PB: predicated region body
PF: predicated region fallthrough
CT: control target
= control target key end

     0   :  { %8 = vsyncpa [#allocation4], 0  ;;  %s18232_s0 = inlined_call_operand.hbm [shape: f32[2,456,128], index: 0, kind: input, shape index: {}]   ;;  %s18233_s1 = inlined_call_operand.hbm [shape: f32[9,128,128], index: 1, kind: input, shape index: {}]   ;;  %s18234_s2 = inlined_call_operand.hbm [shape: f32[9,128,128], index: 2, kind: input, shape index: {}]   ;;  %s18235_s3 = inlined_call_operand.hbm [shape: f32[2,384,128], index: 3, kind: output, shape index: {}]  }
   0x1   :  { %10 = vsyncpa [#allocation4 + $0x1], 0 }
   0x2   :  { %11 = vsyncpa [#allocation7], 0 }
   0x3   :  { %12 = vsyncpa [#allocation5], 0 }
   0x4   :  { %14 = vsyncpa [#allocation5 + $0x1], 0  ;;  %s12673_s12 = smov 0   ;;  %s12675_s13 = smov 0  }
   0x5   :  { %s12677_s14 = smov 0   ;;  %s12679_s15 = smov 0  }
   0x6 LB: > { %s12694_s16 = sadd.s32 4294967295, %s12642_s15   ;;  %s9325_s17 = sadd.s32 4294967294, %s12642_s15   ;;  %s12642_s15 = sphi %s12679_s15, %s19389_s15   ;;  %s12638_s14 = sphi %s12677_s14, %s19388_s14   ;;  %s12634_s13 = sphi %s12675_s13, %s19387_s13   ;;  %s12630_s12 = sphi %s12673_s12, %s19386_s12  }
   0x7   : > { %p40_p0 = scmp.ne.s32.totalorder %s12634_s13, %s12630_s12  ;;  %p18236_p1 = scmp.eq.s32.totalorder %s12694_s16, 0 }
   0x8   : > { %p106_p2 = scmp.eq.s32.totalorder %s12694_s16, 1  ;;  %p112_p3 = scmp.eq.s32.totalorder %s9325_s17, 1 }
   0x9   : > { %p12703_p4 = por %p18236_p1, %p40_p0  ;;  %p9326_p5 = scmp.ge.s32.totalorder %s12642_s15, 1 }
   0xa   : > { %p12708_p6 = por %p112_p3, %p40_p0  ;;  %p119_p7 = scmp.lt.s32.totalorder %s12642_s15, 3 }
   0xb   : > { %s18441_s18 = scalar_select %p12703_p4, 1, 0 }
   0xc   : > { %s18442_s19 = scalar_select %p12708_p6, 1, 0 }
   0xd   : > { %p12713_p8 = pnand %p9326_p5, %p119_p7  ;;  %s12644_s21 = smov [#allocation6]  }
   0xe   : > { %s131_s22 = sshll.u32 %s12644_s21, 4  ;;  %s12645_s24 = smov [#allocation8]   ;;  %s132_s22 = int_to_ptr.vmem [resolvable:$true] %s131_s22 }
   0xf   : > { %s18443_s20 = scalar_select %p12713_p8, 1, 0 }
  0x10   : > { %p12426_p9 = pneg %p12713_p8  ;;  %s144_s25 = sshll.u32 %s12645_s24, 4  ;;  %s145_s25 = int_to_ptr.vmem [resolvable:$true] %s144_s25 }
  0x11   : > { %s12505_s26 = scalar_lea.vmem %s132_s22, 18432  ;;  %p12513_p5 = scmp.lt.s32.totalorder %s132_s22, %s132_s22 }
  0x12   : > { %p12722_p11 = pnand %p12426_p9, %p18236_p1  ;;  %p12506_p13 = scmp.ne.s32.totalorder %s132_s22, %s12505_s26 }
  0x13   : > { %p12514_p7 = scmp.lt.s32.totalorder %s12505_s26, %s12505_s26 }
  0x14   : > { %p12496_p12 = pneg %p12722_p11 }
  0x15   : > { %p12515_p10 = por %p12514_p7, %p12513_p5 }
  0x16   : > { %p12508_p0 = pnand %p12506_p13, %p12496_p12 }
  0x18   : > { %p12509_p3 = pneg %p12508_p0 }
  0x1a   : > { %p12516_p9 = pnand %p12515_p10, %p12509_p3 }
  0x1c   : > { %12519 = shalt.err (!%p12516_p9)
}
  0x1d   : > { %s12646_s27 = smov 128   ;;  %s12647_s28 = smov 8  }
  0x1e   : > { %12429 = dma.hbm_to_vmem [thread:$0]  (!%p12722_p11), %s18233_s1, 18432, %s132_s22, [#allocation7], %s12646_s27, %s12646_s27, %s12647_s28  }
  0x1f   : > { %s12531_s4 = scalar_lea.vmem %s145_s25, 18432  ;;  %p12539_p10 = scmp.lt.s32.totalorder %s145_s25, %s145_s25 }
  0x20   : > { %p12532_p13 = scmp.ne.s32.totalorder %s145_s25, %s12531_s4  ;;  %p12540_p3 = scmp.lt.s32.totalorder %s12531_s4, %s12531_s4 }
  0x22   : > { %p12534_p0 = pnand %p12532_p13, %p12496_p12  ;;  %p12541_p7 = por %p12540_p3, %p12539_p10 }
  0x24   : > { %p12535_p5 = pneg %p12534_p0 }
  0x26   : > { %p12542_p9 = pnand %p12541_p7, %p12535_p5 }
  0x28   : > { %12545 = shalt.err (!%p12542_p9)
}
  0x29   : > { %12432 = dma.hbm_to_vmem [thread:$0]  (!%p12722_p11), %s18234_s2, 18432, %s145_s25, [#allocation7], %s12646_s27, %s12646_s27, %s12647_s28  }
  0x2a   : > { %s12751_s7 = sadd.s32 1, %s12642_s15   ;;  %s27_s8 = sadd.s32 1, %s12638_s14 }
  0x2b   : > { %s24_s9 = ssub.s32 %s12642_s15, %s12751_s7  ;;  %p34_p12 = scmp.ne.s32.totalorder %s12638_s14, %s12634_s13 }
  0x2c   : > { %p25_p13 = scmp.eq.s32.totalorder %s24_s9, 0  ;;  %p35_p0 = scmp.eq.s32.totalorder %s12642_s15, 0 }
  0x2d   : > { %p12761_p5 = por %p106_p2, %p34_p12  ;;  %p12443_p10 = scmp.lt.s32.totalorder %s12642_s15, 2 }
  0x2e   : > { %s12767_s11 = scalar_select %p25_p13, %s12638_s14, %s27_s8  }
  0x2f   : > { %s18445_s10 = scalar_select %p12761_p5, 1, 0 }
  0x30   : > { %p36_p3 = por %p35_p0, %p34_p12  ;;  %s158_s17 = sand.u32 1, %s12638_s14  }
  0x31   : > { %s12409_s21 = smul.u32 456, %s158_s17  ;;  %s12782_s4 = scalar_lea.sflag [#allocation4], %s158_s17 }
  0x32   : > { %s12410_s22 = smul.u32 7296, %s12642_s15  ;;  %p12771_p11 = pnand %p12443_p10, %p36_p3 }
  0x33   : > { %s162_s29 = scalar_lea.vmem [#allocation3], %s12409_s21  ;;  %s12551_s9 = scalar_lea.hbm %s18232_s0, 14592 }
  0x34   : > { %s12778_s26 = scalar_lea.hbm %s18232_s0, %s12410_s22  ;;  %s169_s30 = sshll.u32 %s162_s29, 4  ;;  %s12780_s30 = int_to_ptr.vmem [resolvable:$true] %s169_s30 }
  0x35   : > { %s12546_s5 = scalar_lea.hbm %s12778_s26, 7296  ;;  %p12548_p7 = pneg %p12771_p11 }
  0x36   : > { %p12547_p2 = scmp.ne.s32.totalorder %s12778_s26, %s12546_s5  ;;  %p12552_p13 = scmp.lt.s32.totalorder %s12778_s26, %s18232_s0 }
  0x37   : > { %p12553_p0 = scmp.lt.s32.totalorder %s12551_s9, %s12546_s5 }
  0x38   : > { %p12549_p9 = pnand %p12548_p7, %p12547_p2 }
  0x39   : > { %p12554_p10 = por %p12553_p0, %p12552_p13 }
  0x3a   : > { %p12550_p12 = pneg %p12549_p9 }
  0x3c   : > { %p12555_p3 = pnand %p12554_p10, %p12550_p12 }
  0x3e   : > { %12558 = shalt.err (!%p12555_p3)
}
  0x3f   : > { %s12559_s17 = scalar_lea.vmem %s12780_s30, 7296  ;;  %s12648_s21 = smov [#allocation3]  }
  0x40   : > { %p12560_p1 = scmp.ne.s32.totalorder %s12780_s30, %s12559_s17  ;;  %s12564_s25 = sshll.u32 %s12648_s21, 4  ;;  %s12565_s25 = int_to_ptr.vmem [resolvable:$false] %s12564_s25 }
  0x41   : > { %s12566_s29 = scalar_lea.vmem %s12565_s25, 14592  ;;  %p12567_p9 = scmp.lt.s32.totalorder %s12780_s30, %s12565_s25 }
  0x42   : > { %p12562_p6 = pnand %p12560_p1, %p12548_p7  ;;  %p12568_p5 = scmp.lt.s32.totalorder %s12566_s29, %s12559_s17 }
  0x44   : > { %p12563_p2 = pneg %p12562_p6  ;;  %p12569_p4 = por %p12568_p5, %p12567_p9 }
  0x46   : > { %p12570_p8 = pnand %p12569_p4, %p12563_p2 }
  0x48   : > { %12573 = shalt.err (!%p12570_p8)
}
  0x49   : > { %12436 = dma.hbm_to_vmem [thread:$0]  (!%p12771_p11), %s12778_s26, 7296, %s12780_s30, %s12782_s4, %s12646_s27, %s12646_s27, %s12647_s28  }
  0x4a   : > { %p18447_p1 = scmp.ne.s32.totalorder %s18443_s20, 0 }
  0x4c   : > { %181 = sbr.rel (%p18447_p1) target bundleno = 1870 (0x74e), region = 32 }
  0x51   : > { %s12809_s5 = sand.u32 1, %s12634_s13   ;;  %p18448_p4 = scmp.ne.s32.totalorder %s18441_s18, 0 }
  0x52   : > { %s12411_s6 = smul.u32 456, %s12809_s5  ;;  %s184_s8 = scalar_lea.sflag [#allocation4], %s12809_s5 }
  0x54   : > { %s12813_s9 = scalar_lea.vmem [#allocation3], %s12411_s6 }
  0x55   : > { %12617 = dma.done.wait (%p18448_p4), %s184_s8, 7296  }
  0x56   : > { %12619 = vsyncadd (%p18448_p4), %s184_s8, 4294960000  ;;  %p18449_p6 = scmp.eq.s32.totalorder %s12694_s16, 0 }
  0x58   : > { %12621 = dma.done.wait (%p18449_p6), [#allocation7], 36864   ;;  %p18450_p8 = pmov %p18449_p6 }
  0x59   : > { %v12649_v0 = vmov 0.0   ;;  %v837_v1 = vld [vmem:[#allocation6 + $0xf8] sm:$0xff]  ;;  %v836_v3 = vld [vmem:[#allocation6 + $0xf0] sm:$0xff]  ;;  %v835_v5 = vld [vmem:[#allocation6 + $0xe8] sm:$0xff]  ;;  %s12412_s18 = smul.u32 384, %s12809_s5  ;;  %p19383_p11 = scmp.ne.s32.totalorder %s18445_s10, 0 }
  0x5a   : > { %12623 = vsyncadd (%p18450_p8), [#allocation7], 4294930432  ;;  %707 = vst [vmem:[#allocation2 + $0x1b9] sm:$0xff] %v12649_v0  ;;  %v772_v2 = vld [vmem:[#allocation6 + $0x78] sm:$0xff]  ;;  %10537 = vmatprep.subr.mxu0 %v837_v1  ;;  %v771_v4 = vld [vmem:[#allocation6 + $0x70] sm:$0xff]  ;;  %s12413_s27 = smul.u32 6144, %s12694_s16 }
  0x5b   : > { %699 = vst [vmem:[#allocation2] sm:$0xff] %v12649_v0  ;;  %700 = vst [vmem:[#allocation2 + $0x8] sm:$0xff] %v12649_v0  ;;  %10641 = vmatprep.subr.mxu1 %v772_v2  ;;  %10538 = vmatpush3.msra.mxu0 %v837_v1  ;;  %v770_v6 = vld [vmem:[#allocation6 + $0x68] sm:$0xff]  ;;  %v834_v7 = vld [vmem:[#allocation6 + $0xe0] sm:$0xff]  ;;  %s17904_s20 = scalar_lea.vmem [#allocation9], %s12412_s18  ;;  %s9220_s16 = scalar_lea.sflag [#allocation5], %s12809_s5 }
  0x5c   : > { %701 = vst [vmem:[#allocation2 + $0x10] sm:$0xff] %v12649_v0  ;;  %702 = vst [vmem:[#allocation2 + $0x18] sm:$0x1] %v12649_v0  ;;  %10642 = vmatpush3.msra.mxu1 %v772_v2  ;;  %10539 = vmatprep.subr.mxu0 %v836_v3  ;;  %v769_v8 = vld [vmem:[#allocation6 + $0x60] sm:$0xff]  ;;  %v833_v9 = vld [vmem:[#allocation6 + $0xd8] sm:$0xff]  ;;  %s9233_s28 = sshll.u32 %s17904_s20, 4  ;;  %s18171_s30 = scalar_lea.hbm %s18235_s3, %s12413_s27  ;;  %s18181_s28 = int_to_ptr.vmem [resolvable:$true] %s9233_s28 }
  0x5d   : > { %703 = vst [vmem:[#allocation2 + $0x199] sm:$0xff] %v12649_v0  ;;  %704 = vst [vmem:[#allocation2 + $0x1a1] sm:$0xff] %v12649_v0  ;;  %10643 = vmatprep.subr.mxu1 %v771_v4  ;;  %10540 = vmatpush3.msra.mxu0 %v836_v3  ;;  %v768_v10 = vld [vmem:[#allocation6 + $0x58] sm:$0xff]  ;;  %v832_v11 = vld [vmem:[#allocation6 + $0xd0] sm:$0xff]  ;;  %s12574_s4 = scalar_lea.vmem %s18181_s28, 6144  ;;  %s12650_s22 = smov [#allocation9]  }
  0x5e   : > { %705 = vst [vmem:[#allocation2 + $0x1a9] sm:$0xff] %v12649_v0  ;;  %706 = vst [vmem:[#allocation2 + $0x1b1] sm:$0xff] %v12649_v0  ;;  %10644 = vmatpush3.msra.mxu1 %v771_v4  ;;  %10541 = vmatprep.subr.mxu0 %v835_v5  ;;  %v767_v12 = vld [vmem:[#allocation6 + $0x50] sm:$0xff]  ;;  %v831_v13 = vld [vmem:[#allocation6 + $0xc8] sm:$0xff]  ;;  %p12575_p5 = scmp.ne.s32.totalorder %s18181_s28, %s12574_s4  ;;  %s12578_s24 = sshll.u32 %s12650_s22, 4  ;;  %s12579_s24 = int_to_ptr.vmem [resolvable:$false] %s12578_s24 }
  0x5f   : > { %10645 = vmatprep.subr.mxu1 %v770_v6  ;;  %10542 = vmatpush3.msra.mxu0 %v835_v5  ;;  %v766_v14 = vld [vmem:[#allocation6 + $0x48] sm:$0xff]  ;;  %v830_v15 = vld [vmem:[#allocation6 + $0xc0] sm:$0xff]  ;;  %v829_v17 = vld [vmem:[#allocation6 + $0xb8] sm:$0xff]  ;;  %s12580_s17 = scalar_lea.vmem %s12579_s24, 12288  ;;  %p12581_p13 = scmp.lt.s32.totalorder %s18181_s28, %s12579_s24 }
  0x60   : > { %10646 = vmatpush3.msra.mxu1 %v770_v6  ;;  %10543 = vmatprep.subr.mxu0 %v834_v7  ;;  %v765_v16 = vld [vmem:[#allocation6 + $0x40] sm:$0xff]  ;;  %v764_v18 = vld [vmem:[#allocation6 + $0x38] sm:$0xff]  ;;  %v828_v19 = vld [vmem:[#allocation6 + $0xb0] sm:$0xff]  ;;  %p12576_p7 = pnand %p12575_p5, %p19383_p11  ;;  %p12582_p0 = scmp.lt.s32.totalorder %s12580_s17, %s12574_s4 }
  0x61   : > { %10647 = vmatprep.subr.mxu1 %v769_v8  ;;  %10544 = vmatpush3.msra.mxu0 %v834_v7  ;;  %v763_v20 = vld [vmem:[#allocation6 + $0x30] sm:$0xff]  ;;  %v827_v21 = vld [vmem:[#allocation6 + $0xa8] sm:$0xff]  ;;  %v826_v23 = vld [vmem:[#allocation6 + $0xa0] sm:$0xff] }
  0x62   : > { %10648 = vmatpush3.msra.mxu1 %v769_v8  ;;  %10545 = vmatprep.subr.mxu0 %v833_v9  ;;  %v762_v22 = vld [vmem:[#allocation6 + $0x28] sm:$0xff]  ;;  %v761_v24 = vld [vmem:[#allocation6 + $0x20] sm:$0xff]  ;;  %v825_v25 = vld [vmem:[#allocation6 + $0x98] sm:$0xff]  ;;  %p12577_p12 = pneg %p12576_p7  ;;  %p12583_p10 = por %p12582_p0, %p12581_p13 }
  0x63   : > { %10649 = vmatprep.subr.mxu1 %v768_v10  ;;  %10546 = vmatpush3.msra.mxu0 %v833_v9  ;;  %v760_v26 = vld [vmem:[#allocation6 + $0x18] sm:$0xff]  ;;  %v824_v27 = vld [vmem:[#allocation6 + $0x90] sm:$0xff]  ;;  %v823_v29 = vld [vmem:[#allocation6 + $0x88] sm:$0xff] }
  0x64   : > { %10650 = vmatpush3.msra.mxu1 %v768_v10  ;;  %10547 = vmatprep.subr.mxu0 %v832_v11  ;;  %v759_v28 = vld [vmem:[#allocation6 + $0x10] sm:$0xff]  ;;  %v758_v30 = vld [vmem:[#allocation6 + $0x8] sm:$0xff]  ;;  %v822_v31 = vld [vmem:[#allocation6 + $0x80] sm:$0xff]  ;;  %p12584_p3 = pnand %p12583_p10, %p12577_p12 }
  0x65   : > { %10651 = vmatprep.subr.mxu1 %v767_v12  ;;  %10548 = vmatpush3.msra.mxu0 %v832_v11  ;;  %v757_v32 = vld [vmem:[#allocation6] sm:$0xff]  ;;  %v709_v34 = vld [vmem:[%s12813_s9] sm:$0xff]  ;;  %v12831_v42 = vld [vmem:[%s12813_s9 + $0x18] sm:$0xff] }
  0x66   : > { %10652 = vmatpush3.msra.mxu1 %v767_v12  ;;  %10549 = vmatprep.subr.mxu0 %v831_v13  ;;  %v773_v33 = vld [vmem:[%s12813_s9 + $0x1] sm:$0xff]  ;;  %v774_v35 = vld [vmem:[%s12813_s9 + $0x9] sm:$0xff]  ;;  %v775_v38 = vld [vmem:[%s12813_s9 + $0x11] sm:$0xff] }
  0x67   : > { %10653 = vmatprep.subr.mxu1 %v766_v14  ;;  %10550 = vmatpush3.msra.mxu0 %v831_v13  ;;  %v710_v36 = vld [vmem:[%s12813_s9 + $0x8] sm:$0xff]  ;;  %v711_v39 = vld [vmem:[%s12813_s9 + $0x10] sm:$0xff]  ;;  %v1511_v40 = vld [vmem:[#allocation6 + $0x170] sm:$0xff] }
  0x68   : > { %10654 = vmatpush3.msra.mxu1 %v766_v14  ;;  %10551 = vmatprep.subr.mxu0 %v830_v15  ;;  %v1512_v37 = vld [vmem:[#allocation6 + $0x178] sm:$0xff]  ;;  %v1510_v46 = vld [vmem:[#allocation6 + $0x168] sm:$0xff]  ;;  %v1929_v51 = vld [vmem:[#allocation6 + $0x1f0] sm:$0xff] }
  0x69   : > { %10655 = vmatprep.subr.mxu1 %v765_v16  ;;  %10552 = vmatpush3.msra.mxu0 %v830_v15  ;;  %v776_v41 = vld [vmem:[%s12813_s9 + $0x19] sm:$0xff]  ;;  %v777_v43 = vld [vmem:[%s12813_s9 + $0x21] sm:$0xff]  ;;  %v778_v47 = vld [vmem:[%s12813_s9 + $0x29] sm:$0xff] }
  0x6a   : > { %10656 = vmatpush3.msra.mxu1 %v765_v16  ;;  %10553 = vmatprep.subr.mxu0 %v829_v17  ;;  %v12835_v44 = vld [vmem:[%s12813_s9 + $0x20] sm:$0xff]  ;;  %v12841_v48 = vld [vmem:[%s12813_s9 + $0x28] sm:$0xff]  ;;  %v779_v49 = vld [vmem:[%s12813_s9 + $0x31] sm:$0xff] }
  0x6b   : > { %10657 = vmatprep.subr.mxu1 %v764_v18  ;;  %10554 = vmatpush3.msra.mxu0 %v829_v17  ;;  %v1930_v45 = vld [vmem:[#allocation6 + $0x1f8] sm:$0xff]  ;;  %v12845_v50 = vld [vmem:[%s12813_s9 + $0x30] sm:$0xff]  ;;  %v12851_v54 = vld [vmem:[%s12813_s9 + $0x38] sm:$0xff] }
  0x6c   : > { %10658 = vmatpush3.msra.mxu1 %v764_v18  ;;  %10555 = vmatprep.subr.mxu0 %v828_v19  ;;  %v1509_v52 = vld [vmem:[#allocation6 + $0x160] sm:$0xff]  ;;  %v780_v53 = vld [vmem:[%s12813_s9 + $0x39] sm:$0xff] }
  0x6d   : > { %10659 = vmatprep.subr.mxu1 %v763_v20  ;;  %10556 = vmatpush3.msra.mxu0 %v828_v19  ;;  %v781_v55 = vld [vmem:[%s12813_s9 + $0x41] sm:$0xff]  ;;  %v1928_v57 = vld [vmem:[#allocation6 + $0x1e8] sm:$0xff] }
  0x6e   : > { %10660 = vmatpush3.msra.mxu1 %v763_v20  ;;  %10557 = vmatprep.subr.mxu0 %v827_v21  ;;  %v12855_v56 = vld [vmem:[%s12813_s9 + $0x40] sm:$0xff]  ;;  %v782_v59 = vld [vmem:[%s12813_s9 + $0x49] sm:$0xff]  ;;  %v783_v61 = vld [vmem:[%s12813_s9 + $0x51] sm:$0xff] }
  0x6f   : > { %10661 = vmatprep.subr.mxu1 %v762_v22  ;;  %10558 = vmatpush3.msra.mxu0 %v827_v21  ;;  %v1508_v58 = vld [vmem:[#allocation6 + $0x158] sm:$0xff]  ;;  %v12865_v62 = vld [vmem:[%s12813_s9 + $0x50] sm:$0xff]  ;;  %v1507_v0 = vld [vmem:[#allocation6 + $0x150] sm:$0xff] }
  0x70   : > { %10662 = vmatpush3.msra.mxu1 %v762_v22  ;;  %10559 = vmatprep.subr.mxu0 %v826_v23  ;;  %v12861_v60 = vld [vmem:[%s12813_s9 + $0x48] sm:$0xff]  ;;  %v784_v1 = vld [vmem:[%s12813_s9 + $0x59] sm:$0xff]  ;;  %v787_v9 = vld [vmem:[%s12813_s9 + $0x71] sm:$0xff] }
  0x71   : > { %10663 = vmatprep.subr.mxu1 %v761_v24  ;;  %10560 = vmatpush3.msra.mxu0 %v826_v23  ;;  %v1927_v63 = vld [vmem:[#allocation6 + $0x1e0] sm:$0xff]  ;;  %v12871_v2 = vld [vmem:[%s12813_s9 + $0x58] sm:$0xff]  ;;  %v12875_v4 = vld [vmem:[%s12813_s9 + $0x60] sm:$0xff] }
  0x72   : > { %10664 = vmatpush3.msra.mxu1 %v761_v24  ;;  %10561 = vmatprep.subr.mxu0 %v825_v25  ;;  %v785_v3 = vld [vmem:[%s12813_s9 + $0x61] sm:$0xff]  ;;  %v1506_v6 = vld [vmem:[#allocation6 + $0x148] sm:$0xff] }
  0x73   : > { %10665 = vmatprep.subr.mxu1 %v760_v26  ;;  %10562 = vmatpush3.msra.mxu0 %v825_v25  ;;  %v1926_v5 = vld [vmem:[#allocation6 + $0x1d8] sm:$0xff]  ;;  %v12885_v10 = vld [vmem:[%s12813_s9 + $0x70] sm:$0xff]  ;;  %v1925_v11 = vld [vmem:[#allocation6 + $0x1d0] sm:$0xff] }
  0x74   : > { %10666 = vmatpush3.msra.mxu1 %v760_v26  ;;  %10563 = vmatprep.subr.mxu0 %v824_v27  ;;  %v786_v7 = vld [vmem:[%s12813_s9 + $0x69] sm:$0xff]  ;;  %v788_v13 = vld [vmem:[%s12813_s9 + $0x79] sm:$0xff]  ;;  %v789_v15 = vld [vmem:[%s12813_s9 + $0x81] sm:$0xff] }
  0x75   : > { %10667 = vmatprep.subr.mxu1 %v759_v28  ;;  %10564 = vmatpush3.msra.mxu0 %v824_v27  ;;  %v12881_v8 = vld [vmem:[%s12813_s9 + $0x68] sm:$0xff]  ;;  %v12891_v14 = vld [vmem:[%s12813_s9 + $0x78] sm:$0xff]  ;;  %v12895_v16 = vld [vmem:[%s12813_s9 + $0x80] sm:$0xff] }
  0x76   : > { %10668 = vmatpush3.msra.mxu1 %v759_v28  ;;  %10565 = vmatprep.subr.mxu0 %v823_v29  ;;  %v1505_v12 = vld [vmem:[#allocation6 + $0x140] sm:$0xff]  ;;  %v1924_v17 = vld [vmem:[#allocation6 + $0x1c8] sm:$0xff]  ;;  %v1504_v18 = vld [vmem:[#allocation6 + $0x138] sm:$0xff] }
  0x77   : > { %10669 = vmatprep.subr.mxu1 %v758_v30  ;;  %10566 = vmatpush3.msra.mxu0 %v823_v29  ;;  %v790_v19 = vld [vmem:[%s12813_s9 + $0x89] sm:$0xff]  ;;  %v791_v21 = vld [vmem:[%s12813_s9 + $0x91] sm:$0xff]  ;;  %v792_v25 = vld [vmem:[%s12813_s9 + $0x99] sm:$0xff] }
  0x78   : > { %10670 = vmatpush3.msra.mxu1 %v758_v30  ;;  %10567 = vmatprep.subr.mxu0 %v822_v31  ;;  %v12901_v20 = vld [vmem:[%s12813_s9 + $0x88] sm:$0xff]  ;;  %v12905_v22 = vld [vmem:[%s12813_s9 + $0x90] sm:$0xff]  ;;  %v1503_v24 = vld [vmem:[#allocation6 + $0x130] sm:$0xff] }
  0x79   : > { %10671 = vmatprep.subr.mxu1 %v757_v32  ;;  %10568 = vmatpush3.msra.mxu0 %v822_v31  ;;  %v1923_v23 = vld [vmem:[#allocation6 + $0x1c0] sm:$0xff]  ;;  %v12911_v26 = vld [vmem:[%s12813_s9 + $0x98] sm:$0xff]  ;;  %v12915_v28 = vld [vmem:[%s12813_s9 + $0xa0] sm:$0xff] }
  0x7a   : > { %10569 = vmatprep.mubr.f32.mxu0 %v773_v33  ;;  %10672 = vmatpush3.msra.mxu1 %v757_v32  ;;  %v793_v27 = vld [vmem:[%s12813_s9 + $0xa1] sm:$0xff]  ;;  %v1502_v30 = vld [vmem:[#allocation6 + $0x128] sm:$0xff] }
  0x7b   : > { %10673 = vmatprep.mubr.f32.mxu1 %v709_v34  ;;  %10570 = vmatmul.mubr.f32.vlgmr.msra.gmra.mxu0 %v774_v35  ;;  %v1922_v29 = vld [vmem:[#allocation6 + $0x1b8] sm:$0xff]  ;;  %v795_v33 = vld [vmem:[%s12813_s9 + $0xb1] sm:$0xff] }
  0x7c   : > { %10674 = vmatmul.mubr.f32.vlgmr.msra.gmra.mxu1 %v710_v36  ;;  %10745 = vmatprep.subr.mxu0 %v1512_v37  ;;  %v794_v31 = vld [vmem:[%s12813_s9 + $0xa9] sm:$0xff]  ;;  %v1921_v35 = vld [vmem:[#allocation6 + $0x1b0] sm:$0xff] }
  0x7d   : > { %10572 = vmatprep.mubr.f32.mxu0 %v775_v38  ;;  %10746 = vmatpush3.msra.mxu0 %v1512_v37  ;;  %v12921_v32 = vld [vmem:[%s12813_s9 + $0xa8] sm:$0xff]  ;;  %v12925_v34 = vld [vmem:[%s12813_s9 + $0xb0] sm:$0xff]  ;;  %v796_v37 = vld [vmem:[%s12813_s9 + $0xb9] sm:$0xff] }
  0x7e   : > { %10676 = vmatprep.mubr.f32.mxu1 %v711_v39  ;;  %10747 = vmatprep.subr.mxu0 %v1511_v40  ;;  %v1501_v36 = vld [vmem:[#allocation6 + $0x120] sm:$0xff]  ;;  %v12931_v38 = vld [vmem:[%s12813_s9 + $0xb8] sm:$0xff] }
  0x7f   : > { %10573 = vmatmul.mubr.f32.gmra.mxu0 %v776_v41  ;;  %10849 = vmatprep.subr.mxu1 %v1930_v45  ;;  %v797_v39 = vld [vmem:[%s12813_s9 + $0xc1] sm:$0xff]  ;;  %v1920_v41 = vld [vmem:[#allocation6 + $0x1a8] sm:$0xff] }
  0x80   : > { %10677 = vmatmul.mubr.f32.gmra.mxu1 %v12831_v42  ;;  %10575 = vmatprep.mubr.f32.mxu0 %v777_v43  ;;  %v1500_v43 = vld [vmem:[#allocation6 + $0x118] sm:$0xff] }
  0x81   : > { %10679 = vmatprep.mubr.f32.mxu1 %v12835_v44  ;;  %10748 = vmatpush3.msra.mxu0 %v1511_v40  ;;  %v12935_v40 = vld [vmem:[%s12813_s9 + $0xc0] sm:$0xff] }
  0x82   : > { %10749 = vmatprep.subr.mxu0 %v1510_v46  ;;  %10850 = vmatpush3.msra.mxu1 %v1930_v45  ;;  %v798_v45 = vld [vmem:[%s12813_s9 + $0xc9] sm:$0xff] }
  0x83   : > { %10576 = vmatmul.mubr.f32.gmra.mxu0 %v778_v47  ;;  %10851 = vmatprep.subr.mxu1 %v1929_v51  ;;  %v799_v47 = vld [vmem:[%s12813_s9 + $0xd1] sm:$0xff] }
  0x84   : > { %10680 = vmatmul.mubr.f32.gmra.mxu1 %v12841_v48  ;;  %10578 = vmatprep.mubr.f32.mxu0 %v779_v49  ;;  %v12945_v49 = vld [vmem:[%s12813_s9 + $0xd0] sm:$0xff] }
  0x85   : > { %10682 = vmatprep.mubr.f32.mxu1 %v12845_v50  ;;  %10750 = vmatpush3.msra.mxu0 %v1510_v46  ;;  %v12941_v46 = vld [vmem:[%s12813_s9 + $0xc8] sm:$0xff] }
  0x86   : > { %10751 = vmatprep.subr.mxu0 %v1509_v52  ;;  %10852 = vmatpush3.msra.mxu1 %v1929_v51  ;;  %v1919_v51 = vld [vmem:[#allocation6 + $0x1a0] sm:$0xff] }
  0x87   : > { %10579 = vmatmul.mubr.f32.gmra.mxu0 %v780_v53  ;;  %10853 = vmatprep.subr.mxu1 %v1928_v57  ;;  %v800_v53 = vld [vmem:[%s12813_s9 + $0xd9] sm:$0xff] }
  0x88   : > { %10683 = vmatmul.mubr.f32.gmra.mxu1 %v12851_v54  ;;  %10581 = vmatprep.mubr.f32.mxu0 %v781_v55  ;;  %v12951_v55 = vld [vmem:[%s12813_s9 + $0xd8] sm:$0xff] }
  0x89   : > { %10685 = vmatprep.mubr.f32.mxu1 %v12855_v56  ;;  %10752 = vmatpush3.msra.mxu0 %v1509_v52  ;;  %v1499_v52 = vld [vmem:[#allocation6 + $0x110] sm:$0xff] }
  0x8a   : > { %10753 = vmatprep.subr.mxu0 %v1508_v58  ;;  %10854 = vmatpush3.msra.mxu1 %v1928_v57  ;;  %v801_v57 = vld [vmem:[%s12813_s9 + $0xe1] sm:$0xff] }
  0x8b   : > { %10582 = vmatmul.mubr.f32.gmra.mxu0 %v782_v59  ;;  %10855 = vmatprep.subr.mxu1 %v1927_v63  ;;  %v1918_v59 = vld [vmem:[#allocation6 + $0x198] sm:$0xff] }
  0x8c   : > { %10686 = vmatmul.mubr.f32.gmra.mxu1 %v12861_v60  ;;  %10584 = vmatprep.mubr.f32.mxu0 %v783_v61  ;;  %v1498_v61 = vld [vmem:[#allocation6 + $0x108] sm:$0xff] }
  0x8d   : > { %10688 = vmatprep.mubr.f32.mxu1 %v12865_v62  ;;  %10754 = vmatpush3.msra.mxu0 %v1508_v58  ;;  %v12955_v58 = vld [vmem:[%s12813_s9 + $0xe0] sm:$0xff] }
  0x8e   : > { %10755 = vmatprep.subr.mxu0 %v1507_v0  ;;  %10856 = vmatpush3.msra.mxu1 %v1927_v63  ;;  %v802_v63 = vld [vmem:[%s12813_s9 + $0xe9] sm:$0xff] }
  0x8f   : > { %10585 = vmatmul.mubr.f32.gmra.mxu0 %v784_v1  ;;  %10857 = vmatprep.subr.mxu1 %v1926_v5  ;;  %v803_v1 = vld [vmem:[%s12813_s9 + $0xf1] sm:$0xff] }
  0x90   : > { %10689 = vmatmul.mubr.f32.gmra.mxu1 %v12871_v2  ;;  %10587 = vmatprep.mubr.f32.mxu0 %v785_v3  ;;  %v12965_v3 = vld [vmem:[%s12813_s9 + $0xf0] sm:$0xff] }
  0x91   : > { %10691 = vmatprep.mubr.f32.mxu1 %v12875_v4  ;;  %10756 = vmatpush3.msra.mxu0 %v1507_v0  ;;  %v12961_v0 = vld [vmem:[%s12813_s9 + $0xe8] sm:$0xff] }
  0x92   : > { %10757 = vmatprep.subr.mxu0 %v1506_v6  ;;  %10858 = vmatpush3.msra.mxu1 %v1926_v5  ;;  %v1917_v5 = vld [vmem:[#allocation6 + $0x190] sm:$0xff] }
  0x93   : > { %10588 = vmatmul.mubr.f32.gmra.mxu0 %v786_v7  ;;  %10859 = vmatprep.subr.mxu1 %v1925_v11  ;;  %v804_v7 = vld [vmem:[%s12813_s9 + $0xf9] sm:$0xff] }
  0x94   : > { %10692 = vmatmul.mubr.f32.gmra.mxu1 %v12881_v8  ;;  %10590 = vmatprep.mubr.f32.mxu0 %v787_v9  ;;  %v12971_v9 = vld [vmem:[%s12813_s9 + $0xf8] sm:$0xff] }
  0x95   : > { %10694 = vmatprep.mubr.f32.mxu1 %v12885_v10  ;;  %10758 = vmatpush3.msra.mxu0 %v1506_v6  ;;  %v1497_v6 = vld [vmem:[#allocation6 + $0x100] sm:$0xff] }
  0x96   : > { %10759 = vmatprep.subr.mxu0 %v1505_v12  ;;  %10860 = vmatpush3.msra.mxu1 %v1925_v11  ;;  %v805_v11 = vld [vmem:[%s12813_s9 + $0x101] sm:$0xff] }
  0x97   : > { %10591 = vmatmul.mubr.f32.gmra.mxu0 %v788_v13  ;;  %10861 = vmatprep.subr.mxu1 %v1924_v17  ;;  %v1916_v13 = vld [vmem:[#allocation6 + $0x188] sm:$0xff] }
  0x98   : > { %10695 = vmatmul.mubr.f32.gmra.mxu1 %v12891_v14  ;;  %10593 = vmatprep.mubr.f32.mxu0 %v789_v15  ;;  %v12978_v15 = vld [vmem:[#allocation6 + $0x278] sm:$0xff] }
  0x99   : > { %10697 = vmatprep.mubr.f32.mxu1 %v12895_v16  ;;  %10760 = vmatpush3.msra.mxu0 %v1505_v12  ;;  %v12975_v12 = vld [vmem:[%s12813_s9 + $0x100] sm:$0xff] }
  0x9a   : > { %10761 = vmatprep.subr.mxu0 %v1504_v18  ;;  %10862 = vmatpush3.msra.mxu1 %v1924_v17  ;;  %v806_v17 = vld [vmem:[%s12813_s9 + $0x109] sm:$0xff] }
  0x9b   : > { %10594 = vmatmul.mubr.f32.gmra.mxu0 %v790_v19  ;;  %10863 = vmatprep.subr.mxu1 %v1923_v23  ;;  %v807_v19 = vld [vmem:[%s12813_s9 + $0x111] sm:$0xff] }
  0x9c   : > { %10698 = vmatmul.mubr.f32.gmra.mxu1 %v12901_v20  ;;  %10596 = vmatprep.mubr.f32.mxu0 %v791_v21  ;;  %v12987_v21 = vld [vmem:[%s12813_s9 + $0x110] sm:$0xff] }
  0x9d   : > { %10700 = vmatprep.mubr.f32.mxu1 %v12905_v22  ;;  %10762 = vmatpush3.msra.mxu0 %v1504_v18  ;;  %v12983_v18 = vld [vmem:[%s12813_s9 + $0x108] sm:$0xff] }
  0x9e   : > { %10763 = vmatprep.subr.mxu0 %v1503_v24  ;;  %10864 = vmatpush3.msra.mxu1 %v1923_v23  ;;  %v1915_v23 = vld [vmem:[#allocation6 + $0x180] sm:$0xff] }
  0x9f   : > { %10597 = vmatmul.mubr.f32.gmra.mxu0 %v792_v25  ;;  %10865 = vmatprep.subr.mxu1 %v1922_v29  ;;  %v12994_v25 = vld [vmem:[%s12813_s9 + $0x118] sm:$0xff] }
  0xa0   : > { %10701 = vmatmul.mubr.f32.gmra.mxu1 %v12911_v26  ;;  %10599 = vmatprep.mubr.f32.mxu0 %v793_v27  ;;  %v809_v27 = vld [vmem:[%s12813_s9 + $0x121] sm:$0xff] }
  0xa1   : > { %10703 = vmatprep.mubr.f32.mxu1 %v12915_v28  ;;  %10764 = vmatpush3.msra.mxu0 %v1503_v24  ;;  %v808_v24 = vld [vmem:[%s12813_s9 + $0x119] sm:$0xff] }
  0xa2   : > { %10765 = vmatprep.subr.mxu0 %v1502_v30  ;;  %10866 = vmatpush3.msra.mxu1 %v1922_v29  ;;  %v12998_v29 = vld [vmem:[%s12813_s9 + $0x120] sm:$0xff] }
  0xa3   : > { %10600 = vmatmul.mubr.f32.gmra.mxu0 %v794_v31  ;;  %10867 = vmatprep.subr.mxu1 %v1921_v35  ;;  %v810_v31 = vld [vmem:[%s12813_s9 + $0x129] sm:$0xff] }
  0xa4   : > { %10704 = vmatmul.mubr.f32.gmra.mxu1 %v12921_v32  ;;  %10602 = vmatprep.mubr.f32.mxu0 %v795_v33  ;;  %v13006_v33 = vld [vmem:[%s12813_s9 + $0x128] sm:$0xff] }
  0xa5   : > { %10706 = vmatprep.mubr.f32.mxu1 %v12925_v34  ;;  %10766 = vmatpush3.msra.mxu0 %v1502_v30  ;;  %v13000_v30 = vld [vmem:[#allocation6 + $0x2f8] sm:$0xff] }
  0xa6   : > { %10767 = vmatprep.subr.mxu0 %v1501_v36  ;;  %10868 = vmatpush3.msra.mxu1 %v1921_v35  ;;  %v811_v35 = vld [vmem:[%s12813_s9 + $0x131] sm:$0xff] }
  0xa7   : > { %10603 = vmatmul.mubr.f32.gmra.mxu0 %v796_v37  ;;  %10869 = vmatprep.subr.mxu1 %v1920_v41  ;;  %v812_v37 = vld [vmem:[%s12813_s9 + $0x139] sm:$0xff] }
  0xa8   : > { %10707 = vmatmul.mubr.f32.gmra.mxu1 %v12931_v38  ;;  %10605 = vmatprep.mubr.f32.mxu0 %v797_v39  ;;  %v13017_v39 = vld [vmem:[%s12813_s9 + $0x138] sm:$0xff] }
  0xa9   : > { %10709 = vmatprep.mubr.f32.mxu1 %v12935_v40  ;;  %10768 = vmatpush3.msra.mxu0 %v1501_v36  ;;  %v13010_v36 = vld [vmem:[%s12813_s9 + $0x130] sm:$0xff] }
  0xaa   : > { %10769 = vmatprep.subr.mxu0 %v1500_v43  ;;  %10870 = vmatpush3.msra.mxu1 %v1920_v41  ;;  %v813_v41 = vld [vmem:[%s12813_s9 + $0x141] sm:$0xff] }
  0xab   : > { %10606 = vmatmul.mubr.f32.gmra.mxu0 %v798_v45  ;;  %10871 = vmatprep.subr.mxu1 %v1919_v51  ;;  %v814_v45 = vld [vmem:[%s12813_s9 + $0x149] sm:$0xff] }
  0xac   : > { %10710 = vmatmul.mubr.f32.gmra.mxu1 %v12941_v46  ;;  %10608 = vmatprep.mubr.f32.mxu0 %v799_v47  ;;  %v13027_v47 = vld [vmem:[%s12813_s9 + $0x148] sm:$0xff] }
  0xad   : > { %10712 = vmatprep.mubr.f32.mxu1 %v12945_v49  ;;  %10770 = vmatpush3.msra.mxu0 %v1500_v43  ;;  %v13021_v43 = vld [vmem:[%s12813_s9 + $0x140] sm:$0xff] }
  0xae   : > { %10771 = vmatprep.subr.mxu0 %v1499_v52  ;;  %10872 = vmatpush3.msra.mxu1 %v1919_v51  ;;  %v815_v51 = vld [vmem:[%s12813_s9 + $0x151] sm:$0xff] }
  0xaf   : > { %10609 = vmatmul.mubr.f32.gmra.mxu0 %v800_v53  ;;  %10873 = vmatprep.subr.mxu1 %v1918_v59  ;;  %v816_v53 = vld [vmem:[%s12813_s9 + $0x159] sm:$0xff] }
  0xb0   : > { %10713 = vmatmul.mubr.f32.gmra.mxu1 %v12951_v55  ;;  %10611 = vmatprep.mubr.f32.mxu0 %v801_v57  ;;  %v13037_v57 = vld [vmem:[%s12813_s9 + $0x158] sm:$0xff] }
  0xb1   : > { %10715 = vmatprep.mubr.f32.mxu1 %v12955_v58  ;;  %10772 = vmatpush3.msra.mxu0 %v1499_v52  ;;  %v13031_v52 = vld [vmem:[%s12813_s9 + $0x150] sm:$0xff] }
  0xb2   : > { %10773 = vmatprep.subr.mxu0 %v1498_v61  ;;  %10874 = vmatpush3.msra.mxu1 %v1918_v59  ;;  %v817_v59 = vld [vmem:[%s12813_s9 + $0x161] sm:$0xff] }
  0xb3   : > { %10612 = vmatmul.mubr.f32.gmra.mxu0 %v802_v63  ;;  %10875 = vmatprep.subr.mxu1 %v1917_v5  ;;  %v818_v63 = vld [vmem:[%s12813_s9 + $0x169] sm:$0xff] }
  0xb4   : > { %10716 = vmatmul.mubr.f32.gmra.mxu1 %v12961_v0  ;;  %10614 = vmatprep.mubr.f32.mxu0 %v803_v1  ;;  %v13047_v1 = vld [vmem:[%s12813_s9 + $0x168] sm:$0xff] }
  0xb5   : > { %10718 = vmatprep.mubr.f32.mxu1 %v12965_v3  ;;  %10774 = vmatpush3.msra.mxu0 %v1498_v61  ;;  %v13041_v61 = vld [vmem:[%s12813_s9 + $0x160] sm:$0xff] }
  0xb6   : > { %10775 = vmatprep.subr.mxu0 %v1497_v6  ;;  %10876 = vmatpush3.msra.mxu1 %v1917_v5  ;;  %v819_v5 = vld [vmem:[%s12813_s9 + $0x171] sm:$0xff] }
  0xb7   : > { %10615 = vmatmul.mubr.f32.gmra.mxu0 %v804_v7  ;;  %10877 = vmatprep.subr.mxu1 %v1916_v13  ;;  %v820_v7 = vld [vmem:[%s12813_s9 + $0x179] sm:$0xff] }
  0xb8   : > { %10719 = vmatmul.mubr.f32.gmra.mxu1 %v12971_v9  ;;  %10617 = vmatprep.mubr.f32.mxu0 %v805_v11  ;;  %v13057_v11 = vld [vmem:[%s12813_s9 + $0x178] sm:$0xff] }
  0xb9   : > { %10721 = vmatprep.mubr.f32.mxu1 %v12975_v12  ;;  %10776 = vmatpush3.msra.mxu0 %v1497_v6  ;;  %v13051_v6 = vld [vmem:[%s12813_s9 + $0x170] sm:$0xff] }
  0xba   : > { %10878 = vmatpush3.msra.mxu1 %v1916_v13  ;;  %10953 = vmatprep.subr.mxu0 %v12978_v15  ;;  %v1448_v13 = vld [vmem:[%s12813_s9 + $0x2] sm:$0xff] }
  0xbb   : > { %10618 = vmatmul.mubr.f32.gmra.mxu0 %v806_v17  ;;  %10879 = vmatprep.subr.mxu1 %v1915_v23  ;;  %v1449_v17 = vld [vmem:[%s12813_s9 + $0xa] sm:$0xff] }
  0xbc   : > { %10722 = vmatmul.mubr.f32.gmra.mxu1 %v12983_v18  ;;  %10620 = vmatprep.mubr.f32.mxu0 %v807_v19  ;;  %v1450_v19 = vld [vmem:[%s12813_s9 + $0x12] sm:$0xff] }
  0xbd   : > { %10724 = vmatprep.mubr.f32.mxu1 %v12987_v21  ;;  %10880 = vmatpush3.msra.mxu1 %v1915_v23  ;;  %v2347_v23 = vld [vmem:[#allocation6 + $0x270] sm:$0xff] }
  0xbe   : > { %11057 = vmatprep.subr.mxu1 %v13000_v30 }
  0xbf   : > { %10621 = vmatmul.mubr.f32.gmra.mxu0 %v808_v24  ;;  %v13067_v24 = vld [vmem:[%s12813_s9 + $0x1a] sm:$0xff] }
  0xc0   : > { %10725 = vmatmul.mubr.f32.gmra.mxu1 %v12994_v25  ;;  %10623 = vmatprep.mubr.f32.mxu0 %v809_v27  ;;  %v13071_v27 = vld [vmem:[%s12813_s9 + $0x22] sm:$0xff] }
  0xc1   : > { %10727 = vmatprep.mubr.f32.mxu1 %v12998_v29 }
  0xc3   : > { %10624 = vmatmul.mubr.f32.gmra.mxu0 %v810_v31  ;;  %v2346_v31 = vld [vmem:[#allocation6 + $0x268] sm:$0xff] }
  0xc4   : > { %10728 = vmatmul.mubr.f32.gmra.mxu1 %v13006_v33  ;;  %10626 = vmatprep.mubr.f32.mxu0 %v811_v35  ;;  %v2344_v35 = vld [vmem:[#allocation6 + $0x258] sm:$0xff] }
  0xc5   : > { %10730 = vmatprep.mubr.f32.mxu1 %v13010_v36 }
  0xc7   : > { %10627 = vmatmul.mubr.f32.gmra.mxu0 %v812_v37  ;;  %v2763_v37 = vld [vmem:[#allocation6 + $0x2e0] sm:$0xff] }
  0xc8   : > { %10731 = vmatmul.mubr.f32.gmra.mxu1 %v13017_v39  ;;  %10629 = vmatprep.mubr.f32.mxu0 %v813_v41  ;;  %v2343_v41 = vld [vmem:[#allocation6 + $0x250] sm:$0xff] }
  0xc9   : > { %10733 = vmatprep.mubr.f32.mxu1 %v13021_v43 }
  0xcb   : > { %10630 = vmatmul.mubr.f32.gmra.mxu0 %v814_v45  ;;  %v2762_v45 = vld [vmem:[#allocation6 + $0x2d8] sm:$0xff] }
  0xcc   : > { %10734 = vmatmul.mubr.f32.gmra.mxu1 %v13027_v47  ;;  %10632 = vmatprep.mubr.f32.mxu0 %v815_v51  ;;  %v2342_v51 = vld [vmem:[#allocation6 + $0x248] sm:$0xff] }
  0xcd   : > { %10736 = vmatprep.mubr.f32.mxu1 %v13031_v52 }
  0xcf   : > { %10633 = vmatmul.mubr.f32.gmra.mxu0 %v816_v53  ;;  %v2761_v53 = vld [vmem:[#allocation6 + $0x2d0] sm:$0xff] }
  0xd0   : > { %10737 = vmatmul.mubr.f32.gmra.mxu1 %v13037_v57  ;;  %10635 = vmatprep.mubr.f32.mxu0 %v817_v59  ;;  %v2341_v59 = vld [vmem:[#allocation6 + $0x240] sm:$0xff] }
  0xd1   : > { %10739 = vmatprep.mubr.f32.mxu1 %v13041_v61 }
  0xd3   : > { %10636 = vmatmul.mubr.f32.gmra.mxu0 %v818_v63  ;;  %v2760_v63 = vld [vmem:[#allocation6 + $0x2c8] sm:$0xff] }
  0xd4   : > { %10740 = vmatmul.mubr.f32.gmra.mxu1 %v13047_v1  ;;  %10638 = vmatprep.mubr.f32.mxu0 %v819_v5  ;;  %v2340_v5 = vld [vmem:[#allocation6 + $0x238] sm:$0xff] }
  0xd5   : > { %10742 = vmatprep.mubr.f32.mxu1 %v13051_v6 }
  0xd7   : > { %10639 = vmatmul.mubr.f32.gmra.mxu0 %v820_v7  ;;  %v2759_v7 = vld [vmem:[#allocation6 + $0x2c0] sm:$0xff] }
  0xd8   : > { %10743 = vmatmul.mubr.f32.gmra.mxu1 %v13057_v11  ;;  %10777 = vmatprep.mubr.f32.mxu0 %v1448_v13  ;;  %v2339_v13 = vld [vmem:[#allocation6 + $0x230] sm:$0xff] }
  0xd9   : > { %10881 = vmatprep.mubr.f32.mxu1 %v12831_v42  ;;  %v2765_v42 = vld [vmem:[#allocation6 + $0x2f0] sm:$0xff] }
  0xdb   : > { %10778 = vmatmul.mubr.f32.vlgmr.msra.gmra.mxu0 %v1449_v17  ;;  %v2758_v17 = vld [vmem:[#allocation6 + $0x2b8] sm:$0xff] }
  0xdc   : > { %10882 = vmatmul.mubr.f32.vlgmr.msra.gmra.mxu1 %v12835_v44  ;;  %10954 = vmatpush3.msra.mxu0 %v12978_v15  ;;  %v13078_v44 = vld [vmem:[%s12813_s9 + $0x2a] sm:$0xff] }
  0xdd   : > { %10780 = vmatprep.mubr.f32.mxu0 %v1450_v19  ;;  %10884 = vmatprep.mubr.f32.mxu1 %v12841_v48  ;;  %v13082_v48 = vld [vmem:[%s12813_s9 + $0x32] sm:$0xff] }
  0xde   : > { %10955 = vmatprep.subr.mxu0 %v2347_v23  ;;  %11058 = vmatpush3.msra.mxu1 %v13000_v30  ;;  %v2345_v15 = vld [vmem:[#allocation6 + $0x260] sm:$0xff]  ;;  %v2764_v30 = vld [vmem:[#allocation6 + $0x2e8] sm:$0xff] }
  0xdf   : > { %10956 = vmatpush3.msra.mxu0 %v2347_v23  ;;  %11059 = vmatprep.subr.mxu1 %v2765_v42  ;;  %v2338_v19 = vld [vmem:[#allocation6 + $0x228] sm:$0xff]  ;;  %v2757_v23 = vld [vmem:[#allocation6 + $0x2b0] sm:$0xff] }
  0xe0   : > { %10781 = vmatmul.mubr.f32.gmra.mxu0 %v13067_v24  ;;  %10885 = vmatmul.mubr.f32.gmra.mxu1 %v12845_v50  ;;  %v13088_v50 = vld [vmem:[%s12813_s9 + $0x3a] sm:$0xff] }
  0xe1   : > { %10783 = vmatprep.mubr.f32.mxu0 %v13071_v27  ;;  %10887 = vmatprep.mubr.f32.mxu1 %v12851_v54  ;;  %v13092_v54 = vld [vmem:[%s12813_s9 + $0x42] sm:$0xff] }
  0xe2   : > { %10957 = vmatprep.subr.mxu0 %v2346_v31  ;;  %11060 = vmatpush3.msra.mxu1 %v2765_v42  ;;  %v2756_v42 = vld [vmem:[#allocation6 + $0x2a8] sm:$0xff] }
  0xe3   : > { %10958 = vmatpush3.msra.mxu0 %v2346_v31  ;;  %11061 = vmatprep.subr.mxu1 %v2764_v30  ;;  %v2337_v31 = vld [vmem:[#allocation6 + $0x220] sm:$0xff] }
  0xe4   : > { %10784 = vmatmul.mubr.f32.gmra.mxu0 %v13078_v44  ;;  %10888 = vmatmul.mubr.f32.gmra.mxu1 %v12855_v56  ;;  %v13098_v56 = vld [vmem:[%s12813_s9 + $0x4a] sm:$0xff] }
  0xe5   : > { %10786 = vmatprep.mubr.f32.mxu0 %v13082_v48  ;;  %10890 = vmatprep.mubr.f32.mxu1 %v12861_v60  ;;  %v13102_v60 = vld [vmem:[%s12813_s9 + $0x52] sm:$0xff] }
  0xe6   : > { %10959 = vmatprep.subr.mxu0 %v2345_v15  ;;  %11062 = vmatpush3.msra.mxu1 %v2764_v30  ;;  %v2755_v30 = vld [vmem:[#allocation6 + $0x2a0] sm:$0xff] }
  0xe7   : > { %10960 = vmatpush3.msra.mxu0 %v2345_v15  ;;  %11063 = vmatprep.subr.mxu1 %v2763_v37  ;;  %v2336_v15 = vld [vmem:[#allocation6 + $0x218] sm:$0xff] }
  0xe8   : > { %10787 = vmatmul.mubr.f32.gmra.mxu0 %v13088_v50  ;;  %10891 = vmatmul.mubr.f32.gmra.mxu1 %v12865_v62  ;;  %v13108_v62 = vld [vmem:[%s12813_s9 + $0x5a] sm:$0xff] }
  0xe9   : > { %10789 = vmatprep.mubr.f32.mxu0 %v13092_v54  ;;  %10893 = vmatprep.mubr.f32.mxu1 %v12871_v2  ;;  %v13112_v2 = vld [vmem:[%s12813_s9 + $0x62] sm:$0xff] }
  0xea   : > { %10961 = vmatprep.subr.mxu0 %v2344_v35  ;;  %11064 = vmatpush3.msra.mxu1 %v2763_v37  ;;  %v2754_v37 = vld [vmem:[#allocation6 + $0x298] sm:$0xff] }
  0xeb   : > { %10962 = vmatpush3.msra.mxu0 %v2344_v35  ;;  %11065 = vmatprep.subr.mxu1 %v2762_v45  ;;  %v2335_v35 = vld [vmem:[#allocation6 + $0x210] sm:$0xff] }
  0xec   : > { %10790 = vmatmul.mubr.f32.gmra.mxu0 %v13098_v56  ;;  %10894 = vmatmul.mubr.f32.gmra.mxu1 %v12875_v4  ;;  %v13118_v4 = vld [vmem:[%s12813_s9 + $0x6a] sm:$0xff] }
  0xed   : > { %10792 = vmatprep.mubr.f32.mxu0 %v13102_v60  ;;  %10896 = vmatprep.mubr.f32.mxu1 %v12881_v8  ;;  %v13122_v8 = vld [vmem:[%s12813_s9 + $0x72] sm:$0xff] }
  0xee   : > { %10963 = vmatprep.subr.mxu0 %v2343_v41  ;;  %11066 = vmatpush3.msra.mxu1 %v2762_v45  ;;  %v2753_v45 = vld [vmem:[#allocation6 + $0x290] sm:$0xff] }
  0xef   : > { %10964 = vmatpush3.msra.mxu0 %v2343_v41  ;;  %11067 = vmatprep.subr.mxu1 %v2761_v53  ;;  %v2334_v41 = vld [vmem:[#allocation6 + $0x208] sm:$0xff] }
  0xf0   : > { %10793 = vmatmul.mubr.f32.gmra.mxu0 %v13108_v62  ;;  %10897 = vmatmul.mubr.f32.gmra.mxu1 %v12885_v10  ;;  %v13128_v10 = vld [vmem:[%s12813_s9 + $0x7a] sm:$0xff] }
  0xf1   : > { %10795 = vmatprep.mubr.f32.mxu0 %v13112_v2  ;;  %10899 = vmatprep.mubr.f32.mxu1 %v12891_v14  ;;  %v13132_v14 = vld [vmem:[%s12813_s9 + $0x82] sm:$0xff] }
  0xf2   : > { %10965 = vmatprep.subr.mxu0 %v2342_v51  ;;  %11068 = vmatpush3.msra.mxu1 %v2761_v53  ;;  %v2752_v53 = vld [vmem:[#allocation6 + $0x288] sm:$0xff] }
  0xf3   : > { %10966 = vmatpush3.msra.mxu0 %v2342_v51  ;;  %11069 = vmatprep.subr.mxu1 %v2760_v63  ;;  %v2333_v51 = vld [vmem:[#allocation6 + $0x200] sm:$0xff] }
  0xf4   : > { %10796 = vmatmul.mubr.f32.gmra.mxu0 %v13118_v4  ;;  %10900 = vmatmul.mubr.f32.gmra.mxu1 %v12895_v16  ;;  %v13138_v16 = vld [vmem:[%s12813_s9 + $0x8a] sm:$0xff] }
  0xf5   : > { %10798 = vmatprep.mubr.f32.mxu0 %v13122_v8  ;;  %10902 = vmatprep.mubr.f32.mxu1 %v12901_v20  ;;  %v13142_v20 = vld [vmem:[%s12813_s9 + $0x92] sm:$0xff] }
  0xf6   : > { %10967 = vmatprep.subr.mxu0 %v2341_v59  ;;  %11070 = vmatpush3.msra.mxu1 %v2760_v63  ;;  %v13214_v63 = vld [vmem:[#allocation6 + $0x378] sm:$0xff] }
  0xf7   : > { %10968 = vmatpush3.msra.mxu0 %v2341_v59  ;;  %11071 = vmatprep.subr.mxu1 %v2759_v7  ;;  %v2751_v59 = vld [vmem:[#allocation6 + $0x280] sm:$0xff] }
  0xf8   : > { %10799 = vmatmul.mubr.f32.gmra.mxu0 %v13128_v10  ;;  %10903 = vmatmul.mubr.f32.gmra.mxu1 %v12905_v22  ;;  %v13148_v22 = vld [vmem:[%s12813_s9 + $0x9a] sm:$0xff] }
  0xf9   : > { %10801 = vmatprep.mubr.f32.mxu0 %v13132_v14  ;;  %10905 = vmatprep.mubr.f32.mxu1 %v12911_v26  ;;  %v13152_v26 = vld [vmem:[%s12813_s9 + $0xa2] sm:$0xff] }
  0xfa   : > { %10969 = vmatprep.subr.mxu0 %v2340_v5  ;;  %11072 = vmatpush3.msra.mxu1 %v2759_v7  ;;  %v13248_v7 = vld [vmem:[%s12813_s9 + $0x132] sm:$0xff] }
  0xfb   : > { %10970 = vmatpush3.msra.mxu0 %v2340_v5  ;;  %11073 = vmatprep.subr.mxu1 %v2758_v17  ;;  %v13227_v5 = vld [vmem:[#allocation6 + $0x3f8] sm:$0xff] }
  0xfc   : > { %10802 = vmatmul.mubr.f32.gmra.mxu0 %v13138_v16  ;;  %10906 = vmatmul.mubr.f32.gmra.mxu1 %v12915_v28  ;;  %v13158_v28 = vld [vmem:[%s12813_s9 + $0xaa] sm:$0xff] }
  0xfd   : > { %10804 = vmatprep.mubr.f32.mxu0 %v13142_v20  ;;  %10908 = vmatprep.mubr.f32.mxu1 %v12921_v32  ;;  %v13162_v32 = vld [vmem:[%s12813_s9 + $0xb2] sm:$0xff] }
  0xfe   : > { %10971 = vmatprep.subr.mxu0 %v2339_v13  ;;  %11074 = vmatpush3.msra.mxu1 %v2758_v17  ;;  %v1912_v17 = vld [vmem:[%s12813_s9 + $0x188] sm:$0xff] }
  0xff   : > { %10972 = vmatpush3.msra.mxu0 %v2339_v13  ;;  %11075 = vmatprep.subr.mxu1 %v2757_v23  ;;  %v13289_v13 = vld [vmem:[%s12813_s9 + $0x172] sm:$0xff] }
 0x100   : > { %10805 = vmatmul.mubr.f32.gmra.mxu0 %v13148_v22  ;;  %10909 = vmatmul.mubr.f32.gmra.mxu1 %v12925_v34  ;;  %v13168_v34 = vld [vmem:[%s12813_s9 + $0xba] sm:$0xff] }
 0x101   : > { %10807 = vmatprep.mubr.f32.mxu0 %v13152_v26  ;;  %10911 = vmatprep.mubr.f32.mxu1 %v12931_v38  ;;  %v13172_v38 = vld [vmem:[%s12813_s9 + $0xc2] sm:$0xff] }
 0x102   : > { %10973 = vmatprep.subr.mxu0 %v2338_v19  ;;  %11076 = vmatpush3.msra.mxu1 %v2757_v23  ;;  %v2286_v23 = vld [vmem:[%s12813_s9 + $0x29] sm:$0xff] }
 0x103   : > { %10974 = vmatpush3.msra.mxu0 %v2338_v19  ;;  %11077 = vmatprep.subr.mxu1 %v2756_v42  ;;  %v2284_v19 = vld [vmem:[%s12813_s9 + $0x19] sm:$0xff] }
 0x104   : > { %10808 = vmatmul.mubr.f32.gmra.mxu0 %v13158_v28  ;;  %10912 = vmatmul.mubr.f32.gmra.mxu1 %v12935_v40  ;;  %v13178_v40 = vld [vmem:[%s12813_s9 + $0xca] sm:$0xff] }
 0x105   : > { %10810 = vmatprep.mubr.f32.mxu0 %v13162_v32  ;;  %10914 = vmatprep.mubr.f32.mxu1 %v12941_v46  ;;  %v13182_v46 = vld [vmem:[%s12813_s9 + $0xd2] sm:$0xff] }
 0x106   : > { %10975 = vmatprep.subr.mxu0 %v2337_v31  ;;  %11078 = vmatpush3.msra.mxu1 %v2756_v42 }
 0x107   : > { %10976 = vmatpush3.msra.mxu0 %v2337_v31  ;;  %11079 = vmatprep.subr.mxu1 %v2755_v30  ;;  %v3183_v31 = vld [vmem:[#allocation6 + $0x370] sm:$0xff] }
 0x108   : > { %10811 = vmatmul.mubr.f32.gmra.mxu0 %v13168_v34  ;;  %10915 = vmatmul.mubr.f32.gmra.mxu1 %v12945_v49  ;;  %v13188_v49 = vld [vmem:[%s12813_s9 + $0xda] sm:$0xff] }
 0x109   : > { %10813 = vmatprep.mubr.f32.mxu0 %v13172_v38  ;;  %10917 = vmatprep.mubr.f32.mxu1 %v12951_v55  ;;  %v13192_v55 = vld [vmem:[%s12813_s9 + $0xe2] sm:$0xff] }
 0x10a   : > { %10977 = vmatprep.subr.mxu0 %v2336_v15  ;;  %11080 = vmatpush3.msra.mxu1 %v2755_v30 }
 0x10b   : > { %10978 = vmatpush3.msra.mxu0 %v2336_v15  ;;  %11081 = vmatprep.subr.mxu1 %v2754_v37 }
 0x10c   : > { %10814 = vmatmul.mubr.f32.gmra.mxu0 %v13178_v40  ;;  %10918 = vmatmul.mubr.f32.gmra.mxu1 %v12955_v58  ;;  %v13198_v58 = vld [vmem:[%s12813_s9 + $0xea] sm:$0xff] }
 0x10d   : > { %10816 = vmatprep.mubr.f32.mxu0 %v13182_v46  ;;  %10920 = vmatprep.mubr.f32.mxu1 %v12961_v0  ;;  %v13202_v0 = vld [vmem:[%s12813_s9 + $0xf2] sm:$0xff] }
 0x10e   : > { %10979 = vmatprep.subr.mxu0 %v2335_v35  ;;  %11082 = vmatpush3.msra.mxu1 %v2754_v37 }
 0x10f   : > { %10980 = vmatpush3.msra.mxu0 %v2335_v35  ;;  %11083 = vmatprep.subr.mxu1 %v2753_v45  ;;  %v13308_v35 = vld [vmem:[%s12813_s9 + $0x31] sm:$0xff] }
 0x110   : > { %10817 = vmatmul.mubr.f32.gmra.mxu0 %v13188_v49  ;;  %10921 = vmatmul.mubr.f32.gmra.mxu1 %v12965_v3  ;;  %v13208_v3 = vld [vmem:[%s12813_s9 + $0xfa] sm:$0xff] }
 0x111   : > { %10819 = vmatprep.mubr.f32.mxu0 %v13192_v55  ;;  %10923 = vmatprep.mubr.f32.mxu1 %v12971_v9  ;;  %v13212_v9 = vld [vmem:[%s12813_s9 + $0x102] sm:$0xff] }
 0x112   : > { %10981 = vmatprep.subr.mxu0 %v2334_v41  ;;  %11084 = vmatpush3.msra.mxu1 %v2753_v45 }
 0x113   : > { %10982 = vmatpush3.msra.mxu0 %v2334_v41  ;;  %11085 = vmatprep.subr.mxu1 %v2752_v53 }
 0x114   : > { %10820 = vmatmul.mubr.f32.gmra.mxu0 %v13198_v58  ;;  %10924 = vmatmul.mubr.f32.gmra.mxu1 %v12975_v12  ;;  %v13220_v12 = vld [vmem:[%s12813_s9 + $0x10a] sm:$0xff] }
 0x115   : > { %10822 = vmatprep.mubr.f32.mxu0 %v13202_v0  ;;  %10926 = vmatprep.mubr.f32.mxu1 %v12983_v18  ;;  %v13224_v18 = vld [vmem:[%s12813_s9 + $0x112] sm:$0xff] }
 0x116   : > { %10983 = vmatprep.subr.mxu0 %v2333_v51  ;;  %11086 = vmatpush3.msra.mxu1 %v2752_v53 }
 0x117   : > { %10984 = vmatpush3.msra.mxu0 %v2333_v51  ;;  %11087 = vmatprep.subr.mxu1 %v2751_v59  ;;  %v3601_v51 = vld [vmem:[#allocation6 + $0x3f0] sm:$0xff] }
 0x118   : > { %10823 = vmatmul.mubr.f32.gmra.mxu0 %v13208_v3  ;;  %10927 = vmatmul.mubr.f32.gmra.mxu1 %v12987_v21  ;;  %v13233_v21 = vld [vmem:[%s12813_s9 + $0x11a] sm:$0xff] }
 0x119   : > { %10825 = vmatprep.mubr.f32.mxu0 %v13212_v9  ;;  %10929 = vmatprep.mubr.f32.mxu1 %v12994_v25  ;;  %v13237_v25 = vld [vmem:[%s12813_s9 + $0x122] sm:$0xff] }
 0x11a   : > { %11161 = vmatprep.subr.mxu0 %v13214_v63  ;;  %11088 = vmatpush3.msra.mxu1 %v2751_v59 }
 0x11b   : > { %11265 = vmatprep.subr.mxu1 %v13227_v5 }
 0x11c   : > { %10826 = vmatmul.mubr.f32.gmra.mxu0 %v13220_v12  ;;  %10930 = vmatmul.mubr.f32.gmra.mxu1 %v12998_v29  ;;  %v13244_v29 = vld [vmem:[%s12813_s9 + $0x12a] sm:$0xff] }
 0x11d   : > { %10828 = vmatprep.mubr.f32.mxu0 %v13224_v18  ;;  %10932 = vmatprep.mubr.f32.mxu1 %v13006_v33  ;;  %v13254_v33 = vld [vmem:[%s12813_s9 + $0x13a] sm:$0xff] }
 0x120   : > { %10829 = vmatmul.mubr.f32.gmra.mxu0 %v13233_v21  ;;  %10933 = vmatmul.mubr.f32.gmra.mxu1 %v13010_v36  ;;  %v13258_v36 = vld [vmem:[%s12813_s9 + $0x142] sm:$0xff] }
 0x121   : > { %10831 = vmatprep.mubr.f32.mxu0 %v13237_v25  ;;  %10935 = vmatprep.mubr.f32.mxu1 %v13017_v39  ;;  %v13264_v39 = vld [vmem:[%s12813_s9 + $0x14a] sm:$0xff] }
 0x124   : > { %10832 = vmatmul.mubr.f32.gmra.mxu0 %v13244_v29  ;;  %10936 = vmatmul.mubr.f32.gmra.mxu1 %v13021_v43  ;;  %v13268_v43 = vld [vmem:[%s12813_s9 + $0x152] sm:$0xff] }
 0x125   : > { %10834 = vmatprep.mubr.f32.mxu0 %v13248_v7  ;;  %10938 = vmatprep.mubr.f32.mxu1 %v13027_v47  ;;  %v13274_v47 = vld [vmem:[%s12813_s9 + $0x15a] sm:$0xff] }
 0x128   : > { %10835 = vmatmul.mubr.f32.gmra.mxu0 %v13254_v33  ;;  %10939 = vmatmul.mubr.f32.gmra.mxu1 %v13031_v52  ;;  %v13278_v52 = vld [vmem:[%s12813_s9 + $0x162] sm:$0xff] }
 0x129   : > { %10837 = vmatprep.mubr.f32.mxu0 %v13258_v36  ;;  %10941 = vmatprep.mubr.f32.mxu1 %v13037_v57  ;;  %v13284_v57 = vld [vmem:[%s12813_s9 + $0x16a] sm:$0xff] }
 0x12c   : > { %10838 = vmatmul.mubr.f32.gmra.mxu0 %v13264_v39  ;;  %10942 = vmatmul.mubr.f32.gmra.mxu1 %v13041_v61  ;;  %v1911_v61 = vld [vmem:[%s12813_s9 + $0x180] sm:$0xff] }
 0x12d   : > { %10840 = vmatprep.mubr.f32.mxu0 %v13268_v43  ;;  %10944 = vmatprep.mubr.f32.mxu1 %v13047_v1  ;;  %v13295_v1 = vld [vmem:[%s12813_s9 + $0x17a] sm:$0xff] }
 0x130   : > { %10841 = vmatmul.mubr.f32.gmra.mxu0 %v13274_v47  ;;  %10945 = vmatmul.mubr.f32.gmra.mxu1 %v13051_v6  ;;  %v1913_v6 = vld [vmem:[%s12813_s9 + $0x190] sm:$0xff] }
 0x131   : > { %10843 = vmatprep.mubr.f32.mxu0 %v13278_v52  ;;  %10947 = vmatprep.mubr.f32.mxu1 %v13057_v11  ;;  %v2285_v11 = vld [vmem:[%s12813_s9 + $0x21] sm:$0xff] }
 0x134   : > { %10844 = vmatmul.mubr.f32.gmra.mxu0 %v13284_v57  ;;  %10948 = vmatmul.mubr.f32.gmra.mxu1 %v1911_v61 }
 0x135   : > { %10846 = vmatprep.mubr.f32.mxu0 %v13289_v13  ;;  %10950 = vmatprep.mubr.f32.mxu1 %v1912_v17 }
 0x138   : > { %10847 = vmatmul.mubr.f32.gmra.mxu0 %v13295_v1  ;;  %10951 = vmatmul.mubr.f32.gmra.mxu1 %v1913_v6  ;;  %v13327_v6 = vld [vmem:[%s12813_s9 + $0x49] sm:$0xff] }
 0x139   : > { %10985 = vmatprep.mubr.f32.mxu0 %v2284_v19  ;;  %11089 = vmatprep.mubr.f32.mxu1 %v13067_v24  ;;  %v13312_v24 = vld [vmem:[%s12813_s9 + $0x39] sm:$0xff] }
 0x13a   : > { %v3600_v19 = vld [vmem:[#allocation6 + $0x3e8] sm:$0xff] }
 0x13b   : > { %v10571_v42 = vpop.f32.mrf.mxu0 }
 0x13c   : > { %v10675_v15 = vpop.f32.mrf.mxu1  ;;  %10986 = vmatmul.mubr.f32.vlgmr.msra.gmra.mxu0 %v2285_v11  ;;  %11090 = vmatmul.mubr.f32.vlgmr.msra.gmra.mxu1 %v13071_v27  ;;  %v3182_v27 = vld [vmem:[#allocation6 + $0x368] sm:$0xff] }
 0x13d   : > { %v13304_v30 = vadd.f32 %v10675_v15, %v10571_v42  ;;  %11162 = vmatpush3.msra.mxu0 %v13214_v63  ;;  %10988 = vmatprep.mubr.f32.mxu0 %v2286_v23  ;;  %v904_v37 = vpop.f32.mrf.mxu0 }
 0x13e   : > { %v1209_v41 = vpop.f32.mrf.mxu1  ;;  %11092 = vmatprep.mubr.f32.mxu1 %v13078_v44  ;;  %11163 = vmatprep.subr.mxu0 %v3183_v31  ;;  %v13323_v44 = vld [vmem:[%s12813_s9 + $0x41] sm:$0xff] }
 0x13f   : > { %v13314_v45 = vadd.f32 %v1209_v41, %v904_v37  ;;  %11164 = vmatpush3.msra.mxu0 %v3183_v31  ;;  %11266 = vmatpush3.msra.mxu1 %v13227_v5  ;;  %v10574_v53 = vpop.f32.mrf.mxu0  ;;  %v13337_v31 = vld [vmem:[%s12813_s9 + $0x51] sm:$0xff]  ;;  %v13341_v37 = vld [vmem:[%s12813_s9 + $0x59] sm:$0xff] }
 0x140   : > { %v10678_v59 = vpop.f32.mrf.mxu1  ;;  %10989 = vmatmul.mubr.f32.gmra.mxu0 %v13308_v35  ;;  %11093 = vmatmul.mubr.f32.gmra.mxu1 %v13082_v48  ;;  %v3181_v48 = vld [vmem:[#allocation6 + $0x360] sm:$0xff] }
 0x141   : > { %v13319_v63 = vadd.f32 %v10678_v59, %v10574_v53  ;;  %10991 = vmatprep.mubr.f32.mxu0 %v13312_v24  ;;  %11095 = vmatprep.mubr.f32.mxu1 %v13088_v50  ;;  %v914_v61 = vpop.f32.mrf.mxu0  ;;  %v13351_v59 = vld [vmem:[%s12813_s9 + $0x61] sm:$0xff] }
 0x142   : > { %v1219_v17 = vpop.f32.mrf.mxu1  ;;  %11165 = vmatprep.subr.mxu0 %v3182_v27  ;;  %11267 = vmatprep.subr.mxu1 %v3601_v51 }
 0x143   : > { %v13329_v5 = vadd.f32 %v1219_v17, %v914_v61  ;;  %11166 = vmatpush3.msra.mxu0 %v3182_v27  ;;  %11268 = vmatpush3.msra.mxu1 %v3601_v51  ;;  %v10577_v11 = vpop.f32.mrf.mxu0  ;;  %v3599_v27 = vld [vmem:[#allocation6 + $0x3e0] sm:$0xff] }
 0x144   : > { %v10681_v23 = vpop.f32.mrf.mxu1  ;;  %10992 = vmatmul.mubr.f32.gmra.mxu0 %v13323_v44  ;;  %11096 = vmatmul.mubr.f32.gmra.mxu1 %v13092_v54  ;;  %v3180_v54 = vld [vmem:[#allocation6 + $0x358] sm:$0xff] }
 0x145   : > { %v13333_v50 = vadd.f32 %v10681_v23, %v10577_v11  ;;  %10994 = vmatprep.mubr.f32.mxu0 %v13327_v6  ;;  %11098 = vmatprep.mubr.f32.mxu1 %v13098_v56  ;;  %v924_v42 = vpop.f32.mrf.mxu0  ;;  %v3598_v11 = vld [vmem:[#allocation6 + $0x3d8] sm:$0xff] }
 0x146   : > { %v1229_v15 = vpop.f32.mrf.mxu1  ;;  %11167 = vmatprep.subr.mxu0 %v3181_v48  ;;  %11269 = vmatprep.subr.mxu1 %v3600_v19 }
 0x147   : > { %v13343_v41 = vadd.f32 %v1229_v15, %v924_v42  ;;  %11168 = vmatpush3.msra.mxu0 %v3181_v48  ;;  %11270 = vmatpush3.msra.mxu1 %v3600_v19  ;;  %v10580_v51 = vpop.f32.mrf.mxu0  ;;  %v13355_v48 = vld [vmem:[%s12813_s9 + $0x69] sm:$0xff]  ;;  %v13365_v15 = vld [vmem:[%s12813_s9 + $0x71] sm:$0xff] }
 0x148   : > { %v10684_v53 = vpop.f32.mrf.mxu1  ;;  %10995 = vmatmul.mubr.f32.gmra.mxu0 %v13337_v31  ;;  %11099 = vmatmul.mubr.f32.gmra.mxu1 %v13102_v60  ;;  %v3179_v60 = vld [vmem:[#allocation6 + $0x350] sm:$0xff] }
 0x149   : > { %v13347_v56 = vadd.f32 %v10684_v53, %v10580_v51  ;;  %10997 = vmatprep.mubr.f32.mxu0 %v13341_v37  ;;  %11101 = vmatprep.mubr.f32.mxu1 %v13108_v62  ;;  %v934_v61 = vpop.f32.mrf.mxu0  ;;  %v13369_v53 = vld [vmem:[%s12813_s9 + $0x79] sm:$0xff] }
 0x14a   : > { %v1239_v17 = vpop.f32.mrf.mxu1  ;;  %11169 = vmatprep.subr.mxu0 %v3180_v54  ;;  %11271 = vmatprep.subr.mxu1 %v3599_v27 }
 0x14b   : > { %v13357_v19 = vadd.f32 %v1239_v17, %v934_v61  ;;  %11170 = vmatpush3.msra.mxu0 %v3180_v54  ;;  %11272 = vmatpush3.msra.mxu1 %v3599_v27  ;;  %v10583_v23 = vpop.f32.mrf.mxu0  ;;  %v3597_v61 = vld [vmem:[#allocation6 + $0x3d0] sm:$0xff] }
 0x14c   : > { %v10687_v42 = vpop.f32.mrf.mxu1  ;;  %10998 = vmatmul.mubr.f32.gmra.mxu0 %v13351_v59  ;;  %11102 = vmatmul.mubr.f32.gmra.mxu1 %v13112_v2  ;;  %v3178_v2 = vld [vmem:[#allocation6 + $0x348] sm:$0xff] }
 0x14d   : > { %v13361_v62 = vadd.f32 %v10687_v42, %v10583_v23  ;;  %11000 = vmatprep.mubr.f32.mxu0 %v13355_v48  ;;  %11104 = vmatprep.mubr.f32.mxu1 %v13118_v4  ;;  %v944_v51 = vpop.f32.mrf.mxu0  ;;  %v13379_v42 = vld [vmem:[%s12813_s9 + $0x81] sm:$0xff] }
 0x14e   : > { %v1249_v54 = vpop.f32.mrf.mxu1  ;;  %11171 = vmatprep.subr.mxu0 %v3179_v60  ;;  %11273 = vmatprep.subr.mxu1 %v3598_v11 }
 0x14f   : > { %v13371_v27 = vadd.f32 %v1249_v54, %v944_v51  ;;  %11172 = vmatpush3.msra.mxu0 %v3179_v60  ;;  %11274 = vmatpush3.msra.mxu1 %v3598_v11  ;;  %v10586_v17 = vpop.f32.mrf.mxu0  ;;  %v13383_v54 = vld [vmem:[%s12813_s9 + $0x89] sm:$0xff] }
 0x150   : > { %v10690_v23 = vpop.f32.mrf.mxu1  ;;  %11001 = vmatmul.mubr.f32.gmra.mxu0 %v13365_v15  ;;  %11105 = vmatmul.mubr.f32.gmra.mxu1 %v13122_v8  ;;  %v3177_v8 = vld [vmem:[#allocation6 + $0x340] sm:$0xff] }
 0x151   : > { %18451 = vst [vmem:[#allocation13_spill] sm:$0xff] %v13371_v27  ;;  %v13375_v4 = vadd.f32 %v10690_v23, %v10586_v17  ;;  %11003 = vmatprep.mubr.f32.mxu0 %v13369_v53  ;;  %11107 = vmatprep.mubr.f32.mxu1 %v13128_v10  ;;  %v954_v51 = vpop.f32.mrf.mxu0  ;;  %v3596_v17 = vld [vmem:[#allocation6 + $0x3c8] sm:$0xff] }
 0x152   : > { %v1259_v60 = vpop.f32.mrf.mxu1  ;;  %11173 = vmatprep.subr.mxu0 %v3178_v2  ;;  %11275 = vmatprep.subr.mxu1 %v3597_v61  ;;  %v13393_v27 = vld [vmem:[%s12813_s9 + $0x91] sm:$0xff] }
 0x153   : > { %18452 = vst [vmem:[#allocation14_spill] sm:$0xff] %v13375_v4  ;;  %v13385_v11 = vadd.f32 %v1259_v60, %v954_v51  ;;  %11174 = vmatpush3.msra.mxu0 %v3178_v2  ;;  %11276 = vmatpush3.msra.mxu1 %v3597_v61  ;;  %v10589_v23 = vpop.f32.mrf.mxu0  ;;  %v13397_v60 = vld [vmem:[%s12813_s9 + $0x99] sm:$0xff] }
 0x154   : > { %v10693_v4 = vpop.f32.mrf.mxu1  ;;  %11004 = vmatmul.mubr.f32.gmra.mxu0 %v13379_v42  ;;  %11108 = vmatmul.mubr.f32.gmra.mxu1 %v13132_v14  ;;  %v3176_v14 = vld [vmem:[#allocation6 + $0x338] sm:$0xff] }
 0x155   : > { %18453 = vst [vmem:[#allocation15_spill] sm:$0xff] %v13385_v11  ;;  %v13389_v10 = vadd.f32 %v10693_v4, %v10589_v23  ;;  %11006 = vmatprep.mubr.f32.mxu0 %v13383_v54  ;;  %11110 = vmatprep.mubr.f32.mxu1 %v13138_v16  ;;  %v964_v51 = vpop.f32.mrf.mxu0  ;;  %v3595_v4 = vld [vmem:[#allocation6 + $0x3c0] sm:$0xff] }
 0x156   : > { %v1269_v2 = vpop.f32.mrf.mxu1  ;;  %11175 = vmatprep.subr.mxu0 %v3177_v8  ;;  %11277 = vmatprep.subr.mxu1 %v3596_v17  ;;  %v13407_v11 = vld [vmem:[%s12813_s9 + $0xa1] sm:$0xff] }
 0x157   : > { %18454 = vst [vmem:[#allocation16_spill] sm:$0xff] %v13389_v10  ;;  %v13399_v61 = vadd.f32 %v1269_v2, %v964_v51  ;;  %11176 = vmatpush3.msra.mxu0 %v3177_v8  ;;  %11278 = vmatpush3.msra.mxu1 %v3596_v17  ;;  %v10592_v23 = vpop.f32.mrf.mxu0  ;;  %v13411_v2 = vld [vmem:[%s12813_s9 + $0xa9] sm:$0xff] }
 0x158   : > { %v10696_v10 = vpop.f32.mrf.mxu1  ;;  %11007 = vmatmul.mubr.f32.gmra.mxu0 %v13393_v27  ;;  %11111 = vmatmul.mubr.f32.gmra.mxu1 %v13142_v20  ;;  %v3175_v20 = vld [vmem:[#allocation6 + $0x330] sm:$0xff] }
 0x159   : > { %18455 = vst [vmem:[#allocation17_spill] sm:$0xff] %v13399_v61  ;;  %v13403_v16 = vadd.f32 %v10696_v10, %v10592_v23  ;;  %11009 = vmatprep.mubr.f32.mxu0 %v13397_v60  ;;  %11113 = vmatprep.mubr.f32.mxu1 %v13148_v22  ;;  %v974_v51 = vpop.f32.mrf.mxu0  ;;  %v3594_v10 = vld [vmem:[#allocation6 + $0x3b8] sm:$0xff]  ;;  %v13421_v61 = vld [vmem:[%s12813_s9 + $0xb1] sm:$0xff] }
 0x15a   : > { %v1279_v8 = vpop.f32.mrf.mxu1  ;;  %11177 = vmatprep.subr.mxu0 %v3176_v14  ;;  %11279 = vmatprep.subr.mxu1 %v3595_v4 }
 0x15b   : > { %18456 = vst [vmem:[#allocation18_spill] sm:$0xff] %v13403_v16  ;;  %v13413_v17 = vadd.f32 %v1279_v8, %v974_v51  ;;  %11178 = vmatpush3.msra.mxu0 %v3176_v14  ;;  %11280 = vmatpush3.msra.mxu1 %v3595_v4  ;;  %v10595_v23 = vpop.f32.mrf.mxu0  ;;  %v13425_v8 = vld [vmem:[%s12813_s9 + $0xb9] sm:$0xff] }
 0x15c   : > { %v10699_v16 = vpop.f32.mrf.mxu1  ;;  %11010 = vmatmul.mubr.f32.gmra.mxu0 %v13407_v11  ;;  %11114 = vmatmul.mubr.f32.gmra.mxu1 %v13152_v26  ;;  %v3174_v26 = vld [vmem:[#allocation6 + $0x328] sm:$0xff] }
 0x15d   : > { %18457 = vst [vmem:[#allocation19_spill] sm:$0xff] %v13413_v17  ;;  %v13417_v22 = vadd.f32 %v10699_v16, %v10595_v23  ;;  %11012 = vmatprep.mubr.f32.mxu0 %v13411_v2  ;;  %11116 = vmatprep.mubr.f32.mxu1 %v13158_v28  ;;  %v984_v51 = vpop.f32.mrf.mxu0  ;;  %v3593_v16 = vld [vmem:[#allocation6 + $0x3b0] sm:$0xff] }
 0x15e   : > { %v1289_v14 = vpop.f32.mrf.mxu1  ;;  %11179 = vmatprep.subr.mxu0 %v3175_v20  ;;  %11281 = vmatprep.subr.mxu1 %v3594_v10  ;;  %v13435_v17 = vld [vmem:[%s12813_s9 + $0xc1] sm:$0xff] }
 0x15f   : > { %18458 = vst [vmem:[#allocation20_spill] sm:$0xff] %v13417_v22  ;;  %v13427_v4 = vadd.f32 %v1289_v14, %v984_v51  ;;  %11180 = vmatpush3.msra.mxu0 %v3175_v20  ;;  %11282 = vmatpush3.msra.mxu1 %v3594_v10  ;;  %v10598_v23 = vpop.f32.mrf.mxu0  ;;  %v13439_v14 = vld [vmem:[%s12813_s9 + $0xc9] sm:$0xff] }
 0x160   : > { %v10702_v22 = vpop.f32.mrf.mxu1  ;;  %11013 = vmatmul.mubr.f32.gmra.mxu0 %v13421_v61  ;;  %11117 = vmatmul.mubr.f32.gmra.mxu1 %v13162_v32  ;;  %v3173_v32 = vld [vmem:[#allocation6 + $0x320] sm:$0xff] }
 0x161   : > { %18459 = vst [vmem:[#allocation21_spill] sm:$0xff] %v13427_v4  ;;  %v13431_v28 = vadd.f32 %v10702_v22, %v10598_v23  ;;  %11015 = vmatprep.mubr.f32.mxu0 %v13425_v8  ;;  %11119 = vmatprep.mubr.f32.mxu1 %v13168_v34  ;;  %v994_v51 = vpop.f32.mrf.mxu0  ;;  %v3592_v22 = vld [vmem:[#allocation6 + $0x3a8] sm:$0xff] }
 0x162   : > { %v1299_v20 = vpop.f32.mrf.mxu1  ;;  %11181 = vmatprep.subr.mxu0 %v3174_v26  ;;  %11283 = vmatprep.subr.mxu1 %v3593_v16  ;;  %v13449_v4 = vld [vmem:[%s12813_s9 + $0xd1] sm:$0xff] }
 0x163   : > { %18460 = vst [vmem:[#allocation22_spill] sm:$0xff] %v13431_v28  ;;  %v13441_v10 = vadd.f32 %v1299_v20, %v994_v51  ;;  %11182 = vmatpush3.msra.mxu0 %v3174_v26  ;;  %11284 = vmatpush3.msra.mxu1 %v3593_v16  ;;  %v10601_v23 = vpop.f32.mrf.mxu0  ;;  %v13453_v20 = vld [vmem:[%s12813_s9 + $0xd9] sm:$0xff] }
 0x164   : > { %v10705_v28 = vpop.f32.mrf.mxu1  ;;  %11016 = vmatmul.mubr.f32.gmra.mxu0 %v13435_v17  ;;  %11120 = vmatmul.mubr.f32.gmra.mxu1 %v13172_v38  ;;  %v3172_v38 = vld [vmem:[#allocation6 + $0x318] sm:$0xff] }
 0x165   : > { %18461 = vst [vmem:[#allocation23_spill] sm:$0xff] %v13441_v10  ;;  %v13445_v34 = vadd.f32 %v10705_v28, %v10601_v23  ;;  %11018 = vmatprep.mubr.f32.mxu0 %v13439_v14  ;;  %11122 = vmatprep.mubr.f32.mxu1 %v13178_v40  ;;  %v1004_v51 = vpop.f32.mrf.mxu0  ;;  %v3591_v28 = vld [vmem:[#allocation6 + $0x3a0] sm:$0xff] }
 0x166   : > { %v1309_v26 = vpop.f32.mrf.mxu1  ;;  %11183 = vmatprep.subr.mxu0 %v3173_v32  ;;  %11285 = vmatprep.subr.mxu1 %v3592_v22  ;;  %v13463_v10 = vld [vmem:[%s12813_s9 + $0xe1] sm:$0xff] }
 0x167   : > { %18462 = vst [vmem:[#allocation24_spill] sm:$0xff] %v13445_v34  ;;  %v13455_v16 = vadd.f32 %v1309_v26, %v1004_v51  ;;  %11184 = vmatpush3.msra.mxu0 %v3173_v32  ;;  %11286 = vmatpush3.msra.mxu1 %v3592_v22  ;;  %v10604_v23 = vpop.f32.mrf.mxu0  ;;  %v13467_v26 = vld [vmem:[%s12813_s9 + $0xe9] sm:$0xff] }
 0x168   : > { %v10708_v34 = vpop.f32.mrf.mxu1  ;;  %11019 = vmatmul.mubr.f32.gmra.mxu0 %v13449_v4  ;;  %11123 = vmatmul.mubr.f32.gmra.mxu1 %v13182_v46  ;;  %v3171_v46 = vld [vmem:[#allocation6 + $0x310] sm:$0xff] }
 0x169   : > { %18463 = vst [vmem:[#allocation25_spill] sm:$0xff] %v13455_v16  ;;  %v13459_v40 = vadd.f32 %v10708_v34, %v10604_v23  ;;  %11021 = vmatprep.mubr.f32.mxu0 %v13453_v20  ;;  %11125 = vmatprep.mubr.f32.mxu1 %v13188_v49  ;;  %v1014_v51 = vpop.f32.mrf.mxu0  ;;  %v3590_v34 = vld [vmem:[#allocation6 + $0x398] sm:$0xff]  ;;  %v13477_v16 = vld [vmem:[%s12813_s9 + $0xf1] sm:$0xff] }
 0x16a   : > { %v1319_v32 = vpop.f32.mrf.mxu1  ;;  %11185 = vmatprep.subr.mxu0 %v3172_v38  ;;  %11287 = vmatprep.subr.mxu1 %v3591_v28 }
 0x16b   : > { %18464 = vst [vmem:[#allocation26_spill] sm:$0xff] %v13459_v40  ;;  %v13469_v22 = vadd.f32 %v1319_v32, %v1014_v51  ;;  %11186 = vmatpush3.msra.mxu0 %v3172_v38  ;;  %11288 = vmatpush3.msra.mxu1 %v3591_v28  ;;  %v10607_v23 = vpop.f32.mrf.mxu0  ;;  %v13481_v32 = vld [vmem:[%s12813_s9 + $0xf9] sm:$0xff] }
 0x16c   : > { %v10711_v40 = vpop.f32.mrf.mxu1  ;;  %11022 = vmatmul.mubr.f32.gmra.mxu0 %v13463_v10  ;;  %11126 = vmatmul.mubr.f32.gmra.mxu1 %v13192_v55  ;;  %v3170_v55 = vld [vmem:[#allocation6 + $0x308] sm:$0xff] }
 0x16d   : > { %18465 = vst [vmem:[#allocation27_spill] sm:$0xff] %v13469_v22  ;;  %v13473_v49 = vadd.f32 %v10711_v40, %v10607_v23  ;;  %11024 = vmatprep.mubr.f32.mxu0 %v13467_v26  ;;  %11128 = vmatprep.mubr.f32.mxu1 %v13198_v58  ;;  %v1024_v51 = vpop.f32.mrf.mxu0  ;;  %v3589_v40 = vld [vmem:[#allocation6 + $0x390] sm:$0xff] }
 0x16e   : > { %v1329_v38 = vpop.f32.mrf.mxu1  ;;  %11187 = vmatprep.subr.mxu0 %v3171_v46  ;;  %11289 = vmatprep.subr.mxu1 %v3590_v34  ;;  %v13491_v22 = vld [vmem:[%s12813_s9 + $0x101] sm:$0xff] }
 0x16f   : > { %18466 = vst [vmem:[#allocation28_spill] sm:$0xff] %v13473_v49  ;;  %v13483_v28 = vadd.f32 %v1329_v38, %v1024_v51  ;;  %11188 = vmatpush3.msra.mxu0 %v3171_v46  ;;  %11290 = vmatpush3.msra.mxu1 %v3590_v34  ;;  %v10610_v23 = vpop.f32.mrf.mxu0  ;;  %v13495_v38 = vld [vmem:[%s12813_s9 + $0x109] sm:$0xff] }
 0x170   : > { %v10714_v49 = vpop.f32.mrf.mxu1  ;;  %11025 = vmatmul.mubr.f32.gmra.mxu0 %v13477_v16  ;;  %11129 = vmatmul.mubr.f32.gmra.mxu1 %v13202_v0  ;;  %v3169_v0 = vld [vmem:[#allocation6 + $0x300] sm:$0xff] }
 0x171   : > { %18467 = vst [vmem:[#allocation29_spill] sm:$0xff] %v13483_v28  ;;  %v13487_v58 = vadd.f32 %v10714_v49, %v10610_v23  ;;  %11027 = vmatprep.mubr.f32.mxu0 %v13481_v32  ;;  %11131 = vmatprep.mubr.f32.mxu1 %v13208_v3  ;;  %v1034_v51 = vpop.f32.mrf.mxu0  ;;  %v3588_v49 = vld [vmem:[#allocation6 + $0x388] sm:$0xff] }
 0x172   : > { %v1339_v46 = vpop.f32.mrf.mxu1  ;;  %11189 = vmatprep.subr.mxu0 %v3170_v55  ;;  %11291 = vmatprep.subr.mxu1 %v3589_v40  ;;  %v13505_v28 = vld [vmem:[%s12813_s9 + $0x111] sm:$0xff] }
 0x173   : > { %18468 = vst [vmem:[#allocation30_spill] sm:$0xff] %v13487_v58  ;;  %v13497_v34 = vadd.f32 %v1339_v46, %v1034_v51  ;;  %11190 = vmatpush3.msra.mxu0 %v3170_v55  ;;  %11292 = vmatpush3.msra.mxu1 %v3589_v40  ;;  %v10613_v23 = vpop.f32.mrf.mxu0  ;;  %v13509_v46 = vld [vmem:[%s12813_s9 + $0x119] sm:$0xff] }
 0x174   : > { %v10717_v58 = vpop.f32.mrf.mxu1  ;;  %11028 = vmatmul.mubr.f32.gmra.mxu0 %v13491_v22  ;;  %11132 = vmatmul.mubr.f32.gmra.mxu1 %v13212_v9  ;;  %v3587_v9 = vld [vmem:[#allocation6 + $0x380] sm:$0xff] }
 0x175   : > { %18469 = vst [vmem:[#allocation31_spill] sm:$0xff] %v13497_v34  ;;  %v13501_v3 = vadd.f32 %v10717_v58, %v10613_v23  ;;  %11030 = vmatprep.mubr.f32.mxu0 %v13495_v38  ;;  %11134 = vmatprep.mubr.f32.mxu1 %v13220_v12  ;;  %v1044_v51 = vpop.f32.mrf.mxu0  ;;  %v13513_v58 = vld [vmem:[#allocation6 + $0x478] sm:$0xff] }
 0x176   : > { %v1349_v55 = vpop.f32.mrf.mxu1  ;;  %11191 = vmatprep.subr.mxu0 %v3169_v0  ;;  %11293 = vmatprep.subr.mxu1 %v3588_v49  ;;  %v13521_v34 = vld [vmem:[%s12813_s9 + $0x121] sm:$0xff] }
 0x177   : > { %18470 = vst [vmem:[#allocation32_spill] sm:$0xff] %v13501_v3  ;;  %v13511_v40 = vadd.f32 %v1349_v55, %v1044_v51  ;;  %11192 = vmatpush3.msra.mxu0 %v3169_v0  ;;  %11294 = vmatpush3.msra.mxu1 %v3588_v49  ;;  %v10616_v23 = vpop.f32.mrf.mxu0  ;;  %v13525_v51 = vld [vmem:[%s12813_s9 + $0x129] sm:$0xff] }
 0x178   : > { %v10720_v3 = vpop.f32.mrf.mxu1  ;;  %11031 = vmatmul.mubr.f32.gmra.mxu0 %v13505_v28  ;;  %11135 = vmatmul.mubr.f32.gmra.mxu1 %v13224_v18 }
 0x179   : > { %18471 = vst [vmem:[#allocation33_spill] sm:$0xff] %v13511_v40  ;;  %v13517_v12 = vadd.f32 %v10720_v3, %v10616_v23  ;;  %11033 = vmatprep.mubr.f32.mxu0 %v13509_v46  ;;  %11137 = vmatprep.mubr.f32.mxu1 %v13233_v21  ;;  %v1054_v0 = vpop.f32.mrf.mxu0  ;;  %v13536_v21 = vld [vmem:[%s12813_s9 + $0x131] sm:$0xff] }
 0x17a   : > { %v1359_v49 = vpop.f32.mrf.mxu1  ;;  %11295 = vmatprep.subr.mxu1 %v3587_v9  ;;  %11369 = vmatprep.subr.mxu0 %v13513_v58 }
 0x17b   : > { %18472 = vst [vmem:[#allocation34_spill] sm:$0xff] %v13517_v12  ;;  %v13528_v55 = vadd.f32 %v1359_v49, %v1054_v0  ;;  %11296 = vmatpush3.msra.mxu1 %v3587_v9  ;;  %v10619_v18 = vpop.f32.mrf.mxu0  ;;  %v13540_v49 = vld [vmem:[%s12813_s9 + $0x139] sm:$0xff] }
 0x17c   : > { %v10723_v3 = vpop.f32.mrf.mxu1  ;;  %11034 = vmatmul.mubr.f32.gmra.mxu0 %v13521_v34  ;;  %11138 = vmatmul.mubr.f32.gmra.mxu1 %v13237_v25 }
 0x17d   : > { %18473 = vst [vmem:[#allocation35_spill] sm:$0xff] %v13528_v55  ;;  %v13532_v23 = vadd.f32 %v10723_v3, %v10619_v18  ;;  %11036 = vmatprep.mubr.f32.mxu0 %v13525_v51  ;;  %11140 = vmatprep.mubr.f32.mxu1 %v13244_v29  ;;  %v1064_v12 = vpop.f32.mrf.mxu0  ;;  %v13550_v18 = vld [vmem:[%s12813_s9 + $0x141] sm:$0xff] }
 0x17e   : > { %v1369_v0 = vpop.f32.mrf.mxu1 }
 0x17f   : > { %18474 = vst [vmem:[#allocation36_spill] sm:$0xff] %v13532_v23  ;;  %v13542_v9 = vadd.f32 %v1369_v0, %v1064_v12  ;;  %v10622_v55 = vpop.f32.mrf.mxu0  ;;  %v13554_v12 = vld [vmem:[%s12813_s9 + $0x149] sm:$0xff] }
 0x180   : > { %v10726_v40 = vpop.f32.mrf.mxu1  ;;  %11037 = vmatmul.mubr.f32.gmra.mxu0 %v13536_v21  ;;  %11141 = vmatmul.mubr.f32.gmra.mxu1 %v13248_v7 }
 0x181   : > { %18475 = vst [vmem:[#allocation37_spill] sm:$0xff] %v13542_v9  ;;  %v13546_v25 = vadd.f32 %v10726_v40, %v10622_v55  ;;  %11039 = vmatprep.mubr.f32.mxu0 %v13540_v49  ;;  %11143 = vmatprep.mubr.f32.mxu1 %v13254_v33  ;;  %v1074_v29 = vpop.f32.mrf.mxu0  ;;  %v13564_v40 = vld [vmem:[%s12813_s9 + $0x151] sm:$0xff] }
 0x182   : > { %v1379_v3 = vpop.f32.mrf.mxu1 }
 0x183   : > { %18476 = vst [vmem:[#allocation38_spill] sm:$0xff] %v13546_v25  ;;  %v13556_v0 = vadd.f32 %v1379_v3, %v1074_v29  ;;  %v10625_v9 = vpop.f32.mrf.mxu0  ;;  %v13568_v29 = vld [vmem:[%s12813_s9 + $0x159] sm:$0xff] }
 0x184   : > { %v10729_v23 = vpop.f32.mrf.mxu1  ;;  %11040 = vmatmul.mubr.f32.gmra.mxu0 %v13550_v18  ;;  %11144 = vmatmul.mubr.f32.gmra.mxu1 %v13258_v36 }
 0x185   : > { %18477 = vst [vmem:[#allocation39_spill] sm:$0xff] %v13556_v0  ;;  %v13560_v7 = vadd.f32 %v10729_v23, %v10625_v9  ;;  %11042 = vmatprep.mubr.f32.mxu0 %v13554_v12  ;;  %11146 = vmatprep.mubr.f32.mxu1 %v13264_v39  ;;  %v1084_v33 = vpop.f32.mrf.mxu0  ;;  %v13578_v23 = vld [vmem:[%s12813_s9 + $0x161] sm:$0xff] }
 0x186   : > { %v1389_v55 = vpop.f32.mrf.mxu1 }
 0x187   : > { %18478 = vst [vmem:[#allocation40_spill] sm:$0xff] %v13560_v7  ;;  %v13570_v3 = vadd.f32 %v1389_v55, %v1084_v33  ;;  %v10628_v0 = vpop.f32.mrf.mxu0  ;;  %v13582_v33 = vld [vmem:[%s12813_s9 + $0x169] sm:$0xff] }
 0x188   : > { %v10732_v25 = vpop.f32.mrf.mxu1  ;;  %11043 = vmatmul.mubr.f32.gmra.mxu0 %v13564_v40  ;;  %11147 = vmatmul.mubr.f32.gmra.mxu1 %v13268_v43  ;;  %18481 = vst [vmem:[#allocation43_spill] sm:$0xff] %v13582_v33 }
 0x189   : > { %18479 = vst [vmem:[#allocation41_spill] sm:$0xff] %v13570_v3  ;;  %v13574_v36 = vadd.f32 %v10732_v25, %v10628_v0  ;;  %11045 = vmatprep.mubr.f32.mxu0 %v13568_v29  ;;  %11149 = vmatprep.mubr.f32.mxu1 %v13274_v47  ;;  %v1094_v39 = vpop.f32.mrf.mxu0  ;;  %v13592_v25 = vld [vmem:[%s12813_s9 + $0x171] sm:$0xff] }
 0x18a   : > { %v1399_v9 = vpop.f32.mrf.mxu1  ;;  %18484 = vst [vmem:[#allocation46_spill] sm:$0xff] %v13592_v25 }
 0x18b   : > { %18480 = vst [vmem:[#allocation42_spill] sm:$0xff] %v13574_v36  ;;  %v13584_v55 = vadd.f32 %v1399_v9, %v1094_v39  ;;  %v10631_v3 = vpop.f32.mrf.mxu0  ;;  %v13596_v39 = vld [vmem:[%s12813_s9 + $0x179] sm:$0xff] }
 0x18c   : > { %v10735_v7 = vpop.f32.mrf.mxu1  ;;  %11046 = vmatmul.mubr.f32.gmra.mxu0 %v13578_v23  ;;  %11150 = vmatmul.mubr.f32.gmra.mxu1 %v13278_v52  ;;  %18485 = vst [vmem:[#allocation47_spill] sm:$0xff] %v13596_v39 }
 0x18d   : > { %18482 = vst [vmem:[#allocation44_spill] sm:$0xff] %v13584_v55  ;;  %v13588_v43 = vadd.f32 %v10735_v7, %v10631_v3  ;;  %11048 = vmatprep.mubr.f32.mxu0 %v13582_v33  ;;  %11152 = vmatprep.mubr.f32.mxu1 %v13284_v57  ;;  %v1104_v47 = vpop.f32.mrf.mxu0  ;;  %v13606_v57 = vld [vmem:[%s12813_s9 + $0x181] sm:$0xff]  ;;  %v3120_v33 = vld [vmem:[%s12813_s9 + $0x30] sm:$0xff] }
 0x18e   : > { %v1409_v0 = vpop.f32.mrf.mxu1  ;;  %v2747_v7 = vld [vmem:[%s12813_s9 + $0x182] sm:$0xff] }
 0x18f   : > { %18483 = vst [vmem:[#allocation45_spill] sm:$0xff] %v13588_v43  ;;  %v13598_v9 = vadd.f32 %v1409_v0, %v1104_v47  ;;  %v10634_v55 = vpop.f32.mrf.mxu0  ;;  %v13611_v0 = vld [vmem:[%s12813_s9 + $0x189] sm:$0xff] }
 0x190   : > { %v10738_v36 = vpop.f32.mrf.mxu1  ;;  %11049 = vmatmul.mubr.f32.gmra.mxu0 %v13592_v25  ;;  %11153 = vmatmul.mubr.f32.gmra.mxu1 %v13289_v13  ;;  %18488 = vst [vmem:[#allocation50_spill] sm:$0xff] %v13611_v0 }
 0x191   : > { %18486 = vst [vmem:[#allocation48_spill] sm:$0xff] %v13598_v9  ;;  %v13602_v52 = vadd.f32 %v10738_v36, %v10634_v55  ;;  %11051 = vmatprep.mubr.f32.mxu0 %v13596_v39  ;;  %11155 = vmatprep.mubr.f32.mxu1 %v13295_v1  ;;  %v1114_v3 = vpop.f32.mrf.mxu0  ;;  %v2748_v9 = vld [vmem:[%s12813_s9 + $0x18a] sm:$0xff] }
 0x192   : > { %v1419_v47 = vpop.f32.mrf.mxu1  ;;  %v13621_v1 = vld [vmem:[%s12813_s9 + $0x191] sm:$0xff] }
 0x193   : > { %18487 = vst [vmem:[#allocation49_spill] sm:$0xff] %v13602_v52  ;;  %v13614_v43 = vadd.f32 %v1419_v47, %v1114_v3  ;;  %v10637_v13 = vpop.f32.mrf.mxu0  ;;  %v2749_v52 = vld [vmem:[%s12813_s9 + $0x192] sm:$0xff] }
 0x194   : > { %v10741_v36 = vpop.f32.mrf.mxu1  ;;  %11052 = vmatmul.mubr.f32.gmra.mxu0 %v13606_v57  ;;  %11156 = vmatmul.mubr.f32.gmra.mxu1 %v2747_v7 }
 0x195   : > { %18489 = vst [vmem:[#allocation51_spill] sm:$0xff] %v13614_v43  ;;  %v13617_v55 = vadd.f32 %v10741_v36, %v10637_v13  ;;  %11054 = vmatprep.mubr.f32.mxu0 %v13611_v0  ;;  %11158 = vmatprep.mubr.f32.mxu1 %v2748_v9  ;;  %v1124_v39 = vpop.f32.mrf.mxu0  ;;  %v3121_v13 = vld [vmem:[%s12813_s9 + $0x38] sm:$0xff] }
 0x196   : > { %v1429_v25 = vpop.f32.mrf.mxu1 }
 0x197   : > { %18490 = vst [vmem:[#allocation52_spill] sm:$0xff] %v13617_v55  ;;  %v13625_v3 = vadd.f32 %v1429_v25, %v1124_v39  ;;  %v10640_v47 = vpop.f32.mrf.mxu0  ;;  %v3122_v55 = vld [vmem:[%s12813_s9 + $0x40] sm:$0xff] }
 0x198   : > { %v10744_v43 = vpop.f32.mrf.mxu1  ;;  %11055 = vmatmul.mubr.f32.gmra.mxu0 %v13621_v1  ;;  %11159 = vmatmul.mubr.f32.gmra.mxu1 %v2749_v52  ;;  %v4019_v25 = vld [vmem:[#allocation6 + $0x470] sm:$0xff] }
 0x199   : > { %18491 = vst [vmem:[#allocation53_spill] sm:$0xff] %v13625_v3  ;;  %v13628_v7 = vadd.f32 %v10744_v43, %v10640_v47  ;;  %11193 = vmatprep.mubr.f32.mxu0 %v3120_v33  ;;  %11297 = vmatprep.mubr.f32.mxu1 %v13308_v35  ;;  %v1134_v9 = vpop.f32.mrf.mxu0  ;;  %v3123_v33 = vld [vmem:[%s12813_s9 + $0x48] sm:$0xff]  ;;  %v3124_v47 = vld [vmem:[%s12813_s9 + $0x50] sm:$0xff] }
 0x19a   : > { %v1439_v36 = vpop.f32.mrf.mxu1 }
 0x19b   : > { %v13633_v0 = vadd.f32 %v1439_v36, %v1134_v9  ;;  %v10779_v39 = vpop.f32.mrf.mxu0 }
 0x19c   : > { %11194 = vmatmul.mubr.f32.vlgmr.msra.gmra.mxu0 %v3121_v13  ;;  %v10883_v3 = vpop.f32.mrf.mxu1  ;;  %11298 = vmatmul.mubr.f32.vlgmr.msra.gmra.mxu1 %v13312_v24  ;;  %v1819_v43 = vadd.f32 %v10779_v39, %v13304_v30  ;;  %v4018_v24 = vld [vmem:[#allocation6 + $0x468] sm:$0xff] }
 0x19d   : > { %11370 = vmatpush3.msra.mxu0 %v13513_v58  ;;  %11196 = vmatprep.mubr.f32.mxu0 %v3122_v55  ;;  %v1579_v52 = vpop.f32.mrf.mxu0 }
 0x19e   : > { %v1997_v35 = vpop.f32.mrf.mxu1  ;;  %11300 = vmatprep.mubr.f32.mxu1 %v13323_v44  ;;  %11371 = vmatprep.subr.mxu0 %v4019_v25  ;;  %v1818_v9 = vadd.f32 %v1579_v52, %v13314_v45  ;;  %v13642_v13 = vadd.f32 %v10883_v3, %v1819_v43  ;;  %v3125_v44 = vld [vmem:[%s12813_s9 + $0x58] sm:$0xff]  ;;  %v3126_v3 = vld [vmem:[%s12813_s9 + $0x60] sm:$0xff] }
 0x19f   : > { %11372 = vmatpush3.msra.mxu0 %v4019_v25 }
 0x1a0   : > { %v10782_v36 = vpop.f32.mrf.mxu0  ;;  %11197 = vmatmul.mubr.f32.gmra.mxu0 %v3123_v33  ;;  %v10886_v30 = vpop.f32.mrf.mxu1  ;;  %11301 = vmatmul.mubr.f32.gmra.mxu1 %v13327_v6  ;;  %v13646_v55 = vadd.f32 %v1997_v35, %v1818_v9  ;;  %v4017_v6 = vld [vmem:[#allocation6 + $0x460] sm:$0xff] }
 0x1a1   : > { %v1821_v58 = vadd.f32 %v10782_v36, %v13319_v63  ;;  %11199 = vmatprep.mubr.f32.mxu0 %v3124_v47  ;;  %11303 = vmatprep.mubr.f32.mxu1 %v13337_v31  ;;  %v3127_v35 = vld [vmem:[%s12813_s9 + $0x68] sm:$0xff]  ;;  %v3128_v9 = vld [vmem:[%s12813_s9 + $0x70] sm:$0xff] }
 0x1a2   : > { %v1589_v39 = vpop.f32.mrf.mxu0  ;;  %v2007_v45 = vpop.f32.mrf.mxu1  ;;  %11373 = vmatprep.subr.mxu0 %v4018_v24 }
 0x1a3   : > { %v1820_v25 = vadd.f32 %v1589_v39, %v13329_v5  ;;  %v13652_v43 = vadd.f32 %v10886_v30, %v1821_v58  ;;  %11374 = vmatpush3.msra.mxu0 %v4018_v24 }
 0x1a4   : > { %v10785_v33 = vpop.f32.mrf.mxu0  ;;  %11200 = vmatmul.mubr.f32.gmra.mxu0 %v3125_v44  ;;  %v10889_v63 = vpop.f32.mrf.mxu1  ;;  %11304 = vmatmul.mubr.f32.gmra.mxu1 %v13341_v37  ;;  %v4016_v37 = vld [vmem:[#allocation6 + $0x458] sm:$0xff]  ;;  %v3129_v44 = vld [vmem:[%s12813_s9 + $0x78] sm:$0xff] }
 0x1a5   : > { %v1823_v52 = vadd.f32 %v10785_v33, %v13333_v50  ;;  %v13656_v31 = vadd.f32 %v2007_v45, %v1820_v25  ;;  %11202 = vmatprep.mubr.f32.mxu0 %v3126_v3  ;;  %11306 = vmatprep.mubr.f32.mxu1 %v13351_v59  ;;  %v3130_v45 = vld [vmem:[%s12813_s9 + $0x80] sm:$0xff] }
 0x1a6   : > { %v1599_v47 = vpop.f32.mrf.mxu0  ;;  %v2017_v5 = vpop.f32.mrf.mxu1  ;;  %11375 = vmatprep.subr.mxu0 %v4017_v6 }
 0x1a7   : > { %v1822_v24 = vadd.f32 %v1599_v47, %v13343_v41  ;;  %v13662_v36 = vadd.f32 %v10889_v63, %v1823_v52  ;;  %11376 = vmatpush3.msra.mxu0 %v4017_v6  ;;  %v3131_v63 = vld [vmem:[%s12813_s9 + $0x88] sm:$0xff] }
 0x1a8   : > { %v10788_v30 = vpop.f32.mrf.mxu0  ;;  %11203 = vmatmul.mubr.f32.gmra.mxu0 %v3127_v35  ;;  %v10892_v50 = vpop.f32.mrf.mxu1  ;;  %11307 = vmatmul.mubr.f32.gmra.mxu1 %v13355_v48  ;;  %v4015_v48 = vld [vmem:[#allocation6 + $0x450] sm:$0xff]  ;;  %v3132_v35 = vld [vmem:[%s12813_s9 + $0x90] sm:$0xff] }
 0x1a9   : > { %v1825_v58 = vadd.f32 %v10788_v30, %v13347_v56  ;;  %v13666_v59 = vadd.f32 %v2017_v5, %v1822_v24  ;;  %11205 = vmatprep.mubr.f32.mxu0 %v3128_v9  ;;  %11309 = vmatprep.mubr.f32.mxu1 %v13365_v15  ;;  %v18492_v47 = vld [vmem:[#allocation13_spill] sm:$0xff] }
 0x1aa   : > { %v1609_v39 = vpop.f32.mrf.mxu0  ;;  %v2027_v41 = vpop.f32.mrf.mxu1  ;;  %11377 = vmatprep.subr.mxu0 %v4016_v37 }
 0x1ab   : > { %v1824_v3 = vadd.f32 %v1609_v39, %v13357_v19  ;;  %v13672_v25 = vadd.f32 %v10892_v50, %v1825_v58  ;;  %11378 = vmatpush3.msra.mxu0 %v4016_v37  ;;  %v18493_v37 = vld [vmem:[#allocation14_spill] sm:$0xff]  ;;  %v3134_v39 = vld [vmem:[%s12813_s9 + $0xa0] sm:$0xff] }
 0x1ac   : > { %v10791_v6 = vpop.f32.mrf.mxu0  ;;  %11206 = vmatmul.mubr.f32.gmra.mxu0 %v3129_v44  ;;  %v10895_v56 = vpop.f32.mrf.mxu1  ;;  %11310 = vmatmul.mubr.f32.gmra.mxu1 %v13369_v53  ;;  %v4014_v53 = vld [vmem:[#allocation6 + $0x448] sm:$0xff] }
 0x1ad   : > { %v1827_v33 = vadd.f32 %v10791_v6, %v13361_v62  ;;  %v13676_v15 = vadd.f32 %v2027_v41, %v1824_v3  ;;  %11208 = vmatprep.mubr.f32.mxu0 %v3130_v45  ;;  %11312 = vmatprep.mubr.f32.mxu1 %v13379_v42  ;;  %v3133_v50 = vld [vmem:[%s12813_s9 + $0x98] sm:$0xff] }
 0x1ae   : > { %v1619_v52 = vpop.f32.mrf.mxu0  ;;  %v2037_v19 = vpop.f32.mrf.mxu1  ;;  %11379 = vmatprep.subr.mxu0 %v4015_v48  ;;  %v18494_v41 = vld [vmem:[#allocation15_spill] sm:$0xff] }
 0x1af   : > { %v1826_v5 = vadd.f32 %v1619_v52, %v18492_v47  ;;  %v13682_v9 = vadd.f32 %v10895_v56, %v1827_v33  ;;  %11380 = vmatpush3.msra.mxu0 %v4015_v48  ;;  %v18495_v56 = vld [vmem:[#allocation16_spill] sm:$0xff]  ;;  %v18496_v47 = vld [vmem:[#allocation17_spill] sm:$0xff] }
 0x1b0   : > { %v10794_v24 = vpop.f32.mrf.mxu0  ;;  %11209 = vmatmul.mubr.f32.gmra.mxu0 %v3131_v63  ;;  %v10898_v62 = vpop.f32.mrf.mxu1  ;;  %11313 = vmatmul.mubr.f32.gmra.mxu1 %v13383_v54  ;;  %v4013_v54 = vld [vmem:[#allocation6 + $0x440] sm:$0xff] }
 0x1b1   : > { %v1829_v30 = vadd.f32 %v10794_v24, %v18493_v37  ;;  %v13686_v42 = vadd.f32 %v2037_v19, %v1826_v5  ;;  %11211 = vmatprep.mubr.f32.mxu0 %v3132_v35  ;;  %11315 = vmatprep.mubr.f32.mxu1 %v13393_v27  ;;  %v3135_v63 = vld [vmem:[%s12813_s9 + $0xa8] sm:$0xff]  ;;  %v3136_v35 = vld [vmem:[%s12813_s9 + $0xb0] sm:$0xff] }
 0x1b2   : > { %v1629_v58 = vpop.f32.mrf.mxu0  ;;  %v2047_v44 = vpop.f32.mrf.mxu1  ;;  %11381 = vmatprep.subr.mxu0 %v4014_v53  ;;  %v18497_v37 = vld [vmem:[#allocation18_spill] sm:$0xff] }
 0x1b3   : > { %v1828_v45 = vadd.f32 %v1629_v58, %v18494_v41  ;;  %v13692_v3 = vadd.f32 %v10898_v62, %v1829_v30  ;;  %11382 = vmatpush3.msra.mxu0 %v4014_v53  ;;  %v18498_v41 = vld [vmem:[#allocation19_spill] sm:$0xff] }
 0x1b4   : > { %v10797_v48 = vpop.f32.mrf.mxu0  ;;  %11212 = vmatmul.mubr.f32.gmra.mxu0 %v3133_v50  ;;  %v10901_v6 = vpop.f32.mrf.mxu1  ;;  %11316 = vmatmul.mubr.f32.gmra.mxu1 %v13397_v60  ;;  %v4012_v60 = vld [vmem:[#allocation6 + $0x438] sm:$0xff]  ;;  %v3137_v50 = vld [vmem:[%s12813_s9 + $0xb8] sm:$0xff] }
 0x1b5   : > { %v1831_v33 = vadd.f32 %v10797_v48, %v18495_v56  ;;  %v13696_v27 = vadd.f32 %v2047_v44, %v1828_v45  ;;  %11214 = vmatprep.mubr.f32.mxu0 %v3134_v39  ;;  %11318 = vmatprep.mubr.f32.mxu1 %v13407_v11  ;;  %v3138_v39 = vld [vmem:[%s12813_s9 + $0xc0] sm:$0xff] }
 0x1b6   : > { %v1639_v52 = vpop.f32.mrf.mxu0  ;;  %v2057_v19 = vpop.f32.mrf.mxu1  ;;  %11383 = vmatprep.subr.mxu0 %v4013_v54  ;;  %v18499_v56 = vld [vmem:[#allocation20_spill] sm:$0xff] }
 0x1b7   : > { %v1830_v5 = vadd.f32 %v1639_v52, %v18496_v47  ;;  %v13702_v53 = vadd.f32 %v10901_v6, %v1831_v33  ;;  %11384 = vmatpush3.msra.mxu0 %v4013_v54  ;;  %v18500_v47 = vld [vmem:[#allocation21_spill] sm:$0xff] }
 0x1b8   : > { %v10800_v24 = vpop.f32.mrf.mxu0  ;;  %11215 = vmatmul.mubr.f32.gmra.mxu0 %v3135_v63  ;;  %v10904_v62 = vpop.f32.mrf.mxu1  ;;  %11319 = vmatmul.mubr.f32.gmra.mxu1 %v13411_v2  ;;  %v4011_v2 = vld [vmem:[#allocation6 + $0x430] sm:$0xff]  ;;  %v3139_v63 = vld [vmem:[%s12813_s9 + $0xc8] sm:$0xff] }
 0x1b9   : > { %v1833_v30 = vadd.f32 %v10800_v24, %v18497_v37  ;;  %v13706_v11 = vadd.f32 %v2057_v19, %v1830_v5  ;;  %11217 = vmatprep.mubr.f32.mxu0 %v3136_v35  ;;  %11321 = vmatprep.mubr.f32.mxu1 %v13421_v61  ;;  %v3140_v35 = vld [vmem:[%s12813_s9 + $0xd0] sm:$0xff] }
 0x1ba   : > { %v1649_v58 = vpop.f32.mrf.mxu0  ;;  %v2067_v44 = vpop.f32.mrf.mxu1  ;;  %11385 = vmatprep.subr.mxu0 %v4012_v60  ;;  %v18501_v37 = vld [vmem:[#allocation22_spill] sm:$0xff] }
 0x1bb   : > { %v1832_v45 = vadd.f32 %v1649_v58, %v18498_v41  ;;  %v13712_v54 = vadd.f32 %v10904_v62, %v1833_v30  ;;  %11386 = vmatpush3.msra.mxu0 %v4012_v60  ;;  %v18502_v41 = vld [vmem:[#allocation23_spill] sm:$0xff] }
 0x1bc   : > { %v10803_v48 = vpop.f32.mrf.mxu0  ;;  %11218 = vmatmul.mubr.f32.gmra.mxu0 %v3137_v50  ;;  %v10907_v6 = vpop.f32.mrf.mxu1  ;;  %11322 = vmatmul.mubr.f32.gmra.mxu1 %v13425_v8  ;;  %v4010_v8 = vld [vmem:[#allocation6 + $0x428] sm:$0xff] }
 0x1bd   : > { %v1835_v33 = vadd.f32 %v10803_v48, %v18499_v56  ;;  %v13716_v61 = vadd.f32 %v2067_v44, %v1832_v45  ;;  %11220 = vmatprep.mubr.f32.mxu0 %v3138_v39  ;;  %11324 = vmatprep.mubr.f32.mxu1 %v13435_v17  ;;  %v3141_v50 = vld [vmem:[%s12813_s9 + $0xd8] sm:$0xff]  ;;  %v3142_v39 = vld [vmem:[%s12813_s9 + $0xe0] sm:$0xff] }
 0x1be   : > { %v1659_v52 = vpop.f32.mrf.mxu0  ;;  %v2077_v19 = vpop.f32.mrf.mxu1  ;;  %11387 = vmatprep.subr.mxu0 %v4011_v2  ;;  %v18503_v56 = vld [vmem:[#allocation24_spill] sm:$0xff] }
 0x1bf   : > { %v1834_v5 = vadd.f32 %v1659_v52, %v18500_v47  ;;  %v13722_v60 = vadd.f32 %v10907_v6, %v1835_v33  ;;  %11388 = vmatpush3.msra.mxu0 %v4011_v2  ;;  %v18504_v47 = vld [vmem:[#allocation25_spill] sm:$0xff] }
 0x1c0   : > { %v10806_v24 = vpop.f32.mrf.mxu0  ;;  %11221 = vmatmul.mubr.f32.gmra.mxu0 %v3139_v63  ;;  %v10910_v62 = vpop.f32.mrf.mxu1  ;;  %11325 = vmatmul.mubr.f32.gmra.mxu1 %v13439_v14  ;;  %v4009_v14 = vld [vmem:[#allocation6 + $0x420] sm:$0xff] }
 0x1c1   : > { %v1837_v30 = vadd.f32 %v10806_v24, %v18501_v37  ;;  %v13726_v17 = vadd.f32 %v2077_v19, %v1834_v5  ;;  %11223 = vmatprep.mubr.f32.mxu0 %v3140_v35  ;;  %11327 = vmatprep.mubr.f32.mxu1 %v13449_v4  ;;  %v3143_v63 = vld [vmem:[%s12813_s9 + $0xe8] sm:$0xff]  ;;  %v3144_v35 = vld [vmem:[%s12813_s9 + $0xf0] sm:$0xff] }
 0x1c2   : > { %v1669_v58 = vpop.f32.mrf.mxu0  ;;  %v2087_v44 = vpop.f32.mrf.mxu1  ;;  %11389 = vmatprep.subr.mxu0 %v4010_v8  ;;  %v18505_v37 = vld [vmem:[#allocation26_spill] sm:$0xff] }
 0x1c3   : > { %v1836_v45 = vadd.f32 %v1669_v58, %v18502_v41  ;;  %v13732_v2 = vadd.f32 %v10910_v62, %v1837_v30  ;;  %11390 = vmatpush3.msra.mxu0 %v4010_v8  ;;  %v18506_v41 = vld [vmem:[#allocation27_spill] sm:$0xff] }
 0x1c4   : > { %v10809_v48 = vpop.f32.mrf.mxu0  ;;  %11224 = vmatmul.mubr.f32.gmra.mxu0 %v3141_v50  ;;  %v10913_v6 = vpop.f32.mrf.mxu1  ;;  %11328 = vmatmul.mubr.f32.gmra.mxu1 %v13453_v20  ;;  %v4008_v20 = vld [vmem:[#allocation6 + $0x418] sm:$0xff]  ;;  %v3145_v50 = vld [vmem:[%s12813_s9 + $0xf8] sm:$0xff] }
 0x1c5   : > { %v1839_v33 = vadd.f32 %v10809_v48, %v18503_v56  ;;  %v13736_v4 = vadd.f32 %v2087_v44, %v1836_v45  ;;  %11226 = vmatprep.mubr.f32.mxu0 %v3142_v39  ;;  %11330 = vmatprep.mubr.f32.mxu1 %v13463_v10  ;;  %v3146_v39 = vld [vmem:[%s12813_s9 + $0x100] sm:$0xff] }
 0x1c6   : > { %v1679_v52 = vpop.f32.mrf.mxu0  ;;  %v2097_v19 = vpop.f32.mrf.mxu1  ;;  %11391 = vmatprep.subr.mxu0 %v4009_v14  ;;  %v18507_v56 = vld [vmem:[#allocation28_spill] sm:$0xff] }
 0x1c7   : > { %v1838_v5 = vadd.f32 %v1679_v52, %v18504_v47  ;;  %v13742_v8 = vadd.f32 %v10913_v6, %v1839_v33  ;;  %11392 = vmatpush3.msra.mxu0 %v4009_v14  ;;  %v18508_v47 = vld [vmem:[#allocation29_spill] sm:$0xff] }
 0x1c8   : > { %v10812_v24 = vpop.f32.mrf.mxu0  ;;  %11227 = vmatmul.mubr.f32.gmra.mxu0 %v3143_v63  ;;  %v10916_v62 = vpop.f32.mrf.mxu1  ;;  %11331 = vmatmul.mubr.f32.gmra.mxu1 %v13467_v26  ;;  %v4007_v26 = vld [vmem:[#allocation6 + $0x410] sm:$0xff]  ;;  %v3147_v63 = vld [vmem:[%s12813_s9 + $0x108] sm:$0xff] }
 0x1c9   : > { %v1841_v30 = vadd.f32 %v10812_v24, %v18505_v37  ;;  %v13746_v10 = vadd.f32 %v2097_v19, %v1838_v5  ;;  %11229 = vmatprep.mubr.f32.mxu0 %v3144_v35  ;;  %11333 = vmatprep.mubr.f32.mxu1 %v13477_v16  ;;  %v3148_v35 = vld [vmem:[%s12813_s9 + $0x110] sm:$0xff] }
 0x1ca   : > { %v1689_v58 = vpop.f32.mrf.mxu0  ;;  %v2107_v44 = vpop.f32.mrf.mxu1  ;;  %11393 = vmatprep.subr.mxu0 %v4008_v20  ;;  %v18509_v37 = vld [vmem:[#allocation30_spill] sm:$0xff] }
 0x1cb   : > { %v1840_v45 = vadd.f32 %v1689_v58, %v18506_v41  ;;  %v13752_v14 = vadd.f32 %v10916_v62, %v1841_v30  ;;  %11394 = vmatpush3.msra.mxu0 %v4008_v20  ;;  %v18510_v41 = vld [vmem:[#allocation31_spill] sm:$0xff] }
 0x1cc   : > { %v10815_v48 = vpop.f32.mrf.mxu0  ;;  %11230 = vmatmul.mubr.f32.gmra.mxu0 %v3145_v50  ;;  %v10919_v6 = vpop.f32.mrf.mxu1  ;;  %11334 = vmatmul.mubr.f32.gmra.mxu1 %v13481_v32  ;;  %v4006_v32 = vld [vmem:[#allocation6 + $0x408] sm:$0xff] }
 0x1cd   : > { %v1843_v33 = vadd.f32 %v10815_v48, %v18507_v56  ;;  %v13756_v16 = vadd.f32 %v2107_v44, %v1840_v45  ;;  %11232 = vmatprep.mubr.f32.mxu0 %v3146_v39  ;;  %11336 = vmatprep.mubr.f32.mxu1 %v13491_v22  ;;  %v3149_v50 = vld [vmem:[%s12813_s9 + $0x118] sm:$0xff]  ;;  %v3150_v39 = vld [vmem:[%s12813_s9 + $0x120] sm:$0xff] }
 0x1ce   : > { %v1699_v52 = vpop.f32.mrf.mxu0  ;;  %v2117_v19 = vpop.f32.mrf.mxu1  ;;  %11395 = vmatprep.subr.mxu0 %v4007_v26  ;;  %v18511_v56 = vld [vmem:[#allocation32_spill] sm:$0xff] }
 0x1cf   : > { %v1842_v5 = vadd.f32 %v1699_v52, %v18508_v47  ;;  %v13762_v20 = vadd.f32 %v10919_v6, %v1843_v33  ;;  %11396 = vmatpush3.msra.mxu0 %v4007_v26  ;;  %v18512_v47 = vld [vmem:[#allocation33_spill] sm:$0xff] }
 0x1d0   : > { %v10818_v24 = vpop.f32.mrf.mxu0  ;;  %11233 = vmatmul.mubr.f32.gmra.mxu0 %v3147_v63  ;;  %v10922_v62 = vpop.f32.mrf.mxu1  ;;  %11337 = vmatmul.mubr.f32.gmra.mxu1 %v13495_v38  ;;  %v4005_v38 = vld [vmem:[#allocation6 + $0x400] sm:$0xff] }
 0x1d1   : > { %v1845_v30 = vadd.f32 %v10818_v24, %v18509_v37  ;;  %v13766_v22 = vadd.f32 %v2117_v19, %v1842_v5  ;;  %11235 = vmatprep.mubr.f32.mxu0 %v3148_v35  ;;  %11339 = vmatprep.mubr.f32.mxu1 %v13505_v28  ;;  %v3151_v63 = vld [vmem:[%s12813_s9 + $0x128] sm:$0xff]  ;;  %v3152_v35 = vld [vmem:[%s12813_s9 + $0x130] sm:$0xff] }
 0x1d2   : > { %v1709_v58 = vpop.f32.mrf.mxu0  ;;  %v2127_v44 = vpop.f32.mrf.mxu1  ;;  %11397 = vmatprep.subr.mxu0 %v4006_v32 }
 0x1d3   : > { %v1844_v45 = vadd.f32 %v1709_v58, %v18510_v41  ;;  %v13772_v26 = vadd.f32 %v10922_v62, %v1845_v30  ;;  %11398 = vmatpush3.msra.mxu0 %v4006_v32  ;;  %v18513_v62 = vld [vmem:[#allocation34_spill] sm:$0xff] }
 0x1d4   : > { %v10821_v48 = vpop.f32.mrf.mxu0  ;;  %11236 = vmatmul.mubr.f32.gmra.mxu0 %v3149_v50  ;;  %v10925_v6 = vpop.f32.mrf.mxu1  ;;  %11340 = vmatmul.mubr.f32.gmra.mxu1 %v13509_v46 }
 0x1d5   : > { %v1847_v33 = vadd.f32 %v10821_v48, %v18511_v56  ;;  %v13776_v28 = vadd.f32 %v2127_v44, %v1844_v45  ;;  %11238 = vmatprep.mubr.f32.mxu0 %v3150_v39  ;;  %11342 = vmatprep.mubr.f32.mxu1 %v13521_v34  ;;  %v3153_v34 = vld [vmem:[%s12813_s9 + $0x138] sm:$0xff]  ;;  %v3154_v44 = vld [vmem:[%s12813_s9 + $0x140] sm:$0xff] }
 0x1d6   : > { %v1719_v52 = vpop.f32.mrf.mxu0  ;;  %v2137_v19 = vpop.f32.mrf.mxu1  ;;  %11399 = vmatprep.subr.mxu0 %v4005_v38  ;;  %v18514_v39 = vld [vmem:[#allocation35_spill] sm:$0xff]  ;;  %v18515_v48 = vld [vmem:[#allocation36_spill] sm:$0xff] }
 0x1d7   : > { %v1846_v5 = vadd.f32 %v1719_v52, %v18512_v47  ;;  %v13782_v32 = vadd.f32 %v10925_v6, %v1847_v33  ;;  %11400 = vmatpush3.msra.mxu0 %v4005_v38  ;;  %v3156_v52 = vld [vmem:[%s12813_s9 + $0x150] sm:$0xff] }
 0x1d8   : > { %v10824_v46 = vpop.f32.mrf.mxu0  ;;  %11239 = vmatmul.mubr.f32.gmra.mxu0 %v3151_v63  ;;  %v10928_v24 = vpop.f32.mrf.mxu1  ;;  %11343 = vmatmul.mubr.f32.gmra.mxu1 %v13525_v51 }
 0x1d9   : > { %v1849_v37 = vadd.f32 %v10824_v46, %v18513_v62  ;;  %v13786_v30 = vadd.f32 %v2137_v19, %v1846_v5  ;;  %11241 = vmatprep.mubr.f32.mxu0 %v3152_v35  ;;  %11345 = vmatprep.mubr.f32.mxu1 %v13536_v21  ;;  %v3155_v21 = vld [vmem:[%s12813_s9 + $0x148] sm:$0xff]  ;;  %v18517_v46 = vld [vmem:[#allocation38_spill] sm:$0xff] }
 0x1da   : > { %v1729_v50 = vpop.f32.mrf.mxu0  ;;  %v2147_v58 = vpop.f32.mrf.mxu1  ;;  %v18516_v19 = vld [vmem:[#allocation37_spill] sm:$0xff] }
 0x1db   : > { %v1848_v41 = vadd.f32 %v1729_v50, %v18514_v39  ;;  %v13792_v45 = vadd.f32 %v10928_v24, %v1849_v37  ;;  %v18518_v50 = vld [vmem:[#allocation39_spill] sm:$0xff] }
 0x1dc   : > { %v10827_v38 = vpop.f32.mrf.mxu0  ;;  %11242 = vmatmul.mubr.f32.gmra.mxu0 %v3153_v34  ;;  %v10931_v51 = vpop.f32.mrf.mxu1  ;;  %11346 = vmatmul.mubr.f32.gmra.mxu1 %v13540_v49  ;;  %v3158_v34 = vld [vmem:[%s12813_s9 + $0x160] sm:$0xff] }
 0x1dd   : > { %v1851_v6 = vadd.f32 %v10827_v38, %v18515_v48  ;;  %v13796_v56 = vadd.f32 %v2147_v58, %v1848_v41  ;;  %11244 = vmatprep.mubr.f32.mxu0 %v3154_v44  ;;  %11348 = vmatprep.mubr.f32.mxu1 %v13550_v18  ;;  %v3157_v18 = vld [vmem:[%s12813_s9 + $0x158] sm:$0xff]  ;;  %v18519_v41 = vld [vmem:[#allocation40_spill] sm:$0xff] }
 0x1de   : > { %v1739_v33 = vpop.f32.mrf.mxu0  ;;  %v13800_v63 = vpop.f32.mrf.mxu1 }
 0x1df   : > { %v13804_v35 = vadd.f32 %v1739_v33, %v18516_v19  ;;  %v13806_v47 = vadd.f32 %v10931_v51, %v1851_v6  ;;  %v3160_v6 = vld [vmem:[%s12813_s9 + $0x170] sm:$0xff] }
 0x1e0   : > { %v10830_v49 = vpop.f32.mrf.mxu0  ;;  %11245 = vmatmul.mubr.f32.gmra.mxu0 %v3155_v21  ;;  %v10934_v5 = vpop.f32.mrf.mxu1  ;;  %11349 = vmatmul.mubr.f32.gmra.mxu1 %v13554_v12  ;;  %v18520_v21 = vld [vmem:[#allocation41_spill] sm:$0xff] }
 0x1e1   : > { %v1853_v24 = vadd.f32 %v10830_v49, %v18517_v46  ;;  %11247 = vmatprep.mubr.f32.mxu0 %v3156_v52  ;;  %11351 = vmatprep.mubr.f32.mxu1 %v13564_v40  ;;  %v3159_v40 = vld [vmem:[%s12813_s9 + $0x168] sm:$0xff]  ;;  %v18521_v49 = vld [vmem:[#allocation43_spill] sm:$0xff] }
 0x1e2   : > { %v1749_v62 = vpop.f32.mrf.mxu0  ;;  %v13812_v37 = vpop.f32.mrf.mxu1 }
 0x1e3   : > { %v13816_v58 = vadd.f32 %v1749_v62, %v18518_v50  ;;  %v13818_v44 = vadd.f32 %v10934_v5, %v1853_v24  ;;  %v18522_v5 = vld [vmem:[#allocation42_spill] sm:$0xff]  ;;  %v18525_v50 = vld [vmem:[#allocation44_spill] sm:$0xff] }
 0x1e4   : > { %v10833_v39 = vpop.f32.mrf.mxu0  ;;  %11248 = vmatmul.mubr.f32.gmra.mxu0 %v3157_v18  ;;  %v10937_v12 = vpop.f32.mrf.mxu1  ;;  %11352 = vmatmul.mubr.f32.gmra.mxu1 %v13568_v29  ;;  %v18523_v24 = vld [vmem:[#allocation46_spill] sm:$0xff] }
 0x1e5   : > { %v1855_v38 = vadd.f32 %v10833_v39, %v18519_v41  ;;  %11250 = vmatprep.mubr.f32.mxu0 %v3158_v34  ;;  %11354 = vmatprep.mubr.f32.mxu1 %v13578_v23  ;;  %v3161_v23 = vld [vmem:[%s12813_s9 + $0x178] sm:$0xff]  ;;  %v3162_v34 = vld [vmem:[%s12813_s9 + $0x180] sm:$0xff] }
 0x1e6   : > { %v1759_v51 = vpop.f32.mrf.mxu0  ;;  %v13824_v48 = vpop.f32.mrf.mxu1 }
 0x1e7   : > { %v13828_v33 = vadd.f32 %v1759_v51, %v18520_v21  ;;  %v13830_v52 = vadd.f32 %v10937_v12, %v1855_v38  ;;  %v18528_v51 = vld [vmem:[#allocation45_spill] sm:$0xff] }
 0x1e8   : > { %v10836_v19 = vpop.f32.mrf.mxu0  ;;  %11251 = vmatmul.mubr.f32.gmra.mxu0 %v3159_v40  ;;  %v10940_v29 = vpop.f32.mrf.mxu1  ;;  %11355 = vmatmul.mubr.f32.gmra.mxu1 %v18521_v49  ;;  %v18527_v40 = vld [vmem:[#allocation47_spill] sm:$0xff]  ;;  %v3163_v21 = vld [vmem:[%s12813_s9 + $0x188] sm:$0xff] }
 0x1e9   : > { %v1857_v46 = vadd.f32 %v10836_v19, %v18522_v5  ;;  %11253 = vmatprep.mubr.f32.mxu0 %v3160_v6  ;;  %11357 = vmatprep.mubr.f32.mxu1 %v18523_v24  ;;  %v18530_v5 = vld [vmem:[#allocation48_spill] sm:$0xff] }
 0x1ea   : > { %v1769_v18 = vpop.f32.mrf.mxu0  ;;  %v13836_v62 = vpop.f32.mrf.mxu1 }
 0x1eb   : > { %18524 = vst [vmem:[#allocation13_spill] sm:$0xff] %v13836_v62  ;;  %v13840_v39 = vadd.f32 %v1769_v18, %v18525_v50  ;;  %v13842_v12 = vadd.f32 %v10940_v29, %v1857_v46  ;;  %v3164_v29 = vld [vmem:[%s12813_s9 + $0x190] sm:$0xff] }
 0x1ec   : > { %v10839_v41 = vpop.f32.mrf.mxu0  ;;  %11254 = vmatmul.mubr.f32.gmra.mxu0 %v3161_v23  ;;  %v10943_v38 = vpop.f32.mrf.mxu1  ;;  %11358 = vmatmul.mubr.f32.gmra.mxu1 %v18527_v40  ;;  %v18532_v50 = vld [vmem:[#allocation50_spill] sm:$0xff] }
 0x1ed   : > { %18526 = vst [vmem:[#allocation14_spill] sm:$0xff] %v13840_v39  ;;  %v1859_v6 = vadd.f32 %v10839_v41, %v18528_v51  ;;  %11256 = vmatprep.mubr.f32.mxu0 %v3162_v34  ;;  %11360 = vmatprep.mubr.f32.mxu1 %v13606_v57  ;;  %v18533_v34 = vld [vmem:[#allocation49_spill] sm:$0xff]  ;;  %v3165_v57 = vld [vmem:[%s12813_s9 + $0x198] sm:$0xff] }
 0x1ee   : > { %v1779_v19 = vpop.f32.mrf.mxu0  ;;  %v13848_v49 = vpop.f32.mrf.mxu1  ;;  %v3583_v40 = vld [vmem:[%s12813_s9 + $0x199] sm:$0xff] }
 0x1ef   : > { %18529 = vst [vmem:[#allocation15_spill] sm:$0xff] %v13848_v49  ;;  %v13852_v46 = vadd.f32 %v1779_v19, %v18530_v5  ;;  %v13854_v23 = vadd.f32 %v10943_v38, %v1859_v6  ;;  %v3166_v38 = vld [vmem:[%s12813_s9 + $0x1a0] sm:$0xff]  ;;  %v3956_v39 = vld [vmem:[%s12813_s9 + $0x32] sm:$0xff] }
 0x1f0   : > { %v10842_v24 = vpop.f32.mrf.mxu0  ;;  %11257 = vmatmul.mubr.f32.gmra.mxu0 %v3163_v21  ;;  %v10946_v18 = vpop.f32.mrf.mxu1  ;;  %11361 = vmatmul.mubr.f32.gmra.mxu1 %v18532_v50  ;;  %v3584_v6 = vld [vmem:[%s12813_s9 + $0x1a1] sm:$0xff] }
 0x1f1   : > { %18531 = vst [vmem:[#allocation16_spill] sm:$0xff] %v13852_v46  ;;  %v1861_v41 = vadd.f32 %v10842_v24, %v18533_v34  ;;  %11259 = vmatprep.mubr.f32.mxu0 %v3164_v29  ;;  %11363 = vmatprep.mubr.f32.mxu1 %v13621_v1  ;;  %v18535_v19 = vld [vmem:[#allocation51_spill] sm:$0xff]  ;;  %v18536_v24 = vld [vmem:[#allocation52_spill] sm:$0xff] }
 0x1f2   : > { %v1789_v51 = vpop.f32.mrf.mxu0  ;;  %v13861_v49 = vpop.f32.mrf.mxu1  ;;  %v3167_v1 = vld [vmem:[%s12813_s9 + $0x1a8] sm:$0xff] }
 0x1f3   : > { %18534 = vst [vmem:[#allocation17_spill] sm:$0xff] %v13861_v49  ;;  %v13866_v21 = vadd.f32 %v1789_v51, %v18535_v19  ;;  %v13868_v5 = vadd.f32 %v10946_v18, %v1861_v41  ;;  %v3585_v49 = vld [vmem:[%s12813_s9 + $0x1a9] sm:$0xff] }
 0x1f4   : > { %v10845_v50 = vpop.f32.mrf.mxu0  ;;  %11260 = vmatmul.mubr.f32.gmra.mxu0 %v3165_v57  ;;  %v10949_v29 = vpop.f32.mrf.mxu1  ;;  %11364 = vmatmul.mubr.f32.gmra.mxu1 %v3583_v40  ;;  %v18538_v51 = vld [vmem:[#allocation53_spill] sm:$0xff] }
 0x1f5   : > { %v1863_v34 = vadd.f32 %v10845_v50, %v18536_v24  ;;  %11262 = vmatprep.mubr.f32.mxu0 %v3166_v38  ;;  %11366 = vmatprep.mubr.f32.mxu1 %v3584_v6  ;;  %v3957_v38 = vld [vmem:[%s12813_s9 + $0x3a] sm:$0xff]  ;;  %v3958_v24 = vld [vmem:[%s12813_s9 + $0x42] sm:$0xff] }
 0x1f6   : > { %v1799_v46 = vpop.f32.mrf.mxu0  ;;  %v13873_v62 = vpop.f32.mrf.mxu1 }
 0x1f7   : > { %18537 = vst [vmem:[#allocation18_spill] sm:$0xff] %v13873_v62  ;;  %v13877_v19 = vadd.f32 %v1799_v46, %v18538_v51  ;;  %v13879_v18 = vadd.f32 %v10949_v29, %v1863_v34  ;;  %v3960_v51 = vld [vmem:[%s12813_s9 + $0x52] sm:$0xff] }
 0x1f8   : > { %v10848_v41 = vpop.f32.mrf.mxu0  ;;  %11263 = vmatmul.mubr.f32.gmra.mxu0 %v3167_v1  ;;  %v10952_v57 = vpop.f32.mrf.mxu1  ;;  %11367 = vmatmul.mubr.f32.gmra.mxu1 %v3585_v49 }
 0x1f9   : > { %v1865_v40 = vadd.f32 %v10848_v41, %v13628_v7  ;;  %11401 = vmatprep.mubr.f32.mxu0 %v3956_v39  ;;  %v3959_v7 = vld [vmem:[%s12813_s9 + $0x4a] sm:$0xff] }
 0x1fa   : > { %v1809_v6 = vpop.f32.mrf.mxu0  ;;  %v13883_v50 = vpop.f32.mrf.mxu1 }
 0x1fb   : > { %v13887_v62 = vadd.f32 %v1809_v6, %v13633_v0  ;;  %v13889_v46 = vadd.f32 %v10952_v57, %v1865_v40 }
 0x1fc   : > { %v10987_v29 = vpop.f32.mrf.mxu0  ;;  %11402 = vmatmul.mubr.f32.vlgmr.msra.gmra.mxu0 %v3957_v38  ;;  %v11091_v34 = vpop.f32.mrf.mxu1 }
 0x1fd   : > { %v2655_v49 = vadd.f32 %v10987_v29, %v13642_v13  ;;  %11404 = vmatprep.mubr.f32.mxu0 %v3958_v24  ;;  %v3961_v13 = vld [vmem:[%s12813_s9 + $0x5a] sm:$0xff]  ;;  %v3962_v29 = vld [vmem:[%s12813_s9 + $0x62] sm:$0xff] }
 0x1fe   : > { %v2415_v39 = vpop.f32.mrf.mxu0  ;;  %v13893_v1 = vpop.f32.mrf.mxu1 }
 0x1ff   : > { %18539 = vst [vmem:[#allocation19_spill] sm:$0xff] %v13893_v1  ;;  %v13897_v41 = vadd.f32 %v2415_v39, %v13646_v55  ;;  %v13899_v0 = vadd.f32 %v11091_v34, %v2655_v49 }
 0x200   : > { %v10990_v57 = vpop.f32.mrf.mxu0  ;;  %11405 = vmatmul.mubr.f32.gmra.mxu0 %v3959_v7  ;;  %v11094_v40 = vpop.f32.mrf.mxu1 }
 0x201   : > { %v2657_v38 = vadd.f32 %v10990_v57, %v13652_v43  ;;  %11407 = vmatprep.mubr.f32.mxu0 %v3960_v51  ;;  %v3963_v43 = vld [vmem:[%s12813_s9 + $0x6a] sm:$0xff]  ;;  %v3964_v57 = vld [vmem:[%s12813_s9 + $0x72] sm:$0xff] }
 0x202   : > { %v2425_v6 = vpop.f32.mrf.mxu0  ;;  %v13903_v24 = vpop.f32.mrf.mxu1 }
 0x203   : > { %18540 = vst [vmem:[#allocation20_spill] sm:$0xff] %v13903_v24  ;;  %v13907_v1 = vadd.f32 %v2425_v6, %v13656_v31  ;;  %v13909_v55 = vadd.f32 %v11094_v40, %v2657_v38 }
 0x204   : > { %v10993_v34 = vpop.f32.mrf.mxu0  ;;  %11408 = vmatmul.mubr.f32.gmra.mxu0 %v3961_v13  ;;  %v11097_v49 = vpop.f32.mrf.mxu1 }
 0x205   : > { %v2659_v7 = vadd.f32 %v10993_v34, %v13662_v36  ;;  %11410 = vmatprep.mubr.f32.mxu0 %v3962_v29  ;;  %v3965_v36 = vld [vmem:[%s12813_s9 + $0x7a] sm:$0xff]  ;;  %v3966_v34 = vld [vmem:[%s12813_s9 + $0x82] sm:$0xff] }
 0x206   : > { %v2435_v39 = vpop.f32.mrf.mxu0  ;;  %v13913_v51 = vpop.f32.mrf.mxu1 }
 0x207   : > { %18541 = vst [vmem:[#allocation21_spill] sm:$0xff] %v13913_v51  ;;  %v13917_v24 = vadd.f32 %v2435_v39, %v13666_v59  ;;  %v13919_v31 = vadd.f32 %v11097_v49, %v2659_v7 }
 0x208   : > { %v10996_v40 = vpop.f32.mrf.mxu0  ;;  %11411 = vmatmul.mubr.f32.gmra.mxu0 %v3963_v43  ;;  %v11100_v38 = vpop.f32.mrf.mxu1 }
 0x209   : > { %v2661_v13 = vadd.f32 %v10996_v40, %v13672_v25  ;;  %11413 = vmatprep.mubr.f32.mxu0 %v3964_v57  ;;  %v3967_v25 = vld [vmem:[%s12813_s9 + $0x8a] sm:$0xff]  ;;  %v3968_v40 = vld [vmem:[%s12813_s9 + $0x92] sm:$0xff] }
 0x20a   : > { %v2445_v6 = vpop.f32.mrf.mxu0  ;;  %v13923_v29 = vpop.f32.mrf.mxu1 }
 0x20b   : > { %18542 = vst [vmem:[#allocation22_spill] sm:$0xff] %v13923_v29  ;;  %v13927_v51 = vadd.f32 %v2445_v6, %v13676_v15  ;;  %v13929_v59 = vadd.f32 %v11100_v38, %v2661_v13 }
 0x20c   : > { %v10999_v49 = vpop.f32.mrf.mxu0  ;;  %11414 = vmatmul.mubr.f32.gmra.mxu0 %v3965_v36  ;;  %v11103_v7 = vpop.f32.mrf.mxu1 }
 0x20d   : > { %v2663_v43 = vadd.f32 %v10999_v49, %v13682_v9  ;;  %11416 = vmatprep.mubr.f32.mxu0 %v3966_v34  ;;  %v3969_v9 = vld [vmem:[%s12813_s9 + $0x9a] sm:$0xff]  ;;  %v3970_v49 = vld [vmem:[%s12813_s9 + $0xa2] sm:$0xff] }
 0x20e   : > { %v2455_v39 = vpop.f32.mrf.mxu0  ;;  %v13933_v57 = vpop.f32.mrf.mxu1 }
 0x20f   : > { %18543 = vst [vmem:[#allocation23_spill] sm:$0xff] %v13933_v57  ;;  %v13937_v29 = vadd.f32 %v2455_v39, %v13686_v42  ;;  %v13939_v15 = vadd.f32 %v11103_v7, %v2663_v43 }
 0x210   : > { %v11002_v38 = vpop.f32.mrf.mxu0  ;;  %11417 = vmatmul.mubr.f32.gmra.mxu0 %v3967_v25  ;;  %v11106_v13 = vpop.f32.mrf.mxu1 }
 0x211   : > { %v2665_v36 = vadd.f32 %v11002_v38, %v13692_v3  ;;  %11419 = vmatprep.mubr.f32.mxu0 %v3968_v40  ;;  %v3971_v3 = vld [vmem:[%s12813_s9 + $0xaa] sm:$0xff]  ;;  %v3972_v38 = vld [vmem:[%s12813_s9 + $0xb2] sm:$0xff] }
 0x212   : > { %v2465_v6 = vpop.f32.mrf.mxu0  ;;  %v13943_v34 = vpop.f32.mrf.mxu1 }
 0x213   : > { %18544 = vst [vmem:[#allocation24_spill] sm:$0xff] %v13943_v34  ;;  %v13947_v57 = vadd.f32 %v2465_v6, %v13696_v27  ;;  %v13949_v42 = vadd.f32 %v11106_v13, %v2665_v36 }
 0x214   : > { %v11005_v7 = vpop.f32.mrf.mxu0  ;;  %11420 = vmatmul.mubr.f32.gmra.mxu0 %v3969_v9  ;;  %v11109_v43 = vpop.f32.mrf.mxu1 }
 0x215   : > { %v2667_v25 = vadd.f32 %v11005_v7, %v13702_v53  ;;  %11422 = vmatprep.mubr.f32.mxu0 %v3970_v49  ;;  %v3973_v53 = vld [vmem:[%s12813_s9 + $0xba] sm:$0xff]  ;;  %v3974_v7 = vld [vmem:[%s12813_s9 + $0xc2] sm:$0xff] }
 0x216   : > { %v2475_v39 = vpop.f32.mrf.mxu0  ;;  %v13953_v40 = vpop.f32.mrf.mxu1 }
 0x217   : > { %18545 = vst [vmem:[#allocation25_spill] sm:$0xff] %v13953_v40  ;;  %v13957_v34 = vadd.f32 %v2475_v39, %v13706_v11  ;;  %v13959_v27 = vadd.f32 %v11109_v43, %v2667_v25 }
 0x218   : > { %v11008_v13 = vpop.f32.mrf.mxu0  ;;  %11423 = vmatmul.mubr.f32.gmra.mxu0 %v3971_v3  ;;  %v11112_v36 = vpop.f32.mrf.mxu1 }
 0x219   : > { %v2669_v9 = vadd.f32 %v11008_v13, %v13712_v54  ;;  %11425 = vmatprep.mubr.f32.mxu0 %v3972_v38  ;;  %v3975_v54 = vld [vmem:[%s12813_s9 + $0xca] sm:$0xff]  ;;  %v3976_v13 = vld [vmem:[%s12813_s9 + $0xd2] sm:$0xff] }
 0x21a   : > { %v2485_v6 = vpop.f32.mrf.mxu0  ;;  %v13963_v49 = vpop.f32.mrf.mxu1 }
 0x21b   : > { %18546 = vst [vmem:[#allocation26_spill] sm:$0xff] %v13963_v49  ;;  %v13967_v40 = vadd.f32 %v2485_v6, %v13716_v61  ;;  %v13969_v11 = vadd.f32 %v11112_v36, %v2669_v9 }
 0x21c   : > { %v11011_v43 = vpop.f32.mrf.mxu0  ;;  %11426 = vmatmul.mubr.f32.gmra.mxu0 %v3973_v53  ;;  %v11115_v25 = vpop.f32.mrf.mxu1 }
 0x21d   : > { %18547 = vst [vmem:[#allocation27_spill] sm:$0xff] %v13969_v11  ;;  %v2671_v3 = vadd.f32 %v11011_v43, %v13722_v60  ;;  %11428 = vmatprep.mubr.f32.mxu0 %v3974_v7  ;;  %v3977_v60 = vld [vmem:[%s12813_s9 + $0xda] sm:$0xff]  ;;  %v3978_v43 = vld [vmem:[%s12813_s9 + $0xe2] sm:$0xff] }
 0x21e   : > { %v2495_v39 = vpop.f32.mrf.mxu0  ;;  %v13973_v38 = vpop.f32.mrf.mxu1 }
 0x21f   : > { %v13977_v49 = vadd.f32 %v2495_v39, %v13726_v17  ;;  %v13979_v61 = vadd.f32 %v11115_v25, %v2671_v3 }
 0x220   : > { %v11014_v36 = vpop.f32.mrf.mxu0  ;;  %11429 = vmatmul.mubr.f32.gmra.mxu0 %v3975_v54  ;;  %v11118_v9 = vpop.f32.mrf.mxu1 }
 0x221   : > { %18548 = vst [vmem:[#allocation28_spill] sm:$0xff] %v13979_v61  ;;  %v2673_v53 = vadd.f32 %v11014_v36, %v13732_v2  ;;  %11431 = vmatprep.mubr.f32.mxu0 %v3976_v13  ;;  %v3979_v2 = vld [vmem:[%s12813_s9 + $0xea] sm:$0xff]  ;;  %v3980_v36 = vld [vmem:[%s12813_s9 + $0xf2] sm:$0xff] }
 0x222   : > { %v2505_v6 = vpop.f32.mrf.mxu0  ;;  %v13983_v7 = vpop.f32.mrf.mxu1 }
 0x223   : > { %v13987_v11 = vadd.f32 %v2505_v6, %v13736_v4  ;;  %v13989_v17 = vadd.f32 %v11118_v9, %v2673_v53 }
 0x224   : > { %v11017_v25 = vpop.f32.mrf.mxu0  ;;  %11432 = vmatmul.mubr.f32.gmra.mxu0 %v3977_v60  ;;  %v11121_v3 = vpop.f32.mrf.mxu1 }
 0x225   : > { %18549 = vst [vmem:[#allocation29_spill] sm:$0xff] %v13989_v17  ;;  %v2675_v54 = vadd.f32 %v11017_v25, %v13742_v8  ;;  %11434 = vmatprep.mubr.f32.mxu0 %v3978_v43  ;;  %v3981_v8 = vld [vmem:[%s12813_s9 + $0xfa] sm:$0xff]  ;;  %v3982_v25 = vld [vmem:[%s12813_s9 + $0x102] sm:$0xff] }
 0x226   : > { %v2515_v39 = vpop.f32.mrf.mxu0  ;;  %v13993_v13 = vpop.f32.mrf.mxu1 }
 0x227   : > { %v13997_v61 = vadd.f32 %v2515_v39, %v13746_v10  ;;  %v13999_v4 = vadd.f32 %v11121_v3, %v2675_v54 }
 0x228   : > { %v11020_v9 = vpop.f32.mrf.mxu0  ;;  %11435 = vmatmul.mubr.f32.gmra.mxu0 %v3979_v2  ;;  %v11124_v53 = vpop.f32.mrf.mxu1 }
 0x229   : > { %18550 = vst [vmem:[#allocation30_spill] sm:$0xff] %v13999_v4  ;;  %v2677_v60 = vadd.f32 %v11020_v9, %v13752_v14  ;;  %11437 = vmatprep.mubr.f32.mxu0 %v3980_v36  ;;  %v3983_v14 = vld [vmem:[%s12813_s9 + $0x10a] sm:$0xff]  ;;  %v3984_v9 = vld [vmem:[%s12813_s9 + $0x112] sm:$0xff] }
 0x22a   : > { %v2525_v6 = vpop.f32.mrf.mxu0  ;;  %v14003_v43 = vpop.f32.mrf.mxu1 }
 0x22b   : > { %v14007_v17 = vadd.f32 %v2525_v6, %v13756_v16  ;;  %v14009_v10 = vadd.f32 %v11124_v53, %v2677_v60 }
 0x22c   : > { %v11023_v3 = vpop.f32.mrf.mxu0  ;;  %11438 = vmatmul.mubr.f32.gmra.mxu0 %v3981_v8  ;;  %v11127_v54 = vpop.f32.mrf.mxu1 }
 0x22d   : > { %18551 = vst [vmem:[#allocation31_spill] sm:$0xff] %v14009_v10  ;;  %v2679_v2 = vadd.f32 %v11023_v3, %v13762_v20  ;;  %11440 = vmatprep.mubr.f32.mxu0 %v3982_v25  ;;  %v3985_v20 = vld [vmem:[%s12813_s9 + $0x11a] sm:$0xff]  ;;  %v3986_v3 = vld [vmem:[%s12813_s9 + $0x122] sm:$0xff] }
 0x22e   : > { %v2535_v39 = vpop.f32.mrf.mxu0  ;;  %v14013_v36 = vpop.f32.mrf.mxu1 }
 0x22f   : > { %v14017_v4 = vadd.f32 %v2535_v39, %v13766_v22  ;;  %v14019_v16 = vadd.f32 %v11127_v54, %v2679_v2 }
 0x230   : > { %v11026_v53 = vpop.f32.mrf.mxu0  ;;  %11441 = vmatmul.mubr.f32.gmra.mxu0 %v3983_v14  ;;  %v11130_v60 = vpop.f32.mrf.mxu1 }
 0x231   : > { %18552 = vst [vmem:[#allocation32_spill] sm:$0xff] %v14019_v16  ;;  %v2681_v8 = vadd.f32 %v11026_v53, %v13772_v26  ;;  %11443 = vmatprep.mubr.f32.mxu0 %v3984_v9  ;;  %v3987_v26 = vld [vmem:[%s12813_s9 + $0x12a] sm:$0xff]  ;;  %v3988_v53 = vld [vmem:[%s12813_s9 + $0x132] sm:$0xff] }
 0x232   : > { %v2545_v6 = vpop.f32.mrf.mxu0  ;;  %v14023_v25 = vpop.f32.mrf.mxu1 }
 0x233   : > { %v14027_v10 = vadd.f32 %v2545_v6, %v13776_v28  ;;  %v14029_v22 = vadd.f32 %v11130_v60, %v2681_v8 }
 0x234   : > { %v11029_v54 = vpop.f32.mrf.mxu0  ;;  %11444 = vmatmul.mubr.f32.gmra.mxu0 %v3985_v20  ;;  %v11133_v2 = vpop.f32.mrf.mxu1 }
 0x235   : > { %18553 = vst [vmem:[#allocation33_spill] sm:$0xff] %v14029_v22  ;;  %v2683_v14 = vadd.f32 %v11029_v54, %v13782_v32  ;;  %11446 = vmatprep.mubr.f32.mxu0 %v3986_v3  ;;  %v3989_v32 = vld [vmem:[%s12813_s9 + $0x13a] sm:$0xff]  ;;  %v3990_v54 = vld [vmem:[%s12813_s9 + $0x142] sm:$0xff] }
 0x236   : > { %v2555_v39 = vpop.f32.mrf.mxu0  ;;  %v14033_v9 = vpop.f32.mrf.mxu1 }
 0x237   : > { %v14037_v16 = vadd.f32 %v2555_v39, %v13786_v30  ;;  %v14039_v28 = vadd.f32 %v11133_v2, %v2683_v14 }
 0x238   : > { %v11032_v60 = vpop.f32.mrf.mxu0  ;;  %11447 = vmatmul.mubr.f32.gmra.mxu0 %v3987_v26  ;;  %v11136_v8 = vpop.f32.mrf.mxu1 }
 0x239   : > { %18554 = vst [vmem:[#allocation34_spill] sm:$0xff] %v14039_v28  ;;  %v2685_v20 = vadd.f32 %v11032_v60, %v13792_v45  ;;  %11449 = vmatprep.mubr.f32.mxu0 %v3988_v53  ;;  %v3991_v45 = vld [vmem:[%s12813_s9 + $0x14a] sm:$0xff]  ;;  %v3992_v60 = vld [vmem:[%s12813_s9 + $0x152] sm:$0xff] }
 0x23a   : > { %v2565_v6 = vpop.f32.mrf.mxu0  ;;  %v14043_v3 = vpop.f32.mrf.mxu1 }
 0x23b   : > { %v14047_v22 = vadd.f32 %v2565_v6, %v13796_v56  ;;  %v14049_v30 = vadd.f32 %v11136_v8, %v2685_v20 }
 0x23c   : > { %v11035_v2 = vpop.f32.mrf.mxu0  ;;  %11450 = vmatmul.mubr.f32.gmra.mxu0 %v3989_v32  ;;  %v11139_v14 = vpop.f32.mrf.mxu1  ;;  %v3993_v32 = vld [vmem:[%s12813_s9 + $0x15a] sm:$0xff] }
 0x23d   : > { %18555 = vst [vmem:[#allocation35_spill] sm:$0xff] %v14049_v30  ;;  %v2687_v26 = vadd.f32 %v11035_v2, %v13806_v47  ;;  %11452 = vmatprep.mubr.f32.mxu0 %v3990_v54  ;;  %v3994_v54 = vld [vmem:[%s12813_s9 + $0x162] sm:$0xff] }
 0x23e   : > { %v14053_v39 = vpop.f32.mrf.mxu0  ;;  %v14055_v53 = vpop.f32.mrf.mxu1 }
 0x23f   : > { %v14058_v28 = vadd.f32 %v11139_v14, %v2687_v26 }
 0x240   : > { %v11038_v56 = vpop.f32.mrf.mxu0  ;;  %11453 = vmatmul.mubr.f32.gmra.mxu0 %v3991_v45  ;;  %v11142_v8 = vpop.f32.mrf.mxu1  ;;  %v3995_v45 = vld [vmem:[%s12813_s9 + $0x16a] sm:$0xff] }
 0x241   : > { %18556 = vst [vmem:[#allocation36_spill] sm:$0xff] %v14058_v28  ;;  %v2689_v20 = vadd.f32 %v11038_v56, %v13818_v44  ;;  %11455 = vmatprep.mubr.f32.mxu0 %v3992_v60  ;;  %v3996_v60 = vld [vmem:[%s12813_s9 + $0x172] sm:$0xff] }
 0x242   : > { %v14062_v6 = vpop.f32.mrf.mxu0  ;;  %v14064_v47 = vpop.f32.mrf.mxu1 }
 0x243   : > { %18557 = vst [vmem:[#allocation37_spill] sm:$0xff] %v14064_v47  ;;  %v14067_v2 = vadd.f32 %v11142_v8, %v2689_v20 }
 0x244   : > { %v11041_v30 = vpop.f32.mrf.mxu0  ;;  %11456 = vmatmul.mubr.f32.gmra.mxu0 %v3993_v32  ;;  %v11145_v14 = vpop.f32.mrf.mxu1  ;;  %v3997_v32 = vld [vmem:[%s12813_s9 + $0x17a] sm:$0xff] }
 0x245   : > { %18558 = vst [vmem:[#allocation38_spill] sm:$0xff] %v14067_v2  ;;  %v2691_v26 = vadd.f32 %v11041_v30, %v13830_v52  ;;  %11458 = vmatprep.mubr.f32.mxu0 %v3994_v54  ;;  %v3998_v30 = vld [vmem:[%s12813_s9 + $0x182] sm:$0xff] }
 0x246   : > { %v14071_v28 = vpop.f32.mrf.mxu0  ;;  %v14073_v44 = vpop.f32.mrf.mxu1 }
 0x247   : > { %18559 = vst [vmem:[#allocation39_spill] sm:$0xff] %v14073_v44  ;;  %v14076_v56 = vadd.f32 %v11145_v14, %v2691_v26 }
 0x248   : > { %v11044_v47 = vpop.f32.mrf.mxu0  ;;  %11459 = vmatmul.mubr.f32.gmra.mxu0 %v3995_v45  ;;  %v11148_v8 = vpop.f32.mrf.mxu1  ;;  %v3999_v45 = vld [vmem:[%s12813_s9 + $0x18a] sm:$0xff] }
 0x249   : > { %18560 = vst [vmem:[#allocation40_spill] sm:$0xff] %v14076_v56  ;;  %v2693_v20 = vadd.f32 %v11044_v47, %v13842_v12  ;;  %11461 = vmatprep.mubr.f32.mxu0 %v3996_v60  ;;  %v4000_v47 = vld [vmem:[%s12813_s9 + $0x192] sm:$0xff] }
 0x24a   : > { %v14080_v2 = vpop.f32.mrf.mxu0  ;;  %v14082_v52 = vpop.f32.mrf.mxu1 }
 0x24b   : > { %18561 = vst [vmem:[#allocation41_spill] sm:$0xff] %v14082_v52  ;;  %v14085_v54 = vadd.f32 %v11148_v8, %v2693_v20 }
 0x24c   : > { %v11047_v44 = vpop.f32.mrf.mxu0  ;;  %11462 = vmatmul.mubr.f32.gmra.mxu0 %v3997_v32  ;;  %v11151_v14 = vpop.f32.mrf.mxu1  ;;  %v4001_v32 = vld [vmem:[%s12813_s9 + $0x19a] sm:$0xff] }
 0x24d   : > { %18562 = vst [vmem:[#allocation43_spill] sm:$0xff] %v14085_v54  ;;  %v2695_v26 = vadd.f32 %v11047_v44, %v13854_v23  ;;  %11464 = vmatprep.mubr.f32.mxu0 %v3998_v30  ;;  %v4002_v44 = vld [vmem:[%s12813_s9 + $0x1a2] sm:$0xff] }
 0x24e   : > { %v14089_v56 = vpop.f32.mrf.mxu0  ;;  %v14091_v12 = vpop.f32.mrf.mxu1 }
 0x24f   : > { %18563 = vst [vmem:[#allocation42_spill] sm:$0xff] %v14089_v56  ;;  %18564 = vst [vmem:[#allocation46_spill] sm:$0xff] %v14091_v12  ;;  %v14094_v60 = vadd.f32 %v11151_v14, %v2695_v26  ;;  %v4003_v26 = vld [vmem:[%s12813_s9 + $0x1aa] sm:$0xff] }
 0x250   : > { %v11050_v52 = vpop.f32.mrf.mxu0  ;;  %11465 = vmatmul.mubr.f32.gmra.mxu0 %v3999_v45  ;;  %v11154_v8 = vpop.f32.mrf.mxu1 }
 0x251   : > { %18565 = vst [vmem:[#allocation44_spill] sm:$0xff] %v14094_v60  ;;  %v2697_v20 = vadd.f32 %v11050_v52, %v13868_v5  ;;  %11467 = vmatprep.mubr.f32.mxu0 %v4000_v47 }
 0x252   : > { %v14098_v54 = vpop.f32.mrf.mxu0  ;;  %v14100_v23 = vpop.f32.mrf.mxu1 }
 0x253   : > { %18566 = vst [vmem:[#allocation47_spill] sm:$0xff] %v14100_v23  ;;  %v14103_v30 = vadd.f32 %v11154_v8, %v2697_v20  ;;  %v218_v8 = vlaneseq  ;;  %v14114_v20 = vld [vmem:[#allocation2 + $0x1b9] sm:$0xff] }
 0x254   : > { %v11053_v56 = vpop.f32.mrf.mxu0  ;;  %11468 = vmatmul.mubr.f32.gmra.mxu0 %v4001_v32  ;;  %v11157_v12 = vpop.f32.mrf.mxu1 }
 0x255   : > { %18567 = vst [vmem:[#allocation45_spill] sm:$0xff] %v14103_v30  ;;  %v2699_v14 = vadd.f32 %v11053_v56, %v13879_v18  ;;  %11470 = vmatprep.mubr.f32.mxu0 %v4002_v44 }
 0x256   : > { %v14107_v45 = vpop.f32.mrf.mxu0  ;;  %v14109_v60 = vpop.f32.mrf.mxu1 }
 0x257   : > { %18568 = vst [vmem:[#allocation48_spill] sm:$0xff] %v14109_v60  ;;  %v14111_v5 = vadd.f32 %v11157_v12, %v2699_v14  ;;  %v14128_v14 = vshrl.u32 %v218_v8, 7 }
 0x258   : > { %v11056_v52 = vpop.f32.mrf.mxu0  ;;  %11471 = vmatmul.mubr.f32.gmra.mxu0 %v4003_v26  ;;  %v11160_v47 = vpop.f32.mrf.mxu1 }
 0x259   : > { %18569 = vst [vmem:[#allocation50_spill] sm:$0xff] %v14111_v5  ;;  %v2701_v23 = vadd.f32 %v11056_v52, %v13889_v46  ;;  %11609 = vmatprep.mubr.f32.mxu0 %v14114_v20 }
 0x25a   : > { %v14117_v32 = vpop.f32.mrf.mxu0  ;;  %v14119_v18 = vpop.f32.mrf.mxu1 }
 0x25b   : > { %18570 = vst [vmem:[#allocation49_spill] sm:$0xff] %v14117_v32  ;;  %18571 = vst [vmem:[#allocation51_spill] sm:$0xff] %v14119_v18  ;;  %v14121_v56 = vadd.f32 %v11160_v47, %v2701_v23  ;;  %v14138_v18 = vadd.s32 8, %v14128_v14  ;;  %v14189_v32 = vadd.f32 %v13800_v63, %v13804_v35  ;;  %v18593_v63 = vld [vmem:[#allocation17_spill] sm:$0xff] }
 0x25c   : > { %v11195_v44 = vpop.f32.mrf.mxu0  ;;  %v14123_v30 = vpop.f32.mrf.mxu1  ;;  %v14210_v35 = vadd.f32 %v18593_v63, %v13866_v21 }
 0x25d   : > { %18572 = vst [vmem:[#allocation52_spill] sm:$0xff] %v14121_v56  ;;  %18573 = vst [vmem:[#allocation53_spill] sm:$0xff] %v14123_v30  ;;  %v14126_v12 = vadd.f32 %v11195_v44, %v13899_v0  ;;  %v18244_v8 = vcvt.s32.f32 %v14138_v18  ;;  %v18245_v44 = vcvt.s32.f32 %v14128_v14 }
 0x25e   : > { %v14130_v46 = vpop.f32.mrf.mxu0  ;;  %v14132_v26 = vpop.f32.mrf.mxu1 }
 0x25f   : > { %18574 = vst [vmem:[#allocation54_spill] sm:$0xff] %v14126_v12  ;;  %18575 = vst [vmem:[#allocation55_spill] sm:$0xff] %v14130_v46  ;;  %v14185_v46 = vadd.s32 32, %v14128_v14 }
 0x260   : > { %18576 = vst [vmem:[#allocation56_spill] sm:$0xff] %v14132_v26  ;;  %v11198_v52 = vpop.f32.mrf.mxu0  ;;  %v14142_v47 = vpop.f32.mrf.mxu1 }
 0x261   : > { %v14135_v5 = vadd.f32 %v11198_v52, %v13909_v55  ;;  %18579 = vst [vmem:[#allocation59_spill] sm:$0xff] %v14142_v47  ;;  %v14154_v55 = vadd.s32 24, %v14128_v14  ;;  %v316_v47 = vmul.f32 0.041666668, %v18244_v8 }
 0x262   : > { %v14140_v23 = vpop.f32.mrf.mxu0  ;;  %v14149_v26 = vpop.f32.mrf.mxu1 }
 0x263   : > { %18577 = vst [vmem:[#allocation57_spill] sm:$0xff] %v14135_v5  ;;  %18578 = vst [vmem:[#allocation58_spill] sm:$0xff] %v14140_v23  ;;  %v14172_v23 = vadd.s32 40, %v14128_v14  ;;  %v364_v8 = vadd.f32 0.020833334, %v316_v47  ;;  %v14197_v47 = vadd.f32 %v13824_v48, %v13828_v33  ;;  %v14218_v33 = vadd.f32 %v13883_v50, %v13887_v62  ;;  %v18600_v50 = vld [vmem:[#allocation20_spill] sm:$0xff] }
 0x264   : > { %v11201_v56 = vpop.f32.mrf.mxu0  ;;  %18581 = vst [vmem:[#allocation61_spill] sm:$0xff] %v14149_v26  ;;  %v18246_v26 = vcvt.s32.f32 %v14154_v55 }
 0x265   : > { %v14145_v0 = vadd.f32 %v11201_v56, %v13919_v31  ;;  %v315_v31 = vmul.f32 0.041666668, %v18245_v44  ;;  %v14163_v56 = vpop.f32.mrf.mxu1 }
 0x266   : > { %v14151_v30 = vpop.f32.mrf.mxu0  ;;  %18584 = vst [vmem:[#allocation64_spill] sm:$0xff] %v14163_v56 }
 0x267   : > { %18580 = vst [vmem:[#allocation60_spill] sm:$0xff] %v14145_v0  ;;  %18582 = vst [vmem:[#allocation62_spill] sm:$0xff] %v14151_v30  ;;  %v14169_v30 = vadd.s32 16, %v14128_v14  ;;  %v14177_v12 = vpop.f32.mrf.mxu1 }
 0x268   : > { %v11204_v52 = vpop.f32.mrf.mxu0  ;;  %18587 = vst [vmem:[#allocation67_spill] sm:$0xff] %v14177_v12 }
 0x269   : > { %v14157_v5 = vadd.f32 %v11204_v52, %v13929_v59  ;;  %v14227_v21 = vpop.f32.mrf.mxu1 }
 0x26a   : > { %v14165_v0 = vpop.f32.mrf.mxu0 }
 0x26b   : > { %18583 = vst [vmem:[#allocation63_spill] sm:$0xff] %v14157_v5  ;;  %18585 = vst [vmem:[#allocation65_spill] sm:$0xff] %v14165_v0  ;;  %v363_v5 = vadd.f32 0.020833334, %v315_v31  ;;  %v318_v0 = vmul.f32 0.041666668, %v18246_v26 }
 0x26c   : > { %v11207_v59 = vpop.f32.mrf.mxu0  ;;  %v18590_v26 = vld [vmem:[#allocation13_spill] sm:$0xff] }
 0x26d   : > { %v14175_v52 = vadd.f32 %v11207_v59, %v13939_v15  ;;  %v14193_v15 = vadd.f32 %v13812_v37, %v13816_v58  ;;  %v18589_v59 = vld [vmem:[#allocation14_spill] sm:$0xff]  ;;  %v411_v31 = vfloor.f32 %v363_v5  ;;  %18597 = vst [vmem:[#allocation13_spill] sm:$0xff] %v14227_v21  ;;  %v18601_v5 = vld [vmem:[#allocation21_spill] sm:$0xff] }
 0x26e   : > { %v14179_v44 = vpop.f32.mrf.mxu0  ;;  %v14202_v56 = vadd.f32 %v18590_v26, %v18589_v59  ;;  %v18594_v37 = vld [vmem:[#allocation18_spill] sm:$0xff]  ;;  %v412_v59 = vfloor.f32 %v364_v8  ;;  %v14240_v8 = vadd.f32 %v18601_v5, %v13917_v24  ;;  %v18607_v24 = vld [vmem:[#allocation25_spill] sm:$0xff] }
 0x26f   : > { %18586 = vst [vmem:[#allocation66_spill] sm:$0xff] %v14175_v52  ;;  %18588 = vst [vmem:[#allocation68_spill] sm:$0xff] %v14179_v44  ;;  %v18591_v52 = vld [vmem:[#allocation16_spill] sm:$0xff]  ;;  %v18592_v44 = vld [vmem:[#allocation15_spill] sm:$0xff]  ;;  %v14214_v58 = vadd.f32 %v18594_v37, %v13877_v19  ;;  %v366_v19 = vadd.f32 0.020833334, %v318_v0  ;;  %v18599_v37 = vcvt.s32.f32 %v14169_v30  ;;  %v14261_v5 = vadd.f32 %v18607_v24, %v13957_v34 }
 0x270   : > { %v14206_v12 = vadd.f32 %v18592_v44, %v18591_v52  ;;  %v11210_v48 = vpop.f32.mrf.mxu0  ;;  %v18596_v44 = vld [vmem:[#allocation19_spill] sm:$0xff]  ;;  %18602 = vst [vmem:[#allocation15_spill] sm:$0xff] %v14240_v8  ;;  %v18604_v0 = vld [vmem:[#allocation22_spill] sm:$0xff]  ;;  %v460_v21 = vmul.f32 24.0, %v412_v59  ;;  %v459_v8 = vmul.f32 24.0, %v411_v31  ;;  %v18610_v24 = vcvt.s32.f32 %v14185_v46 }
 0x271   : > { %v14221_v26 = vadd.f32 %v11210_v48, %v13949_v42  ;;  %v14225_v52 = vadd.f32 %v18596_v44, %v13897_v41  ;;  %v317_v60 = vmul.f32 0.041666668, %v18599_v37  ;;  %v14236_v42 = vadd.f32 %v18600_v50, %v13907_v1  ;;  %v18605_v37 = vld [vmem:[#allocation23_spill] sm:$0xff]  ;;  %v18606_v1 = vld [vmem:[#allocation24_spill] sm:$0xff]  ;;  %18608 = vst [vmem:[#allocation17_spill] sm:$0xff] %v14261_v5 }
 0x272   : > { %v14229_v63 = vpop.f32.mrf.mxu0  ;;  %v18603_v41 = vcvt.s32.f32 %v14172_v23  ;;  %v14245_v44 = vadd.s32 56, %v14128_v14  ;;  %v14253_v62 = vadd.f32 %v18605_v37, %v13937_v29  ;;  %v14257_v50 = vadd.f32 %v18606_v1, %v13947_v57  ;;  %v18609_v29 = vld [vmem:[#allocation26_spill] sm:$0xff]  ;;  %v14273_v37 = vpop.f32.mrf.mxu1 }
 0x273   : > { %18595 = vst [vmem:[#allocation14_spill] sm:$0xff] %v14221_v26  ;;  %18598 = vst [vmem:[#allocation16_spill] sm:$0xff] %v14229_v63  ;;  %v14249_v26 = vadd.f32 %v18604_v0, %v13927_v51  ;;  %v14267_v51 = vadd.s32 48, %v14128_v14  ;;  %v14271_v0 = vadd.f32 %v18609_v29, %v13967_v40  ;;  %v414_v1 = vfloor.f32 %v366_v19 }
 0x274   : > { %v320_v48 = vmul.f32 0.041666668, %v18603_v41  ;;  %v11213_v41 = vpop.f32.mrf.mxu0  ;;  %v365_v34 = vadd.f32 0.020833334, %v317_v60  ;;  %v319_v5 = vmul.f32 0.041666668, %v18610_v24  ;;  %v14289_v40 = vadd.f32 %v13983_v7, %v13987_v11 }
 0x275   : > { %v14264_v63 = vadd.f32 %v11213_v41, %v13959_v27  ;;  %v14281_v27 = vadd.f32 %v13973_v38, %v13977_v49  ;;  %v14285_v41 = vadd.s32 72, %v14128_v14  ;;  %v14293_v60 = vadd.f32 %v13993_v13, %v13997_v61  ;;  %v14311_v13 = vpop.f32.mrf.mxu1 }
 0x276   : > { %v14275_v57 = vpop.f32.mrf.mxu0  ;;  %v368_v31 = vadd.f32 0.020833334, %v320_v48  ;;  %18611 = vst [vmem:[#allocation18_spill] sm:$0xff] %v14289_v40  ;;  %v14297_v19 = vadd.f32 %v14003_v43, %v14007_v17  ;;  %v14301_v49 = vadd.f32 %v14013_v36, %v14017_v4  ;;  %v18615_v48 = vld [vmem:[#allocation27_spill] sm:$0xff]  ;;  %v18616_v24 = vcvt.s32.f32 %v14138_v18 }
 0x277   : > { %18612 = vst [vmem:[#allocation19_spill] sm:$0xff] %v14293_v60  ;;  %v18617_v7 = vcvt.s32.f32 %v14128_v14  ;;  %v18247_v61 = vcvt.s32.f32 %v14267_v51  ;;  %v462_v43 = vmul.f32 24.0, %v414_v1  ;;  %v367_v4 = vadd.f32 0.020833334, %v319_v5 }
 0x278   : > { %18613 = vst [vmem:[#allocation20_spill] sm:$0xff] %v14297_v19  ;;  %18614 = vst [vmem:[#allocation21_spill] sm:$0xff] %v14301_v49  ;;  %v11216_v38 = vpop.f32.mrf.mxu0  ;;  %v508_v11 = vsub.f32 %v18616_v24, %v460_v21  ;;  %v413_v19 = vfloor.f32 %v365_v34  ;;  %v14316_v36 = vadd.s32 64, %v14128_v14  ;;  %v14326_v24 = vadd.f32 %v14023_v25, %v14027_v10  ;;  %v14344_v25 = vpop.f32.mrf.mxu1 }
 0x279   : > { %v14304_v29 = vadd.f32 %v11216_v38, %v18615_v48  ;;  %v507_v59 = vsub.f32 %v18617_v7, %v459_v8  ;;  %v416_v38 = vfloor.f32 %v368_v31  ;;  %v18618_v48 = vcvt.s32.f32 %v14245_v44  ;;  %v18622_v7 = vld [vmem:[#allocation28_spill] sm:$0xff] }
 0x27a   : > { %v14313_v17 = vpop.f32.mrf.mxu0  ;;  %v14322_v8 = vadd.s32 88, %v14128_v14  ;;  %18619 = vst [vmem:[#allocation22_spill] sm:$0xff] %v14326_v24  ;;  %v14330_v1 = vadd.f32 %v14033_v9, %v14037_v16  ;;  %v14334_v5 = vadd.f32 %v14043_v3, %v14047_v22  ;;  %v14337_v31 = vadd.s32 80, %v14128_v14 }
 0x27b   : > { %v322_v18 = vmul.f32 0.041666668, %v18618_v48  ;;  %vm556_vm0 = vcmp.lt.f32.partialorder %v508_v11, 15.5  ;;  %vm555_vm1 = vcmp.lt.f32.partialorder %v507_v59, 15.5  ;;  %v321_v10 = vmul.f32 0.041666668, %v18247_v61 }
 0x27c   : > { %18620 = vst [vmem:[#allocation23_spill] sm:$0xff] %v14330_v1  ;;  %18621 = vst [vmem:[#allocation24_spill] sm:$0xff] %v14334_v5  ;;  %v11219_v34 = vpop.f32.mrf.mxu0  ;;  %v18623_v9 = vcvt.s32.f32 %v14154_v55  ;;  %v461_v3 = vmul.f32 24.0, %v413_v19  ;;  %v415_v21 = vfloor.f32 %v367_v4  ;;  %v18250_v5 = vcvt.s32.f32 %v14316_v36 }
 0x27d   : > { %v14340_v48 = vadd.f32 %v11219_v34, %v18622_v7  ;;  %v464_v1 = vmul.f32 24.0, %v416_v38  ;;  %v370_v24 = vadd.f32 0.020833334, %v322_v18  ;;  %v18624_v34 = vcvt.s32.f32 %v14285_v41 }
 0x27e   : > { %v14346_v16 = vpop.f32.mrf.mxu0  ;;  %v510_v22 = vsub.f32 %v18623_v9, %v462_v43  ;;  %v2686_v61 = vadd.f32 %v14053_v39, %v14189_v32  ;;  %v14357_v60 = vsel %vm556_vm0, 1.0, %v14114_v20  ;;  %v14361_v19 = vadd.s32 104, %v14128_v14  ;;  %v18626_v43 = vld [vmem:[#allocation29_spill] sm:$0xff]  ;;  %v14373_v39 = vpop.f32.mrf.mxu1 }
 0x27f   : > { %v324_v11 = vmul.f32 0.041666668, %v18624_v34  ;;  %18625 = vst [vmem:[#allocation25_spill] sm:$0xff] %v14357_v60  ;;  %v14368_v38 = vsel %vm555_vm1, 1.0, %v14114_v20  ;;  %v369_v18 = vadd.f32 0.020833334, %v321_v10  ;;  %v18629_v34 = vcvt.s32.f32 %v14169_v30 }
 0x280   : > { %v11222_v49 = vpop.f32.mrf.mxu0  ;;  %18628 = vst [vmem:[#allocation27_spill] sm:$0xff] %v14368_v38  ;;  %v14371_v9 = vadd.s32 96, %v14128_v14  ;;  %vm558_vm2 = vcmp.lt.f32.partialorder %v510_v22, 15.5  ;;  %v463_v7 = vmul.f32 24.0, %v415_v21  ;;  %v18630_v59 = vcvt.s32.f32 %v14172_v23 }
 0x281   : > { %v14364_v4 = vadd.f32 %v11222_v49, %v18626_v43  ;;  %v509_v55 = vsub.f32 %v18629_v34, %v461_v3  ;;  %v323_v49 = vmul.f32 0.041666668, %v18250_v5  ;;  %v418_v60 = vfloor.f32 %v370_v24  ;;  %v18634_v5 = vld [vmem:[#allocation30_spill] sm:$0xff]  ;;  %v18638_v34 = vld [vmem:[#allocation37_spill] sm:$0xff] }
 0x282   : > { %v14375_v32 = vpop.f32.mrf.mxu0  ;;  %v512_v43 = vsub.f32 %v18630_v59, %v464_v1  ;;  %v372_v10 = vadd.f32 0.020833334, %v324_v11  ;;  %v18631_v38 = vcvt.s32.f32 %v14322_v8  ;;  %v14386_v40 = vadd.f32 %v14055_v53, %v2686_v61  ;;  %v14400_v53 = vpop.f32.mrf.mxu1 }
 0x283   : > { %18627 = vst [vmem:[#allocation26_spill] sm:$0xff] %v14364_v4  ;;  %v2688_v22 = vadd.f32 %v14062_v6, %v14193_v15  ;;  %v18633_v21 = vcvt.s32.f32 %v14337_v31  ;;  %v14397_v24 = vsel %vm558_vm2, 1.0, %v14114_v20  ;;  %v417_v1 = vfloor.f32 %v369_v18 }
 0x284   : > { %v326_v4 = vmul.f32 0.041666668, %v18631_v38  ;;  %18632 = vst [vmem:[#allocation28_spill] sm:$0xff] %v14386_v40  ;;  %v11225_v30 = vpop.f32.mrf.mxu0  ;;  %18636 = vst [vmem:[#allocation30_spill] sm:$0xff] %v14397_v24  ;;  %vm557_vm3 = vcmp.lt.f32.partialorder %v509_v55, 15.5  ;;  %v18637_v6 = vcvt.s32.f32 %v14185_v46  ;;  %v14407_v59 = vadd.s32 120, %v14128_v14 }
 0x285   : > { %v325_v3 = vmul.f32 0.041666668, %v18633_v21  ;;  %v14394_v23 = vadd.f32 %v11225_v30, %v18634_v5  ;;  %v371_v38 = vadd.f32 0.020833334, %v323_v49  ;;  %vm560_vm4 = vcmp.lt.f32.partialorder %v512_v43, 15.5 }
 0x286   : > { %v14402_v61 = vpop.f32.mrf.mxu0  ;;  %v511_v15 = vsub.f32 %v18637_v6, %v463_v7  ;;  %v466_v5 = vmul.f32 24.0, %v418_v60  ;;  %v420_v30 = vfloor.f32 %v372_v10  ;;  %v374_v21 = vadd.f32 0.020833334, %v326_v4  ;;  %v18641_v7 = vld [vmem:[#allocation31_spill] sm:$0xff]  ;;  %v14424_v10 = vpop.f32.mrf.mxu1 }
 0x287   : > { %18635 = vst [vmem:[#allocation29_spill] sm:$0xff] %v14394_v23  ;;  %v14410_v18 = vadd.f32 %v18638_v34, %v2688_v22  ;;  %v2690_v11 = vadd.f32 %v14071_v28, %v14197_v47  ;;  %v373_v24 = vadd.f32 0.020833334, %v325_v3  ;;  %v18640_v55 = vcvt.s32.f32 %v14361_v19 }
 0x288   : > { %v11228_v40 = vpop.f32.mrf.mxu0  ;;  %v14420_v6 = vsel %vm557_vm3, 1.0, %v14114_v20  ;;  %v465_v60 = vmul.f32 24.0, %v417_v1  ;;  %v18644_v4 = vcvt.s32.f32 %v14371_v9  ;;  %v14429_v28 = vsel %vm560_vm4, 1.0, %v14114_v20 }
 0x289   : > { %18639 = vst [vmem:[#allocation37_spill] sm:$0xff] %v14410_v18  ;;  %v328_v46 = vmul.f32 0.041666668, %v18640_v55  ;;  %v14417_v49 = vadd.f32 %v11228_v40, %v18641_v7  ;;  %18643 = vst [vmem:[#allocation69_spill] sm:$0xff] %v14420_v6  ;;  %vm559_vm5 = vcmp.lt.f32.partialorder %v511_v15, 15.5  ;;  %v419_v47 = vfloor.f32 %v371_v38  ;;  %v18650_v38 = vld [vmem:[#allocation32_spill] sm:$0xff] }
 0x28a   : > { %v327_v43 = vmul.f32 0.041666668, %v18644_v4  ;;  %v14426_v22 = vpop.f32.mrf.mxu0  ;;  %18646 = vst [vmem:[#allocation71_spill] sm:$0xff] %v14429_v28  ;;  %v2692_v40 = vadd.f32 %v14080_v2, %v14202_v56  ;;  %v18647_v34 = vcvt.s32.f32 %v14245_v44  ;;  %v468_v55 = vmul.f32 24.0, %v420_v30  ;;  %v18648_v4 = vld [vmem:[#allocation39_spill] sm:$0xff]  ;;  %v14452_v30 = vpop.f32.mrf.mxu1 }
 0x28b   : > { %18642 = vst [vmem:[#allocation31_spill] sm:$0xff] %v14417_v49  ;;  %18645 = vst [vmem:[#allocation70_spill] sm:$0xff] %v14426_v22  ;;  %v422_v7 = vfloor.f32 %v374_v21  ;;  %v14437_v18 = vadd.f32 %v18648_v4, %v2690_v11  ;;  %v421_v22 = vfloor.f32 %v373_v24  ;;  %v376_v6 = vadd.f32 0.020833334, %v328_v46 }
 0x28c   : > { %v514_v1 = vsub.f32 %v18647_v34, %v466_v5  ;;  %v11231_v49 = vpop.f32.mrf.mxu0  ;;  %v14440_v28 = vadd.s32 112, %v14128_v14  ;;  %v18652_v3 = vcvt.s32.f32 %v14267_v51  ;;  %v375_v56 = vadd.f32 0.020833334, %v327_v43  ;;  %v18653_v5 = vld [vmem:[#allocation42_spill] sm:$0xff] }
 0x28d   : > { %18649 = vst [vmem:[#allocation39_spill] sm:$0xff] %v14437_v18  ;;  %v14443_v23 = vadd.f32 %v11231_v49, %v18650_v38  ;;  %v14448_v44 = vadd.s32 136, %v14128_v14  ;;  %v2694_v11 = vadd.f32 %v18653_v5, %v14206_v12  ;;  %v14458_v21 = vsel %vm559_vm5, 1.0, %v14114_v20 }
 0x28e   : > { %v513_v2 = vsub.f32 %v18652_v3, %v465_v60  ;;  %v14454_v24 = vpop.f32.mrf.mxu0  ;;  %18655 = vst [vmem:[#allocation72_spill] sm:$0xff] %v14458_v21  ;;  %v467_v46 = vmul.f32 24.0, %v419_v47  ;;  %v18656_v49 = vcvt.s32.f32 %v14407_v59  ;;  %v18657_v60 = vld [vmem:[#allocation41_spill] sm:$0xff]  ;;  %vm562_vm6 = vcmp.lt.f32.partialorder %v514_v1, 15.5  ;;  %v18662_v1 = vld [vmem:[#allocation46_spill] sm:$0xff] }
 0x28f   : > { %18651 = vst [vmem:[#allocation32_spill] sm:$0xff] %v14443_v23  ;;  %18654 = vst [vmem:[#allocation42_spill] sm:$0xff] %v14454_v24  ;;  %v14463_v43 = vadd.f32 %v18657_v60, %v2692_v40  ;;  %v18659_v3 = vcvt.s32.f32 %v14285_v41  ;;  %v470_v12 = vmul.f32 24.0, %v422_v7  ;;  %v469_v38 = vmul.f32 24.0, %v421_v22  ;;  %v18660_v47 = vld [vmem:[#allocation33_spill] sm:$0xff]  ;;  %v14478_v41 = vpop.f32.mrf.mxu1 }
 0x290   : > { %v330_v51 = vmul.f32 0.041666668, %v18656_v49  ;;  %v11234_v4 = vpop.f32.mrf.mxu0  ;;  %v424_v5 = vfloor.f32 %v376_v6  ;;  %v14469_v15 = vadd.s32 128, %v14128_v14  ;;  %vm561_vm7 = vcmp.lt.f32.partialorder %v513_v2, 15.5 }
 0x291   : > { %18658 = vst [vmem:[#allocation41_spill] sm:$0xff] %v14463_v43  ;;  %v516_v34 = vsub.f32 %v18659_v3, %v468_v55  ;;  %v14472_v23 = vadd.f32 %v11234_v4, %v18660_v47  ;;  %v423_v49 = vfloor.f32 %v375_v56  ;;  %v14476_v60 = vadd.f32 %v18662_v1, %v2694_v11 }
 0x292   : > { %v14480_v55 = vpop.f32.mrf.mxu0  ;;  %v14483_v6 = vsel %vm562_vm6, 1.0, %v14114_v20  ;;  %v18666_v22 = vcvt.s32.f32 %v14316_v36  ;;  %v378_v3 = vadd.f32 0.020833334, %v330_v51  ;;  %v2696_v4 = vadd.f32 %v14098_v54, %v14210_v35  ;;  %v18670_v51 = vld [vmem:[#allocation34_spill] sm:$0xff] }
 0x293   : > { %18661 = vst [vmem:[#allocation33_spill] sm:$0xff] %v14472_v23  ;;  %18663 = vst [vmem:[#allocation46_spill] sm:$0xff] %v14476_v60  ;;  %v2698_v56 = vadd.f32 %v14107_v45, %v14214_v58  ;;  %vm564_vm8 = vcmp.lt.f32.partialorder %v516_v34, 15.5  ;;  %v18667_v11 = vcvt.s32.f32 %v14322_v8  ;;  %v18668_v40 = vcvt.s32.f32 %v14337_v31  ;;  %v14507_v8 = vpop.f32.mrf.mxu1 }
 0x294   : > { %18664 = vst [vmem:[#allocation73_spill] sm:$0xff] %v14480_v55  ;;  %18665 = vst [vmem:[#allocation74_spill] sm:$0xff] %v14483_v6  ;;  %v515_v7 = vsub.f32 %v18666_v22, %v467_v46  ;;  %v11237_v1 = vpop.f32.mrf.mxu0  ;;  %v472_v60 = vmul.f32 24.0, %v424_v5  ;;  %v18669_v43 = vcvt.s32.f32 %v14440_v28  ;;  %v18254_v46 = vcvt.s32.f32 %v14469_v15  ;;  %v18675_v5 = vld [vmem:[#allocation47_spill] sm:$0xff]  ;;  %v18716_v6 = vld [vmem:[#allocation64_spill] sm:$0xff] }
 0x295   : > { %v518_v47 = vsub.f32 %v18667_v11, %v470_v12  ;;  %v517_v18 = vsub.f32 %v18668_v40, %v469_v38  ;;  %v14499_v22 = vadd.f32 %v11237_v1, %v18670_v51  ;;  %v14503_v54 = vsel %vm561_vm7, 1.0, %v14114_v20  ;;  %v18677_v40 = vld [vmem:[#allocation48_spill] sm:$0xff] }
 0x296   : > { %v329_v36 = vmul.f32 0.041666668, %v18669_v43  ;;  %18672 = vst [vmem:[#allocation75_spill] sm:$0xff] %v14503_v54  ;;  %v471_v45 = vmul.f32 24.0, %v423_v49  ;;  %v18673_v35 = vcvt.s32.f32 %v14448_v44  ;;  %v14509_v31 = vpop.f32.mrf.mxu0  ;;  %vm563_vm9 = vcmp.lt.f32.partialorder %v515_v7, 15.5  ;;  %v18717_v54 = vld [vmem:[#allocation40_spill] sm:$0xff] }
 0x297   : > { %18671 = vst [vmem:[#allocation34_spill] sm:$0xff] %v14499_v22  ;;  %18674 = vst [vmem:[#allocation76_spill] sm:$0xff] %v14509_v31  ;;  %v426_v12 = vfloor.f32 %v378_v3  ;;  %v14512_v43 = vadd.s32 152, %v14128_v14  ;;  %v14515_v38 = vadd.s32 144, %v14128_v14  ;;  %v14518_v2 = vadd.f32 %v18675_v5, %v2696_v4  ;;  %v18681_v22 = vld [vmem:[#allocation35_spill] sm:$0xff] }
 0x298   : > { %v332_v58 = vmul.f32 0.041666668, %v18673_v35  ;;  %v14521_v49 = vadd.f32 %v18677_v40, %v2698_v56  ;;  %v14525_v11 = vsel %vm564_vm8, 1.0, %v14114_v20  ;;  %vm566_vm10 = vcmp.lt.f32.partialorder %v518_v47, 15.5  ;;  %v11240_v1 = vpop.f32.mrf.mxu0  ;;  %v14539_v47 = vpop.f32.mrf.mxu1 }
 0x299   : > { %18676 = vst [vmem:[#allocation47_spill] sm:$0xff] %v14518_v2  ;;  %18679 = vst [vmem:[#allocation77_spill] sm:$0xff] %v14525_v11  ;;  %vm565_vm11 = vcmp.lt.f32.partialorder %v517_v18, 15.5  ;;  %v18680_v7 = vcvt.s32.f32 %v14361_v19  ;;  %v377_v51 = vadd.f32 0.020833334, %v329_v36  ;;  %v14532_v4 = vadd.f32 %v11240_v1, %v18681_v22  ;;  %v18687_v1 = vld [vmem:[#allocation49_spill] sm:$0xff] }
 0x29a   : > { %18678 = vst [vmem:[#allocation48_spill] sm:$0xff] %v14521_v49  ;;  %v331_v35 = vmul.f32 0.041666668, %v18254_v46  ;;  %v14535_v56 = vsel %vm563_vm9, 1.0, %v14114_v20  ;;  %v18684_v34 = vcvt.s32.f32 %v14371_v9  ;;  %v380_v40 = vadd.f32 0.020833334, %v332_v58  ;;  %v14541_v49 = vpop.f32.mrf.mxu0 }
 0x29b   : > { %v520_v3 = vsub.f32 %v18680_v7, %v472_v60  ;;  %18682 = vst [vmem:[#allocation35_spill] sm:$0xff] %v14532_v4  ;;  %18683 = vst [vmem:[#allocation78_spill] sm:$0xff] %v14535_v56  ;;  %v14544_v19 = vsel %vm566_vm10, 1.0, %v14114_v20  ;;  %v474_v60 = vmul.f32 24.0, %v426_v12  ;;  %v14550_v7 = vadd.f32 %v18687_v1, %v14218_v33  ;;  %v18689_v9 = vld [vmem:[#allocation55_spill] sm:$0xff]  ;;  %v18691_v46 = vld [vmem:[#allocation54_spill] sm:$0xff] }
 0x29c   : > { %v519_v5 = vsub.f32 %v18684_v34, %v471_v45  ;;  %18685 = vst [vmem:[#allocation79_spill] sm:$0xff] %v14541_v49  ;;  %18686 = vst [vmem:[#allocation80_spill] sm:$0xff] %v14544_v19  ;;  %v3490_v45 = vadd.f32 %v18689_v9, %v14225_v52  ;;  %v14556_v58 = vsel %vm565_vm11, 1.0, %v14114_v20  ;;  %v14559_v34 = vadd.s32 168, %v14128_v14  ;;  %v18692_v12 = vld [vmem:[#allocation53_spill] sm:$0xff]  ;;  %v11243_v36 = vpop.f32.mrf.mxu0  ;;  %v18693_v33 = vld [vmem:[#allocation36_spill] sm:$0xff]  ;;  %v14571_v9 = vpop.f32.mrf.mxu1 }
 0x29d   : > { %18688 = vst [vmem:[#allocation49_spill] sm:$0xff] %v14550_v7  ;;  %18690 = vst [vmem:[#allocation55_spill] sm:$0xff] %v14556_v58  ;;  %v14563_v2 = vadd.f32 %v18692_v12, %v18691_v46  ;;  %vm568_vm12 = vcmp.lt.f32.partialorder %v520_v3, 15.5  ;;  %v425_v22 = vfloor.f32 %v377_v51  ;;  %v379_v4 = vadd.f32 0.020833334, %v331_v35 }
 0x29e   : > { %v14566_v1 = vadd.f32 %v11243_v36, %v18693_v33  ;;  %vm567_vm13 = vcmp.lt.f32.partialorder %v519_v5, 15.5  ;;  %v428_v52 = vfloor.f32 %v380_v40  ;;  %v14569_v18 = vadd.s32 160, %v14128_v14  ;;  %v14573_v7 = vpop.f32.mrf.mxu0  ;;  %v18699_v40 = vld [vmem:[#allocation56_spill] sm:$0xff]  ;;  %v14609_v11 = vpop.f32.mrf.mxu1 }
 0x29f   : > { %18695 = vst [vmem:[#allocation53_spill] sm:$0xff] %v14573_v7  ;;  %v18696_v49 = vcvt.s32.f32 %v14407_v59  ;;  %v18697_v12 = vcvt.s32.f32 %v14512_v43  ;;  %v18698_v51 = vcvt.s32.f32 %v14515_v38  ;;  %v14582_v36 = vadd.s32 184, %v14128_v14  ;;  %v18710_v7 = vld [vmem:[#allocation61_spill] sm:$0xff] }
 0x2a0   : > { %18694 = vst [vmem:[#allocation54_spill] sm:$0xff] %v14566_v1  ;;  %v14585_v33 = vadd.f32 %v18699_v40, %v3490_v45  ;;  %v18700_v1 = vld [vmem:[#allocation58_spill] sm:$0xff]  ;;  %v14591_v59 = vadd.s32 176, %v14128_v14  ;;  %v11246_v58 = vpop.f32.mrf.mxu0  ;;  %v473_v23 = vmul.f32 24.0, %v425_v22  ;;  %v427_v45 = vfloor.f32 %v379_v4 }
 0x2a1   : > { %v522_v46 = vsub.f32 %v18696_v49, %v474_v60  ;;  %v334_v31 = vmul.f32 0.041666668, %v18697_v12  ;;  %v333_v35 = vmul.f32 0.041666668, %v18698_v51  ;;  %v3492_v19 = vadd.f32 %v18700_v1, %v14236_v42  ;;  %v18701_v49 = vld [vmem:[#allocation57_spill] sm:$0xff]  ;;  %v18702_v60 = vld [vmem:[#allocation59_spill] sm:$0xff] }
 0x2a2   : > { %v14595_v12 = vadd.f32 %v18702_v60, %v18701_v49  ;;  %v14599_v51 = vsel %vm568_vm12, 1.0, %v14114_v20  ;;  %v18705_v40 = vld [vmem:[#allocation38_spill] sm:$0xff]  ;;  %v14606_v42 = vsel %vm567_vm13, 1.0, %v14114_v20  ;;  %v476_v1 = vmul.f32 24.0, %v428_v52  ;;  %v14611_v49 = vpop.f32.mrf.mxu0 }
 0x2a3   : > { %18704 = vst [vmem:[#allocation56_spill] sm:$0xff] %v14599_v51  ;;  %v14602_v55 = vadd.f32 %v11246_v58, %v18705_v40  ;;  %18707 = vst [vmem:[#allocation57_spill] sm:$0xff] %v14606_v42  ;;  %vm570_vm14 = vcmp.lt.f32.partialorder %v522_v46, 15.5  ;;  %v382_v3 = vadd.f32 0.020833334, %v334_v31  ;;  %v18709_v4 = vcvt.s32.f32 %v14559_v34  ;;  %v18713_v51 = vld [vmem:[#allocation62_spill] sm:$0xff] }
 0x2a4   : > { %18703 = vst [vmem:[#allocation36_spill] sm:$0xff] %v14595_v12  ;;  %18708 = vst [vmem:[#allocation59_spill] sm:$0xff] %v14611_v49  ;;  %v381_v60 = vadd.f32 0.020833334, %v333_v35  ;;  %v14618_v5 = vadd.s32 200, %v14128_v14  ;;  %v14621_v52 = vadd.s32 192, %v14128_v14  ;;  %v11249_v35 = vpop.f32.mrf.mxu0  ;;  %v18714_v22 = vcvt.s32.f32 %v14440_v28 }
 0x2a5   : > { %18706 = vst [vmem:[#allocation58_spill] sm:$0xff] %v14602_v55  ;;  %v336_v58 = vmul.f32 0.041666668, %v18709_v4  ;;  %v14624_v55 = vadd.f32 %v18710_v7, %v3492_v19  ;;  %v18712_v49 = vld [vmem:[#allocation15_spill] sm:$0xff]  ;;  %v475_v56 = vmul.f32 24.0, %v427_v45  ;;  %v18715_v4 = vld [vmem:[#allocation60_spill] sm:$0xff]  ;;  %v14635_v24 = vadd.f32 %v11249_v35, %v18717_v54 }
 0x2a6   : > { %v3494_v31 = vadd.f32 %v18713_v51, %v18712_v49  ;;  %v521_v42 = vsub.f32 %v18714_v22, %v473_v23  ;;  %v14632_v40 = vadd.f32 %v18716_v6, %v18715_v4  ;;  %v18719_v21 = vcvt.s32.f32 %v14448_v44  ;;  %v14643_v51 = vpop.f32.mrf.mxu0  ;;  %v18725_v35 = vld [vmem:[#allocation67_spill] sm:$0xff]  ;;  %v18727_v46 = vld [vmem:[#allocation65_spill] sm:$0xff] }
 0x2a7   : > { %18711 = vst [vmem:[#allocation38_spill] sm:$0xff] %v14624_v55  ;;  %18718 = vst [vmem:[#allocation61_spill] sm:$0xff] %v14635_v24  ;;  %v18720_v19 = vcvt.s32.f32 %v14569_v18  ;;  %v14641_v55 = vpop.f32.mrf.mxu1  ;;  %v14647_v23 = vsel %vm570_vm14, 1.0, %v14114_v20  ;;  %v430_v28 = vfloor.f32 %v382_v3  ;;  %v429_v6 = vfloor.f32 %v381_v60  ;;  %v18731_v22 = vld [vmem:[#allocation63_spill] sm:$0xff] }
 0x2a8   : > { %v524_v12 = vsub.f32 %v18719_v21, %v476_v1  ;;  %18721 = vst [vmem:[#allocation15_spill] sm:$0xff] %v14643_v51  ;;  %18722 = vst [vmem:[#allocation62_spill] sm:$0xff] %v14647_v23  ;;  %v18723_v45 = vcvt.s32.f32 %v14582_v36  ;;  %v384_v49 = vadd.f32 0.020833334, %v336_v58  ;;  %v18724_v44 = vcvt.s32.f32 %v14591_v59  ;;  %v11252_v24 = vpop.f32.mrf.mxu0  ;;  %v18732_v51 = vld [vmem:[#allocation13_spill] sm:$0xff] }
 0x2a9   : > { %v335_v7 = vmul.f32 0.041666668, %v18720_v19  ;;  %v14656_v4 = vadd.f32 %v18725_v35, %v3494_v31  ;;  %v3496_v19 = vadd.f32 %v18727_v46, %v14249_v26  ;;  %vm569_vm15 = vcmp.lt.f32.partialorder %v521_v42, 15.5  ;;  %v14672_v35 = vpop.f32.mrf.mxu1 }
 0x2aa   : > { %v338_v54 = vmul.f32 0.041666668, %v18723_v45  ;;  %v337_v21 = vmul.f32 0.041666668, %v18724_v44  ;;  %v18728_v3 = vcvt.s32.f32 %v14469_v15  ;;  %v18729_v45 = vld [vmem:[#allocation43_spill] sm:$0xff]  ;;  %vm572_vm0 = vcmp.lt.f32.partialorder %v524_v12, 15.5  ;;  %v14674_v26 = vpop.f32.mrf.mxu0 }
 0x2ab   : > { %18726 = vst [vmem:[#allocation60_spill] sm:$0xff] %v14656_v4  ;;  %v14663_v58 = vadd.f32 %v11252_v24, %v18729_v45  ;;  %v383_v44 = vadd.f32 0.020833334, %v335_v7  ;;  %v14666_v1 = vadd.s32 216, %v14128_v14  ;;  %v14670_v31 = vadd.f32 %v18732_v51, %v18731_v22  ;;  %18733 = vst [vmem:[#allocation40_spill] sm:$0xff] %v14674_v26 }
 0x2ac   : > { %v523_v60 = vsub.f32 %v18728_v3, %v475_v56  ;;  %v478_v46 = vmul.f32 24.0, %v430_v28  ;;  %v477_v23 = vmul.f32 24.0, %v429_v6  ;;  %v386_v15 = vadd.f32 0.020833334, %v338_v54  ;;  %v11255_v51 = vpop.f32.mrf.mxu0  ;;  %v18739_v6 = vld [vmem:[#allocation68_spill] sm:$0xff] }
 0x2ad   : > { %18730 = vst [vmem:[#allocation64_spill] sm:$0xff] %v14663_v58  ;;  %v432_v56 = vfloor.f32 %v384_v49  ;;  %v385_v3 = vadd.f32 0.020833334, %v337_v21  ;;  %v18734_v24 = vcvt.s32.f32 %v14618_v5  ;;  %v18735_v7 = vcvt.s32.f32 %v14621_v52  ;;  %v18740_v49 = vld [vmem:[#allocation44_spill] sm:$0xff] }
 0x2ae   : > { %v14681_v4 = vadd.f32 %v14273_v37, %v3496_v19  ;;  %v14685_v22 = vsel %vm569_vm15, 1.0, %v14114_v20  ;;  %v14689_v28 = vsel %vm572_vm0, 1.0, %v14114_v20  ;;  %vm571_vm1 = vcmp.lt.f32.partialorder %v523_v60, 15.5  ;;  %v14697_v19 = vpop.f32.mrf.mxu1 }
 0x2af   : > { %v340_v45 = vmul.f32 0.041666668, %v18734_v24  ;;  %v339_v58 = vmul.f32 0.041666668, %v18735_v7  ;;  %18737 = vst [vmem:[#allocation65_spill] sm:$0xff] %v14685_v22  ;;  %18738 = vst [vmem:[#allocation43_spill] sm:$0xff] %v14689_v28  ;;  %v3498_v54 = vadd.f32 %v18739_v6, %v14253_v62  ;;  %v14694_v21 = vadd.f32 %v11255_v51, %v18740_v49  ;;  %v14699_v7 = vpop.f32.mrf.mxu0 }
 0x2b0   : > { %18736 = vst [vmem:[#allocation67_spill] sm:$0xff] %v14681_v4  ;;  %v431_v24 = vfloor.f32 %v383_v44  ;;  %18742 = vst [vmem:[#allocation13_spill] sm:$0xff] %v14699_v7  ;;  %v18743_v42 = vcvt.s32.f32 %v14512_v43  ;;  %v18744_v12 = vcvt.s32.f32 %v14515_v38  ;;  %v434_v22 = vfloor.f32 %v386_v15  ;;  %v18745_v49 = vld [vmem:[#allocation66_spill] sm:$0xff]  ;;  %v18748_v15 = vld [vmem:[#allocation45_spill] sm:$0xff] }
 0x2b1   : > { %18741 = vst [vmem:[#allocation63_spill] sm:$0xff] %v14694_v21  ;;  %v14706_v4 = vadd.s32 208, %v14128_v14  ;;  %v480_v62 = vmul.f32 24.0, %v432_v56  ;;  %v433_v51 = vfloor.f32 %v385_v3  ;;  %v388_v6 = vadd.f32 0.020833334, %v340_v45  ;;  %v18746_v21 = vld [vmem:[#allocation16_spill] sm:$0xff]  ;;  %v11258_v43 = vpop.f32.mrf.mxu0  ;;  %v14729_v45 = vpop.f32.mrf.mxu1 }
 0x2b2   : > { %v526_v26 = vsub.f32 %v18743_v42, %v478_v46  ;;  %v525_v28 = vsub.f32 %v18744_v12, %v477_v23  ;;  %v387_v44 = vadd.f32 0.020833334, %v339_v58  ;;  %v14710_v37 = vadd.f32 %v14311_v13, %v18745_v49 }
 0x2b3   : > { %v3500_v7 = vadd.f32 %v18746_v21, %v14257_v50  ;;  %v14716_v38 = vsel %vm571_vm1, 1.0, %v14114_v20  ;;  %v14719_v23 = vadd.s32 232, %v14128_v14  ;;  %v14722_v46 = vadd.f32 %v14344_v25, %v3498_v54  ;;  %v14731_v50 = vpop.f32.mrf.mxu0  ;;  %v18754_v21 = vld [vmem:[#allocation17_spill] sm:$0xff] }
 0x2b4   : > { %18747 = vst [vmem:[#allocation68_spill] sm:$0xff] %v14716_v38  ;;  %v14725_v58 = vadd.f32 %v11258_v43, %v18748_v15  ;;  %v479_v56 = vmul.f32 24.0, %v431_v24  ;;  %v18750_v13 = vcvt.s32.f32 %v14666_v1  ;;  %18751 = vst [vmem:[#allocation66_spill] sm:$0xff] %v14731_v50  ;;  %vm574_vm2 = vcmp.lt.f32.partialorder %v526_v26, 15.5  ;;  %v18753_v43 = vld [vmem:[#allocation14_spill] sm:$0xff]  ;;  %v18810_v50 = vld [vmem:[#allocation75_spill] sm:$0xff] }
 0x2b5   : > { %vm573_vm3 = vcmp.lt.f32.partialorder %v525_v28, 15.5  ;;  %v482_v60 = vmul.f32 24.0, %v434_v22  ;;  %v18752_v42 = vcvt.s32.f32 %v14559_v34  ;;  %v481_v54 = vmul.f32 24.0, %v433_v51 }
 0x2b6   : > { %18749 = vst [vmem:[#allocation44_spill] sm:$0xff] %v14725_v58  ;;  %v342_v3 = vmul.f32 0.041666668, %v18750_v13  ;;  %v436_v12 = vfloor.f32 %v388_v6  ;;  %v435_v49 = vfloor.f32 %v387_v44  ;;  %v14738_v24 = vadd.f32 %v14373_v39, %v18753_v43  ;;  %v11261_v13 = vpop.f32.mrf.mxu0 }
 0x2b7   : > { %v528_v25 = vsub.f32 %v18752_v42, %v480_v62  ;;  %v14741_v15 = vadd.f32 %v14400_v53, %v3500_v7  ;;  %v14745_v22 = vadd.s32 224, %v14128_v14  ;;  %v3502_v34 = vadd.f32 %v14275_v57, %v18754_v21  ;;  %v18755_v62 = vld [vmem:[#allocation50_spill] sm:$0xff]  ;;  %v14754_v42 = vpop.f32.mrf.mxu1 }
 0x2b8   : > { %v14750_v51 = vadd.f32 %v11261_v13, %v18755_v62  ;;  %v18757_v6 = vcvt.s32.f32 %v14569_v18  ;;  %v390_v39 = vadd.f32 0.020833334, %v342_v3  ;;  %v14756_v53 = vpop.f32.mrf.mxu0  ;;  %v14760_v7 = vsel %vm574_vm2, 1.0, %v14114_v20 }
 0x2b9   : > { %18758 = vst [vmem:[#allocation45_spill] sm:$0xff] %v14756_v53  ;;  %18759 = vst [vmem:[#allocation14_spill] sm:$0xff] %v14760_v7  ;;  %v14764_v43 = vsel %vm573_vm3, 1.0, %v14114_v20  ;;  %v18761_v57 = vcvt.s32.f32 %v14582_v36  ;;  %v18762_v13 = vcvt.s32.f32 %v14706_v4  ;;  %vm576_vm4 = vcmp.lt.f32.partialorder %v528_v25, 15.5 }
 0x2ba   : > { %18756 = vst [vmem:[#allocation16_spill] sm:$0xff] %v14750_v51  ;;  %v527_v44 = vsub.f32 %v18757_v6, %v479_v56  ;;  %18760 = vst [vmem:[#allocation17_spill] sm:$0xff] %v14764_v43  ;;  %v18763_v56 = vcvt.s32.f32 %v14591_v59  ;;  %v484_v62 = vmul.f32 24.0, %v436_v12  ;;  %v483_v6 = vmul.f32 24.0, %v435_v49  ;;  %v11264_v58 = vpop.f32.mrf.mxu0  ;;  %v18765_v59 = vld [vmem:[#allocation52_spill] sm:$0xff] }
 0x2bb   : > { %v530_v21 = vsub.f32 %v18761_v57, %v482_v60  ;;  %v341_v18 = vmul.f32 0.041666668, %v18762_v13  ;;  %v14774_v26 = vadd.f32 %v14424_v10, %v14264_v63  ;;  %v3504_v28 = vadd.f32 %v14313_v17, %v14271_v0  ;;  %v14789_v10 = vpop.f32.mrf.mxu1 }
 0x2bc   : > { %v529_v3 = vsub.f32 %v18763_v56, %v481_v54  ;;  %v18764_v36 = vcvt.s32.f32 %v14719_v23  ;;  %v18267_v57 = vcvt.s32.f32 %v14745_v22  ;;  %v14782_v13 = vadd.f32 %v14452_v30, %v3502_v34  ;;  %v14791_v0 = vpop.f32.mrf.mxu0  ;;  %v18773_v56 = vld [vmem:[#allocation18_spill] sm:$0xff] }
 0x2bd   : > { %v14785_v54 = vadd.f32 %v11264_v58, %v18765_v59  ;;  %vm575_vm5 = vcmp.lt.f32.partialorder %v527_v44, 15.5  ;;  %v438_v12 = vfloor.f32 %v390_v39  ;;  %v3506_v63 = vadd.f32 %v14346_v16, %v14281_v27  ;;  %18767 = vst [vmem:[#allocation52_spill] sm:$0xff] %v14791_v0 }
 0x2be   : > { %v344_v60 = vmul.f32 0.041666668, %v18764_v36  ;;  %v14795_v17 = vsel %vm576_vm4, 1.0, %v14114_v20  ;;  %vm578_vm6 = vcmp.lt.f32.partialorder %v530_v21, 15.5  ;;  %v389_v49 = vadd.f32 0.020833334, %v341_v18  ;;  %v11403_v39 = vpop.f32.mrf.mxu0 }
 0x2bf   : > { %18766 = vst [vmem:[#allocation50_spill] sm:$0xff] %v14785_v54  ;;  %18768 = vst [vmem:[#allocation81_spill] sm:$0xff] %v14795_v17  ;;  %v14799_v30 = vadd.f32 %v14478_v41, %v14304_v29  ;;  %vm577_vm7 = vcmp.lt.f32.partialorder %v529_v3, 15.5  ;;  %v18769_v58 = vcvt.s32.f32 %v14618_v5  ;;  %v18770_v27 = vcvt.s32.f32 %v14621_v52  ;;  %v18778_v3 = vld [vmem:[#allocation26_spill] sm:$0xff]  ;;  %v18793_v54 = vld [vmem:[#allocation31_spill] sm:$0xff] }
 0x2c0   : > { %v14806_v44 = vadd.f32 %v14507_v8, %v3504_v28  ;;  %v14809_v25 = vsel %vm575_vm5, 1.0, %v14114_v20  ;;  %v392_v21 = vadd.f32 0.020833334, %v344_v60  ;;  %v343_v18 = vmul.f32 0.041666668, %v18267_v57  ;;  %v4087_v28 = vpop.f32.mrf.mxu0  ;;  %v18786_v57 = vld [vmem:[#allocation38_spill] sm:$0xff] }
 0x2c1   : > { %v532_v34 = vsub.f32 %v18769_v58, %v484_v62  ;;  %v531_v16 = vsub.f32 %v18770_v27, %v483_v6  ;;  %18771 = vst [vmem:[#allocation82_spill] sm:$0xff] %v14809_v25  ;;  %v14815_v29 = vadd.f32 %v14539_v47, %v14340_v48  ;;  %v14818_v41 = vsel %vm578_vm6, 1.0, %v14114_v20  ;;  %v14828_v6 = vpop.f32.mrf.mxu1 }
 0x2c2   : > { %18772 = vst [vmem:[#allocation83_spill] sm:$0xff] %v14818_v41  ;;  %v486_v5 = vmul.f32 24.0, %v438_v12  ;;  %v14821_v52 = vadd.s32 248, %v14128_v14  ;;  %v14824_v8 = vadd.f32 %v14571_v9, %v3506_v63  ;;  %v3508_v62 = vadd.f32 %v14375_v32, %v18773_v56  ;;  %v18777_v9 = vld [vmem:[#allocation19_spill] sm:$0xff]  ;;  %v11406_v32 = vpop.f32.mrf.mxu0 }
 0x2c3   : > { %v14832_v48 = vsel %vm577_vm7, 1.0, %v14114_v20  ;;  %v437_v47 = vfloor.f32 %v389_v49  ;;  %v14835_v36 = vadd.f32 %v11403_v39, %v14563_v2  ;;  %v14838_v60 = vadd.f32 %v4087_v28, %v14585_v33  ;;  %v18779_v2 = vld [vmem:[#allocation27_spill] sm:$0xff]  ;;  %v14861_v56 = vpop.f32.mrf.mxu1 }
 0x2c4   : > { %18774 = vst [vmem:[#allocation18_spill] sm:$0xff] %v14832_v48  ;;  %vm580_vm8 = vcmp.lt.f32.partialorder %v532_v34, 15.5  ;;  %vm579_vm9 = vcmp.lt.f32.partialorder %v531_v16, 15.5  ;;  %v3510_v59 = vadd.f32 %v14402_v61, %v18777_v9  ;;  %v440_v12 = vfloor.f32 %v392_v21  ;;  %v18781_v21 = vld [vmem:[#allocation29_spill] sm:$0xff]  ;;  %v4097_v28 = vpop.f32.mrf.mxu0  ;;  %v18792_v16 = vld [vmem:[#allocation70_spill] sm:$0xff] }
 0x2c5   : > { %18775 = vst [vmem:[#allocation84_spill] sm:$0xff] %v14835_v36  ;;  %18776 = vst [vmem:[#allocation85_spill] sm:$0xff] %v14838_v60  ;;  %v391_v63 = vadd.f32 0.020833334, %v343_v18  ;;  %v14843_v58 = vadd.s32 240, %v14128_v14  ;;  %v14847_v49 = vadd.f32 %v14609_v11, %v18778_v3  ;;  %v4470_v27 = vmul.f32 %v18779_v2, %v14838_v60  ;;  %v18783_v3 = vld [vmem:[#allocation25_spill] sm:$0xff] }
 0x2c6   : > { %v18780_v33 = vcvt.s32.f32 %v14666_v1  ;;  %v14855_v61 = vadd.f32 %v14641_v55, %v3508_v62  ;;  %v14859_v18 = vadd.f32 %v14672_v35, %v18781_v21  ;;  %v14864_v11 = vsel %vm580_vm8, 1.0, %v14114_v20  ;;  %v11409_v21 = vpop.f32.mrf.mxu0 }
 0x2c7   : > { %18782 = vst [vmem:[#allocation19_spill] sm:$0xff] %v14864_v11  ;;  %v485_v9 = vmul.f32 24.0, %v437_v47  ;;  %v4471_v1 = vmul.f32 %v18783_v3, %v14835_v36  ;;  %v14872_v55 = vadd.f32 %v4097_v28, %v18786_v57  ;;  %v14876_v35 = vsel %vm579_vm9, 1.0, %v14114_v20  ;;  %v18789_v3 = vld [vmem:[#allocation69_spill] sm:$0xff] }
 0x2c8   : > { %v534_v34 = vsub.f32 %v18780_v33, %v486_v5  ;;  %v18784_v5 = vld [vmem:[#allocation36_spill] sm:$0xff]  ;;  %v14879_v62 = vadd.f32 %v14697_v19, %v3510_v59  ;;  %v488_v39 = vmul.f32 24.0, %v440_v12  ;;  %v439_v2 = vfloor.f32 %v391_v63  ;;  %v14892_v59 = vpop.f32.mrf.mxu1  ;;  %v4107_v12 = vpop.f32.mrf.mxu0 }
 0x2c9   : > { %v14869_v33 = vadd.f32 %v11406_v32, %v18784_v5  ;;  %18787 = vst [vmem:[#allocation29_spill] sm:$0xff] %v14872_v55  ;;  %18788 = vst [vmem:[#allocation36_spill] sm:$0xff] %v14876_v35  ;;  %v4518_v60 = vadd.f32 %v4471_v1, %v4470_v27  ;;  %v4472_v32 = vmul.f32 %v18789_v3, %v14872_v55  ;;  %v18790_v57 = vcvt.s32.f32 %v14821_v52  ;;  %v18791_v5 = vld [vmem:[#allocation20_spill] sm:$0xff] }
 0x2ca   : > { %vm582_vm10 = vcmp.lt.f32.partialorder %v534_v34, 15.5  ;;  %v3512_v36 = vadd.f32 %v18792_v16, %v18791_v5  ;;  %v14890_v19 = vadd.f32 %v14729_v45, %v18793_v54  ;;  %v18794_v63 = vcvt.s32.f32 %v14706_v4  ;;  %v18795_v34 = vld [vmem:[#allocation30_spill] sm:$0xff]  ;;  %v18797_v5 = vld [vmem:[#allocation60_spill] sm:$0xff]  ;;  %v11412_v45 = vpop.f32.mrf.mxu0 }
 0x2cb   : > { %18785 = vst [vmem:[#allocation26_spill] sm:$0xff] %v14869_v33  ;;  %v346_v28 = vmul.f32 0.041666668, %v18790_v57  ;;  %v14897_v1 = vadd.s32 264, %v14128_v14  ;;  %v4473_v47 = vmul.f32 %v18795_v34, %v14869_v33  ;;  %v4519_v57 = vadd.f32 %v4518_v60, %v4472_v32  ;;  %v18802_v34 = vld [vmem:[#allocation72_spill] sm:$0xff] }
 0x2cc   : > { %v533_v27 = vsub.f32 %v18794_v63, %v485_v9  ;;  %v14902_v3 = vadd.f32 %v11409_v21, %v14632_v40  ;;  %v14905_v16 = vadd.f32 %v4107_v12, %v18797_v5  ;;  %v14908_v54 = vsel %vm582_vm10, 1.0, %v14114_v20  ;;  %v14922_v5 = vpop.f32.mrf.mxu1  ;;  %v4117_v33 = vpop.f32.mrf.mxu0 }
 0x2cd   : > { %18799 = vst [vmem:[#allocation70_spill] sm:$0xff] %v14908_v54  ;;  %v18800_v4 = vcvt.s32.f32 %v14719_v23  ;;  %v487_v63 = vmul.f32 24.0, %v439_v2  ;;  %v18801_v55 = vcvt.s32.f32 %v14843_v58  ;;  %v4520_v32 = vadd.f32 %v4519_v57, %v4473_v47  ;;  %v18805_v57 = vld [vmem:[#allocation67_spill] sm:$0xff] }
 0x2ce   : > { %18796 = vst [vmem:[#allocation38_spill] sm:$0xff] %v14902_v3  ;;  %18798 = vst [vmem:[#allocation20_spill] sm:$0xff] %v14905_v16  ;;  %v4474_v60 = vmul.f32 %v18802_v34, %v14905_v16  ;;  %v394_v40 = vadd.f32 0.020833334, %v346_v28  ;;  %v14917_v21 = vadd.s32 256, %v14128_v14  ;;  %v14920_v12 = vadd.f32 %v14754_v42, %v3512_v36  ;;  %v18807_v42 = vld [vmem:[#allocation21_spill] sm:$0xff]  ;;  %v11415_v16 = vpop.f32.mrf.mxu0 }
 0x2cf   : > { %v536_v9 = vsub.f32 %v18800_v4, %v488_v39  ;;  %v345_v0 = vmul.f32 0.041666668, %v18801_v55  ;;  %vm581_vm11 = vcmp.lt.f32.partialorder %v533_v27, 15.5  ;;  %v14926_v2 = vadd.s32 280, %v14128_v14  ;;  %v18803_v39 = vld [vmem:[#allocation71_spill] sm:$0xff]  ;;  %v18808_v36 = vld [vmem:[#allocation42_spill] sm:$0xff] }
 0x2d0   : > { %v4475_v55 = vmul.f32 %v18803_v39, %v14902_v3  ;;  %v4521_v47 = vadd.f32 %v4520_v32, %v4474_v60  ;;  %v14931_v28 = vadd.f32 %v11412_v45, %v14670_v31  ;;  %v14934_v4 = vadd.f32 %v4117_v33, %v18805_v57  ;;  %v18811_v45 = vld [vmem:[#allocation32_spill] sm:$0xff]  ;;  %v14947_v32 = vpop.f32.mrf.mxu1  ;;  %v4127_v57 = vpop.f32.mrf.mxu0  ;;  %v18818_v31 = vld [vmem:[#allocation78_spill] sm:$0xff] }
 0x2d1   : > { %v3514_v34 = vadd.f32 %v18808_v36, %v18807_v42  ;;  %vm584_vm12 = vcmp.lt.f32.partialorder %v536_v9, 15.5  ;;  %v18809_v23 = vcvt.s32.f32 %v14745_v22  ;;  %v393_v53 = vadd.f32 0.020833334, %v345_v0 }
 0x2d2   : > { %18804 = vst [vmem:[#allocation31_spill] sm:$0xff] %v14931_v28  ;;  %18806 = vst [vmem:[#allocation60_spill] sm:$0xff] %v14934_v4  ;;  %v4476_v54 = vmul.f32 %v18810_v50, %v14934_v4  ;;  %v4522_v39 = vadd.f32 %v4521_v47, %v4475_v55  ;;  %v442_v60 = vfloor.f32 %v394_v40  ;;  %v14945_v33 = vadd.f32 %v14789_v10, %v18811_v45  ;;  %v11418_v47 = vpop.f32.mrf.mxu0  ;;  %v14978_v27 = vpop.f32.mrf.mxu1  ;;  %v14997_v4 = vld [vmem:[#allocation2 + $0x1b9] sm:$0xff] }
 0x2d3   : > { %v535_v51 = vsub.f32 %v18809_v23, %v487_v63  ;;  %v18812_v42 = vcvt.s32.f32 %v14897_v1  ;;  %v14953_v0 = vadd.s32 272, %v14128_v14  ;;  %v18813_v63 = vld [vmem:[#allocation74_spill] sm:$0xff]  ;;  %v14958_v55 = vadd.f32 %v11415_v16, %v14710_v37 }
 0x2d4   : > { %v4477_v40 = vmul.f32 %v18813_v63, %v14931_v28  ;;  %v4523_v23 = vadd.f32 %v4522_v39, %v4476_v54  ;;  %v14961_v10 = vadd.f32 %v4127_v57, %v14722_v46  ;;  %v14965_v45 = vsel %vm581_vm11, 1.0, %v14114_v20  ;;  %v4137_v63 = vpop.f32.mrf.mxu0  ;;  %v18821_v28 = vld [vmem:[#allocation77_spill] sm:$0xff] }
 0x2d5   : > { %v348_v36 = vmul.f32 0.041666668, %v18812_v42  ;;  %18814 = vst [vmem:[#allocation67_spill] sm:$0xff] %v14958_v55  ;;  %18816 = vst [vmem:[#allocation42_spill] sm:$0xff] %v14965_v45  ;;  %v14969_v42 = vsel %vm584_vm12, 1.0, %v14114_v20  ;;  %vm583_vm13 = vcmp.lt.f32.partialorder %v535_v51, 15.5  ;;  %v441_v22 = vfloor.f32 %v393_v53 }
 0x2d6   : > { %18815 = vst [vmem:[#allocation21_spill] sm:$0xff] %v14961_v10  ;;  %18817 = vst [vmem:[#allocation32_spill] sm:$0xff] %v14969_v42  ;;  %v4478_v54 = vmul.f32 %v18818_v31, %v14961_v10  ;;  %v4524_v39 = vadd.f32 %v4523_v23, %v4477_v40  ;;  %v490_v37 = vmul.f32 24.0, %v442_v60  ;;  %v18819_v16 = vcvt.s32.f32 %v14917_v21  ;;  %v18825_v10 = vld [vmem:[#allocation33_spill] sm:$0xff] }
 0x2d7   : > { %v14976_v57 = vadd.f32 %v14828_v6, %v3514_v34  ;;  %v396_v50 = vadd.f32 0.020833334, %v348_v36  ;;  %v18820_v20 = vcvt.s32.f32 %v14926_v2  ;;  %v4479_v31 = vmul.f32 %v18821_v28, %v14958_v55  ;;  %v18823_v6 = vld [vmem:[#allocation22_spill] sm:$0xff]  ;;  %v18824_v34 = vld [vmem:[#allocation73_spill] sm:$0xff] }
 0x2d8   : > { %v347_v46 = vmul.f32 0.041666668, %v18819_v16  ;;  %v4525_v40 = vadd.f32 %v4524_v39, %v4478_v54  ;;  %v14986_v60 = vadd.f32 %v11418_v47, %v14738_v24  ;;  %v14989_v23 = vadd.f32 %v4137_v63, %v14741_v15  ;;  %v18827_v24 = vld [vmem:[#allocation55_spill] sm:$0xff] }
 0x2d9   : > { %v350_v9 = vmul.f32 0.041666668, %v18820_v20  ;;  %v3516_v16 = vadd.f32 %v18824_v34, %v18823_v6  ;;  %v14995_v36 = vadd.f32 %v14861_v56, %v18825_v10  ;;  %v11421_v20 = vpop.f32.mrf.mxu0  ;;  %v15001_v53 = vsel %vm583_vm13, 1.0, %v14997_v4  ;;  %v15007_v34 = vpop.f32.mrf.mxu1 }
 0x2da   : > { %18822 = vst [vmem:[#allocation86_spill] sm:$0xff] %v14989_v23  ;;  %18826 = vst [vmem:[#allocation22_spill] sm:$0xff] %v15001_v53  ;;  %v489_v54 = vmul.f32 24.0, %v441_v22  ;;  %v4480_v47 = vmul.f32 %v18827_v24, %v14989_v23  ;;  %v4526_v15 = vadd.f32 %v4525_v40, %v4479_v31  ;;  %v18828_v63 = vcvt.s32.f32 %v14821_v52  ;;  %v18830_v22 = vld [vmem:[#allocation80_spill] sm:$0xff] }
 0x2db   : > { %v395_v6 = vadd.f32 0.020833334, %v347_v46  ;;  %v4147_v56 = vpop.f32.mrf.mxu0  ;;  %v444_v10 = vfloor.f32 %v396_v50  ;;  %v398_v28 = vadd.f32 0.020833334, %v350_v9  ;;  %v18829_v55 = vcvt.s32.f32 %v14953_v0  ;;  %v18833_v50 = vld [vmem:[#allocation23_spill] sm:$0xff]  ;;  %v18834_v46 = vld [vmem:[#allocation76_spill] sm:$0xff] }
 0x2dc   : > { %v538_v39 = vsub.f32 %v18828_v63, %v490_v37  ;;  %v15012_v51 = vadd.s32 296, %v14128_v14  ;;  %v4481_v42 = vmul.f32 %v18830_v22, %v14986_v60  ;;  %v4527_v24 = vadd.f32 %v4526_v15, %v4480_v47  ;;  %v18836_v47 = vld [vmem:[#allocation57_spill] sm:$0xff]  ;;  %v15034_v15 = vpop.f32.mrf.mxu1 }
 0x2dd   : > { %v349_v3 = vmul.f32 0.041666668, %v18829_v55  ;;  %v15017_v31 = vadd.f32 %v11421_v20, %v14774_v26  ;;  %v15020_v52 = vadd.f32 %v4147_v56, %v14782_v13  ;;  %v15023_v37 = vadd.f32 %v14892_v59, %v3516_v16  ;;  %v11424_v55 = vpop.f32.mrf.mxu0 }
 0x2de   : > { %v3518_v9 = vadd.f32 %v18834_v46, %v18833_v50  ;;  %v18835_v40 = vcvt.s32.f32 %v14843_v58  ;;  %v15030_v23 = vadd.s32 288, %v14128_v14  ;;  %v4528_v20 = vadd.f32 %v4527_v24, %v4481_v42  ;;  %v18837_v58 = vld [vmem:[#allocation56_spill] sm:$0xff]  ;;  %v18840_v42 = vld [vmem:[#allocation34_spill] sm:$0xff] }
 0x2df   : > { %18831 = vst [vmem:[#allocation73_spill] sm:$0xff] %v15017_v31  ;;  %18832 = vst [vmem:[#allocation33_spill] sm:$0xff] %v15020_v52  ;;  %v4482_v26 = vmul.f32 %v18836_v47, %v15020_v52  ;;  %vm586_vm14 = vcmp.lt.f32.partialorder %v538_v39, 15.5  ;;  %v443_v13 = vfloor.f32 %v395_v6  ;;  %v4157_v59 = vpop.f32.mrf.mxu0  ;;  %v492_v16 = vmul.f32 24.0, %v444_v10  ;;  %v18841_v10 = vld [vmem:[#allocation65_spill] sm:$0xff] }
 0x2e0   : > { %v537_v63 = vsub.f32 %v18835_v40, %v489_v54  ;;  %v446_v56 = vfloor.f32 %v398_v28  ;;  %v397_v22 = vadd.f32 0.020833334, %v349_v3  ;;  %v18283_v50 = vcvt.s32.f32 %v15012_v51  ;;  %v18844_v28 = vld [vmem:[#allocation62_spill] sm:$0xff] }
 0x2e1   : > { %v4483_v54 = vmul.f32 %v18837_v58, %v15017_v31  ;;  %v4529_v46 = vadd.f32 %v4528_v20, %v4482_v26  ;;  %v15040_v40 = vadd.f32 %v11424_v55, %v14799_v30  ;;  %v15043_v47 = vadd.f32 %v4157_v59, %v14806_v44  ;;  %v11427_v3 = vpop.f32.mrf.mxu0  ;;  %v3829_v55 = vpop.f32.mrf.mxu1 }
 0x2e2   : > { %v15047_v24 = vadd.f32 %v14922_v5, %v18840_v42  ;;  %v15050_v6 = vadd.f32 %v14947_v32, %v3518_v9  ;;  %vm585_vm15 = vcmp.lt.f32.partialorder %v537_v63, 15.5  ;;  %v15057_v30 = vsel %vm586_vm14, 1.0, %v14997_v4 }
 0x2e3   : > { %18838 = vst [vmem:[#allocation23_spill] sm:$0xff] %v15040_v40  ;;  %18839 = vst [vmem:[#allocation76_spill] sm:$0xff] %v15043_v47  ;;  %v4484_v26 = vmul.f32 %v18841_v10, %v15043_v47  ;;  %v4530_v20 = vadd.f32 %v4529_v46, %v4483_v54  ;;  %v491_v44 = vmul.f32 24.0, %v443_v13  ;;  %v4167_v59 = vpop.f32.mrf.mxu0  ;;  %v18843_v5 = vcvt.s32.f32 %v14897_v1  ;;  %v18845_v13 = vld [vmem:[#allocation24_spill] sm:$0xff]  ;;  %v18846_v46 = vld [vmem:[#allocation79_spill] sm:$0xff]  ;;  %v11350_v63 = vpop.f32.mrf.mxu1 }
 0x2e4   : > { %18842 = vst [vmem:[#allocation34_spill] sm:$0xff] %v15057_v30  ;;  %v494_v32 = vmul.f32 24.0, %v446_v56  ;;  %v445_v9 = vfloor.f32 %v397_v22  ;;  %v352_v58 = vmul.f32 0.041666668, %v18283_v50  ;;  %v4485_v31 = vmul.f32 %v18844_v28, %v15040_v40  ;;  %v18852_v40 = vld [vmem:[#allocation43_spill] sm:$0xff] }
 0x2e5   : > { %v540_v42 = vsub.f32 %v18843_v5, %v492_v16  ;;  %v4531_v10 = vadd.f32 %v4530_v20, %v4484_v26  ;;  %v15066_v54 = vadd.f32 %v11427_v3, %v14815_v29  ;;  %v15069_v39 = vadd.f32 %v4167_v59, %v14824_v8  ;;  %v11430_v1 = vpop.f32.mrf.mxu0  ;;  %v18849_v26 = vld [vmem:[#allocation35_spill] sm:$0xff] }
 0x2e6   : > { %v3520_v47 = vadd.f32 %v18846_v46, %v18845_v13  ;;  %v15075_v22 = vsel %vm585_vm15, 1.0, %v14997_v4  ;;  %v18848_v16 = vcvt.s32.f32 %v15030_v23  ;;  %v15080_v5 = vadd.s32 312, %v14128_v14 }
 0x2e7   : > { %18847 = vst [vmem:[#allocation24_spill] sm:$0xff] %v15075_v22  ;;  %v15084_v29 = vadd.f32 %v14978_v27, %v18849_v26  ;;  %v4486_v8 = vmul.f32 %v14716_v38, %v15069_v39  ;;  %v4532_v3 = vadd.f32 %v4531_v10, %v4485_v31  ;;  %v18850_v20 = vcvt.s32.f32 %v14917_v21  ;;  %v4177_v13 = vpop.f32.mrf.mxu0  ;;  %v18853_v10 = vld [vmem:[#allocation28_spill] sm:$0xff] }
 0x2e8   : > { %v351_v56 = vmul.f32 0.041666668, %v18848_v16  ;;  %vm588_vm0 = vcmp.lt.f32.partialorder %v540_v42, 15.5  ;;  %v18851_v46 = vcvt.s32.f32 %v14926_v2  ;;  %v493_v50 = vmul.f32 24.0, %v445_v9 }
 0x2e9   : > { %v539_v59 = vsub.f32 %v18850_v20, %v491_v44  ;;  %v400_v28 = vadd.f32 0.020833334, %v352_v58  ;;  %v4487_v52 = vmul.f32 %v18852_v40, %v15066_v54  ;;  %v4533_v27 = vadd.f32 %v4532_v3, %v4486_v8  ;;  %v18854_v44 = vld [vmem:[#allocation53_spill] sm:$0xff]  ;;  %v11433_v2 = vpop.f32.mrf.mxu0 }
 0x2ea   : > { %v542_v16 = vsub.f32 %v18851_v46, %v494_v32  ;;  %v15095_v26 = vadd.f32 %v11430_v1, %v14847_v49  ;;  %v15098_v31 = vadd.f32 %v4177_v13, %v14855_v61  ;;  %v15101_v21 = vadd.f32 %v15007_v34, %v3520_v47  ;;  %v3839_v61 = vpop.f32.mrf.mxu1 }
 0x2eb   : > { %v3522_v42 = vadd.f32 %v18854_v44, %v18853_v10  ;;  %v399_v32 = vadd.f32 0.020833334, %v351_v56  ;;  %v18286_v58 = vcvt.s32.f32 %v15080_v5  ;;  %v4534_v8 = vadd.f32 %v4533_v27, %v4487_v52  ;;  %v4187_v1 = vpop.f32.mrf.mxu0  ;;  %v18857_v27 = vld [vmem:[#allocation54_spill] sm:$0xff] }
 0x2ec   : > { %v4488_v9 = vmul.f32 %v14764_v43, %v15098_v31  ;;  %v15109_v49 = vsel %vm588_vm0, 1.0, %v14997_v4  ;;  %vm587_vm1 = vcmp.lt.f32.partialorder %v539_v59, 15.5  ;;  %vm590_vm2 = vcmp.lt.f32.partialorder %v542_v16, 15.5 }
 0x2ed   : > { %18855 = vst [vmem:[#allocation79_spill] sm:$0xff] %v15109_v49  ;;  %v18856_v34 = vcvt.s32.f32 %v14953_v0  ;;  %v448_v3 = vfloor.f32 %v400_v28  ;;  %v15114_v20 = vadd.s32 304, %v14128_v14  ;;  %v4489_v56 = vmul.f32 %v14760_v7, %v15095_v26 }
 0x2ee   : > { %v4535_v13 = vadd.f32 %v4534_v8, %v4488_v9  ;;  %v15119_v52 = vadd.f32 %v11433_v2, %v14859_v18  ;;  %v15122_v46 = vadd.f32 %v4187_v1, %v14879_v62  ;;  %v15126_v10 = vadd.f32 %v15034_v15, %v18857_v27  ;;  %v11353_v15 = vpop.f32.mrf.mxu1  ;;  %v18863_v27 = vld [vmem:[#allocation59_spill] sm:$0xff] }
 0x2ef   : > { %v541_v47 = vsub.f32 %v18856_v34, %v493_v50  ;;  %v15128_v0 = vadd.f32 %v3829_v55, %v3522_v42  ;;  %v11436_v50 = vpop.f32.mrf.mxu0  ;;  %v447_v28 = vfloor.f32 %v399_v32  ;;  %v354_v44 = vmul.f32 0.041666668, %v18286_v58  ;;  %v18864_v32 = vld [vmem:[#allocation58_spill] sm:$0xff] }
 0x2f0   : > { %v4490_v9 = vmul.f32 %v14809_v25, %v15122_v46  ;;  %v4536_v8 = vadd.f32 %v4535_v13, %v4489_v56  ;;  %v15136_v18 = vsel %vm587_vm1, 1.0, %v14997_v4  ;;  %v15139_v62 = vadd.s32 328, %v14128_v14  ;;  %v18862_v13 = vld [vmem:[#allocation37_spill] sm:$0xff] }
 0x2f1   : > { %18858 = vst [vmem:[#allocation35_spill] sm:$0xff] %v15136_v18  ;;  %v4197_v2 = vpop.f32.mrf.mxu0  ;;  %v15143_v55 = vsel %vm590_vm2, 1.0, %v14997_v4  ;;  %vm589_vm3 = vcmp.lt.f32.partialorder %v541_v47, 15.5  ;;  %v496_v42 = vmul.f32 24.0, %v448_v3  ;;  %v4491_v1 = vmul.f32 %v14795_v17, %v15119_v52  ;;  %v3849_v17 = vpop.f32.mrf.mxu1 }
 0x2f2   : > { %18859 = vst [vmem:[#allocation28_spill] sm:$0xff] %v15143_v55  ;;  %v4537_v34 = vadd.f32 %v4536_v8, %v4490_v9  ;;  %v15149_v59 = vadd.f32 %v11436_v50, %v14890_v19  ;;  %v15152_v56 = vadd.f32 %v4197_v2, %v14920_v12  ;;  %v3524_v58 = vadd.f32 %v18863_v27, %v18862_v13  ;;  %v18865_v12 = vld [vmem:[#allocation39_spill] sm:$0xff] }
 0x2f3   : > { %v11439_v16 = vpop.f32.mrf.mxu0  ;;  %v495_v25 = vmul.f32 24.0, %v447_v28  ;;  %v402_v7 = vadd.f32 0.020833334, %v354_v44  ;;  %v15157_v3 = vadd.s32 320, %v14128_v14  ;;  %v15160_v43 = vadd.f32 %v11350_v63, %v18864_v32  ;;  %v18866_v8 = vld [vmem:[#allocation15_spill] sm:$0xff] }
 0x2f4   : > { %18860 = vst [vmem:[#allocation53_spill] sm:$0xff] %v15149_v59  ;;  %18861 = vst [vmem:[#allocation54_spill] sm:$0xff] %v15152_v56  ;;  %v4492_v9 = vmul.f32 %v14832_v48, %v15152_v56  ;;  %v4538_v19 = vadd.f32 %v4537_v34, %v4491_v1  ;;  %v3526_v2 = vadd.f32 %v18866_v8, %v18865_v12  ;;  %v15169_v28 = vsel %vm589_vm3, 1.0, %v14997_v4 }
 0x2f5   : > { %v4207_v13 = vpop.f32.mrf.mxu0  ;;  %18867 = vst [vmem:[#allocation37_spill] sm:$0xff] %v15169_v28  ;;  %v18868_v44 = vcvt.s32.f32 %v15012_v51  ;;  %v18869_v63 = vcvt.s32.f32 %v15114_v20  ;;  %v4493_v1 = vmul.f32 %v14818_v41, %v15149_v59  ;;  %v15178_v50 = vadd.f32 %v11439_v16, %v14945_v33 }
 0x2f6   : > { %v4539_v34 = vadd.f32 %v4538_v19, %v4492_v9  ;;  %v15181_v12 = vadd.f32 %v4207_v13, %v14976_v57  ;;  %v15183_v8 = vadd.f32 %v3839_v61, %v3524_v58  ;;  %v18872_v48 = vcvt.s32.f32 %v15030_v23  ;;  %v11356_v58 = vpop.f32.mrf.mxu1 }
 0x2f7   : > { %v544_v27 = vsub.f32 %v18868_v44, %v496_v42  ;;  %v353_v32 = vmul.f32 0.041666668, %v18869_v63  ;;  %18870 = vst [vmem:[#allocation59_spill] sm:$0xff] %v15178_v50  ;;  %v11442_v47 = vpop.f32.mrf.mxu0  ;;  %v450_v42 = vfloor.f32 %v402_v7  ;;  %v18300_v44 = vcvt.s32.f32 %v15157_v3  ;;  %v18873_v63 = vld [vmem:[#allocation61_spill] sm:$0xff] }
 0x2f8   : > { %18871 = vst [vmem:[#allocation58_spill] sm:$0xff] %v15181_v12  ;;  %v543_v51 = vsub.f32 %v18872_v48, %v495_v25  ;;  %v15189_v56 = vadd.f32 %v11353_v15, %v18873_v63  ;;  %v4494_v9 = vmul.f32 %v14876_v35, %v15181_v12  ;;  %v4540_v33 = vadd.f32 %v4539_v34, %v4493_v1  ;;  %v18877_v34 = vld [vmem:[#allocation41_spill] sm:$0xff]  ;;  %v18878_v63 = vld [vmem:[#allocation40_spill] sm:$0xff] }
 0x2f9   : > { %v18874_v16 = vcvt.s32.f32 %v15139_v62  ;;  %v15195_v19 = vadd.f32 %v3849_v17, %v3526_v2  ;;  %v4217_v61 = vpop.f32.mrf.mxu0  ;;  %vm592_vm4 = vcmp.lt.f32.partialorder %v544_v27, 15.5  ;;  %v401_v23 = vadd.f32 0.020833334, %v353_v32 }
 0x2fa   : > { %v15198_v7 = vadd.s32 336, %v14128_v14  ;;  %v4495_v25 = vmul.f32 %v14864_v11, %v15178_v50  ;;  %v4541_v48 = vadd.f32 %v4540_v33, %v4494_v9  ;;  %v15203_v15 = vadd.f32 %v11442_v47, %v14995_v36  ;;  %v18879_v33 = vld [vmem:[#allocation64_spill] sm:$0xff] }
 0x2fb   : > { %v356_v57 = vmul.f32 0.041666668, %v18874_v16  ;;  %v15206_v13 = vadd.f32 %v4217_v61, %v15023_v37  ;;  %v11445_v1 = vpop.f32.mrf.mxu0  ;;  %vm591_vm5 = vcmp.lt.f32.partialorder %v543_v51, 15.5  ;;  %v498_v17 = vmul.f32 24.0, %v450_v42  ;;  %v3859_v61 = vpop.f32.mrf.mxu1 }
 0x2fc   : > { %18875 = vst [vmem:[#allocation39_spill] sm:$0xff] %v15203_v15  ;;  %v355_v2 = vmul.f32 0.041666668, %v18300_v44  ;;  %v15211_v32 = vadd.s32 344, %v14128_v14  ;;  %v3528_v16 = vadd.f32 %v18878_v63, %v18877_v34  ;;  %v4542_v36 = vadd.f32 %v4541_v48, %v4495_v25  ;;  %v18881_v34 = vld [vmem:[#allocation70_spill] sm:$0xff] }
 0x2fd   : > { %18876 = vst [vmem:[#allocation15_spill] sm:$0xff] %v15206_v13  ;;  %v4496_v9 = vmul.f32 %v14965_v45, %v15206_v13  ;;  %v404_v47 = vadd.f32 0.020833334, %v356_v57  ;;  %v15218_v37 = vadd.f32 %v11356_v58, %v18879_v33  ;;  %v4227_v11 = vpop.f32.mrf.mxu0  ;;  %v15222_v42 = vsel %vm592_vm4, 1.0, %v14997_v4 }
 0x2fe   : > { %18880 = vst [vmem:[#allocation61_spill] sm:$0xff] %v15222_v42  ;;  %v15226_v35 = vadd.s32 352, %v14128_v14  ;;  %v4497_v63 = vmul.f32 %v18881_v34, %v15203_v15  ;;  %v15231_v57 = vadd.f32 %v11445_v1, %v15047_v24  ;;  %v15234_v58 = vadd.f32 %v4227_v11, %v15050_v6  ;;  %v11359_v11 = vpop.f32.mrf.mxu1 }
 0x2ff   : > { %v4543_v45 = vadd.f32 %v4542_v36, %v4496_v9  ;;  %v11448_v25 = vpop.f32.mrf.mxu0  ;;  %v15238_v27 = vsel %vm591_vm5, 1.0, %v14997_v4  ;;  %v18884_v48 = vcvt.s32.f32 %v15080_v5  ;;  %v449_v44 = vfloor.f32 %v401_v23 }
 0x300   : > { %18882 = vst [vmem:[#allocation41_spill] sm:$0xff] %v15231_v57  ;;  %18883 = vst [vmem:[#allocation40_spill] sm:$0xff] %v15238_v27  ;;  %v4498_v9 = vmul.f32 %v15001_v53, %v15234_v58  ;;  %v452_v24 = vfloor.f32 %v404_v47  ;;  %v15246_v1 = vadd.s32 360, %v14128_v14  ;;  %v403_v34 = vadd.f32 0.020833334, %v355_v2 }
 0x301   : > { %v546_v33 = vsub.f32 %v18884_v48, %v498_v17  ;;  %v4544_v36 = vadd.f32 %v4543_v45, %v4497_v63  ;;  %v4237_v6 = vpop.f32.mrf.mxu0  ;;  %v18885_v51 = vcvt.s32.f32 %v15198_v7  ;;  %v15252_v23 = vadd.s32 368, %v14128_v14  ;;  %v18886_v17 = vld [vmem:[#allocation32_spill] sm:$0xff] }
 0x302   : > { %v4499_v48 = vmul.f32 %v18886_v17, %v15231_v57  ;;  %v15257_v45 = vadd.f32 %v11448_v25, %v15084_v29  ;;  %v15260_v47 = vadd.f32 %v4237_v6, %v15101_v21  ;;  %v15262_v63 = vadd.f32 %v3859_v61, %v3528_v16  ;;  %v3869_v25 = vpop.f32.mrf.mxu1 }
 0x303   : > { %v357_v15 = vmul.f32 0.041666668, %v18885_v51  ;;  %v4545_v13 = vadd.f32 %v4544_v36, %v4498_v9  ;;  %v11451_v2 = vpop.f32.mrf.mxu0  ;;  %vm594_vm6 = vcmp.lt.f32.partialorder %v546_v33, 15.5  ;;  %v497_v51 = vmul.f32 24.0, %v449_v44  ;;  %v18890_v9 = vld [vmem:[#allocation13_spill] sm:$0xff] }
 0x304   : > { %v18887_v5 = vcvt.s32.f32 %v15211_v32  ;;  %v4500_v41 = vmul.f32 %v15075_v22, %v15260_v47  ;;  %v15270_v29 = vadd.s32 376, %v14128_v14  ;;  %v451_v36 = vfloor.f32 %v403_v34  ;;  %v18889_v14 = vld [vmem:[#allocation46_spill] sm:$0xff] }
 0x305   : > { %v4546_v50 = vadd.f32 %v4545_v13, %v4499_v48  ;;  %v4247_v21 = vpop.f32.mrf.mxu0  ;;  %v405_v16 = vadd.f32 0.020833334, %v357_v15  ;;  %v18888_v61 = vcvt.s32.f32 %v15226_v35  ;;  %v15278_v13 = vadd.f32 %v11451_v2, %v15126_v10 }
 0x306   : > { %v358_v53 = vmul.f32 0.041666668, %v18887_v5  ;;  %v4501_v5 = vmul.f32 %v15057_v30, %v15257_v45  ;;  %v15281_v48 = vadd.f32 %v4247_v21, %v15128_v0  ;;  %v3530_v22 = vadd.f32 %v18890_v9, %v18889_v14  ;;  %v11362_v0 = vpop.f32.mrf.mxu1 }
 0x307   : > { %v359_v6 = vmul.f32 0.041666668, %v18888_v61  ;;  %v4547_v17 = vadd.f32 %v4546_v50, %v4500_v41  ;;  %v11454_v34 = vpop.f32.mrf.mxu0  ;;  %v18891_v15 = vcvt.s32.f32 %v15114_v20  ;;  %v500_v61 = vmul.f32 24.0, %v452_v24 }
 0x308   : > { %v406_v12 = vadd.f32 0.020833334, %v358_v53  ;;  %v4502_v44 = vmul.f32 %v15136_v18, %v15281_v48  ;;  %v18892_v41 = vcvt.s32.f32 %v15246_v1  ;;  %v18323_v50 = vcvt.s32.f32 %v15270_v29 }
 0x309   : > { %v545_v57 = vsub.f32 %v18891_v15, %v497_v51  ;;  %v4548_v30 = vadd.f32 %v4547_v17, %v4501_v5  ;;  %v4257_v2 = vpop.f32.mrf.mxu0  ;;  %v499_v21 = vmul.f32 24.0, %v451_v36  ;;  %v453_v59 = vfloor.f32 %v405_v16  ;;  %v18894_v5 = vld [vmem:[#allocation63_spill] sm:$0xff] }
 0x30a   : > { %v360_v10 = vmul.f32 0.041666668, %v18892_v41  ;;  %v407_v9 = vadd.f32 0.020833334, %v359_v6  ;;  %v18893_v14 = vcvt.s32.f32 %v15252_v23  ;;  %v4503_v53 = vmul.f32 %v15109_v49, %v15278_v13 }
 0x30b   : > { %v4549_v24 = vadd.f32 %v4548_v30, %v4502_v44  ;;  %v15297_v51 = vadd.f32 %v11454_v34, %v15160_v43  ;;  %v15300_v17 = vadd.f32 %v4257_v2, %v15183_v8  ;;  %v3949_v15 = vadd.f32 %v11359_v11, %v18894_v5  ;;  %v11457_v41 = vpop.f32.mrf.mxu0  ;;  %v3879_v44 = vpop.f32.mrf.mxu1 }
 0x30c   : > { %v361_v20 = vmul.f32 0.041666668, %v18893_v14  ;;  %v15305_v36 = vsel %vm594_vm6, 1.0, %v14997_v4  ;;  %vm593_vm7 = vcmp.lt.f32.partialorder %v545_v57, 15.5  ;;  %v454_v16 = vfloor.f32 %v406_v12 }
 0x30d   : > { %18895 = vst [vmem:[#allocation64_spill] sm:$0xff] %v15305_v36  ;;  %v4504_v6 = vmul.f32 %v15169_v28, %v15300_v17  ;;  %v4550_v14 = vadd.f32 %v4549_v24, %v4503_v53  ;;  %v408_v30 = vadd.f32 0.020833334, %v360_v10  ;;  %v362_v43 = vmul.f32 0.041666668, %v18323_v50  ;;  %v4267_v8 = vpop.f32.mrf.mxu0 }
 0x30e   : > { %v18896_v34 = vcvt.s32.f32 %v15157_v3  ;;  %v501_v2 = vmul.f32 24.0, %v453_v59  ;;  %v455_v5 = vfloor.f32 %v407_v9  ;;  %v409_v33 = vadd.f32 0.020833334, %v361_v20 }
 0x30f   : > { %v4505_v49 = vmul.f32 %v15143_v55, %v15297_v51  ;;  %v4551_v12 = vadd.f32 %v4550_v14, %v4504_v6  ;;  %v15316_v18 = vadd.f32 %v11457_v41, %v15189_v56  ;;  %v15319_v10 = vadd.f32 %v4267_v8, %v15195_v19  ;;  %v11460_v24 = vpop.f32.mrf.mxu0  ;;  %v11365_v41 = vpop.f32.mrf.mxu1 }
 0x310   : > { %v547_v11 = vsub.f32 %v18896_v34, %v499_v21  ;;  %v3948_v53 = vadd.f32 %v3869_v25, %v3530_v22  ;;  %v15323_v50 = vsel %vm593_vm7, 1.0, %v14997_v4  ;;  %v18898_v59 = vcvt.s32.f32 %v15139_v62  ;;  %v18902_v34 = vld [vmem:[#allocation44_spill] sm:$0xff] }
 0x311   : > { %18897 = vst [vmem:[#allocation46_spill] sm:$0xff] %v15323_v50  ;;  %v502_v21 = vmul.f32 24.0, %v454_v16  ;;  %v4506_v9 = vmul.f32 %v15238_v27, %v15319_v10  ;;  %v4552_v20 = vadd.f32 %v4551_v12, %v4505_v49  ;;  %v456_v6 = vfloor.f32 %v408_v30  ;;  %v4277_v14 = vpop.f32.mrf.mxu0  ;;  %v18900_v49 = vld [vmem:[#allocation47_spill] sm:$0xff]  ;;  %v18901_v30 = vld [vmem:[#allocation66_spill] sm:$0xff] }
 0x312   : > { %v548_v3 = vsub.f32 %v18898_v59, %v500_v61  ;;  %v410_v56 = vadd.f32 0.020833334, %v362_v43  ;;  %vm595_vm8 = vcmp.lt.f32.partialorder %v547_v11, 15.5  ;;  %v18899_v22 = vcvt.s32.f32 %v15198_v7 }
 0x313   : > { %v503_v25 = vmul.f32 24.0, %v455_v5  ;;  %v457_v57 = vfloor.f32 %v409_v33  ;;  %v4507_v8 = vmul.f32 %v15222_v42, %v15316_v18  ;;  %v4553_v62 = vadd.f32 %v4552_v20, %v4506_v9  ;;  %v11463_v7 = vpop.f32.mrf.mxu0 }
 0x314   : > { %v549_v19 = vsub.f32 %v18899_v22, %v501_v2  ;;  %v15334_v61 = vadd.f32 %v11460_v24, %v15218_v37  ;;  %v15337_v16 = vadd.f32 %v4277_v14, %v15262_v63  ;;  %v3532_v43 = vadd.f32 %v18901_v30, %v18900_v49  ;;  %v3889_v24 = vpop.f32.mrf.mxu1 }
 0x315   : > { %v3951_v12 = vadd.f32 %v11362_v0, %v18902_v34  ;;  %vm596_vm9 = vcmp.lt.f32.partialorder %v548_v3, 15.5  ;;  %v18903_v2 = vcvt.s32.f32 %v15211_v32  ;;  %v4554_v59 = vadd.f32 %v4553_v62, %v4507_v8  ;;  %v4287_v20 = vpop.f32.mrf.mxu0  ;;  %v18907_v62 = vld [vmem:[#allocation45_spill] sm:$0xff] }
 0x316   : > { %v4508_v33 = vmul.f32 %v15323_v50, %v15337_v16  ;;  %v504_v9 = vmul.f32 24.0, %v456_v6  ;;  %v458_v37 = vfloor.f32 %v410_v56  ;;  %v15348_v63 = vsel %vm595_vm8, 1.0, %v14997_v4  ;;  %v18906_v56 = vld [vmem:[#allocation48_spill] sm:$0xff] }
 0x317   : > { %v550_v5 = vsub.f32 %v18903_v2, %v502_v21  ;;  %18904 = vst [vmem:[#allocation13_spill] sm:$0xff] %v15348_v63  ;;  %vm597_vm10 = vcmp.lt.f32.partialorder %v549_v19, 15.5  ;;  %v18905_v0 = vcvt.s32.f32 %v15226_v35  ;;  %v505_v22 = vmul.f32 24.0, %v457_v57  ;;  %v11466_v35 = vpop.f32.mrf.mxu0  ;;  %v18911_v2 = vld [vmem:[#allocation51_spill] sm:$0xff] }
 0x318   : > { %v4509_v32 = vmul.f32 %v15305_v36, %v15334_v61  ;;  %v4555_v21 = vadd.f32 %v4554_v59, %v4508_v33  ;;  %v15354_v49 = vadd.f32 %v11463_v7, %v3949_v15  ;;  %v15356_v8 = vadd.f32 %v4287_v20, %v3948_v53  ;;  %v18910_v53 = vld [vmem:[#allocation49_spill] sm:$0xff] }
 0x319   : > { %v551_v14 = vsub.f32 %v18905_v0, %v503_v25  ;;  %v3950_v6 = vadd.f32 %v3879_v44, %v3532_v43  ;;  %v3534_v11 = vadd.f32 %v18907_v62, %v18906_v56  ;;  %v15362_v30 = vsel %vm596_vm9, 1.0, %v14997_v4  ;;  %v11368_v43 = vpop.f32.mrf.mxu1  ;;  %v4297_v3 = vpop.f32.mrf.mxu0  ;;  %v18915_v62 = vld [vmem:[#allocation52_spill] sm:$0xff] }
 0x31a   : > { %18908 = vst [vmem:[#allocation63_spill] sm:$0xff] %v15362_v30  ;;  %vm598_vm11 = vcmp.lt.f32.partialorder %v550_v5, 15.5  ;;  %v4510_v25 = vmul.f32 %v15348_v63, %v15356_v8  ;;  %v4556_v57 = vadd.f32 %v4555_v21, %v4509_v32  ;;  %v18909_v34 = vcvt.s32.f32 %v15246_v1 }
 0x31b   : > { %v506_v7 = vmul.f32 24.0, %v458_v37  ;;  %v3118_v44 = vadd.f32 %v18911_v2, %v18910_v53  ;;  %v15372_v33 = vsel %vm597_vm10, 1.0, %v14997_v4  ;;  %vm599_vm12 = vcmp.lt.f32.partialorder %v551_v14, 15.5  ;;  %v18914_v37 = vld [vmem:[#allocation16_spill] sm:$0xff]  ;;  %v11469_v53 = vpop.f32.mrf.mxu0 }
 0x31c   : > { %v552_v15 = vsub.f32 %v18909_v34, %v504_v9  ;;  %18912 = vst [vmem:[#allocation47_spill] sm:$0xff] %v15372_v33  ;;  %v18913_v59 = vcvt.s32.f32 %v15252_v23  ;;  %v4511_v0 = vmul.f32 %v15362_v30, %v15354_v49  ;;  %v4557_v32 = vadd.f32 %v4556_v57, %v4510_v25  ;;  %v3899_v25 = vpop.f32.mrf.mxu1 }
 0x31d   : > { %v4369_v1 = vadd.f32 %v11466_v35, %v3951_v12  ;;  %v4368_v9 = vadd.f32 %v4297_v3, %v3950_v6  ;;  %v3953_v21 = vadd.f32 %v11365_v41, %v18914_v37  ;;  %v3952_v56 = vadd.f32 %v3889_v24, %v3534_v11  ;;  %v4307_v41 = vpop.f32.mrf.mxu0  ;;  %v18919_v35 = vld [vmem:[#allocation50_spill] sm:$0xff] }
 0x31e   : > { %v553_v20 = vsub.f32 %v18913_v59, %v505_v22  ;;  %v3536_v34 = vadd.f32 %v18915_v62, %v3118_v44  ;;  %v15382_v19 = vsel %vm598_vm11, 1.0, %v14997_v4  ;;  %v4558_v23 = vadd.f32 %v4557_v32, %v4511_v0 }
 0x31f   : > { %18916 = vst [vmem:[#allocation66_spill] sm:$0xff] %v15382_v19  ;;  %v4512_v2 = vmul.f32 %v15372_v33, %v4368_v9  ;;  %vm600_vm13 = vcmp.lt.f32.partialorder %v552_v15, 15.5  ;;  %v18917_v22 = vcvt.s32.f32 %v15270_v29  ;;  %v15389_v12 = vsel %vm599_vm12, 1.0, %v14997_v4  ;;  %v11472_v15 = vpop.f32.mrf.mxu0 }
 0x320   : > { %18918 = vst [vmem:[#allocation44_spill] sm:$0xff] %v15389_v12  ;;  %vm601_vm14 = vcmp.lt.f32.partialorder %v553_v20, 15.5  ;;  %v4513_v24 = vmul.f32 %v15382_v19, %v4369_v1  ;;  %v4371_v6 = vadd.f32 %v11469_v53, %v3953_v21  ;;  %v4370_v11 = vadd.f32 %v4307_v41, %v3952_v56 }
 0x321   : > { %v554_v59 = vsub.f32 %v18917_v22, %v506_v7  ;;  %v4559_v5 = vadd.f32 %v4558_v23, %v4512_v2  ;;  %v3955_v57 = vadd.f32 %v11368_v43, %v18919_v35  ;;  %v15394_v44 = vsel %vm600_vm13, 1.0, %v14997_v4  ;;  %v4317_v20 = vpop.f32.mrf.mxu0 }
 0x322   : > { %18920 = vst [vmem:[#allocation48_spill] sm:$0xff] %v15394_v44  ;;  %v3954_v29 = vadd.f32 %v3899_v25, %v3536_v34  ;;  %v4514_v7 = vmul.f32 %v15389_v12, %v4370_v11  ;;  %v15398_v14 = vsel %vm601_vm14, 1.0, %v14997_v4  ;;  %v4515_v0 = vmul.f32 %v15394_v44, %v4371_v6 }
 0x323   : > { %v4560_v3 = vadd.f32 %v4559_v5, %v4513_v24  ;;  %vm602_vm15 = vcmp.lt.f32.partialorder %v554_v59, 15.5  ;;  %18921 = vst [vmem:[#allocation45_spill] sm:$0xff] %v15398_v14  ;;  %v4373_v37 = vadd.f32 %v11472_v15, %v3955_v57 }
 0x324   : > { %v4372_v21 = vadd.f32 %v4317_v20, %v3954_v29  ;;  %v15402_v43 = vsel %vm602_vm15, 1.0, %v14997_v4 }
 0x325   : > { %v4561_v32 = vadd.f32 %v4560_v3, %v4514_v7  ;;  %18922 = vst [vmem:[#allocation49_spill] sm:$0xff] %v15402_v43  ;;  %v4517_v34 = vmul.f32 %v15402_v43, %v4373_v37 }
 0x326   : > { %v4516_v56 = vmul.f32 %v15398_v14, %v4372_v21 }
 0x327   : > { %v4562_v62 = vadd.f32 %v4561_v32, %v4515_v0 }
 0x329   : > { %v4563_v53 = vadd.f32 %v4562_v62, %v4516_v56 }
 0x32b   : > { %v4564_v2 = vadd.f32 %v4563_v53, %v4517_v34  ;;  %v5092_v34 = vld [vmem:[#allocation8 + $0xf8] sm:$0xff] }
 0x32c   : > { %11473 = vmatprep.subr.mxu1 %v5092_v34  ;;  %v18934_v53 = vld [vmem:[#allocation20_spill] sm:$0xff] }
 0x32d   : > { %v4565_v23 = vrot.slane %v4564_v2, 4  ;;  %11474 = vmatpush3.msra.mxu1 %v5092_v34 }
 0x32f   : > { %v4566_v22 = vadd.f32 %v4565_v23, %v4564_v2  ;;  %v18936_v23 = vld [vmem:[#allocation69_spill] sm:$0xff] }
 0x331   : > { %v4567_v59 = vrot.slane %v4566_v22, 2 }
 0x333   : > { %v4568_v25 = vadd.f32 %v4567_v59, %v4566_v22 }
 0x335   : > { %v4569_v41 = vrot.slane %v4568_v25, 1 }
 0x337   : > { %v4570_v24 = vadd.f32 %v4569_v41, %v4568_v25  ;;  %v5091_v41 = vld [vmem:[#allocation8 + $0xf0] sm:$0xff] }
 0x338   : > { %11475 = vmatprep.subr.mxu1 %v5091_v41 }
 0x339   : > { %v15406_v5 = vmul.f32 0.00390625, %v4570_v24  ;;  %v5027_v24 = vld [vmem:[#allocation8 + $0x78] sm:$0xff]  ;;  %11476 = vmatpush3.msra.mxu1 %v5091_v41  ;;  %v5025_v41 = vld [vmem:[#allocation8 + $0x68] sm:$0xff] }
 0x33a   : > { %11577 = vmatprep.subr.mxu0 %v5027_v24 }
 0x33b   : > { %v15410_v35 = vsub.f32 %v15234_v58, %v15406_v5  ;;  %v15414_v4 = vsub.f32 %v15260_v47, %v15406_v5  ;;  %v15418_v57 = vsub.f32 %v15257_v45, %v15406_v5  ;;  %v15422_v15 = vsub.f32 %v15281_v48, %v15406_v5  ;;  %11578 = vmatpush3.msra.mxu0 %v5027_v24 }
 0x33c   : > { %v15426_v29 = vsub.f32 %v15278_v13, %v15406_v5  ;;  %v15430_v58 = vsub.f32 %v15300_v17, %v15406_v5  ;;  %v15434_v47 = vsub.f32 %v15297_v51, %v15406_v5  ;;  %v15438_v45 = vsub.f32 %v15319_v10, %v15406_v5 }
 0x33d   : > { %v15442_v48 = vsub.f32 %v15316_v18, %v15406_v5  ;;  %v15446_v13 = vsub.f32 %v15337_v16, %v15406_v5  ;;  %v15450_v17 = vsub.f32 %v15334_v61, %v15406_v5  ;;  %v15454_v51 = vsub.f32 %v15356_v8, %v15406_v5 }
 0x33e   : > { %v15458_v10 = vsub.f32 %v15354_v49, %v15406_v5  ;;  %v15461_v7 = vsub.f32 %v4368_v9, %v15406_v5  ;;  %v15464_v18 = vsub.f32 %v4369_v1, %v15406_v5  ;;  %v15467_v16 = vsub.f32 %v4370_v11, %v15406_v5  ;;  %v18924_v49 = vld [vmem:[#allocation85_spill] sm:$0xff]  ;;  %v18926_v9 = vld [vmem:[#allocation84_spill] sm:$0xff] }
 0x33f   : > { %v15470_v61 = vsub.f32 %v4371_v6, %v15406_v5  ;;  %v15473_v3 = vsub.f32 %v4372_v21, %v15406_v5  ;;  %v15476_v8 = vsub.f32 %v4373_v37, %v15406_v5  ;;  %v15480_v20 = vsub.f32 %v18924_v49, %v15406_v5  ;;  %v18928_v11 = vld [vmem:[#allocation29_spill] sm:$0xff]  ;;  %v18930_v6 = vld [vmem:[#allocation27_spill] sm:$0xff]  ;;  %v18932_v37 = vld [vmem:[#allocation26_spill] sm:$0xff] }
 0x340   : > { %v15484_v1 = vsub.f32 %v18926_v9, %v15406_v5  ;;  %v15488_v0 = vsub.f32 %v18928_v11, %v15406_v5  ;;  %v18931_v21 = vld [vmem:[#allocation25_spill] sm:$0xff]  ;;  %v15496_v62 = vsub.f32 %v18932_v37, %v15406_v5  ;;  %v15500_v2 = vsub.f32 %v18934_v53, %v15406_v5  ;;  %v18937_v49 = vld [vmem:[#allocation38_spill] sm:$0xff]  ;;  %v18940_v53 = vld [vmem:[#allocation60_spill] sm:$0xff] }
 0x341   : > { %18923 = vst [vmem:[#allocation51_spill] sm:$0xff] %v15476_v8  ;;  %18925 = vst [vmem:[#allocation16_spill] sm:$0xff] %v15480_v20  ;;  %v4620_v32 = vmul.f32 %v18930_v6, %v15480_v20  ;;  %v15506_v9 = vsub.f32 %v18937_v49, %v15406_v5  ;;  %v18939_v11 = vld [vmem:[#allocation30_spill] sm:$0xff]  ;;  %v15512_v6 = vsub.f32 %v18940_v53, %v15406_v5  ;;  %v18943_v49 = vld [vmem:[#allocation31_spill] sm:$0xff] }
 0x342   : > { %18927 = vst [vmem:[#allocation52_spill] sm:$0xff] %v15484_v1  ;;  %18929 = vst [vmem:[#allocation50_spill] sm:$0xff] %v15488_v0  ;;  %v4621_v56 = vmul.f32 %v18931_v21, %v15484_v1  ;;  %v4622_v22 = vmul.f32 %v18936_v23, %v15488_v0  ;;  %v4623_v37 = vmul.f32 %v18939_v11, %v15496_v62  ;;  %v5090_v21 = vld [vmem:[#allocation8 + $0xe8] sm:$0xff]  ;;  %v5089_v1 = vld [vmem:[#allocation8 + $0xe0] sm:$0xff] }
 0x343   : > { %18933 = vst [vmem:[#allocation85_spill] sm:$0xff] %v15496_v62  ;;  %18935 = vst [vmem:[#allocation84_spill] sm:$0xff] %v15500_v2  ;;  %v4668_v59 = vmul.f32 %v4620_v32, %v4620_v32  ;;  %11477 = vmatprep.subr.mxu1 %v5090_v21  ;;  %v5026_v32 = vld [vmem:[#allocation8 + $0x70] sm:$0xff]  ;;  %v15518_v20 = vsub.f32 %v18943_v49, %v15406_v5  ;;  %v5088_v8 = vld [vmem:[#allocation8 + $0xd8] sm:$0xff] }
 0x344   : > { %v4669_v25 = vmul.f32 %v4621_v56, %v4621_v56  ;;  %18938 = vst [vmem:[#allocation29_spill] sm:$0xff] %v15506_v9  ;;  %18941 = vst [vmem:[#allocation26_spill] sm:$0xff] %v15512_v6  ;;  %v18942_v56 = vld [vmem:[#allocation72_spill] sm:$0xff]  ;;  %v4670_v23 = vmul.f32 %v4622_v22, %v4622_v22  ;;  %11478 = vmatpush3.msra.mxu1 %v5090_v21  ;;  %v18944_v53 = vld [vmem:[#allocation71_spill] sm:$0xff]  ;;  %v4671_v62 = vmul.f32 %v4623_v37, %v4623_v37 }
 0x345   : > { %v4624_v34 = vmul.f32 %v18942_v56, %v15500_v2  ;;  %11479 = vmatprep.subr.mxu1 %v5089_v1  ;;  %v4625_v11 = vmul.f32 %v18944_v53, %v15506_v9  ;;  %11579 = vmatprep.subr.mxu0 %v5026_v32  ;;  %v18945_v22 = vld [vmem:[#allocation21_spill] sm:$0xff]  ;;  %v5087_v2 = vld [vmem:[#allocation8 + $0xd0] sm:$0xff]  ;;  %v18950_v37 = vld [vmem:[#allocation74_spill] sm:$0xff] }
 0x346   : > { %v4716_v0 = vadd.f32 %v4669_v25, %v4668_v59  ;;  %11480 = vmatpush3.msra.mxu1 %v5089_v1  ;;  %v15524_v21 = vsub.f32 %v18945_v22, %v15406_v5  ;;  %11580 = vmatpush3.msra.mxu0 %v5026_v32  ;;  %v5024_v59 = vld [vmem:[#allocation8 + $0x60] sm:$0xff]  ;;  %v18947_v25 = vld [vmem:[#allocation75_spill] sm:$0xff]  ;;  %v4627_v22 = vmul.f32 %v18950_v37, %v15518_v20  ;;  %v5086_v9 = vld [vmem:[#allocation8 + $0xc8] sm:$0xff] }
 0x347   : > { %11481 = vmatprep.subr.mxu1 %v5088_v8  ;;  %v4626_v49 = vmul.f32 %v18947_v25, %v15512_v6  ;;  %v4672_v24 = vmul.f32 %v4624_v34, %v4624_v34  ;;  %11581 = vmatprep.subr.mxu0 %v5025_v41  ;;  %v4673_v32 = vmul.f32 %v4625_v11, %v4625_v11  ;;  %v18953_v34 = vld [vmem:[#allocation78_spill] sm:$0xff]  ;;  %v5085_v6 = vld [vmem:[#allocation8 + $0xc0] sm:$0xff]  ;;  %v5084_v37 = vld [vmem:[#allocation8 + $0xb8] sm:$0xff] }
 0x348   : > { %v4717_v43 = vadd.f32 %v4716_v0, %v4670_v23  ;;  %18946 = vst [vmem:[#allocation20_spill] sm:$0xff] %v15524_v21  ;;  %11482 = vmatpush3.msra.mxu1 %v5088_v8  ;;  %v18948_v0 = vld [vmem:[#allocation67_spill] sm:$0xff]  ;;  %11582 = vmatpush3.msra.mxu0 %v5025_v41  ;;  %v5023_v23 = vld [vmem:[#allocation8 + $0x58] sm:$0xff]  ;;  %v5021_v11 = vld [vmem:[#allocation8 + $0x48] sm:$0xff] }
 0x349   : > { %v15530_v1 = vsub.f32 %v18948_v0, %v15406_v5  ;;  %11483 = vmatprep.subr.mxu1 %v5087_v2  ;;  %11583 = vmatprep.subr.mxu0 %v5024_v59  ;;  %v4628_v0 = vmul.f32 %v18953_v34, %v15524_v21  ;;  %v4674_v41 = vmul.f32 %v4626_v49, %v4626_v49  ;;  %v5020_v49 = vld [vmem:[#allocation8 + $0x40] sm:$0xff]  ;;  %v5083_v21 = vld [vmem:[#allocation8 + $0xb0] sm:$0xff] }
 0x34a   : > { %v4718_v56 = vadd.f32 %v4717_v43, %v4671_v62  ;;  %11484 = vmatpush3.msra.mxu1 %v5087_v2  ;;  %v18951_v43 = vld [vmem:[#allocation86_spill] sm:$0xff]  ;;  %11584 = vmatpush3.msra.mxu0 %v5024_v59  ;;  %v5022_v62 = vld [vmem:[#allocation8 + $0x50] sm:$0xff]  ;;  %v15542_v2 = vsub.f32 %v14986_v60, %v15406_v5  ;;  %v4675_v59 = vmul.f32 %v4627_v22, %v4627_v22  ;;  %v5019_v22 = vld [vmem:[#allocation8 + $0x38] sm:$0xff] }
 0x34b   : > { %18949 = vst [vmem:[#allocation38_spill] sm:$0xff] %v15530_v1  ;;  %v15536_v8 = vsub.f32 %v18951_v43, %v15406_v5  ;;  %11485 = vmatprep.subr.mxu1 %v5086_v9  ;;  %11585 = vmatprep.subr.mxu0 %v5023_v23  ;;  %v18957_v60 = vld [vmem:[#allocation55_spill] sm:$0xff] }
 0x34c   : > { %v4719_v53 = vadd.f32 %v4718_v56, %v4672_v24  ;;  %11486 = vmatpush3.msra.mxu1 %v5086_v9  ;;  %18954 = vst [vmem:[#allocation31_spill] sm:$0xff] %v15542_v2  ;;  %11586 = vmatpush3.msra.mxu0 %v5023_v23  ;;  %v18955_v56 = vld [vmem:[#allocation77_spill] sm:$0xff]  ;;  %v4676_v23 = vmul.f32 %v4628_v0, %v4628_v0  ;;  %v18960_v0 = vld [vmem:[#allocation76_spill] sm:$0xff] }
 0x34d   : > { %18952 = vst [vmem:[#allocation60_spill] sm:$0xff] %v15536_v8  ;;  %11487 = vmatprep.subr.mxu1 %v5085_v6  ;;  %v4629_v24 = vmul.f32 %v18955_v56, %v15530_v1  ;;  %11587 = vmatprep.subr.mxu0 %v5022_v62  ;;  %v5082_v1 = vld [vmem:[#allocation8 + $0xa8] sm:$0xff] }
 0x34e   : > { %v4720_v25 = vadd.f32 %v4719_v53, %v4673_v32  ;;  %11488 = vmatpush3.msra.mxu1 %v5085_v6  ;;  %v18956_v53 = vld [vmem:[#allocation33_spill] sm:$0xff]  ;;  %11588 = vmatpush3.msra.mxu0 %v5022_v62  ;;  %v4630_v32 = vmul.f32 %v18957_v60, %v15536_v8 }
 0x34f   : > { %v15548_v9 = vsub.f32 %v18956_v53, %v15406_v5  ;;  %11489 = vmatprep.subr.mxu1 %v5084_v37  ;;  %11589 = vmatprep.subr.mxu0 %v5021_v11  ;;  %v4677_v62 = vmul.f32 %v4629_v24, %v4629_v24  ;;  %v5081_v8 = vld [vmem:[#allocation8 + $0xa0] sm:$0xff]  ;;  %v5017_v24 = vld [vmem:[#allocation8 + $0x28] sm:$0xff] }
 0x350   : > { %v4721_v43 = vadd.f32 %v4720_v25, %v4674_v41  ;;  %11490 = vmatpush3.msra.mxu1 %v5084_v37  ;;  %v18958_v25 = vld [vmem:[#allocation73_spill] sm:$0xff]  ;;  %11590 = vmatpush3.msra.mxu0 %v5021_v11  ;;  %v18959_v41 = vld [vmem:[#allocation80_spill] sm:$0xff]  ;;  %v15560_v37 = vsub.f32 %v18960_v0, %v15406_v5  ;;  %v4678_v11 = vmul.f32 %v4630_v32, %v4630_v32 }
 0x351   : > { %v15554_v6 = vsub.f32 %v18958_v25, %v15406_v5  ;;  %11491 = vmatprep.subr.mxu1 %v5083_v21  ;;  %v4631_v53 = vmul.f32 %v18959_v41, %v15542_v2  ;;  %11591 = vmatprep.subr.mxu0 %v5020_v49  ;;  %v5080_v2 = vld [vmem:[#allocation8 + $0x98] sm:$0xff]  ;;  %v18964_v32 = vld [vmem:[#allocation65_spill] sm:$0xff] }
 0x352   : > { %v4722_v34 = vadd.f32 %v4721_v43, %v4675_v59  ;;  %11492 = vmatpush3.msra.mxu1 %v5083_v21  ;;  %11592 = vmatpush3.msra.mxu0 %v5020_v49  ;;  %v5018_v59 = vld [vmem:[#allocation8 + $0x30] sm:$0xff]  ;;  %v18961_v43 = vld [vmem:[#allocation57_spill] sm:$0xff] }
 0x353   : > { %11493 = vmatprep.subr.mxu1 %v5082_v1  ;;  %v4632_v25 = vmul.f32 %v18961_v43, %v15548_v9  ;;  %11593 = vmatprep.subr.mxu0 %v5019_v22  ;;  %v4679_v49 = vmul.f32 %v4631_v53, %v4631_v53  ;;  %v5079_v43 = vld [vmem:[#allocation8 + $0x90] sm:$0xff] }
 0x354   : > { %v4723_v56 = vadd.f32 %v4722_v34, %v4676_v23  ;;  %11494 = vmatpush3.msra.mxu1 %v5082_v1  ;;  %v18962_v34 = vld [vmem:[#allocation23_spill] sm:$0xff]  ;;  %11594 = vmatpush3.msra.mxu0 %v5019_v22  ;;  %v18963_v23 = vld [vmem:[#allocation56_spill] sm:$0xff]  ;;  %v15572_v1 = vsub.f32 %v15069_v39, %v15406_v5  ;;  %v18965_v39 = vld [vmem:[#allocation62_spill] sm:$0xff] }
 0x355   : > { %v15566_v21 = vsub.f32 %v18962_v34, %v15406_v5  ;;  %11495 = vmatprep.subr.mxu1 %v5081_v8  ;;  %v4633_v0 = vmul.f32 %v18963_v23, %v15554_v6  ;;  %11595 = vmatprep.subr.mxu0 %v5018_v59  ;;  %v4680_v22 = vmul.f32 %v4632_v25, %v4632_v25  ;;  %v5078_v23 = vld [vmem:[#allocation8 + $0x88] sm:$0xff] }
 0x356   : > { %v4724_v60 = vadd.f32 %v4723_v56, %v4677_v62  ;;  %11496 = vmatpush3.msra.mxu1 %v5081_v8  ;;  %11596 = vmatpush3.msra.mxu0 %v5018_v59  ;;  %v5016_v56 = vld [vmem:[#allocation8 + $0x20] sm:$0xff]  ;;  %v4634_v62 = vmul.f32 %v18964_v32, %v15560_v37  ;;  %v15578_v8 = vsub.f32 %v15066_v54, %v15406_v5 }
 0x357   : > { %11497 = vmatprep.subr.mxu1 %v5080_v2  ;;  %11597 = vmatprep.subr.mxu0 %v5017_v24  ;;  %v4635_v53 = vmul.f32 %v18965_v39, %v15566_v21  ;;  %v4681_v59 = vmul.f32 %v4633_v0, %v4633_v0  ;;  %v4636_v54 = vmul.f32 %v14716_v38, %v15572_v1  ;;  %v5013_v0 = vld [vmem:[#allocation8 + $0x8] sm:$0xff] }
 0x358   : > { %v4725_v41 = vadd.f32 %v4724_v60, %v4678_v11  ;;  %11498 = vmatpush3.msra.mxu1 %v5080_v2  ;;  %11598 = vmatpush3.msra.mxu0 %v5017_v24  ;;  %v5015_v60 = vld [vmem:[#allocation8 + $0x18] sm:$0xff]  ;;  %v15584_v2 = vsub.f32 %v15098_v31, %v15406_v5  ;;  %v4682_v25 = vmul.f32 %v4634_v62, %v4634_v62  ;;  %v5028_v31 = vld [vmem:[#allocation2 + $0x1] sm:$0xff] }
 0x359   : > { %11499 = vmatprep.subr.mxu1 %v5079_v43  ;;  %11599 = vmatprep.subr.mxu0 %v5016_v56  ;;  %v5029_v62 = vld [vmem:[#allocation2 + $0x9] sm:$0xff] }
 0x35a   : > { %v4726_v34 = vadd.f32 %v4725_v41, %v4679_v49  ;;  %11500 = vmatpush3.msra.mxu1 %v5079_v43  ;;  %11600 = vmatpush3.msra.mxu0 %v5016_v56  ;;  %v5014_v41 = vld [vmem:[#allocation8 + $0x10] sm:$0xff]  ;;  %v5077_v49 = vld [vmem:[#allocation8 + $0x80] sm:$0xff]  ;;  %v15590_v43 = vsub.f32 %v15095_v26, %v15406_v5  ;;  %v4637_v56 = vmul.f32 %v18852_v40, %v15578_v8 }
 0x35b   : > { %11501 = vmatprep.subr.mxu1 %v5078_v23  ;;  %11601 = vmatprep.subr.mxu0 %v5015_v60  ;;  %v18967_v26 = vld [vmem:[#allocation17_spill] sm:$0xff] }
 0x35c   : > { %v4727_v11 = vadd.f32 %v4726_v34, %v4680_v22  ;;  %11502 = vmatpush3.msra.mxu1 %v5078_v23  ;;  %11602 = vmatpush3.msra.mxu0 %v5015_v60  ;;  %v4683_v22 = vmul.f32 %v4635_v53, %v4635_v53  ;;  %v15596_v23 = vsub.f32 %v15122_v46, %v15406_v5 }
 0x35d   : > { %11503 = vmatprep.subr.mxu1 %v5077_v49  ;;  %11603 = vmatprep.subr.mxu0 %v5014_v41  ;;  %v4638_v60 = vmul.f32 %v18967_v26, %v15584_v2  ;;  %v15602_v53 = vsub.f32 %v15119_v52, %v15406_v5  ;;  %v4685_v46 = vmul.f32 %v4637_v56, %v4637_v56  ;;  %v12492_v26 = vld [vmem:[#allocation2 + $0x1b9] sm:$0xff]  ;;  %v5767_v52 = vld [vmem:[#allocation8 + $0x178] sm:$0xff] }
 0x35e   : > { %v4728_v24 = vadd.f32 %v4727_v11, %v4681_v59  ;;  %11504 = vmatpush3.msra.mxu1 %v5077_v49  ;;  %18966 = vst [vmem:[#allocation21_spill] sm:$0xff] %v15596_v23  ;;  %11604 = vmatpush3.msra.mxu0 %v5014_v41  ;;  %v5012_v59 = vld [vmem:[#allocation8] sm:$0xff]  ;;  %v4684_v11 = vmul.f32 %v4636_v54, %v4636_v54  ;;  %v18970_v41 = vld [vmem:[#allocation54_spill] sm:$0xff] }
 0x35f   : > { %11505 = vmatprep.mubr.f32.mxu1 %v5028_v31  ;;  %11605 = vmatprep.subr.mxu0 %v5013_v0  ;;  %18968 = vst [vmem:[#allocation67_spill] sm:$0xff] %v15602_v53  ;;  %v15608_v31 = vsub.f32 %v18970_v41, %v15406_v5  ;;  %v5030_v54 = vld [vmem:[#allocation2 + $0x11] sm:$0xff] }
 0x360   : > { %v4729_v34 = vadd.f32 %v4728_v24, %v4682_v25  ;;  %11506 = vmatmul.mubr.f32.vlgmr.msra.gmra.mxu1 %v5029_v62  ;;  %11606 = vmatpush3.msra.mxu0 %v5013_v0  ;;  %v18969_v25 = vld [vmem:[#allocation14_spill] sm:$0xff]  ;;  %v4686_v0 = vmul.f32 %v4638_v60, %v4638_v60 }
 0x361   : > { %v4639_v24 = vmul.f32 %v18969_v25, %v15590_v43  ;;  %11607 = vmatprep.subr.mxu0 %v5012_v59  ;;  %18971 = vst [vmem:[#allocation86_spill] sm:$0xff] %v15608_v31  ;;  %11508 = vmatprep.mubr.f32.mxu1 %v5030_v54  ;;  %v5766_v25 = vld [vmem:[#allocation8 + $0x170] sm:$0xff]  ;;  %v18976_v60 = vld [vmem:[#allocation58_spill] sm:$0xff] }
 0x362   : > { %v4730_v38 = vadd.f32 %v4729_v34, %v4683_v22  ;;  %11608 = vmatpush3.msra.mxu0 %v5012_v59  ;;  %v18972_v22 = vld [vmem:[#allocation82_spill] sm:$0xff]  ;;  %11681 = vmatprep.subr.mxu1 %v5767_v52 }
 0x363   : > { %v4640_v34 = vmul.f32 %v18972_v22, %v15596_v23  ;;  %11610 = vmatmul.mubr.f32.vlgmr.msra.gmra.mxu0 %v12492_v26  ;;  %v4687_v59 = vmul.f32 %v4639_v24, %v4639_v24  ;;  %11682 = vmatpush3.msra.mxu1 %v5767_v52  ;;  %v18980_v24 = vld [vmem:[#allocation83_spill] sm:$0xff] }
 0x364   : > { %v4731_v49 = vadd.f32 %v4730_v38, %v4684_v11  ;;  %11612 = vmatprep.mubr.f32.mxu0 %v12492_v26  ;;  %v18973_v38 = vld [vmem:[#allocation53_spill] sm:$0xff]  ;;  %11683 = vmatprep.subr.mxu1 %v5766_v25 }
 0x365   : > { %v15614_v56 = vsub.f32 %v18973_v38, %v15406_v5  ;;  %v18975_v11 = vld [vmem:[#allocation81_spill] sm:$0xff]  ;;  %v4688_v26 = vmul.f32 %v4640_v34, %v4640_v34  ;;  %11684 = vmatpush3.msra.mxu1 %v5766_v25  ;;  %v18978_v38 = vld [vmem:[#allocation59_spill] sm:$0xff]  ;;  %v18983_v34 = vld [vmem:[#allocation36_spill] sm:$0xff] }
 0x366   : > { %v4732_v62 = vadd.f32 %v4731_v49, %v4685_v46  ;;  %v4641_v41 = vmul.f32 %v18975_v11, %v15602_v53  ;;  %v15620_v46 = vsub.f32 %v18976_v60, %v15406_v5  ;;  %v18977_v49 = vld [vmem:[#allocation18_spill] sm:$0xff]  ;;  %v15626_v39 = vsub.f32 %v18978_v38, %v15406_v5  ;;  %v18981_v60 = vld [vmem:[#allocation15_spill] sm:$0xff] }
 0x367   : > { %18974 = vst [vmem:[#allocation33_spill] sm:$0xff] %v15614_v56  ;;  %v4642_v54 = vmul.f32 %v18977_v49, %v15608_v31  ;;  %v5765_v11 = vld [vmem:[#allocation8 + $0x168] sm:$0xff]  ;;  %v15632_v32 = vsub.f32 %v18981_v60, %v15406_v5  ;;  %v18984_v38 = vld [vmem:[#allocation39_spill] sm:$0xff] }
 0x368   : > { %v4733_v40 = vadd.f32 %v4732_v62, %v4686_v0  ;;  %18979 = vst [vmem:[#allocation73_spill] sm:$0xff] %v15626_v39  ;;  %v4643_v0 = vmul.f32 %v18980_v24, %v15614_v56  ;;  %v4689_v62 = vmul.f32 %v4641_v41, %v4641_v41  ;;  %11685 = vmatprep.subr.mxu1 %v5765_v11  ;;  %v18985_v24 = vld [vmem:[#allocation19_spill] sm:$0xff]  ;;  %v5764_v56 = vld [vmem:[#allocation8 + $0x160] sm:$0xff]  ;;  %v18986_v31 = vld [vmem:[#allocation42_spill] sm:$0xff] }
 0x369   : > { %18982 = vst [vmem:[#allocation76_spill] sm:$0xff] %v15632_v32  ;;  %11686 = vmatpush3.msra.mxu1 %v5765_v11  ;;  %v15638_v49 = vsub.f32 %v18984_v38, %v15406_v5  ;;  %v4645_v41 = vmul.f32 %v18985_v24, %v15626_v39  ;;  %v4646_v60 = vmul.f32 %v18986_v31, %v15632_v32  ;;  %v18990_v31 = vld [vmem:[#allocation32_spill] sm:$0xff] }
 0x36a   : > { %v4734_v22 = vadd.f32 %v4733_v40, %v4687_v59  ;;  %v4644_v40 = vmul.f32 %v18983_v34, %v15620_v46  ;;  %v4690_v59 = vmul.f32 %v4642_v54, %v4642_v54  ;;  %11687 = vmatprep.subr.mxu1 %v5764_v56  ;;  %v18987_v54 = vld [vmem:[#allocation41_spill] sm:$0xff] }
 0x36b   : > { %11688 = vmatpush3.msra.mxu1 %v5764_v56  ;;  %v15646_v11 = vsub.f32 %v18987_v54, %v15406_v5  ;;  %v4693_v38 = vmul.f32 %v4645_v41, %v4645_v41  ;;  %v5763_v56 = vld [vmem:[#allocation8 + $0x158] sm:$0xff] }
 0x36c   : > { %v4735_v52 = vadd.f32 %v4734_v22, %v4688_v26  ;;  %v4691_v22 = vmul.f32 %v4643_v0, %v4643_v0  ;;  %v4692_v53 = vmul.f32 %v4644_v40, %v4644_v40  ;;  %v18989_v0 = vld [vmem:[#allocation22_spill] sm:$0xff]  ;;  %11689 = vmatprep.subr.mxu1 %v5763_v56  ;;  %v18991_v5 = vld [vmem:[#allocation24_spill] sm:$0xff] }
 0x36d   : > { %v4649_v40 = vmul.f32 %v18990_v31, %v15646_v11  ;;  %v4650_v54 = vmul.f32 %v18991_v5, %v15414_v4  ;;  %11690 = vmatpush3.msra.mxu1 %v5763_v56 }
 0x36e   : > { %v4736_v25 = vadd.f32 %v4735_v52, %v4689_v62  ;;  %v18988_v62 = vld [vmem:[#allocation70_spill] sm:$0xff] }
 0x36f   : > { %v4647_v52 = vmul.f32 %v18988_v62, %v15638_v49  ;;  %v4697_v41 = vmul.f32 %v4649_v40, %v4649_v40  ;;  %v4698_v31 = vmul.f32 %v4650_v54, %v4650_v54 }
 0x370   : > { %v4737_v26 = vadd.f32 %v4736_v25, %v4690_v59  ;;  %v4648_v59 = vmul.f32 %v18989_v0, %v15410_v35  ;;  %v4694_v25 = vmul.f32 %v4646_v60, %v4646_v60  ;;  %v5762_v60 = vld [vmem:[#allocation8 + $0x150] sm:$0xff] }
 0x371   : > { %11691 = vmatprep.subr.mxu1 %v5762_v60 }
 0x372   : > { %v4738_v23 = vadd.f32 %v4737_v26, %v4691_v22  ;;  %v4695_v22 = vmul.f32 %v4647_v52, %v4647_v52  ;;  %v4696_v32 = vmul.f32 %v4648_v59, %v4648_v59  ;;  %11692 = vmatpush3.msra.mxu1 %v5762_v60 }
 0x374   : > { %v4739_v34 = vadd.f32 %v4738_v23, %v4692_v53  ;;  %v18992_v23 = vld [vmem:[#allocation34_spill] sm:$0xff] }
 0x375   : > { %v4651_v53 = vmul.f32 %v18992_v23, %v15418_v57 }
 0x376   : > { %v4740_v24 = vadd.f32 %v4739_v34, %v4693_v38  ;;  %v18993_v34 = vld [vmem:[#allocation35_spill] sm:$0xff] }
 0x377   : > { %v4652_v38 = vmul.f32 %v18993_v34, %v15422_v15  ;;  %v4699_v5 = vmul.f32 %v4651_v53, %v4651_v53  ;;  %v5761_v34 = vld [vmem:[#allocation8 + $0x148] sm:$0xff] }
 0x378   : > { %v4741_v26 = vadd.f32 %v4740_v24, %v4694_v25  ;;  %v18994_v24 = vld [vmem:[#allocation79_spill] sm:$0xff]  ;;  %11693 = vmatprep.subr.mxu1 %v5761_v34 }
 0x379   : > { %v4653_v25 = vmul.f32 %v18994_v24, %v15426_v29  ;;  %11694 = vmatpush3.msra.mxu1 %v5761_v34  ;;  %v4660_v34 = vmul.f32 %v15348_v63, %v15454_v51 }
 0x37a   : > { %v4742_v39 = vadd.f32 %v4741_v26, %v4695_v22  ;;  %v4654_v22 = vmul.f32 %v15169_v28, %v15430_v58  ;;  %v4700_v26 = vmul.f32 %v4652_v38, %v4652_v38  ;;  %v5760_v38 = vld [vmem:[#allocation8 + $0x140] sm:$0xff] }
 0x37b   : > { %11695 = vmatprep.subr.mxu1 %v5760_v38 }
 0x37c   : > { %v4743_v0 = vadd.f32 %v4742_v39, %v4696_v32  ;;  %v4655_v32 = vmul.f32 %v15143_v55, %v15434_v47  ;;  %v4701_v39 = vmul.f32 %v4653_v25, %v4653_v25  ;;  %v4702_v54 = vmul.f32 %v4654_v22, %v4654_v22  ;;  %11696 = vmatpush3.msra.mxu1 %v5760_v38 }
 0x37e   : > { %v4744_v52 = vadd.f32 %v4743_v0, %v4697_v41  ;;  %v4656_v0 = vmul.f32 %v15238_v27, %v15438_v45  ;;  %v4703_v53 = vmul.f32 %v4655_v32, %v4655_v32  ;;  %v4661_v32 = vmul.f32 %v15362_v30, %v15458_v10 }
 0x380   : > { %v4745_v59 = vadd.f32 %v4744_v52, %v4698_v31  ;;  %v4657_v31 = vmul.f32 %v15222_v42, %v15442_v48  ;;  %v4704_v52 = vmul.f32 %v4656_v0, %v4656_v0  ;;  %v4662_v0 = vmul.f32 %v15372_v33, %v15461_v7 }
 0x381   : > { %v4709_v38 = vmul.f32 %v4661_v32, %v4661_v32  ;;  %v18995_v32 = vld [vmem:[#allocation51_spill] sm:$0xff] }
 0x382   : > { %v4746_v56 = vadd.f32 %v4745_v59, %v4699_v5  ;;  %v4658_v5 = vmul.f32 %v15323_v50, %v15446_v13  ;;  %v4659_v59 = vmul.f32 %v15305_v36, %v15450_v17 }
 0x384   : > { %v4747_v40 = vadd.f32 %v4746_v56, %v4700_v26  ;;  %v4705_v26 = vmul.f32 %v4657_v31, %v4657_v31  ;;  %v4706_v56 = vmul.f32 %v4658_v5, %v4658_v5  ;;  %v4663_v31 = vmul.f32 %v15382_v19, %v15464_v18  ;;  %v5758_v5 = vld [vmem:[#allocation8 + $0x130] sm:$0xff] }
 0x386   : > { %v4748_v41 = vadd.f32 %v4747_v40, %v4701_v39  ;;  %v4707_v40 = vmul.f32 %v4659_v59, %v4659_v59 }
 0x388   : > { %v4749_v60 = vadd.f32 %v4748_v41, %v4702_v54  ;;  %v5759_v41 = vld [vmem:[#allocation8 + $0x138] sm:$0xff] }
 0x389   : > { %11697 = vmatprep.subr.mxu1 %v5759_v41 }
 0x38a   : > { %v4750_v25 = vadd.f32 %v4749_v60, %v4703_v53  ;;  %v4708_v53 = vmul.f32 %v4660_v34, %v4660_v34  ;;  %11698 = vmatpush3.msra.mxu1 %v5759_v41  ;;  %v18996_v41 = vld [vmem:[#allocation49_spill] sm:$0xff] }
 0x38b   : > { %11699 = vmatprep.subr.mxu1 %v5758_v5 }
 0x38c   : > { %v4751_v22 = vadd.f32 %v4750_v25, %v4704_v52  ;;  %v4664_v25 = vmul.f32 %v15389_v12, %v15467_v16  ;;  %11700 = vmatpush3.msra.mxu1 %v5758_v5  ;;  %v5757_v12 = vld [vmem:[#allocation8 + $0x128] sm:$0xff] }
 0x38d   : > { %11701 = vmatprep.subr.mxu1 %v5757_v12 }
 0x38e   : > { %v4752_v39 = vadd.f32 %v4751_v22, %v4705_v26  ;;  %v4710_v26 = vmul.f32 %v4662_v0, %v4662_v0  ;;  %v4665_v22 = vmul.f32 %v15394_v44, %v15470_v61  ;;  %11702 = vmatpush3.msra.mxu1 %v5757_v12  ;;  %v6185_v44 = vld [vmem:[#allocation8 + $0x1f8] sm:$0xff] }
 0x38f   : > { %11785 = vmatprep.subr.mxu0 %v6185_v44  ;;  %v5755_v12 = vld [vmem:[#allocation8 + $0x118] sm:$0xff] }
 0x390   : > { %v4753_v54 = vadd.f32 %v4752_v39, %v4706_v56  ;;  %v4711_v56 = vmul.f32 %v4663_v31, %v4663_v31  ;;  %v4666_v39 = vmul.f32 %v15398_v14, %v15473_v3  ;;  %v5756_v31 = vld [vmem:[#allocation8 + $0x120] sm:$0xff]  ;;  %11786 = vmatpush3.msra.mxu0 %v6185_v44 }
 0x391   : > { %11703 = vmatprep.subr.mxu1 %v5756_v31 }
 0x392   : > { %v4754_v60 = vadd.f32 %v4753_v54, %v4707_v40  ;;  %v4712_v40 = vmul.f32 %v4664_v25, %v4664_v25  ;;  %v4714_v0 = vmul.f32 %v4666_v39, %v4666_v39  ;;  %11704 = vmatpush3.msra.mxu1 %v5756_v31  ;;  %v6181_v39 = vld [vmem:[#allocation8 + $0x1d8] sm:$0xff]  ;;  %v6176_v31 = vld [vmem:[#allocation8 + $0x1b0] sm:$0xff] }
 0x393   : > { %11705 = vmatprep.subr.mxu1 %v5755_v12 }
 0x394   : > { %v4755_v52 = vadd.f32 %v4754_v60, %v4708_v53  ;;  %v4667_v53 = vmul.f32 %v18996_v41, %v18995_v32  ;;  %v4713_v60 = vmul.f32 %v4665_v22, %v4665_v22  ;;  %v6183_v22 = vld [vmem:[#allocation8 + $0x1e8] sm:$0xff]  ;;  %11706 = vmatpush3.msra.mxu1 %v5755_v12 }
 0x395   : > { %v6171_v12 = vld [vmem:[#allocation8 + $0x188] sm:$0xff] }
 0x396   : > { %v4756_v59 = vadd.f32 %v4755_v52, %v4709_v38  ;;  %v4715_v52 = vmul.f32 %v4667_v53, %v4667_v53  ;;  %v6179_v53 = vld [vmem:[#allocation8 + $0x1c8] sm:$0xff] }
 0x398   : > { %v4757_v34 = vadd.f32 %v4756_v59, %v4710_v26  ;;  %v6184_v26 = vld [vmem:[#allocation8 + $0x1f0] sm:$0xff] }
 0x399   : > { %11787 = vmatprep.subr.mxu0 %v6184_v26 }
 0x39a   : > { %v4758_v54 = vadd.f32 %v4757_v34, %v4711_v56  ;;  %11788 = vmatpush3.msra.mxu0 %v6184_v26  ;;  %v6182_v56 = vld [vmem:[#allocation8 + $0x1e0] sm:$0xff] }
 0x39b   : > { %11789 = vmatprep.subr.mxu0 %v6183_v22 }
 0x39c   : > { %v4759_v19 = vadd.f32 %v4758_v54, %v4712_v40  ;;  %11790 = vmatpush3.msra.mxu0 %v6183_v22  ;;  %v6180_v40 = vld [vmem:[#allocation8 + $0x1d0] sm:$0xff]  ;;  %v6174_v22 = vld [vmem:[#allocation8 + $0x1a0] sm:$0xff] }
 0x39d   : > { %11791 = vmatprep.subr.mxu0 %v6182_v56 }
 0x39e   : > { %v4760_v38 = vadd.f32 %v4759_v19, %v4713_v60  ;;  %11792 = vmatpush3.msra.mxu0 %v6182_v56  ;;  %v5754_v60 = vld [vmem:[#allocation8 + $0x110] sm:$0xff]  ;;  %v6173_v56 = vld [vmem:[#allocation8 + $0x198] sm:$0xff] }
 0x39f   : > { %11793 = vmatprep.subr.mxu0 %v6181_v39  ;;  %11707 = vmatprep.subr.mxu1 %v5754_v60 }
 0x3a0   : > { %v4761_v5 = vadd.f32 %v4760_v38, %v4714_v0  ;;  %11794 = vmatpush3.msra.mxu0 %v6181_v39  ;;  %v6178_v0 = vld [vmem:[#allocation8 + $0x1c0] sm:$0xff]  ;;  %11708 = vmatpush3.msra.mxu1 %v5754_v60 }
 0x3a1   : > { %11795 = vmatprep.subr.mxu0 %v6180_v40  ;;  %v6170_v39 = vld [vmem:[#allocation8 + $0x180] sm:$0xff] }
 0x3a2   : > { %v4762_v59 = vadd.f32 %v4761_v5, %v4715_v52  ;;  %11796 = vmatpush3.msra.mxu0 %v6180_v40  ;;  %v6177_v5 = vld [vmem:[#allocation8 + $0x1b8] sm:$0xff] }
 0x3a3   : > { %11797 = vmatprep.subr.mxu0 %v6179_v53  ;;  %v15690_v40 = vld [vmem:[#allocation8 + $0x278] sm:$0xff] }
 0x3a4   : > { %v4763_v25 = vrot.slane %v4762_v59, 4  ;;  %11798 = vmatpush3.msra.mxu0 %v6179_v53  ;;  %18997 = vst [vmem:[#allocation23_spill] sm:$0xff] %v15690_v40  ;;  %v18998_v53 = vld [vmem:[#allocation16_spill] sm:$0xff] }
 0x3a5   : > { %11799 = vmatprep.subr.mxu0 %v6178_v0 }
 0x3a6   : > { %v4764_v34 = vadd.f32 %v4763_v25, %v4762_v59  ;;  %11800 = vmatpush3.msra.mxu0 %v6178_v0  ;;  %v5753_v59 = vld [vmem:[#allocation8 + $0x108] sm:$0xff]  ;;  %v18999_v0 = vld [vmem:[#allocation52_spill] sm:$0xff] }
 0x3a7   : > { %11801 = vmatprep.subr.mxu0 %v6177_v5  ;;  %v6175_v25 = vld [vmem:[#allocation8 + $0x1a8] sm:$0xff]  ;;  %11709 = vmatprep.subr.mxu1 %v5753_v59 }
 0x3a8   : > { %v4765_v19 = vrot.slane %v4764_v34, 2  ;;  %11802 = vmatpush3.msra.mxu0 %v6177_v5  ;;  %11710 = vmatpush3.msra.mxu1 %v5753_v59  ;;  %v19002_v59 = vld [vmem:[#allocation84_spill] sm:$0xff] }
 0x3a9   : > { %11803 = vmatprep.subr.mxu0 %v6176_v31 }
 0x3aa   : > { %v4766_v54 = vadd.f32 %v4765_v19, %v4764_v34  ;;  %11804 = vmatpush3.msra.mxu0 %v6176_v31  ;;  %v5752_v34 = vld [vmem:[#allocation8 + $0x100] sm:$0xff]  ;;  %v6172_v19 = vld [vmem:[#allocation8 + $0x190] sm:$0xff] }
 0x3ab   : > { %11805 = vmatprep.subr.mxu0 %v6175_v25  ;;  %11711 = vmatprep.subr.mxu1 %v5752_v34  ;;  %v19001_v31 = vld [vmem:[#allocation85_spill] sm:$0xff] }
 0x3ac   : > { %v4767_v44 = vrot.slane %v4766_v54, 1  ;;  %11806 = vmatpush3.msra.mxu0 %v6175_v25  ;;  %11712 = vmatpush3.msra.mxu1 %v5752_v34  ;;  %v19004_v34 = vld [vmem:[#allocation26_spill] sm:$0xff] }
 0x3ad   : > { %11807 = vmatprep.subr.mxu0 %v6174_v22  ;;  %11889 = vmatprep.subr.mxu1 %v15690_v40 }
 0x3ae   : > { %v4768_v38 = vadd.f32 %v4767_v44, %v4766_v54  ;;  %11808 = vmatpush3.msra.mxu0 %v6174_v22  ;;  %v19003_v22 = vld [vmem:[#allocation29_spill] sm:$0xff] }
 0x3af   : > { %11809 = vmatprep.subr.mxu0 %v6173_v56 }
 0x3b0   : > { %v4769_v52 = vmul.f32 0.00390625, %v4768_v38  ;;  %11810 = vmatpush3.msra.mxu0 %v6173_v56 }
 0x3b1   : > { %11811 = vmatprep.subr.mxu0 %v6172_v19 }
 0x3b2   : > { %v4770_v26 = vadd.f32 1e-05, %v4769_v52  ;;  %11812 = vmatpush3.msra.mxu0 %v6172_v19  ;;  %v19000_v52 = vld [vmem:[#allocation50_spill] sm:$0xff] }
 0x3b3   : > { %11813 = vmatprep.subr.mxu0 %v6171_v12 }
 0x3b4   : > { %12486 = vrsqrt.f32 %v4770_v26  ;;  %11814 = vmatpush3.msra.mxu0 %v6171_v12 }
 0x3b5   : > { %11815 = vmatprep.subr.mxu0 %v6170_v39 }
 0x3b6   : > { %11816 = vmatpush3.msra.mxu0 %v6170_v39  ;;  %v19005_v39 = vld [vmem:[#allocation20_spill] sm:$0xff] }
 0x3c1   : > { %v12487_v54 = vpop.eup %12486 }
 0x3c2   : > { %v4818_v44 = vmul.f32 %v12487_v54, %v15473_v3  ;;  %v15695_v60 = vmul.f32 %v12487_v54, %v18998_v53  ;;  %v15698_v38 = vmul.f32 %v12487_v54, %v18999_v0  ;;  %v15701_v5 = vmul.f32 %v12487_v54, %v19000_v52  ;;  %v19006_v0 = vld [vmem:[#allocation38_spill] sm:$0xff] }
 0x3c3   : > { %v15704_v26 = vmul.f32 %v12487_v54, %v19001_v31  ;;  %v15707_v25 = vmul.f32 %v12487_v54, %v19002_v59  ;;  %v15710_v56 = vmul.f32 %v12487_v54, %v19003_v22  ;;  %v15713_v3 = vmul.f32 %v12487_v54, %v19004_v34  ;;  %v19007_v31 = vld [vmem:[#allocation60_spill] sm:$0xff]  ;;  %v19008_v59 = vld [vmem:[#allocation31_spill] sm:$0xff] }
 0x3c4   : > { %v4866_v19 = vmax.f32 %v4818_v44, 0.0  ;;  %v15716_v12 = vmul.f32 %v12487_v54, %v15518_v20  ;;  %v15719_v53 = vmul.f32 %v12487_v54, %v19005_v39  ;;  %v15722_v52 = vmul.f32 %v12487_v54, %v19006_v0 }
 0x3c5   : > { %v15725_v40 = vmul.f32 %v12487_v54, %v19007_v31  ;;  %v15728_v41 = vmul.f32 %v12487_v54, %v19008_v59  ;;  %v15731_v22 = vmul.f32 %v12487_v54, %v15548_v9  ;;  %v15734_v44 = vmul.f32 %v12487_v54, %v15554_v6  ;;  %v19009_v59 = vld [vmem:[#allocation21_spill] sm:$0xff] }
 0x3c6   : > { %v4914_v20 = vmul.f32 %v15398_v14, %v4866_v19  ;;  %v15738_v34 = vmul.f32 %v12487_v54, %v15560_v37  ;;  %v15741_v39 = vmul.f32 %v12487_v54, %v15566_v21  ;;  %v15744_v0 = vmul.f32 %v12487_v54, %v15572_v1  ;;  %v19010_v37 = vld [vmem:[#allocation67_spill] sm:$0xff]  ;;  %v19011_v21 = vld [vmem:[#allocation86_spill] sm:$0xff]  ;;  %v19012_v1 = vld [vmem:[#allocation33_spill] sm:$0xff] }
 0x3c7   : > { %v15747_v31 = vmul.f32 %v12487_v54, %v15578_v8  ;;  %v15750_v9 = vmul.f32 %v12487_v54, %v15584_v2  ;;  %v15753_v6 = vmul.f32 %v12487_v54, %v15590_v43  ;;  %v15756_v19 = vmul.f32 %v12487_v54, %v19009_v59  ;;  %v19013_v2 = vld [vmem:[#allocation73_spill] sm:$0xff]  ;;  %v19014_v43 = vld [vmem:[#allocation76_spill] sm:$0xff] }
 0x3c8   : > { %4962 = vst [vmem:[#allocation2 + $0x189] sm:$0xff] %v4914_v20  ;;  %v15759_v14 = vmul.f32 %v12487_v54, %v19010_v37  ;;  %v15762_v33 = vmul.f32 %v12487_v54, %v19011_v21  ;;  %v15765_v30 = vmul.f32 %v12487_v54, %v19012_v1  ;;  %v15768_v8 = vmul.f32 %v12487_v54, %v15620_v46 }
 0x3c9   : > { %v15771_v63 = vmul.f32 %v12487_v54, %v19013_v2  ;;  %v15774_v36 = vmul.f32 %v12487_v54, %v19014_v43  ;;  %v15777_v20 = vmul.f32 %v12487_v54, %v15638_v49  ;;  %v15780_v59 = vmul.f32 %v12487_v54, %v15410_v35 }
 0x3ca   : > { %v15783_v37 = vmul.f32 %v12487_v54, %v15646_v11  ;;  %v15786_v21 = vmul.f32 %v12487_v54, %v15414_v4  ;;  %v15789_v46 = vmul.f32 %v12487_v54, %v15418_v57  ;;  %v15792_v1 = vmul.f32 %v12487_v54, %v15422_v15 }
 0x3cb   : > { %v15795_v2 = vmul.f32 %v12487_v54, %v15426_v29  ;;  %v15798_v49 = vmul.f32 %v12487_v54, %v15430_v58  ;;  %v15801_v35 = vmul.f32 %v12487_v54, %v15434_v47  ;;  %v15804_v11 = vmul.f32 %v12487_v54, %v15438_v45 }
 0x3cc   : > { %v15807_v4 = vmul.f32 %v12487_v54, %v15442_v48  ;;  %v15810_v57 = vmul.f32 %v12487_v54, %v15446_v13  ;;  %v15813_v15 = vmul.f32 %v12487_v54, %v15450_v17  ;;  %v15816_v29 = vmul.f32 %v12487_v54, %v15454_v51 }
 0x3cd   : > { %v15819_v58 = vmul.f32 %v12487_v54, %v15458_v10  ;;  %v15822_v47 = vmul.f32 %v12487_v54, %v15461_v7  ;;  %v15825_v45 = vmul.f32 %v12487_v54, %v15464_v18  ;;  %v15828_v48 = vmul.f32 %v12487_v54, %v15467_v16 }
 0x3ce   : > { %19015 = vst [vmem:[#allocation54_spill] sm:$0xff] %v15807_v4  ;;  %19016 = vst [vmem:[#allocation53_spill] sm:$0xff] %v15810_v57  ;;  %v15831_v13 = vmul.f32 %v12487_v54, %v15470_v61  ;;  %v15834_v17 = vmul.f32 %v12487_v54, %v18995_v32  ;;  %v4820_v51 = vmax.f32 %v15695_v60, 0.0  ;;  %v4821_v10 = vmax.f32 %v15698_v38, 0.0  ;;  %v19022_v4 = vld [vmem:[#allocation25_spill] sm:$0xff] }
 0x3cf   : > { %19017 = vst [vmem:[#allocation58_spill] sm:$0xff] %v15813_v15  ;;  %19018 = vst [vmem:[#allocation59_spill] sm:$0xff] %v15816_v29  ;;  %v4822_v43 = vmax.f32 %v15701_v5, 0.0  ;;  %v4823_v7 = vmax.f32 %v15704_v26, 0.0  ;;  %v4824_v18 = vmax.f32 %v15707_v25, 0.0  ;;  %v4825_v50 = vmax.f32 %v15710_v56, 0.0 }
 0x3d0   : > { %19019 = vst [vmem:[#allocation15_spill] sm:$0xff] %v15822_v47  ;;  %19020 = vst [vmem:[#allocation39_spill] sm:$0xff] %v15831_v13  ;;  %v4826_v16 = vmax.f32 %v15713_v3, 0.0  ;;  %v4827_v61 = vmax.f32 %v15716_v12, 0.0  ;;  %v4828_v42 = vmax.f32 %v15719_v53, 0.0  ;;  %v4829_v32 = vmax.f32 %v15722_v52, 0.0 }
 0x3d1   : > { %v4830_v54 = vmax.f32 %v15725_v40, 0.0  ;;  %v4831_v60 = vmax.f32 %v15728_v41, 0.0  ;;  %v4832_v38 = vmax.f32 %v15731_v22, 0.0  ;;  %v4833_v5 = vmax.f32 %v15734_v44, 0.0  ;;  %v19021_v22 = vld [vmem:[#allocation27_spill] sm:$0xff]  ;;  %v19023_v57 = vld [vmem:[#allocation69_spill] sm:$0xff] }
 0x3d2   : > { %v4834_v26 = vmax.f32 %v15738_v34, 0.0  ;;  %v4835_v25 = vmax.f32 %v15741_v39, 0.0  ;;  %v4836_v56 = vmax.f32 %v15744_v0, 0.0  ;;  %v4837_v3 = vmax.f32 %v15747_v31, 0.0  ;;  %v19024_v15 = vld [vmem:[#allocation30_spill] sm:$0xff]  ;;  %v19025_v29 = vld [vmem:[#allocation72_spill] sm:$0xff] }
 0x3d3   : > { %v4838_v12 = vmax.f32 %v15750_v9, 0.0  ;;  %v4839_v53 = vmax.f32 %v15753_v6, 0.0  ;;  %v4840_v40 = vmax.f32 %v15756_v19, 0.0  ;;  %v4841_v41 = vmax.f32 %v15759_v14, 0.0  ;;  %v19027_v19 = vld [vmem:[#allocation75_spill] sm:$0xff]  ;;  %v19028_v34 = vld [vmem:[#allocation74_spill] sm:$0xff] }
 0x3d4   : > { %v4842_v52 = vmax.f32 %v15762_v33, 0.0  ;;  %v4868_v0 = vmul.f32 %v19021_v22, %v4820_v51  ;;  %v4869_v31 = vmul.f32 %v19022_v4, %v4821_v10  ;;  %v4870_v9 = vmul.f32 %v19023_v57, %v4822_v43  ;;  %v19026_v33 = vld [vmem:[#allocation71_spill] sm:$0xff]  ;;  %v19029_v39 = vld [vmem:[#allocation78_spill] sm:$0xff]  ;;  %v19030_v10 = vld [vmem:[#allocation77_spill] sm:$0xff] }
 0x3d5   : > { %v4871_v6 = vmul.f32 %v19024_v15, %v4823_v7  ;;  %v15888_v14 = vmul.f32 %v19025_v29, %v4824_v18  ;;  %v15891_v47 = vmul.f32 %v19026_v33, %v4825_v50  ;;  %v15894_v44 = vmul.f32 %v19027_v19, %v4826_v16  ;;  %v19031_v43 = vld [vmem:[#allocation55_spill] sm:$0xff]  ;;  %v19032_v50 = vld [vmem:[#allocation80_spill] sm:$0xff]  ;;  %v19033_v16 = vld [vmem:[#allocation57_spill] sm:$0xff] }
 0x3d6   : > { %v15897_v13 = vmul.f32 %v19028_v34, %v4827_v61  ;;  %v15900_v51 = vmul.f32 %v19029_v39, %v4828_v42  ;;  %v15903_v4 = vmul.f32 %v19030_v10, %v4829_v32  ;;  %v15906_v7 = vmul.f32 %v19031_v43, %v4830_v54  ;;  %4916 = vst [vmem:[#allocation2 + $0x19] sm:$0xff] %v4868_v0  ;;  %v19034_v61 = vld [vmem:[#allocation56_spill] sm:$0xff]  ;;  %v19035_v42 = vld [vmem:[#allocation65_spill] sm:$0xff]  ;;  %v19036_v32 = vld [vmem:[#allocation62_spill] sm:$0xff] }
 0x3d7   : > { %4917 = vst [vmem:[#allocation2 + $0x21] sm:$0xff] %v4869_v31  ;;  %4918 = vst [vmem:[#allocation2 + $0x29] sm:$0xff] %v4870_v9  ;;  %11509 = vmatmul.mubr.f32.gmra.mxu1 %v4868_v0  ;;  %v15909_v18 = vmul.f32 %v19032_v50, %v4831_v60  ;;  %v15912_v19 = vmul.f32 %v19033_v16, %v4832_v38  ;;  %v15915_v34 = vmul.f32 %v19034_v61, %v4833_v5  ;;  %v19037_v60 = vld [vmem:[#allocation68_spill] sm:$0xff]  ;;  %v19038_v0 = vld [vmem:[#allocation43_spill] sm:$0xff] }
 0x3d8   : > { %v15918_v39 = vmul.f32 %v19035_v42, %v4834_v26  ;;  %4919 = vst [vmem:[#allocation2 + $0x31] sm:$0xff] %v4871_v6  ;;  %4920 = vst [vmem:[#allocation2 + $0x39] sm:$0xff] %v15888_v14  ;;  %11511 = vmatprep.mubr.f32.mxu1 %v4869_v31  ;;  %v15924_v54 = vmul.f32 %v19036_v32, %v4835_v25  ;;  %v15927_v38 = vmul.f32 %v19037_v60, %v4836_v56  ;;  %v19039_v61 = vld [vmem:[#allocation17_spill] sm:$0xff]  ;;  %v19040_v31 = vld [vmem:[#allocation14_spill] sm:$0xff] }
 0x3d9   : > { %4921 = vst [vmem:[#allocation2 + $0x41] sm:$0xff] %v15891_v47  ;;  %4922 = vst [vmem:[#allocation2 + $0x49] sm:$0xff] %v15894_v44  ;;  %v15930_v5 = vmul.f32 %v19038_v0, %v4837_v3  ;;  %v15933_v26 = vmul.f32 %v19039_v61, %v4838_v12  ;;  %v15940_v25 = vmul.f32 %v19040_v31, %v4839_v53  ;;  %v19041_v32 = vld [vmem:[#allocation82_spill] sm:$0xff]  ;;  %v19042_v60 = vld [vmem:[#allocation81_spill] sm:$0xff]  ;;  %v19044_v53 = vmax.f32 %v15765_v30, 0.0 }
 0x3da   : > { %4923 = vst [vmem:[#allocation2 + $0x51] sm:$0xff] %v15897_v13  ;;  %4924 = vst [vmem:[#allocation2 + $0x59] sm:$0xff] %v15900_v51  ;;  %v15943_v56 = vmul.f32 %v19041_v32, %v4840_v40  ;;  %v15946_v3 = vmul.f32 %v19042_v60, %v4841_v41  ;;  %v19043_v0 = vld [vmem:[#allocation18_spill] sm:$0xff]  ;;  %v19045_v31 = vld [vmem:[#allocation83_spill] sm:$0xff]  ;;  %v19046_v40 = vmax.f32 %v15768_v8, 0.0  ;;  %v19050_v42 = vmax.f32 %v15774_v36, 0.0 }
 0x3db   : > { %4925 = vst [vmem:[#allocation2 + $0x61] sm:$0xff] %v15903_v4  ;;  %4926 = vst [vmem:[#allocation2 + $0x69] sm:$0xff] %v15906_v7  ;;  %v15949_v12 = vmul.f32 %v19043_v0, %v4842_v52  ;;  %v15958_v61 = vmul.f32 %v19045_v31, %v19044_v53  ;;  %v19047_v41 = vld [vmem:[#allocation36_spill] sm:$0xff]  ;;  %v19048_v52 = vmax.f32 %v15771_v63, 0.0  ;;  %v19049_v0 = vld [vmem:[#allocation19_spill] sm:$0xff]  ;;  %11512 = vmatmul.mubr.f32.gmra.mxu1 %v4870_v9  ;;  %v19052_v30 = vmax.f32 %v15777_v20, 0.0 }
 0x3dc   : > { %4927 = vst [vmem:[#allocation2 + $0x71] sm:$0xff] %v15909_v18  ;;  %4928 = vst [vmem:[#allocation2 + $0x79] sm:$0xff] %v15912_v19  ;;  %v15963_v60 = vmul.f32 %v19047_v41, %v19046_v40  ;;  %v19051_v16 = vld [vmem:[#allocation42_spill] sm:$0xff]  ;;  %v19053_v8 = vmax.f32 %v15780_v59, 0.0  ;;  %v19056_v40 = vld [vmem:[#allocation32_spill] sm:$0xff]  ;;  %11514 = vmatprep.mubr.f32.mxu1 %v4871_v6  ;;  %v19059_v20 = vmax.f32 %v15789_v46, 0.0 }
 0x3dd   : > { %4929 = vst [vmem:[#allocation2 + $0x81] sm:$0xff] %v15915_v34  ;;  %4930 = vst [vmem:[#allocation2 + $0x89] sm:$0xff] %v15918_v39  ;;  %v15968_v32 = vmul.f32 %v19049_v0, %v19048_v52  ;;  %v15973_v50 = vmul.f32 %v19051_v16, %v19050_v42  ;;  %v15982_v63 = vmul.f32 %v18988_v62, %v19052_v30  ;;  %v19054_v36 = vld [vmem:[#allocation22_spill] sm:$0xff]  ;;  %v19055_v42 = vmax.f32 %v15783_v37, 0.0  ;;  %v19058_v0 = vld [vmem:[#allocation24_spill] sm:$0xff] }
 0x3de   : > { %4931 = vst [vmem:[#allocation2 + $0x91] sm:$0xff] %v15924_v54  ;;  %4932 = vst [vmem:[#allocation2 + $0x99] sm:$0xff] %v15927_v38  ;;  %v15987_v53 = vmul.f32 %v19054_v36, %v19053_v8  ;;  %v19057_v16 = vmax.f32 %v15786_v21, 0.0  ;;  %v16006_v59 = vmul.f32 %v18992_v23, %v19059_v20  ;;  %v19060_v37 = vmax.f32 %v15792_v1, 0.0  ;;  %v19061_v21 = vld [vmem:[#allocation35_spill] sm:$0xff]  ;;  %v19066_v6 = vld [vmem:[#allocation54_spill] sm:$0xff] }
 0x3df   : > { %4933 = vst [vmem:[#allocation2 + $0xa1] sm:$0xff] %v15930_v5  ;;  %4934 = vst [vmem:[#allocation2 + $0xa9] sm:$0xff] %v15933_v26  ;;  %v15992_v52 = vmul.f32 %v19056_v40, %v19055_v42  ;;  %v19063_v8 = vmax.f32 %v15798_v49, 0.0  ;;  %v19064_v46 = vmax.f32 %v15801_v35, 0.0  ;;  %v19067_v20 = vmax.f32 %v19066_v6, 0.0  ;;  %v16051_v35 = vld [vmem:[#allocation2 + $0x18] sm:$0xff]  ;;  %11515 = vmatmul.mubr.f32.gmra.mxu1 %v15888_v14 }
 0x3e0   : > { %v15997_v41 = vmul.f32 %v19058_v0, %v19057_v16  ;;  %4935 = vst [vmem:[#allocation2 + $0xb1] sm:$0xff] %v15940_v25  ;;  %4936 = vst [vmem:[#allocation2 + $0xb9] sm:$0xff] %v15943_v56  ;;  %v16011_v9 = vmul.f32 %v19061_v21, %v19060_v37  ;;  %v19062_v16 = vmax.f32 %v15795_v2, 0.0  ;;  %v19065_v2 = vmax.f32 %v15804_v11, 0.0  ;;  %v19068_v37 = vld [vmem:[#allocation61_spill] sm:$0xff]  ;;  %v16053_v11 = vld [vmem:[#allocation2 + $0x20] sm:$0xff]  ;;  %11613 = vmatmul.mubr.f32.gmra.mxu0 %v16051_v35 }
 0x3e1   : > { %4937 = vst [vmem:[#allocation2 + $0xc1] sm:$0xff] %v15946_v3  ;;  %4938 = vst [vmem:[#allocation2 + $0xc9] sm:$0xff] %v15949_v12  ;;  %v16021_v42 = vmul.f32 %v15169_v28, %v19063_v8  ;;  %v16030_v1 = vmul.f32 %v15143_v55, %v19064_v46  ;;  %v19069_v8 = vld [vmem:[#allocation53_spill] sm:$0xff]  ;;  %v19072_v46 = vld [vmem:[#allocation58_spill] sm:$0xff]  ;;  %11615 = vmatprep.mubr.f32.mxu0 %v16053_v11  ;;  %11517 = vmatprep.mubr.f32.mxu1 %v15891_v47 }
 0x3e2   : > { %v16016_v30 = vmul.f32 %v18994_v24, %v19062_v16  ;;  %4939 = vst [vmem:[#allocation2 + $0xd1] sm:$0xff] %v15958_v61  ;;  %4940 = vst [vmem:[#allocation2 + $0xd9] sm:$0xff] %v15963_v60  ;;  %v16035_v49 = vmul.f32 %v15238_v27, %v19065_v2  ;;  %v16040_v16 = vmul.f32 %v19068_v37, %v19067_v20  ;;  %v19070_v28 = vmax.f32 %v19069_v8, 0.0  ;;  %v19071_v24 = vld [vmem:[#allocation46_spill] sm:$0xff]  ;;  %v19074_v6 = vld [vmem:[#allocation64_spill] sm:$0xff] }
 0x3e3   : > { %4941 = vst [vmem:[#allocation2 + $0xe1] sm:$0xff] %v15968_v32  ;;  %4942 = vst [vmem:[#allocation2 + $0xe9] sm:$0xff] %v15973_v50  ;;  %v19073_v2 = vmax.f32 %v19072_v46, 0.0  ;;  %v19075_v8 = vld [vmem:[#allocation59_spill] sm:$0xff]  ;;  %v19078_v27 = vmax.f32 %v15819_v58, 0.0  ;;  %v19083_v58 = vmax.f32 %v15825_v45, 0.0  ;;  %11518 = vmatmul.mubr.f32.gmra.mxu1 %v15894_v44 }
 0x3e4   : > { %v16045_v21 = vmul.f32 %v19071_v24, %v19070_v28  ;;  %4943 = vst [vmem:[#allocation2 + $0xf1] sm:$0xff] %v15982_v63  ;;  %4944 = vst [vmem:[#allocation2 + $0xf9] sm:$0xff] %v15987_v53  ;;  %v19076_v28 = vmax.f32 %v19075_v8, 0.0  ;;  %v19077_v24 = vld [vmem:[#allocation13_spill] sm:$0xff]  ;;  %v19079_v55 = vld [vmem:[#allocation63_spill] sm:$0xff]  ;;  %11520 = vmatprep.mubr.f32.mxu1 %v15897_v13 }
 0x3e5   : > { %4945 = vst [vmem:[#allocation2 + $0x101] sm:$0xff] %v15992_v52  ;;  %4946 = vst [vmem:[#allocation2 + $0x109] sm:$0xff] %v15997_v41  ;;  %v16058_v20 = vmul.f32 %v19074_v6, %v19073_v2  ;;  %v16068_v23 = vmul.f32 %v19079_v55, %v19078_v27  ;;  %v19080_v0 = vld [vmem:[#allocation15_spill] sm:$0xff]  ;;  %v19084_v46 = vld [vmem:[#allocation66_spill] sm:$0xff] }
 0x3e6   : > { %v16063_v37 = vmul.f32 %v19077_v24, %v19076_v28  ;;  %v19081_v40 = vmax.f32 %v19080_v0, 0.0  ;;  %v19082_v36 = vld [vmem:[#allocation47_spill] sm:$0xff]  ;;  %4947 = vst [vmem:[#allocation2 + $0x111] sm:$0xff] %v16006_v59  ;;  %4948 = vst [vmem:[#allocation2 + $0x119] sm:$0xff] %v16011_v9  ;;  %v16083_v27 = vmul.f32 %v19084_v46, %v19083_v58  ;;  %v19085_v0 = vmax.f32 %v15828_v48, 0.0  ;;  %v19086_v2 = vld [vmem:[#allocation44_spill] sm:$0xff] }
 0x3e7   : > { %4949 = vst [vmem:[#allocation2 + $0x121] sm:$0xff] %v16016_v30  ;;  %4950 = vst [vmem:[#allocation2 + $0x129] sm:$0xff] %v16021_v42  ;;  %v19087_v8 = vld [vmem:[#allocation39_spill] sm:$0xff]  ;;  %v19090_v24 = vmax.f32 %v15834_v17, 0.0  ;;  %v19091_v6 = vld [vmem:[#allocation49_spill] sm:$0xff]  ;;  %11521 = vmatmul.mubr.f32.gmra.mxu1 %v15900_v51 }
 0x3e8   : > { %v16073_v62 = vmul.f32 %v19082_v36, %v19081_v40  ;;  %v16088_v40 = vmul.f32 %v19086_v2, %v19085_v0  ;;  %v19088_v28 = vmax.f32 %v19087_v8, 0.0  ;;  %v19089_v36 = vld [vmem:[#allocation48_spill] sm:$0xff]  ;;  %4951 = vst [vmem:[#allocation2 + $0x131] sm:$0xff] %v16030_v1  ;;  %4952 = vst [vmem:[#allocation2 + $0x139] sm:$0xff] %v16035_v49  ;;  %v16116_v48 = vld [vmem:[#allocation2 + $0x38] sm:$0xff]  ;;  %11523 = vmatprep.mubr.f32.mxu1 %v15903_v4 }
 0x3e9   : > { %v4915_v31 = vmul.f32 %v19091_v6, %v19090_v24  ;;  %4953 = vst [vmem:[#allocation2 + $0x141] sm:$0xff] %v16040_v16  ;;  %4954 = vst [vmem:[#allocation2 + $0x149] sm:$0xff] %v16045_v21  ;;  %v16108_v24 = vld [vmem:[#allocation2 + $0x28] sm:$0xff]  ;;  %v16112_v45 = vld [vmem:[#allocation2 + $0x30] sm:$0xff] }
 0x3ea   : > { %v4913_v55 = vmul.f32 %v19089_v36, %v19088_v28  ;;  %4955 = vst [vmem:[#allocation2 + $0x151] sm:$0xff] %v16058_v20  ;;  %4956 = vst [vmem:[#allocation2 + $0x159] sm:$0xff] %v16063_v37  ;;  %11616 = vmatmul.mubr.f32.gmra.mxu0 %v16108_v24  ;;  %v16124_v47 = vld [vmem:[#allocation2 + $0x48] sm:$0xff]  ;;  %v16128_v17 = vld [vmem:[#allocation2 + $0x50] sm:$0xff] }
 0x3eb   : > { %4957 = vst [vmem:[#allocation2 + $0x161] sm:$0xff] %v16068_v23  ;;  %4958 = vst [vmem:[#allocation2 + $0x169] sm:$0xff] %v16073_v62  ;;  %11618 = vmatprep.mubr.f32.mxu0 %v16112_v45  ;;  %11524 = vmatmul.mubr.f32.gmra.mxu1 %v15906_v7  ;;  %v16132_v13 = vld [vmem:[#allocation2 + $0x58] sm:$0xff]  ;;  %v16136_v44 = vld [vmem:[#allocation2 + $0x60] sm:$0xff] }
 0x3ec   : > { %4959 = vst [vmem:[#allocation2 + $0x171] sm:$0xff] %v16083_v27  ;;  %4960 = vst [vmem:[#allocation2 + $0x179] sm:$0xff] %v16088_v40  ;;  %11526 = vmatprep.mubr.f32.mxu1 %v15909_v18  ;;  %v16140_v4 = vld [vmem:[#allocation2 + $0x68] sm:$0xff]  ;;  %v16144_v14 = vld [vmem:[#allocation2 + $0x70] sm:$0xff] }
 0x3ed   : > { %4961 = vst [vmem:[#allocation2 + $0x181] sm:$0xff] %v4913_v55  ;;  %4963 = vst [vmem:[#allocation2 + $0x191] sm:$0xff] %v4915_v31  ;;  %v16120_v55 = vld [vmem:[#allocation2 + $0x40] sm:$0xff]  ;;  %v16148_v51 = vld [vmem:[#allocation2 + $0x78] sm:$0xff] }
 0x3ee   : > { %11619 = vmatmul.mubr.f32.gmra.mxu0 %v16116_v48  ;;  %v16152_v7 = vld [vmem:[#allocation2 + $0x80] sm:$0xff]  ;;  %v16167_v18 = vld [vmem:[#allocation2 + $0x98] sm:$0xff]  ;;  %v5704_v8 = vld [vmem:[#allocation2 + $0xa] sm:$0xff] }
 0x3ef   : > { %11621 = vmatprep.mubr.f32.mxu0 %v16120_v55  ;;  %11527 = vmatmul.mubr.f32.gmra.mxu1 %v15912_v19  ;;  %v16160_v19 = vld [vmem:[#allocation2 + $0x90] sm:$0xff]  ;;  %v16187_v31 = vld [vmem:[#allocation2 + $0xc0] sm:$0xff]  ;;  %v7432_v29 = vld [vmem:[#allocation8 + $0x340] sm:$0xff] }
 0x3f0   : > { %11529 = vmatprep.mubr.f32.mxu1 %v15915_v34  ;;  %v16156_v34 = vld [vmem:[#allocation2 + $0x88] sm:$0xff]  ;;  %v5705_v28 = vld [vmem:[#allocation2 + $0x12] sm:$0xff]  ;;  %v6601_v6 = vld [vmem:[#allocation8 + $0x268] sm:$0xff] }
 0x3f1   : > { %v16261_v0 = vld [vmem:[#allocation2 + $0x150] sm:$0xff]  ;;  %v16287_v36 = vld [vmem:[#allocation2 + $0x22] sm:$0xff]  ;;  %v16497_v22 = vld [vmem:[#allocation2 + $0x59] sm:$0xff] }
 0x3f2   : > { %11622 = vmatmul.mubr.f32.gmra.mxu0 %v16124_v47  ;;  %v6541_v46 = vld [vmem:[#allocation2 + $0x29] sm:$0xff]  ;;  %19095 = vst [vmem:[#allocation16_spill] sm:$0xff] %v16497_v22 }
 0x3f3   : > { %11624 = vmatprep.mubr.f32.mxu0 %v16128_v17  ;;  %11530 = vmatmul.mubr.f32.gmra.mxu1 %v15918_v39  ;;  %v16162_v39 = vld [vmem:[#allocation8 + $0x2f8] sm:$0xff] }
 0x3f4   : > { %11532 = vmatprep.mubr.f32.mxu1 %v15924_v54  ;;  %11993 = vmatprep.subr.mxu0 %v16162_v39  ;;  %v16171_v54 = vld [vmem:[#allocation2 + $0xa0] sm:$0xff]  ;;  %v6168_v43 = vld [vmem:[#allocation2 + $0x190] sm:$0xff] }
 0x3f5   : > { %v16487_v10 = vld [vmem:[#allocation2 + $0x49] sm:$0xff] }
 0x3f6   : > { %11625 = vmatmul.mubr.f32.gmra.mxu0 %v16132_v13  ;;  %19093 = vst [vmem:[#allocation41_spill] sm:$0xff] %v16487_v10 }
 0x3f7   : > { %11627 = vmatprep.mubr.f32.mxu0 %v16136_v44  ;;  %11533 = vmatmul.mubr.f32.gmra.mxu1 %v15927_v38  ;;  %v16175_v38 = vld [vmem:[#allocation2 + $0xa8] sm:$0xff] }
 0x3f8   : > { %11535 = vmatprep.mubr.f32.mxu1 %v15930_v5  ;;  %v16179_v5 = vld [vmem:[#allocation2 + $0xb0] sm:$0xff] }
 0x3fa   : > { %11628 = vmatmul.mubr.f32.gmra.mxu0 %v16140_v4 }
 0x3fb   : > { %11630 = vmatprep.mubr.f32.mxu0 %v16144_v14  ;;  %11536 = vmatmul.mubr.f32.gmra.mxu1 %v15933_v26  ;;  %v16183_v26 = vld [vmem:[#allocation2 + $0xb8] sm:$0xff] }
 0x3fc   : > { %11538 = vmatprep.mubr.f32.mxu1 %v15940_v25  ;;  %v16191_v25 = vld [vmem:[#allocation2 + $0xc8] sm:$0xff] }
 0x3fe   : > { %11631 = vmatmul.mubr.f32.gmra.mxu0 %v16148_v51 }
 0x3ff   : > { %11633 = vmatprep.mubr.f32.mxu0 %v16152_v7  ;;  %11539 = vmatmul.mubr.f32.gmra.mxu1 %v15943_v56  ;;  %v16195_v56 = vld [vmem:[#allocation2 + $0xd0] sm:$0xff] }
 0x400   : > { %11541 = vmatprep.mubr.f32.mxu1 %v15946_v3  ;;  %v16203_v3 = vld [vmem:[#allocation2 + $0xe0] sm:$0xff] }
 0x402   : > { %11634 = vmatmul.mubr.f32.gmra.mxu0 %v16156_v34 }
 0x403   : > { %11636 = vmatprep.mubr.f32.mxu0 %v16160_v19  ;;  %11542 = vmatmul.mubr.f32.gmra.mxu1 %v15949_v12  ;;  %v16219_v12 = vld [vmem:[#allocation2 + $0x100] sm:$0xff] }
 0x404   : > { %11544 = vmatprep.mubr.f32.mxu1 %v15958_v61  ;;  %v16199_v61 = vld [vmem:[#allocation2 + $0xd8] sm:$0xff] }
 0x406   : > { %11637 = vmatmul.mubr.f32.gmra.mxu0 %v16167_v18 }
 0x407   : > { %11639 = vmatprep.mubr.f32.mxu0 %v16171_v54  ;;  %11545 = vmatmul.mubr.f32.gmra.mxu1 %v15963_v60  ;;  %v16211_v60 = vld [vmem:[#allocation2 + $0xf0] sm:$0xff] }
 0x408   : > { %11547 = vmatprep.mubr.f32.mxu1 %v15968_v32  ;;  %v16207_v32 = vld [vmem:[#allocation2 + $0xe8] sm:$0xff] }
 0x40a   : > { %11640 = vmatmul.mubr.f32.gmra.mxu0 %v16175_v38 }
 0x40b   : > { %11642 = vmatprep.mubr.f32.mxu0 %v16179_v5  ;;  %11548 = vmatmul.mubr.f32.gmra.mxu1 %v15973_v50  ;;  %v16215_v50 = vld [vmem:[#allocation2 + $0xf8] sm:$0xff] }
 0x40c   : > { %11550 = vmatprep.mubr.f32.mxu1 %v15982_v63  ;;  %v16223_v63 = vld [vmem:[#allocation2 + $0x108] sm:$0xff] }
 0x40e   : > { %11643 = vmatmul.mubr.f32.gmra.mxu0 %v16183_v26 }
 0x40f   : > { %11645 = vmatprep.mubr.f32.mxu0 %v16187_v31  ;;  %11551 = vmatmul.mubr.f32.gmra.mxu1 %v15987_v53  ;;  %v16227_v53 = vld [vmem:[#allocation2 + $0x110] sm:$0xff] }
 0x410   : > { %11553 = vmatprep.mubr.f32.mxu1 %v15992_v52  ;;  %v16235_v52 = vld [vmem:[#allocation2 + $0x120] sm:$0xff] }
 0x412   : > { %11646 = vmatmul.mubr.f32.gmra.mxu0 %v16191_v25 }
 0x413   : > { %11648 = vmatprep.mubr.f32.mxu0 %v16195_v56  ;;  %11554 = vmatmul.mubr.f32.gmra.mxu1 %v15997_v41  ;;  %v16231_v41 = vld [vmem:[#allocation2 + $0x118] sm:$0xff] }
 0x414   : > { %11556 = vmatprep.mubr.f32.mxu1 %v16006_v59 }
 0x416   : > { %11649 = vmatmul.mubr.f32.gmra.mxu0 %v16199_v61 }
 0x417   : > { %11651 = vmatprep.mubr.f32.mxu0 %v16203_v3  ;;  %11557 = vmatmul.mubr.f32.gmra.mxu1 %v16011_v9 }
 0x418   : > { %11559 = vmatprep.mubr.f32.mxu1 %v16016_v30  ;;  %v16239_v30 = vld [vmem:[#allocation2 + $0x128] sm:$0xff] }
 0x41a   : > { %11652 = vmatmul.mubr.f32.gmra.mxu0 %v16207_v32 }
 0x41b   : > { %11654 = vmatprep.mubr.f32.mxu0 %v16211_v60  ;;  %11560 = vmatmul.mubr.f32.gmra.mxu1 %v16021_v42  ;;  %v16245_v42 = vld [vmem:[#allocation2 + $0x130] sm:$0xff] }
 0x41c   : > { %11562 = vmatprep.mubr.f32.mxu1 %v16030_v1  ;;  %v16249_v1 = vld [vmem:[#allocation2 + $0x138] sm:$0xff] }
 0x41e   : > { %11655 = vmatmul.mubr.f32.gmra.mxu0 %v16215_v50 }
 0x41f   : > { %11657 = vmatprep.mubr.f32.mxu0 %v16219_v12  ;;  %11563 = vmatmul.mubr.f32.gmra.mxu1 %v16035_v49  ;;  %v16253_v49 = vld [vmem:[#allocation2 + $0x140] sm:$0xff] }
 0x420   : > { %v11507_v59 = vpop.f32.mrf.mxu1  ;;  %11565 = vmatprep.mubr.f32.mxu1 %v16040_v16  ;;  %v16257_v16 = vld [vmem:[#allocation2 + $0x148] sm:$0xff] }
 0x422   : > { %11658 = vmatmul.mubr.f32.gmra.mxu0 %v16223_v63  ;;  %v16470_v2 = vpop.f32.mrf.mxu1 }
 0x423   : > { %11660 = vmatprep.mubr.f32.mxu0 %v16227_v53  ;;  %v11611_v9 = vpop.f32.mrf.mxu0  ;;  %11566 = vmatmul.mubr.f32.gmra.mxu1 %v16045_v21  ;;  %v16265_v21 = vld [vmem:[#allocation2 + $0x158] sm:$0xff] }
 0x424   : > { %v16242_v58 = vadd.f32 %v11611_v9, %v11507_v59  ;;  %11568 = vmatprep.mubr.f32.mxu1 %v16058_v20  ;;  %v16269_v20 = vld [vmem:[#allocation2 + $0x160] sm:$0xff]  ;;  %v16279_v59 = vld [vmem:[#allocation2 + $0x178] sm:$0xff]  ;;  %v19092_v9 = vld [vmem:[#allocation23_spill] sm:$0xff] }
 0x426   : > { %11661 = vmatmul.mubr.f32.gmra.mxu0 %v16231_v41 }
 0x427   : > { %11663 = vmatprep.mubr.f32.mxu0 %v16235_v52  ;;  %11569 = vmatmul.mubr.f32.gmra.mxu1 %v16063_v37  ;;  %v5703_v37 = vld [vmem:[#allocation2 + $0x2] sm:$0xff] }
 0x428   : > { %11571 = vmatprep.mubr.f32.mxu1 %v16068_v23  ;;  %v16273_v23 = vld [vmem:[#allocation2 + $0x168] sm:$0xff] }
 0x42a   : > { %11664 = vmatmul.mubr.f32.gmra.mxu0 %v16239_v30 }
 0x42b   : > { %11666 = vmatprep.mubr.f32.mxu0 %v16245_v42  ;;  %11572 = vmatmul.mubr.f32.gmra.mxu1 %v16073_v62  ;;  %v16276_v62 = vld [vmem:[#allocation2 + $0x170] sm:$0xff] }
 0x42c   : > { %11574 = vmatprep.mubr.f32.mxu1 %v16083_v27  ;;  %v6602_v27 = vld [vmem:[#allocation8 + $0x270] sm:$0xff] }
 0x42e   : > { %11667 = vmatmul.mubr.f32.gmra.mxu0 %v16249_v1 }
 0x42f   : > { %11669 = vmatprep.mubr.f32.mxu0 %v16253_v49  ;;  %11575 = vmatmul.mubr.f32.gmra.mxu1 %v16088_v40  ;;  %v16284_v40 = vld [vmem:[#allocation2 + $0x1a] sm:$0xff] }
 0x430   : > { %11713 = vmatprep.mubr.f32.mxu1 %v5703_v37  ;;  %v6600_v37 = vld [vmem:[#allocation8 + $0x260] sm:$0xff] }
 0x432   : > { %11670 = vmatmul.mubr.f32.gmra.mxu0 %v16257_v16 }
 0x433   : > { %11672 = vmatprep.mubr.f32.mxu0 %v16261_v0  ;;  %11714 = vmatmul.mubr.f32.vlgmr.msra.gmra.mxu1 %v5704_v8  ;;  %v6599_v8 = vld [vmem:[#allocation8 + $0x258] sm:$0xff] }
 0x434   : > { %11716 = vmatprep.mubr.f32.mxu1 %v5705_v28  ;;  %11890 = vmatpush3.msra.mxu1 %v19092_v9  ;;  %v16292_v28 = vld [vmem:[#allocation2 + $0x2a] sm:$0xff]  ;;  %v6597_v9 = vld [vmem:[#allocation8 + $0x248] sm:$0xff] }
 0x435   : > { %11891 = vmatprep.subr.mxu1 %v6602_v27 }
 0x436   : > { %11673 = vmatmul.mubr.f32.gmra.mxu0 %v16265_v21  ;;  %11892 = vmatpush3.msra.mxu1 %v6602_v27  ;;  %v16295_v27 = vld [vmem:[#allocation2 + $0x32] sm:$0xff] }
 0x437   : > { %11675 = vmatprep.mubr.f32.mxu0 %v16269_v20  ;;  %11717 = vmatmul.mubr.f32.gmra.mxu1 %v16284_v40 }
 0x438   : > { %11893 = vmatprep.subr.mxu1 %v6601_v6  ;;  %11719 = vmatprep.mubr.f32.mxu1 %v16287_v36 }
 0x439   : > { %11894 = vmatpush3.msra.mxu1 %v6601_v6  ;;  %v6596_v6 = vld [vmem:[#allocation8 + $0x240] sm:$0xff] }
 0x43a   : > { %11676 = vmatmul.mubr.f32.gmra.mxu0 %v16273_v23  ;;  %11895 = vmatprep.subr.mxu1 %v6600_v37 }
 0x43b   : > { %11678 = vmatprep.mubr.f32.mxu0 %v16276_v62  ;;  %11896 = vmatpush3.msra.mxu1 %v6600_v37  ;;  %v6595_v37 = vld [vmem:[#allocation8 + $0x238] sm:$0xff] }
 0x43c   : > { %11720 = vmatmul.mubr.f32.gmra.mxu1 %v16292_v28  ;;  %11897 = vmatprep.subr.mxu1 %v6599_v8 }
 0x43d   : > { %11722 = vmatprep.mubr.f32.mxu1 %v16295_v27  ;;  %11898 = vmatpush3.msra.mxu1 %v6599_v8  ;;  %v16311_v8 = vld [vmem:[#allocation2 + $0x52] sm:$0xff] }
 0x43e   : > { %11679 = vmatmul.mubr.f32.gmra.mxu0 %v16279_v59 }
 0x43f   : > { %11817 = vmatprep.mubr.f32.mxu0 %v16051_v35  ;;  %v6598_v35 = vld [vmem:[#allocation8 + $0x250] sm:$0xff] }
 0x440   : > { %11899 = vmatprep.subr.mxu1 %v6598_v35 }
 0x441   : > { %11900 = vmatpush3.msra.mxu1 %v6598_v35  ;;  %v6593_v35 = vld [vmem:[#allocation8 + $0x228] sm:$0xff] }
 0x442   : > { %11818 = vmatmul.mubr.f32.vlgmr.msra.gmra.mxu0 %v16053_v11  ;;  %v16300_v11 = vld [vmem:[#allocation2 + $0x3a] sm:$0xff]  ;;  %11901 = vmatprep.subr.mxu1 %v6597_v9 }
 0x443   : > { %11820 = vmatprep.mubr.f32.mxu0 %v16108_v24  ;;  %11723 = vmatmul.mubr.f32.gmra.mxu1 %v16300_v11  ;;  %v16303_v24 = vld [vmem:[#allocation2 + $0x42] sm:$0xff] }
 0x444   : > { %11725 = vmatprep.mubr.f32.mxu1 %v16303_v24  ;;  %11902 = vmatpush3.msra.mxu1 %v6597_v9  ;;  %v16319_v9 = vld [vmem:[#allocation2 + $0x62] sm:$0xff] }
 0x445   : > { %11903 = vmatprep.subr.mxu1 %v6596_v6  ;;  %11994 = vmatpush3.msra.mxu0 %v16162_v39  ;;  %v16336_v39 = vld [vmem:[#allocation2 + $0x82] sm:$0xff] }
 0x446   : > { %11821 = vmatmul.mubr.f32.gmra.mxu0 %v16112_v45  ;;  %v16308_v45 = vld [vmem:[#allocation2 + $0x4a] sm:$0xff]  ;;  %11904 = vmatpush3.msra.mxu1 %v6596_v6 }
 0x447   : > { %11823 = vmatprep.mubr.f32.mxu0 %v16116_v48  ;;  %v6594_v48 = vld [vmem:[#allocation8 + $0x230] sm:$0xff]  ;;  %11726 = vmatmul.mubr.f32.gmra.mxu1 %v16308_v45 }
 0x448   : > { %11905 = vmatprep.subr.mxu1 %v6595_v37  ;;  %11728 = vmatprep.mubr.f32.mxu1 %v16311_v8  ;;  %v7020_v6 = vld [vmem:[#allocation8 + $0x2f0] sm:$0xff] }
 0x449   : > { %11906 = vmatpush3.msra.mxu1 %v6595_v37  ;;  %v16328_v37 = vld [vmem:[#allocation2 + $0x72] sm:$0xff]  ;;  %11995 = vmatprep.subr.mxu0 %v7020_v6 }
 0x44a   : > { %11824 = vmatmul.mubr.f32.gmra.mxu0 %v16120_v55  ;;  %11907 = vmatprep.subr.mxu1 %v6594_v48  ;;  %v16316_v55 = vld [vmem:[#allocation2 + $0x5a] sm:$0xff] }
 0x44b   : > { %11826 = vmatprep.mubr.f32.mxu0 %v16124_v47  ;;  %11908 = vmatpush3.msra.mxu1 %v6594_v48  ;;  %v6592_v47 = vld [vmem:[#allocation8 + $0x220] sm:$0xff]  ;;  %v7019_v48 = vld [vmem:[#allocation8 + $0x2e8] sm:$0xff] }
 0x44c   : > { %11729 = vmatmul.mubr.f32.gmra.mxu1 %v16316_v55  ;;  %11909 = vmatprep.subr.mxu1 %v6593_v35 }
 0x44d   : > { %11731 = vmatprep.mubr.f32.mxu1 %v16319_v9  ;;  %11910 = vmatpush3.msra.mxu1 %v6593_v35  ;;  %v7017_v35 = vld [vmem:[#allocation8 + $0x2d8] sm:$0xff] }
 0x44e   : > { %11827 = vmatmul.mubr.f32.gmra.mxu0 %v16128_v17  ;;  %11911 = vmatprep.subr.mxu1 %v6592_v47  ;;  %v16324_v17 = vld [vmem:[#allocation2 + $0x6a] sm:$0xff] }
 0x44f   : > { %11829 = vmatprep.mubr.f32.mxu0 %v16132_v13  ;;  %v6591_v13 = vld [vmem:[#allocation8 + $0x218] sm:$0xff]  ;;  %11912 = vmatpush3.msra.mxu1 %v6592_v47 }
 0x450   : > { %11732 = vmatmul.mubr.f32.gmra.mxu1 %v16324_v17  ;;  %11913 = vmatprep.subr.mxu1 %v6591_v13  ;;  %v16344_v47 = vld [vmem:[#allocation2 + $0x92] sm:$0xff] }
 0x451   : > { %11734 = vmatprep.mubr.f32.mxu1 %v16328_v37  ;;  %11996 = vmatpush3.msra.mxu0 %v7020_v6  ;;  %v7016_v6 = vld [vmem:[#allocation8 + $0x2d0] sm:$0xff] }
 0x452   : > { %11830 = vmatmul.mubr.f32.gmra.mxu0 %v16136_v44  ;;  %v16333_v44 = vld [vmem:[#allocation2 + $0x7a] sm:$0xff]  ;;  %11997 = vmatprep.subr.mxu0 %v7019_v48 }
 0x453   : > { %11832 = vmatprep.mubr.f32.mxu0 %v16140_v4  ;;  %v7018_v4 = vld [vmem:[#allocation8 + $0x2e0] sm:$0xff]  ;;  %11998 = vmatpush3.msra.mxu0 %v7019_v48  ;;  %v16352_v48 = vld [vmem:[#allocation2 + $0xa2] sm:$0xff] }
 0x454   : > { %11735 = vmatmul.mubr.f32.gmra.mxu1 %v16333_v44  ;;  %11999 = vmatprep.subr.mxu0 %v7018_v4 }
 0x455   : > { %11737 = vmatprep.mubr.f32.mxu1 %v16336_v39  ;;  %12000 = vmatpush3.msra.mxu0 %v7018_v4  ;;  %v7014_v4 = vld [vmem:[#allocation8 + $0x2c0] sm:$0xff] }
 0x456   : > { %11833 = vmatmul.mubr.f32.gmra.mxu0 %v16144_v14  ;;  %v16341_v14 = vld [vmem:[#allocation2 + $0x8a] sm:$0xff]  ;;  %12001 = vmatprep.subr.mxu0 %v7017_v35 }
 0x457   : > { %11835 = vmatprep.mubr.f32.mxu0 %v16148_v51  ;;  %v6590_v51 = vld [vmem:[#allocation8 + $0x210] sm:$0xff]  ;;  %11914 = vmatpush3.msra.mxu1 %v6591_v13  ;;  %v16360_v13 = vld [vmem:[#allocation2 + $0xb2] sm:$0xff] }
 0x458   : > { %11738 = vmatmul.mubr.f32.gmra.mxu1 %v16341_v14  ;;  %11915 = vmatprep.subr.mxu1 %v6590_v51 }
 0x459   : > { %11740 = vmatprep.mubr.f32.mxu1 %v16344_v47  ;;  %12002 = vmatpush3.msra.mxu0 %v7017_v35  ;;  %v7013_v35 = vld [vmem:[#allocation8 + $0x2b8] sm:$0xff] }
 0x45a   : > { %11836 = vmatmul.mubr.f32.gmra.mxu0 %v16152_v7  ;;  %v16349_v7 = vld [vmem:[#allocation2 + $0x9a] sm:$0xff]  ;;  %12003 = vmatprep.subr.mxu0 %v7016_v6 }
 0x45b   : > { %11838 = vmatprep.mubr.f32.mxu0 %v16156_v34  ;;  %v7015_v34 = vld [vmem:[#allocation8 + $0x2c8] sm:$0xff]  ;;  %12004 = vmatpush3.msra.mxu0 %v7016_v6 }
 0x45c   : > { %11741 = vmatmul.mubr.f32.gmra.mxu1 %v16349_v7  ;;  %12005 = vmatprep.subr.mxu0 %v7015_v34  ;;  %v16368_v6 = vld [vmem:[#allocation2 + $0xc2] sm:$0xff] }
 0x45d   : > { %11743 = vmatprep.mubr.f32.mxu1 %v16352_v48  ;;  %12006 = vmatpush3.msra.mxu0 %v7015_v34  ;;  %v7011_v34 = vld [vmem:[#allocation8 + $0x2a8] sm:$0xff] }
 0x45e   : > { %11839 = vmatmul.mubr.f32.gmra.mxu0 %v16160_v19  ;;  %v16357_v19 = vld [vmem:[#allocation2 + $0xaa] sm:$0xff]  ;;  %12007 = vmatprep.subr.mxu0 %v7014_v4 }
 0x45f   : > { %11841 = vmatprep.mubr.f32.mxu0 %v16167_v18  ;;  %v6589_v18 = vld [vmem:[#allocation8 + $0x208] sm:$0xff]  ;;  %11916 = vmatpush3.msra.mxu1 %v6590_v51  ;;  %v16376_v51 = vld [vmem:[#allocation2 + $0xd2] sm:$0xff] }
 0x460   : > { %11744 = vmatmul.mubr.f32.gmra.mxu1 %v16357_v19  ;;  %11917 = vmatprep.subr.mxu1 %v6589_v18 }
 0x461   : > { %11746 = vmatprep.mubr.f32.mxu1 %v16360_v13  ;;  %12008 = vmatpush3.msra.mxu0 %v7014_v4  ;;  %v7010_v4 = vld [vmem:[#allocation8 + $0x2a0] sm:$0xff] }
 0x462   : > { %11842 = vmatmul.mubr.f32.gmra.mxu0 %v16171_v54  ;;  %v16365_v54 = vld [vmem:[#allocation2 + $0xba] sm:$0xff]  ;;  %12009 = vmatprep.subr.mxu0 %v7013_v35 }
 0x463   : > { %11844 = vmatprep.mubr.f32.mxu0 %v16175_v38  ;;  %v7012_v38 = vld [vmem:[#allocation8 + $0x2b0] sm:$0xff]  ;;  %12010 = vmatpush3.msra.mxu0 %v7013_v35 }
 0x464   : > { %11747 = vmatmul.mubr.f32.gmra.mxu1 %v16365_v54  ;;  %12011 = vmatprep.subr.mxu0 %v7012_v38  ;;  %v16384_v35 = vld [vmem:[#allocation2 + $0xe2] sm:$0xff] }
 0x465   : > { %11749 = vmatprep.mubr.f32.mxu1 %v16368_v6  ;;  %12012 = vmatpush3.msra.mxu0 %v7012_v38  ;;  %v7008_v38 = vld [vmem:[#allocation8 + $0x290] sm:$0xff] }
 0x466   : > { %11845 = vmatmul.mubr.f32.gmra.mxu0 %v16179_v5  ;;  %v16373_v5 = vld [vmem:[#allocation2 + $0xca] sm:$0xff]  ;;  %12013 = vmatprep.subr.mxu0 %v7011_v34 }
 0x467   : > { %11847 = vmatprep.mubr.f32.mxu0 %v16183_v26  ;;  %v6588_v26 = vld [vmem:[#allocation8 + $0x200] sm:$0xff]  ;;  %11918 = vmatpush3.msra.mxu1 %v6589_v18 }
 0x468   : > { %11750 = vmatmul.mubr.f32.gmra.mxu1 %v16373_v5  ;;  %11919 = vmatprep.subr.mxu1 %v6588_v26  ;;  %v16394_v18 = vld [vmem:[#allocation2 + $0xf2] sm:$0xff] }
 0x469   : > { %11752 = vmatprep.mubr.f32.mxu1 %v16376_v51  ;;  %12014 = vmatpush3.msra.mxu0 %v7011_v34  ;;  %v7007_v34 = vld [vmem:[#allocation8 + $0x288] sm:$0xff] }
 0x46a   : > { %11848 = vmatmul.mubr.f32.gmra.mxu0 %v16187_v31  ;;  %v16381_v31 = vld [vmem:[#allocation2 + $0xda] sm:$0xff]  ;;  %12015 = vmatprep.subr.mxu0 %v7010_v4 }
 0x46b   : > { %11850 = vmatprep.mubr.f32.mxu0 %v16191_v25  ;;  %v7009_v25 = vld [vmem:[#allocation8 + $0x298] sm:$0xff]  ;;  %12016 = vmatpush3.msra.mxu0 %v7010_v4  ;;  %v16403_v4 = vld [vmem:[#allocation2 + $0x102] sm:$0xff] }
 0x46c   : > { %11753 = vmatmul.mubr.f32.gmra.mxu1 %v16381_v31  ;;  %12017 = vmatprep.subr.mxu0 %v7009_v25 }
 0x46d   : > { %11755 = vmatprep.mubr.f32.mxu1 %v16384_v35  ;;  %12018 = vmatpush3.msra.mxu0 %v7009_v25  ;;  %v16419_v25 = vld [vmem:[#allocation2 + $0x11a] sm:$0xff] }
 0x46e   : > { %11851 = vmatmul.mubr.f32.gmra.mxu0 %v16195_v56  ;;  %v16389_v56 = vld [vmem:[#allocation2 + $0xea] sm:$0xff]  ;;  %12019 = vmatprep.subr.mxu0 %v7008_v38 }
 0x46f   : > { %11853 = vmatprep.mubr.f32.mxu0 %v16199_v61  ;;  %v16391_v61 = vld [vmem:[#allocation8 + $0x378] sm:$0xff]  ;;  %11920 = vmatpush3.msra.mxu1 %v6588_v26 }
 0x470   : > { %11756 = vmatmul.mubr.f32.gmra.mxu1 %v16389_v56  ;;  %12097 = vmatprep.subr.mxu1 %v16391_v61  ;;  %v16406_v26 = vld [vmem:[#allocation8 + $0x3f8] sm:$0xff] }
 0x471   : > { %11758 = vmatprep.mubr.f32.mxu1 %v16394_v18  ;;  %12020 = vmatpush3.msra.mxu0 %v7008_v38  ;;  %v16430_v38 = vld [vmem:[#allocation2 + $0x132] sm:$0xff] }
 0x472   : > { %11854 = vmatmul.mubr.f32.gmra.mxu0 %v16203_v3  ;;  %v16400_v3 = vld [vmem:[#allocation2 + $0xfa] sm:$0xff]  ;;  %12021 = vmatprep.subr.mxu0 %v7007_v34 }
 0x473   : > { %11856 = vmatprep.mubr.f32.mxu0 %v16207_v32  ;;  %v7006_v32 = vld [vmem:[#allocation8 + $0x280] sm:$0xff]  ;;  %12022 = vmatpush3.msra.mxu0 %v7007_v34  ;;  %v6540_v34 = vld [vmem:[#allocation2 + $0x21] sm:$0xff] }
 0x474   : > { %11759 = vmatmul.mubr.f32.gmra.mxu1 %v16400_v3  ;;  %12023 = vmatprep.subr.mxu0 %v7006_v32 }
 0x475   : > { %11761 = vmatprep.mubr.f32.mxu1 %v16403_v4  ;;  %12024 = vmatpush3.msra.mxu0 %v7006_v32  ;;  %v7438_v32 = vld [vmem:[#allocation8 + $0x370] sm:$0xff] }
 0x476   : > { %11857 = vmatmul.mubr.f32.gmra.mxu0 %v16211_v60  ;;  %v16410_v60 = vld [vmem:[#allocation2 + $0x10a] sm:$0xff]  ;;  %12201 = vmatprep.subr.mxu0 %v16406_v26 }
 0x477   : > { %11859 = vmatprep.mubr.f32.mxu0 %v16215_v50  ;;  %v16413_v50 = vld [vmem:[#allocation2 + $0x112] sm:$0xff] }
 0x478   : > { %11762 = vmatmul.mubr.f32.gmra.mxu1 %v16410_v60 }
 0x479   : > { %11764 = vmatprep.mubr.f32.mxu1 %v16413_v50 }
 0x47a   : > { %11860 = vmatmul.mubr.f32.gmra.mxu0 %v16219_v12  ;;  %v16422_v12 = vld [vmem:[#allocation2 + $0x122] sm:$0xff] }
 0x47b   : > { %11862 = vmatprep.mubr.f32.mxu0 %v16223_v63  ;;  %v16427_v63 = vld [vmem:[#allocation2 + $0x12a] sm:$0xff] }
 0x47c   : > { %11765 = vmatmul.mubr.f32.gmra.mxu1 %v16419_v25 }
 0x47d   : > { %11767 = vmatprep.mubr.f32.mxu1 %v16422_v12 }
 0x47e   : > { %11863 = vmatmul.mubr.f32.gmra.mxu0 %v16227_v53  ;;  %v16435_v53 = vld [vmem:[#allocation2 + $0x13a] sm:$0xff] }
 0x47f   : > { %11865 = vmatprep.mubr.f32.mxu0 %v16231_v41  ;;  %v16438_v41 = vld [vmem:[#allocation2 + $0x142] sm:$0xff] }
 0x480   : > { %11768 = vmatmul.mubr.f32.gmra.mxu1 %v16427_v63 }
 0x481   : > { %11770 = vmatprep.mubr.f32.mxu1 %v16430_v38 }
 0x482   : > { %11866 = vmatmul.mubr.f32.gmra.mxu0 %v16235_v52  ;;  %v16443_v52 = vld [vmem:[#allocation2 + $0x14a] sm:$0xff] }
 0x483   : > { %11868 = vmatprep.mubr.f32.mxu0 %v16239_v30  ;;  %v16446_v30 = vld [vmem:[#allocation2 + $0x152] sm:$0xff] }
 0x484   : > { %11771 = vmatmul.mubr.f32.gmra.mxu1 %v16435_v53 }
 0x485   : > { %11773 = vmatprep.mubr.f32.mxu1 %v16438_v41 }
 0x486   : > { %11869 = vmatmul.mubr.f32.gmra.mxu0 %v16245_v42  ;;  %v16451_v42 = vld [vmem:[#allocation2 + $0x15a] sm:$0xff] }
 0x487   : > { %11871 = vmatprep.mubr.f32.mxu0 %v16249_v1  ;;  %v16454_v1 = vld [vmem:[#allocation2 + $0x162] sm:$0xff] }
 0x488   : > { %11774 = vmatmul.mubr.f32.gmra.mxu1 %v16443_v52 }
 0x489   : > { %11776 = vmatprep.mubr.f32.mxu1 %v16446_v30 }
 0x48a   : > { %11872 = vmatmul.mubr.f32.gmra.mxu0 %v16253_v49  ;;  %v16459_v49 = vld [vmem:[#allocation2 + $0x16a] sm:$0xff] }
 0x48b   : > { %11874 = vmatprep.mubr.f32.mxu0 %v16257_v16  ;;  %v16462_v16 = vld [vmem:[#allocation2 + $0x172] sm:$0xff] }
 0x48c   : > { %11777 = vmatmul.mubr.f32.gmra.mxu1 %v16451_v42 }
 0x48d   : > { %11779 = vmatprep.mubr.f32.mxu1 %v16454_v1 }
 0x48e   : > { %11875 = vmatmul.mubr.f32.gmra.mxu0 %v16261_v0  ;;  %v16467_v0 = vld [vmem:[#allocation2 + $0x17a] sm:$0xff] }
 0x48f   : > { %11877 = vmatprep.mubr.f32.mxu0 %v16265_v21  ;;  %v6539_v21 = vld [vmem:[#allocation2 + $0x19] sm:$0xff] }
 0x490   : > { %11780 = vmatmul.mubr.f32.gmra.mxu1 %v16459_v49 }
 0x491   : > { %11782 = vmatprep.mubr.f32.mxu1 %v16462_v16 }
 0x492   : > { %11878 = vmatmul.mubr.f32.gmra.mxu0 %v16269_v20  ;;  %v6166_v20 = vld [vmem:[#allocation2 + $0x180] sm:$0xff] }
 0x493   : > { %11880 = vmatprep.mubr.f32.mxu0 %v16273_v23  ;;  %v6167_v23 = vld [vmem:[#allocation2 + $0x188] sm:$0xff] }
 0x494   : > { %11783 = vmatmul.mubr.f32.gmra.mxu1 %v16467_v0 }
 0x495   : > { %11921 = vmatprep.mubr.f32.mxu1 %v6539_v21  ;;  %v16474_v21 = vld [vmem:[#allocation2 + $0x31] sm:$0xff] }
 0x496   : > { %11881 = vmatmul.mubr.f32.gmra.mxu0 %v16276_v62  ;;  %v7437_v62 = vld [vmem:[#allocation8 + $0x368] sm:$0xff] }
 0x497   : > { %11883 = vmatprep.mubr.f32.mxu0 %v16279_v59  ;;  %v11510_v59 = vpop.f32.mrf.mxu1 }
 0x498   : > { %11922 = vmatmul.mubr.f32.vlgmr.msra.gmra.mxu1 %v6540_v34 }
 0x499   : > { %11924 = vmatprep.mubr.f32.mxu1 %v6541_v46  ;;  %12098 = vmatpush3.msra.mxu1 %v16391_v61  ;;  %v5169_v34 = vpop.f32.mrf.mxu1  ;;  %v7435_v46 = vld [vmem:[#allocation8 + $0x358] sm:$0xff]  ;;  %v7434_v61 = vld [vmem:[#allocation8 + $0x350] sm:$0xff] }
 0x49a   : > { %11884 = vmatmul.mubr.f32.gmra.mxu0 %v6166_v20  ;;  %12099 = vmatprep.subr.mxu1 %v7438_v32  ;;  %v7436_v20 = vld [vmem:[#allocation8 + $0x360] sm:$0xff] }
 0x49b   : > { %11886 = vmatprep.mubr.f32.mxu0 %v6167_v23  ;;  %12100 = vmatpush3.msra.mxu1 %v7438_v32  ;;  %v16477_v23 = vld [vmem:[#allocation2 + $0x39] sm:$0xff]  ;;  %v16484_v32 = vpop.f32.mrf.mxu0 }
 0x49c   : > { %11925 = vmatmul.mubr.f32.gmra.mxu1 %v16474_v21  ;;  %12101 = vmatprep.subr.mxu1 %v7437_v62 }
 0x49d   : > { %11927 = vmatprep.mubr.f32.mxu1 %v16477_v23  ;;  %12102 = vmatpush3.msra.mxu1 %v7437_v62 }
 0x49e   : > { %11887 = vmatmul.mubr.f32.gmra.mxu0 %v6168_v43  ;;  %v11513_v43 = vpop.f32.mrf.mxu1  ;;  %12103 = vmatprep.subr.mxu1 %v7436_v20 }
 0x49f   : > { %12025 = vmatprep.mubr.f32.mxu0 %v16284_v40  ;;  %v16482_v40 = vld [vmem:[#allocation2 + $0x41] sm:$0xff]  ;;  %12104 = vmatpush3.msra.mxu1 %v7436_v20  ;;  %v16494_v20 = vld [vmem:[#allocation2 + $0x51] sm:$0xff] }
 0x4a0   : > { %11928 = vmatmul.mubr.f32.gmra.mxu1 %v16482_v40  ;;  %v5179_v33 = vpop.f32.mrf.mxu1  ;;  %12105 = vmatprep.subr.mxu1 %v7435_v46  ;;  %v11614_v62 = vpop.f32.mrf.mxu0  ;;  %19094 = vst [vmem:[#allocation51_spill] sm:$0xff] %v16494_v20 }
 0x4a1   : > { %11930 = vmatprep.mubr.f32.mxu1 %v16487_v10  ;;  %12106 = vmatpush3.msra.mxu1 %v7435_v46 }
 0x4a2   : > { %12026 = vmatmul.mubr.f32.vlgmr.msra.gmra.mxu0 %v16287_v36  ;;  %v7433_v36 = vld [vmem:[#allocation8 + $0x348] sm:$0xff]  ;;  %12107 = vmatprep.subr.mxu1 %v7434_v61  ;;  %v5474_v15 = vpop.f32.mrf.mxu0  ;;  %v11516_v57 = vpop.f32.mrf.mxu1 }
 0x4a3   : > { %12028 = vmatprep.mubr.f32.mxu0 %v16292_v28  ;;  %v16491_v28 = vadd.f32 %v11614_v62, %v11510_v59  ;;  %12108 = vmatpush3.msra.mxu1 %v7434_v61  ;;  %v16499_v46 = vadd.f32 %v5474_v15, %v5169_v34  ;;  %v16506_v62 = vld [vmem:[#allocation2 + $0x61] sm:$0xff]  ;;  %v16509_v34 = vld [vmem:[#allocation2 + $0x69] sm:$0xff] }
 0x4a4   : > { %11931 = vmatmul.mubr.f32.gmra.mxu1 %v16494_v20  ;;  %12109 = vmatprep.subr.mxu1 %v7433_v36  ;;  %19096 = vst [vmem:[#allocation52_spill] sm:$0xff] %v16506_v62  ;;  %v7430_v20 = vld [vmem:[#allocation8 + $0x330] sm:$0xff]  ;;  %19097 = vst [vmem:[#allocation50_spill] sm:$0xff] %v16509_v34 }
 0x4a5   : > { %11933 = vmatprep.mubr.f32.mxu1 %v16497_v22  ;;  %12110 = vmatpush3.msra.mxu1 %v7433_v36 }
 0x4a6   : > { %12029 = vmatmul.mubr.f32.gmra.mxu0 %v16295_v27  ;;  %v7431_v27 = vld [vmem:[#allocation8 + $0x338] sm:$0xff]  ;;  %12111 = vmatprep.subr.mxu1 %v7432_v29 }
 0x4a7   : > { %12031 = vmatprep.mubr.f32.mxu0 %v16300_v11  ;;  %v5189_v11 = vpop.f32.mrf.mxu1  ;;  %12112 = vmatpush3.msra.mxu1 %v7432_v29 }
 0x4a8   : > { %11934 = vmatmul.mubr.f32.gmra.mxu1 %v16506_v62  ;;  %12113 = vmatprep.subr.mxu1 %v7431_v27  ;;  %v7428_v62 = vld [vmem:[#allocation8 + $0x320] sm:$0xff] }
 0x4a9   : > { %v11519_v15 = vpop.f32.mrf.mxu1  ;;  %11936 = vmatprep.mubr.f32.mxu1 %v16509_v34  ;;  %12114 = vmatpush3.msra.mxu1 %v7431_v27 }
 0x4aa   : > { %v11617_v59 = vpop.f32.mrf.mxu0  ;;  %12032 = vmatmul.mubr.f32.gmra.mxu0 %v16303_v24  ;;  %v7429_v24 = vld [vmem:[#allocation8 + $0x328] sm:$0xff]  ;;  %12115 = vmatprep.subr.mxu1 %v7430_v20 }
 0x4ab   : > { %v16503_v61 = vadd.f32 %v11617_v59, %v11513_v43  ;;  %12034 = vmatprep.mubr.f32.mxu0 %v16308_v45  ;;  %v5199_v45 = vpop.f32.mrf.mxu1  ;;  %v16518_v59 = vld [vmem:[#allocation2 + $0x71] sm:$0xff]  ;;  %12116 = vmatpush3.msra.mxu1 %v7430_v20 }
 0x4ac   : > { %v5484_v10 = vpop.f32.mrf.mxu0  ;;  %19098 = vst [vmem:[#allocation85_spill] sm:$0xff] %v16518_v59  ;;  %11937 = vmatmul.mubr.f32.gmra.mxu1 %v16518_v59  ;;  %12117 = vmatprep.subr.mxu1 %v7429_v24  ;;  %v7427_v59 = vld [vmem:[#allocation8 + $0x318] sm:$0xff] }
 0x4ad   : > { %v16511_v36 = vadd.f32 %v5484_v10, %v5179_v33  ;;  %v11522_v33 = vpop.f32.mrf.mxu1  ;;  %v16521_v10 = vld [vmem:[#allocation2 + $0x79] sm:$0xff]  ;;  %12118 = vmatpush3.msra.mxu1 %v7429_v24  ;;  %12202 = vmatpush3.msra.mxu0 %v16406_v26  ;;  %v16534_v24 = vld [vmem:[#allocation2 + $0x89] sm:$0xff] }
 0x4ae   : > { %v11620_v43 = vpop.f32.mrf.mxu0  ;;  %12035 = vmatmul.mubr.f32.gmra.mxu0 %v16311_v8  ;;  %19099 = vst [vmem:[#allocation84_spill] sm:$0xff] %v16521_v10  ;;  %11939 = vmatprep.mubr.f32.mxu1 %v16521_v10  ;;  %19101 = vst [vmem:[#allocation26_spill] sm:$0xff] %v16534_v24 }
 0x4af   : > { %v16515_v29 = vadd.f32 %v11620_v43, %v11516_v57  ;;  %12037 = vmatprep.mubr.f32.mxu0 %v16316_v55  ;;  %v7856_v57 = vld [vmem:[#allocation8 + $0x3f0] sm:$0xff]  ;;  %v5209_v55 = vpop.f32.mrf.mxu1  ;;  %12119 = vmatprep.subr.mxu1 %v7428_v62 }
 0x4b0   : > { %v5494_v22 = vpop.f32.mrf.mxu0  ;;  %v16530_v43 = vld [vmem:[#allocation2 + $0x81] sm:$0xff]  ;;  %12203 = vmatprep.subr.mxu0 %v7856_v57  ;;  %12120 = vmatpush3.msra.mxu1 %v7428_v62 }
 0x4b1   : > { %v16523_v27 = vadd.f32 %v5494_v22, %v5189_v11  ;;  %19100 = vst [vmem:[#allocation29_spill] sm:$0xff] %v16530_v43  ;;  %v11525_v11 = vpop.f32.mrf.mxu1  ;;  %11940 = vmatmul.mubr.f32.gmra.mxu1 %v16530_v43  ;;  %12121 = vmatprep.subr.mxu1 %v7427_v59  ;;  %v7854_v43 = vld [vmem:[#allocation8 + $0x3e0] sm:$0xff] }
 0x4b2   : > { %v11623_v8 = vpop.f32.mrf.mxu0  ;;  %12038 = vmatmul.mubr.f32.gmra.mxu0 %v16319_v9  ;;  %11942 = vmatprep.mubr.f32.mxu1 %v16534_v24  ;;  %v7855_v9 = vld [vmem:[#allocation8 + $0x3e8] sm:$0xff] }
 0x4b3   : > { %v16527_v20 = vadd.f32 %v11623_v8, %v11519_v15  ;;  %12040 = vmatprep.mubr.f32.mxu0 %v16324_v17  ;;  %v5219_v17 = vpop.f32.mrf.mxu1  ;;  %v16543_v8 = vld [vmem:[#allocation2 + $0x91] sm:$0xff]  ;;  %12204 = vmatpush3.msra.mxu0 %v7856_v57 }
 0x4b4   : > { %v5504_v22 = vpop.f32.mrf.mxu0  ;;  %19102 = vst [vmem:[#allocation20_spill] sm:$0xff] %v16543_v8  ;;  %12205 = vmatprep.subr.mxu0 %v7855_v9  ;;  %12122 = vmatpush3.msra.mxu1 %v7427_v59 }
 0x4b5   : > { %v16536_v10 = vadd.f32 %v5504_v22, %v5199_v45  ;;  %v11528_v45 = vpop.f32.mrf.mxu1  ;;  %11943 = vmatmul.mubr.f32.gmra.mxu1 %v16543_v8  ;;  %v16546_v22 = vld [vmem:[#allocation2 + $0x99] sm:$0xff]  ;;  %12206 = vmatpush3.msra.mxu0 %v7855_v9  ;;  %v7426_v8 = vld [vmem:[#allocation8 + $0x310] sm:$0xff] }
 0x4b6   : > { %v11626_v15 = vpop.f32.mrf.mxu0  ;;  %12041 = vmatmul.mubr.f32.gmra.mxu0 %v16328_v37  ;;  %19103 = vst [vmem:[#allocation38_spill] sm:$0xff] %v16546_v22  ;;  %11945 = vmatprep.mubr.f32.mxu1 %v16546_v22  ;;  %v7853_v37 = vld [vmem:[#allocation8 + $0x3d8] sm:$0xff] }
 0x4b7   : > { %v16540_v26 = vadd.f32 %v11626_v15, %v11522_v33  ;;  %12043 = vmatprep.mubr.f32.mxu0 %v16333_v44  ;;  %v5229_v44 = vpop.f32.mrf.mxu1  ;;  %12207 = vmatprep.subr.mxu0 %v7854_v43  ;;  %v16555_v15 = vld [vmem:[#allocation2 + $0xa1] sm:$0xff] }
 0x4b8   : > { %v5514_v34 = vpop.f32.mrf.mxu0  ;;  %19104 = vst [vmem:[#allocation60_spill] sm:$0xff] %v16555_v15  ;;  %12208 = vmatpush3.msra.mxu0 %v7854_v43  ;;  %12123 = vmatprep.subr.mxu1 %v7426_v8 }
 0x4b9   : > { %v16548_v62 = vadd.f32 %v5514_v34, %v5209_v55  ;;  %v11531_v34 = vpop.f32.mrf.mxu1  ;;  %11946 = vmatmul.mubr.f32.gmra.mxu1 %v16555_v15  ;;  %v16558_v55 = vld [vmem:[#allocation2 + $0xa9] sm:$0xff]  ;;  %12209 = vmatprep.subr.mxu0 %v7853_v37  ;;  %v7851_v15 = vld [vmem:[#allocation8 + $0x3c8] sm:$0xff] }
 0x4ba   : > { %v11629_v33 = vpop.f32.mrf.mxu0  ;;  %12044 = vmatmul.mubr.f32.gmra.mxu0 %v16336_v39  ;;  %19105 = vst [vmem:[#allocation31_spill] sm:$0xff] %v16558_v55  ;;  %11948 = vmatprep.mubr.f32.mxu1 %v16558_v55  ;;  %v7852_v39 = vld [vmem:[#allocation8 + $0x3d0] sm:$0xff] }
 0x4bb   : > { %v16552_v57 = vadd.f32 %v11629_v33, %v11525_v11  ;;  %12046 = vmatprep.mubr.f32.mxu0 %v16341_v14  ;;  %v5239_v14 = vpop.f32.mrf.mxu1  ;;  %v16567_v33 = vld [vmem:[#allocation2 + $0xb1] sm:$0xff]  ;;  %12210 = vmatpush3.msra.mxu0 %v7853_v37 }
 0x4bc   : > { %v5524_v24 = vpop.f32.mrf.mxu0  ;;  %19106 = vst [vmem:[#allocation21_spill] sm:$0xff] %v16567_v33  ;;  %12211 = vmatprep.subr.mxu0 %v7852_v39  ;;  %12124 = vmatpush3.msra.mxu1 %v7426_v8 }
 0x4bd   : > { %v16560_v9 = vadd.f32 %v5524_v24, %v5219_v17  ;;  %v11534_v24 = vpop.f32.mrf.mxu1  ;;  %11949 = vmatmul.mubr.f32.gmra.mxu1 %v16567_v33  ;;  %v16570_v17 = vld [vmem:[#allocation2 + $0xb9] sm:$0xff]  ;;  %12212 = vmatpush3.msra.mxu0 %v7852_v39 }
 0x4be   : > { %v11632_v11 = vpop.f32.mrf.mxu0  ;;  %12047 = vmatmul.mubr.f32.gmra.mxu0 %v16344_v47  ;;  %19107 = vst [vmem:[#allocation67_spill] sm:$0xff] %v16570_v17  ;;  %11951 = vmatprep.mubr.f32.mxu1 %v16570_v17  ;;  %v7850_v47 = vld [vmem:[#allocation8 + $0x3c0] sm:$0xff]  ;;  %v7425_v33 = vld [vmem:[#allocation8 + $0x308] sm:$0xff] }
 0x4bf   : > { %v16564_v43 = vadd.f32 %v11632_v11, %v11528_v45  ;;  %12049 = vmatprep.mubr.f32.mxu0 %v16349_v7  ;;  %v5249_v7 = vpop.f32.mrf.mxu1  ;;  %12213 = vmatprep.subr.mxu0 %v7851_v15  ;;  %v16579_v11 = vld [vmem:[#allocation2 + $0xc1] sm:$0xff] }
 0x4c0   : > { %v5534_v22 = vpop.f32.mrf.mxu0  ;;  %19108 = vst [vmem:[#allocation86_spill] sm:$0xff] %v16579_v11  ;;  %12214 = vmatpush3.msra.mxu0 %v7851_v15  ;;  %12125 = vmatprep.subr.mxu1 %v7425_v33 }
 0x4c1   : > { %v16572_v59 = vadd.f32 %v5534_v22, %v5229_v44  ;;  %v11537_v22 = vpop.f32.mrf.mxu1  ;;  %11952 = vmatmul.mubr.f32.gmra.mxu1 %v16579_v11  ;;  %v16582_v44 = vld [vmem:[#allocation2 + $0xc9] sm:$0xff]  ;;  %12215 = vmatprep.subr.mxu0 %v7850_v47 }
 0x4c2   : > { %v11635_v45 = vpop.f32.mrf.mxu0  ;;  %12050 = vmatmul.mubr.f32.gmra.mxu0 %v16352_v48  ;;  %19109 = vst [vmem:[#allocation33_spill] sm:$0xff] %v16582_v44  ;;  %11954 = vmatprep.mubr.f32.mxu1 %v16582_v44  ;;  %v7849_v48 = vld [vmem:[#allocation8 + $0x3b8] sm:$0xff]  ;;  %v7848_v11 = vld [vmem:[#allocation8 + $0x3b0] sm:$0xff] }
 0x4c3   : > { %v16576_v37 = vadd.f32 %v11635_v45, %v11531_v34  ;;  %12052 = vmatprep.mubr.f32.mxu0 %v16357_v19  ;;  %v5259_v19 = vpop.f32.mrf.mxu1  ;;  %v16591_v45 = vld [vmem:[#allocation2 + $0xd1] sm:$0xff]  ;;  %12216 = vmatpush3.msra.mxu0 %v7850_v47 }
 0x4c4   : > { %v5544_v55 = vpop.f32.mrf.mxu0  ;;  %19110 = vst [vmem:[#allocation73_spill] sm:$0xff] %v16591_v45  ;;  %12217 = vmatprep.subr.mxu0 %v7849_v48  ;;  %12126 = vmatpush3.msra.mxu1 %v7425_v33 }
 0x4c5   : > { %v16584_v39 = vadd.f32 %v5544_v55, %v5239_v14  ;;  %v11540_v55 = vpop.f32.mrf.mxu1  ;;  %11955 = vmatmul.mubr.f32.gmra.mxu1 %v16591_v45  ;;  %v16594_v14 = vld [vmem:[#allocation2 + $0xd9] sm:$0xff]  ;;  %12218 = vmatpush3.msra.mxu0 %v7849_v48 }
 0x4c6   : > { %v11638_v34 = vpop.f32.mrf.mxu0  ;;  %12053 = vmatmul.mubr.f32.gmra.mxu0 %v16360_v13  ;;  %19111 = vst [vmem:[#allocation76_spill] sm:$0xff] %v16594_v14  ;;  %11957 = vmatprep.mubr.f32.mxu1 %v16594_v14  ;;  %v7847_v13 = vld [vmem:[#allocation8 + $0x3a8] sm:$0xff]  ;;  %v7424_v45 = vld [vmem:[#allocation8 + $0x300] sm:$0xff] }
 0x4c7   : > { %v16588_v15 = vadd.f32 %v11638_v34, %v11534_v24  ;;  %12055 = vmatprep.mubr.f32.mxu0 %v16365_v54  ;;  %v5269_v54 = vpop.f32.mrf.mxu1  ;;  %12219 = vmatprep.subr.mxu0 %v7848_v11  ;;  %v16603_v34 = vld [vmem:[#allocation2 + $0xe1] sm:$0xff] }
 0x4c8   : > { %v5554_v17 = vpop.f32.mrf.mxu0  ;;  %19112 = vst [vmem:[#allocation54_spill] sm:$0xff] %v16603_v34  ;;  %12220 = vmatpush3.msra.mxu0 %v7848_v11  ;;  %12127 = vmatprep.subr.mxu1 %v7424_v45 }
 0x4c9   : > { %v16596_v8 = vadd.f32 %v5554_v17, %v5249_v7  ;;  %v11543_v17 = vpop.f32.mrf.mxu1  ;;  %11958 = vmatmul.mubr.f32.gmra.mxu1 %v16603_v34  ;;  %v16606_v7 = vld [vmem:[#allocation2 + $0xe9] sm:$0xff]  ;;  %12221 = vmatprep.subr.mxu0 %v7847_v13 }
 0x4ca   : > { %v11641_v24 = vpop.f32.mrf.mxu0  ;;  %12056 = vmatmul.mubr.f32.gmra.mxu0 %v16368_v6  ;;  %11960 = vmatprep.mubr.f32.mxu1 %v16606_v7  ;;  %v7846_v6 = vld [vmem:[#allocation8 + $0x3a0] sm:$0xff]  ;;  %v7845_v34 = vld [vmem:[#allocation8 + $0x398] sm:$0xff] }
 0x4cb   : > { %v16600_v47 = vadd.f32 %v11641_v24, %v11537_v22  ;;  %12058 = vmatprep.mubr.f32.mxu0 %v16373_v5  ;;  %v5279_v5 = vpop.f32.mrf.mxu1  ;;  %v16615_v24 = vld [vmem:[#allocation2 + $0xf1] sm:$0xff]  ;;  %12222 = vmatpush3.msra.mxu0 %v7847_v13 }
 0x4cc   : > { %v5564_v44 = vpop.f32.mrf.mxu0  ;;  %19113 = vst [vmem:[#allocation53_spill] sm:$0xff] %v16615_v24  ;;  %12223 = vmatprep.subr.mxu0 %v7846_v6  ;;  %12128 = vmatpush3.msra.mxu1 %v7424_v45  ;;  %v16645_v45 = vld [vmem:[#allocation2 + $0x119] sm:$0xff] }
 0x4cd   : > { %v16608_v48 = vadd.f32 %v5564_v44, %v5259_v19  ;;  %v11546_v44 = vpop.f32.mrf.mxu1  ;;  %11961 = vmatmul.mubr.f32.gmra.mxu1 %v16615_v24  ;;  %v16618_v19 = vld [vmem:[#allocation2 + $0xf9] sm:$0xff]  ;;  %12224 = vmatpush3.msra.mxu0 %v7846_v6  ;;  %v16629_v24 = vld [vmem:[#allocation8 + $0x478] sm:$0xff] }
 0x4ce   : > { %v11644_v22 = vpop.f32.mrf.mxu0  ;;  %12059 = vmatmul.mubr.f32.gmra.mxu0 %v16376_v51  ;;  %19114 = vst [vmem:[#allocation58_spill] sm:$0xff] %v16618_v19  ;;  %11963 = vmatprep.mubr.f32.mxu1 %v16618_v19  ;;  %v7844_v51 = vld [vmem:[#allocation8 + $0x390] sm:$0xff] }
 0x4cf   : > { %v16612_v11 = vadd.f32 %v11644_v22, %v11540_v55  ;;  %12061 = vmatprep.mubr.f32.mxu0 %v16381_v31  ;;  %v5289_v31 = vpop.f32.mrf.mxu1  ;;  %12225 = vmatprep.subr.mxu0 %v7845_v34  ;;  %v16627_v22 = vld [vmem:[#allocation2 + $0x101] sm:$0xff]  ;;  %v16632_v6 = vld [vmem:[#allocation2 + $0x109] sm:$0xff] }
 0x4d0   : > { %v5574_v14 = vpop.f32.mrf.mxu0  ;;  %19115 = vst [vmem:[#allocation59_spill] sm:$0xff] %v16627_v22  ;;  %12226 = vmatpush3.msra.mxu0 %v7845_v34  ;;  %19116 = vst [vmem:[#allocation15_spill] sm:$0xff] %v16632_v6  ;;  %12305 = vmatprep.subr.mxu1 %v16629_v24 }
 0x4d1   : > { %v16620_v33 = vadd.f32 %v5574_v14, %v5269_v54  ;;  %v11549_v54 = vpop.f32.mrf.mxu1  ;;  %11964 = vmatmul.mubr.f32.gmra.mxu1 %v16627_v22  ;;  %12227 = vmatprep.subr.mxu0 %v7844_v51  ;;  %v7842_v22 = vld [vmem:[#allocation8 + $0x380] sm:$0xff] }
 0x4d2   : > { %v11647_v55 = vpop.f32.mrf.mxu0  ;;  %12062 = vmatmul.mubr.f32.gmra.mxu0 %v16384_v35  ;;  %11966 = vmatprep.mubr.f32.mxu1 %v16632_v6  ;;  %v7843_v35 = vld [vmem:[#allocation8 + $0x388] sm:$0xff] }
 0x4d3   : > { %v16624_v13 = vadd.f32 %v11647_v55, %v11543_v17  ;;  %12064 = vmatprep.mubr.f32.mxu0 %v16389_v56  ;;  %v5299_v56 = vpop.f32.mrf.mxu1  ;;  %v16642_v55 = vld [vmem:[#allocation2 + $0x111] sm:$0xff]  ;;  %12228 = vmatpush3.msra.mxu0 %v7844_v51  ;;  %v16654_v51 = vld [vmem:[#allocation2 + $0x121] sm:$0xff] }
 0x4d4   : > { %v5584_v14 = vpop.f32.mrf.mxu0  ;;  %19117 = vst [vmem:[#allocation39_spill] sm:$0xff] %v16642_v55  ;;  %12229 = vmatprep.subr.mxu0 %v7843_v35  ;;  %19118 = vst [vmem:[#allocation23_spill] sm:$0xff] %v16654_v51 }
 0x4d5   : > { %v16634_v19 = vadd.f32 %v5584_v14, %v5279_v5  ;;  %v11552_v14 = vpop.f32.mrf.mxu1  ;;  %11967 = vmatmul.mubr.f32.gmra.mxu1 %v16642_v55  ;;  %12230 = vmatpush3.msra.mxu0 %v7843_v35 }
 0x4d6   : > { %v11650_v17 = vpop.f32.mrf.mxu0  ;;  %12065 = vmatmul.mubr.f32.gmra.mxu0 %v16394_v18  ;;  %11969 = vmatprep.mubr.f32.mxu1 %v16645_v45 }
 0x4d7   : > { %v16639_v34 = vadd.f32 %v11650_v17, %v11546_v44  ;;  %12067 = vmatprep.mubr.f32.mxu0 %v16400_v3  ;;  %v5309_v3 = vpop.f32.mrf.mxu1  ;;  %12231 = vmatprep.subr.mxu0 %v7842_v22 }
 0x4d8   : > { %v5594_v5 = vpop.f32.mrf.mxu0  ;;  %12232 = vmatpush3.msra.mxu0 %v7842_v22 }
 0x4d9   : > { %v16647_v6 = vadd.f32 %v5594_v5, %v5289_v31  ;;  %v11555_v55 = vpop.f32.mrf.mxu1  ;;  %11970 = vmatmul.mubr.f32.gmra.mxu1 %v16654_v51  ;;  %v16657_v31 = vld [vmem:[#allocation2 + $0x129] sm:$0xff]  ;;  %v16669_v51 = vld [vmem:[#allocation2 + $0x139] sm:$0xff] }
 0x4da   : > { %v11653_v18 = vpop.f32.mrf.mxu0  ;;  %12068 = vmatmul.mubr.f32.gmra.mxu0 %v16403_v4  ;;  %19119 = vst [vmem:[#allocation87_spill] sm:$0xff] %v16657_v31  ;;  %11972 = vmatprep.mubr.f32.mxu1 %v16657_v31  ;;  %19121 = vst [vmem:[#allocation89_spill] sm:$0xff] %v16669_v51 }
 0x4db   : > { %v16651_v44 = vadd.f32 %v11653_v18, %v11549_v54  ;;  %12070 = vmatprep.mubr.f32.mxu0 %v16410_v60  ;;  %v5319_v54 = vpop.f32.mrf.mxu1  ;;  %v16666_v60 = vld [vmem:[#allocation2 + $0x131] sm:$0xff] }
 0x4dc   : > { %v5604_v17 = vpop.f32.mrf.mxu0  ;;  %19120 = vst [vmem:[#allocation88_spill] sm:$0xff] %v16666_v60 }
 0x4dd   : > { %v16659_v5 = vadd.f32 %v5604_v17, %v5299_v56  ;;  %v11558_v18 = vpop.f32.mrf.mxu1  ;;  %11973 = vmatmul.mubr.f32.gmra.mxu1 %v16666_v60  ;;  %v16681_v60 = vld [vmem:[#allocation2 + $0x149] sm:$0xff] }
 0x4de   : > { %v11656_v4 = vpop.f32.mrf.mxu0  ;;  %12071 = vmatmul.mubr.f32.gmra.mxu0 %v16413_v50  ;;  %11975 = vmatprep.mubr.f32.mxu1 %v16669_v51  ;;  %19123 = vst [vmem:[#allocation91_spill] sm:$0xff] %v16681_v60 }
 0x4df   : > { %v16663_v35 = vadd.f32 %v11656_v4, %v11552_v14  ;;  %12073 = vmatprep.mubr.f32.mxu0 %v16419_v25  ;;  %v5329_v50 = vpop.f32.mrf.mxu1  ;;  %v16678_v25 = vld [vmem:[#allocation2 + $0x141] sm:$0xff] }
 0x4e0   : > { %v5614_v22 = vpop.f32.mrf.mxu0  ;;  %19122 = vst [vmem:[#allocation90_spill] sm:$0xff] %v16678_v25 }
 0x4e1   : > { %v16671_v56 = vadd.f32 %v5614_v22, %v5309_v3  ;;  %v11561_v31 = vpop.f32.mrf.mxu1  ;;  %11976 = vmatmul.mubr.f32.gmra.mxu1 %v16678_v25  ;;  %v16693_v25 = vld [vmem:[#allocation2 + $0x159] sm:$0xff] }
 0x4e2   : > { %v11659_v17 = vpop.f32.mrf.mxu0  ;;  %12074 = vmatmul.mubr.f32.gmra.mxu0 %v16422_v12  ;;  %11978 = vmatprep.mubr.f32.mxu1 %v16681_v60  ;;  %19125 = vst [vmem:[#allocation93_spill] sm:$0xff] %v16693_v25 }
 0x4e3   : > { %v16675_v14 = vadd.f32 %v11659_v17, %v11555_v55  ;;  %12076 = vmatprep.mubr.f32.mxu0 %v16427_v63  ;;  %v5339_v12 = vpop.f32.mrf.mxu1  ;;  %v16690_v63 = vld [vmem:[#allocation2 + $0x151] sm:$0xff] }
 0x4e4   : > { %v5624_v4 = vpop.f32.mrf.mxu0  ;;  %19124 = vst [vmem:[#allocation92_spill] sm:$0xff] %v16690_v63 }
 0x4e5   : > { %v16683_v3 = vadd.f32 %v5624_v4, %v5319_v54  ;;  %v11564_v51 = vpop.f32.mrf.mxu1  ;;  %11979 = vmatmul.mubr.f32.gmra.mxu1 %v16690_v63  ;;  %v16705_v63 = vld [vmem:[#allocation2 + $0x169] sm:$0xff] }
 0x4e6   : > { %v11662_v22 = vpop.f32.mrf.mxu0  ;;  %12077 = vmatmul.mubr.f32.gmra.mxu0 %v16430_v38  ;;  %11981 = vmatprep.mubr.f32.mxu1 %v16693_v25  ;;  %19127 = vst [vmem:[#allocation95_spill] sm:$0xff] %v16705_v63 }
 0x4e7   : > { %v16687_v55 = vadd.f32 %v11662_v22, %v11558_v18  ;;  %12079 = vmatprep.mubr.f32.mxu0 %v16435_v53  ;;  %v5349_v38 = vpop.f32.mrf.mxu1  ;;  %v16702_v53 = vld [vmem:[#allocation2 + $0x161] sm:$0xff] }
 0x4e8   : > { %v5634_v17 = vpop.f32.mrf.mxu0  ;;  %19126 = vst [vmem:[#allocation94_spill] sm:$0xff] %v16702_v53 }
 0x4e9   : > { %v16695_v54 = vadd.f32 %v5634_v17, %v5329_v50  ;;  %v11567_v60 = vpop.f32.mrf.mxu1  ;;  %11982 = vmatmul.mubr.f32.gmra.mxu1 %v16702_v53  ;;  %v16717_v53 = vld [vmem:[#allocation2 + $0x179] sm:$0xff] }
 0x4ea   : > { %v11665_v4 = vpop.f32.mrf.mxu0  ;;  %12080 = vmatmul.mubr.f32.gmra.mxu0 %v16438_v41  ;;  %11984 = vmatprep.mubr.f32.mxu1 %v16705_v63  ;;  %19130 = vst [vmem:[#allocation98_spill] sm:$0xff] %v16717_v53 }
 0x4eb   : > { %v16699_v18 = vadd.f32 %v11665_v4, %v11561_v31  ;;  %12082 = vmatprep.mubr.f32.mxu0 %v16443_v52  ;;  %v5359_v41 = vpop.f32.mrf.mxu1  ;;  %v16714_v52 = vld [vmem:[#allocation2 + $0x171] sm:$0xff] }
 0x4ec   : > { %v5644_v22 = vpop.f32.mrf.mxu0  ;;  %19129 = vst [vmem:[#allocation97_spill] sm:$0xff] %v16714_v52 }
 0x4ed   : > { %v16707_v50 = vadd.f32 %v5644_v22, %v5339_v12  ;;  %v11570_v25 = vpop.f32.mrf.mxu1  ;;  %11985 = vmatmul.mubr.f32.gmra.mxu1 %v16714_v52  ;;  %v16729_v52 = vld [vmem:[#allocation2 + $0x189] sm:$0xff] }
 0x4ee   : > { %v11668_v17 = vpop.f32.mrf.mxu0  ;;  %12083 = vmatmul.mubr.f32.gmra.mxu0 %v16446_v30  ;;  %11987 = vmatprep.mubr.f32.mxu1 %v16717_v53  ;;  %19134 = vst [vmem:[#allocation102_spill] sm:$0xff] %v16729_v52 }
 0x4ef   : > { %v16711_v31 = vadd.f32 %v11668_v17, %v11564_v51  ;;  %12085 = vmatprep.mubr.f32.mxu0 %v16451_v42  ;;  %v5369_v30 = vpop.f32.mrf.mxu1  ;;  %v16726_v42 = vld [vmem:[#allocation2 + $0x181] sm:$0xff] }
 0x4f0   : > { %v5654_v4 = vpop.f32.mrf.mxu0  ;;  %19133 = vst [vmem:[#allocation101_spill] sm:$0xff] %v16726_v42 }
 0x4f1   : > { %19128 = vst [vmem:[#allocation96_spill] sm:$0xff] %v16711_v31  ;;  %v16719_v12 = vadd.f32 %v5654_v4, %v5349_v38  ;;  %v11573_v63 = vpop.f32.mrf.mxu1  ;;  %11988 = vmatmul.mubr.f32.gmra.mxu1 %v16726_v42  ;;  %v7375_v42 = vld [vmem:[#allocation2 + $0x30] sm:$0xff] }
 0x4f2   : > { %v11671_v22 = vpop.f32.mrf.mxu0  ;;  %12086 = vmatmul.mubr.f32.gmra.mxu0 %v16454_v1  ;;  %11990 = vmatprep.mubr.f32.mxu1 %v16729_v52  ;;  %v7003_v52 = vld [vmem:[#allocation2 + $0x18a] sm:$0xff] }
 0x4f3   : > { %19131 = vst [vmem:[#allocation99_spill] sm:$0xff] %v16719_v12  ;;  %v16723_v51 = vadd.f32 %v11671_v22, %v11567_v60  ;;  %12088 = vmatprep.mubr.f32.mxu0 %v16459_v49  ;;  %v5379_v1 = vpop.f32.mrf.mxu1  ;;  %v16738_v49 = vld [vmem:[#allocation2 + $0x191] sm:$0xff]  ;;  %v7377_v12 = vld [vmem:[#allocation2 + $0x40] sm:$0xff] }
 0x4f4   : > { %v5664_v17 = vpop.f32.mrf.mxu0  ;;  %19137 = vst [vmem:[#allocation105_spill] sm:$0xff] %v16738_v49 }
 0x4f5   : > { %19132 = vst [vmem:[#allocation100_spill] sm:$0xff] %v16723_v51  ;;  %v16731_v38 = vadd.f32 %v5664_v17, %v5359_v41  ;;  %v11576_v53 = vpop.f32.mrf.mxu1  ;;  %11991 = vmatmul.mubr.f32.gmra.mxu1 %v16738_v49  ;;  %v7002_v41 = vld [vmem:[#allocation2 + $0x182] sm:$0xff]  ;;  %v7004_v49 = vld [vmem:[#allocation2 + $0x192] sm:$0xff] }
 0x4f6   : > { %v11674_v4 = vpop.f32.mrf.mxu0  ;;  %12089 = vmatmul.mubr.f32.gmra.mxu0 %v16462_v16  ;;  %12129 = vmatprep.mubr.f32.mxu1 %v7375_v42  ;;  %v8273_v42 = vld [vmem:[#allocation8 + $0x468] sm:$0xff] }
 0x4f7   : > { %19135 = vst [vmem:[#allocation103_spill] sm:$0xff] %v16731_v38  ;;  %v16735_v60 = vadd.f32 %v11674_v4, %v11570_v25  ;;  %12091 = vmatprep.mubr.f32.mxu0 %v16467_v0  ;;  %v5389_v16 = vpop.f32.mrf.mxu1  ;;  %v7376_v25 = vld [vmem:[#allocation2 + $0x38] sm:$0xff]  ;;  %v8274_v0 = vld [vmem:[#allocation8 + $0x470] sm:$0xff] }
 0x4f8   : > { %v5674_v22 = vpop.f32.mrf.mxu0 }
 0x4f9   : > { %19136 = vst [vmem:[#allocation104_spill] sm:$0xff] %v16735_v60  ;;  %v16741_v51 = vadd.f32 %v5674_v22, %v5369_v30  ;;  %v11715_v60 = vpop.f32.mrf.mxu1  ;;  %12130 = vmatmul.mubr.f32.vlgmr.msra.gmra.mxu1 %v7376_v25 }
 0x4fa   : > { %v11677_v17 = vpop.f32.mrf.mxu0  ;;  %12092 = vmatmul.mubr.f32.gmra.mxu0 %v7002_v41  ;;  %v6074_v30 = vadd.f32 %v11715_v60, %v16242_v58  ;;  %12132 = vmatprep.mubr.f32.mxu1 %v7377_v12  ;;  %v7378_v41 = vld [vmem:[#allocation2 + $0x48] sm:$0xff]  ;;  %v5465_v58 = vadd.f32 %v16484_v32, %v16470_v2  ;;  %v7380_v2 = vld [vmem:[#allocation2 + $0x58] sm:$0xff] }
 0x4fb   : > { %v16743_v38 = vadd.f32 %v11677_v17, %v11573_v63  ;;  %12094 = vmatprep.mubr.f32.mxu0 %v7003_v52  ;;  %12306 = vmatpush3.msra.mxu1 %v16629_v24  ;;  %v5834_v63 = vpop.f32.mrf.mxu1  ;;  %v8272_v17 = vld [vmem:[#allocation8 + $0x460] sm:$0xff]  ;;  %v8270_v32 = vld [vmem:[#allocation8 + $0x450] sm:$0xff] }
 0x4fc   : > { %v5684_v4 = vpop.f32.mrf.mxu0  ;;  %12307 = vmatprep.subr.mxu1 %v8274_v0 }
 0x4fd   : > { %v16745_v31 = vadd.f32 %v5684_v4, %v5379_v1  ;;  %12308 = vmatpush3.msra.mxu1 %v8274_v0  ;;  %v11718_v25 = vpop.f32.mrf.mxu1  ;;  %v7379_v4 = vld [vmem:[#allocation2 + $0x50] sm:$0xff]  ;;  %v6073_v0 = vadd.f32 %v5834_v63, %v5465_v58  ;;  %v8268_v58 = vld [vmem:[#allocation8 + $0x440] sm:$0xff] }
 0x4fe   : > { %v11680_v22 = vpop.f32.mrf.mxu0  ;;  %12095 = vmatmul.mubr.f32.gmra.mxu0 %v7004_v49  ;;  %12133 = vmatmul.mubr.f32.gmra.mxu1 %v7378_v41  ;;  %v6076_v12 = vadd.f32 %v11718_v25, %v16491_v28 }
 0x4ff   : > { %v16749_v52 = vadd.f32 %v11680_v22, %v11576_v53  ;;  %12233 = vmatprep.mubr.f32.mxu0 %v16474_v21  ;;  %12309 = vmatprep.subr.mxu1 %v8273_v42  ;;  %v8271_v53 = vld [vmem:[#allocation8 + $0x458] sm:$0xff]  ;;  %v5844_v21 = vpop.f32.mrf.mxu1 }
 0x500   : > { %v5694_v1 = vpop.f32.mrf.mxu0  ;;  %12135 = vmatprep.mubr.f32.mxu1 %v7379_v4  ;;  %12310 = vmatpush3.msra.mxu1 %v8273_v42  ;;  %v6075_v22 = vadd.f32 %v5844_v21, %v16499_v46  ;;  %v7381_v42 = vld [vmem:[#allocation2 + $0x60] sm:$0xff]  ;;  %v7382_v4 = vld [vmem:[#allocation2 + $0x68] sm:$0xff] }
 0x501   : > { %v16754_v24 = vadd.f32 %v5694_v1, %v5389_v16  ;;  %12311 = vmatprep.subr.mxu1 %v8272_v17  ;;  %v11721_v28 = vpop.f32.mrf.mxu1 }
 0x502   : > { %v11819_v60 = vpop.f32.mrf.mxu0  ;;  %12234 = vmatmul.mubr.f32.vlgmr.msra.gmra.mxu0 %v16477_v23  ;;  %12312 = vmatpush3.msra.mxu1 %v8272_v17  ;;  %v6078_v23 = vadd.f32 %v11721_v28, %v16503_v61  ;;  %v19139_v17 = vld [vmem:[#allocation51_spill] sm:$0xff]  ;;  %v7383_v61 = vld [vmem:[#allocation2 + $0x70] sm:$0xff] }
 0x503   : > { %v16758_v49 = vadd.f32 %v11819_v60, %v6074_v30  ;;  %12236 = vmatprep.mubr.f32.mxu0 %v16482_v40  ;;  %12136 = vmatmul.mubr.f32.gmra.mxu1 %v7380_v2  ;;  %v8269_v30 = vld [vmem:[#allocation8 + $0x448] sm:$0xff]  ;;  %v19138_v40 = vld [vmem:[#allocation41_spill] sm:$0xff]  ;;  %v5854_v63 = vpop.f32.mrf.mxu1 }
 0x504   : > { %v6252_v16 = vpop.f32.mrf.mxu0  ;;  %12313 = vmatprep.subr.mxu1 %v8271_v53  ;;  %12138 = vmatprep.mubr.f32.mxu1 %v7381_v42  ;;  %v6077_v25 = vadd.f32 %v5854_v63, %v16511_v36 }
 0x505   : > { %v16762_v41 = vadd.f32 %v6252_v16, %v6073_v0  ;;  %12314 = vmatpush3.msra.mxu1 %v8271_v53  ;;  %v11724_v21 = vpop.f32.mrf.mxu1  ;;  %v19140_v16 = vld [vmem:[#allocation16_spill] sm:$0xff] }
 0x506   : > { %v11822_v1 = vpop.f32.mrf.mxu0  ;;  %12237 = vmatmul.mubr.f32.gmra.mxu0 %v19138_v40  ;;  %12315 = vmatprep.subr.mxu1 %v8270_v32  ;;  %v6080_v0 = vadd.f32 %v11724_v21, %v16515_v29  ;;  %v7385_v29 = vld [vmem:[#allocation2 + $0x80] sm:$0xff] }
 0x507   : > { %v16766_v46 = vadd.f32 %v11822_v1, %v6076_v12  ;;  %12239 = vmatprep.mubr.f32.mxu0 %v19139_v17  ;;  %12316 = vmatpush3.msra.mxu1 %v8270_v32  ;;  %v8267_v12 = vld [vmem:[#allocation8 + $0x438] sm:$0xff]  ;;  %v5864_v28 = vpop.f32.mrf.mxu1  ;;  %v7384_v1 = vld [vmem:[#allocation2 + $0x78] sm:$0xff] }
 0x508   : > { %v6262_v60 = vpop.f32.mrf.mxu0  ;;  %12139 = vmatmul.mubr.f32.gmra.mxu1 %v7382_v4  ;;  %12317 = vmatprep.subr.mxu1 %v8269_v30  ;;  %v19141_v32 = vld [vmem:[#allocation52_spill] sm:$0xff]  ;;  %v6079_v42 = vadd.f32 %v5864_v28, %v16523_v27 }
 0x509   : > { %v16770_v53 = vadd.f32 %v6262_v60, %v6075_v22  ;;  %12141 = vmatprep.mubr.f32.mxu1 %v7383_v61  ;;  %12318 = vmatpush3.msra.mxu1 %v8269_v30  ;;  %v8266_v22 = vld [vmem:[#allocation8 + $0x430] sm:$0xff]  ;;  %v11727_v63 = vpop.f32.mrf.mxu1  ;;  %v19142_v60 = vld [vmem:[#allocation50_spill] sm:$0xff] }
 0x50a   : > { %v11825_v2 = vpop.f32.mrf.mxu0  ;;  %12240 = vmatmul.mubr.f32.gmra.mxu0 %v19140_v16  ;;  %12319 = vmatprep.subr.mxu1 %v8268_v58  ;;  %v6082_v17 = vadd.f32 %v11727_v63, %v16527_v20  ;;  %v7387_v20 = vld [vmem:[#allocation2 + $0x90] sm:$0xff] }
 0x50b   : > { %v16774_v36 = vadd.f32 %v11825_v2, %v6078_v23  ;;  %12242 = vmatprep.mubr.f32.mxu0 %v19141_v32  ;;  %12320 = vmatpush3.msra.mxu1 %v8268_v58  ;;  %v8265_v23 = vld [vmem:[#allocation8 + $0x428] sm:$0xff]  ;;  %v5874_v21 = vpop.f32.mrf.mxu1  ;;  %v19143_v58 = vld [vmem:[#allocation85_spill] sm:$0xff]  ;;  %v7386_v2 = vld [vmem:[#allocation2 + $0x88] sm:$0xff] }
 0x50c   : > { %v6272_v40 = vpop.f32.mrf.mxu0  ;;  %12142 = vmatmul.mubr.f32.gmra.mxu1 %v7384_v1  ;;  %12321 = vmatprep.subr.mxu1 %v8267_v12  ;;  %v6081_v61 = vadd.f32 %v5874_v21, %v16536_v10 }
 0x50d   : > { %v16778_v30 = vadd.f32 %v6272_v40, %v6077_v25  ;;  %12144 = vmatprep.mubr.f32.mxu1 %v7385_v29  ;;  %12322 = vmatpush3.msra.mxu1 %v8267_v12  ;;  %v8264_v25 = vld [vmem:[#allocation8 + $0x420] sm:$0xff]  ;;  %v11730_v28 = vpop.f32.mrf.mxu1  ;;  %v19144_v40 = vld [vmem:[#allocation84_spill] sm:$0xff] }
 0x50e   : > { %v11828_v4 = vpop.f32.mrf.mxu0  ;;  %12243 = vmatmul.mubr.f32.gmra.mxu0 %v19142_v60  ;;  %12323 = vmatprep.subr.mxu1 %v8266_v22  ;;  %v6084_v32 = vadd.f32 %v11730_v28, %v16540_v26  ;;  %v7389_v26 = vld [vmem:[#allocation2 + $0xa0] sm:$0xff] }
 0x50f   : > { %v16782_v27 = vadd.f32 %v11828_v4, %v6080_v0  ;;  %12245 = vmatprep.mubr.f32.mxu0 %v19143_v58  ;;  %12324 = vmatpush3.msra.mxu1 %v8266_v22  ;;  %v8263_v0 = vld [vmem:[#allocation8 + $0x418] sm:$0xff]  ;;  %v5884_v63 = vpop.f32.mrf.mxu1  ;;  %v19145_v22 = vld [vmem:[#allocation29_spill] sm:$0xff] }
 0x510   : > { %v6282_v16 = vpop.f32.mrf.mxu0  ;;  %12145 = vmatmul.mubr.f32.gmra.mxu1 %v7386_v2  ;;  %12325 = vmatprep.subr.mxu1 %v8265_v23  ;;  %v6083_v29 = vadd.f32 %v5884_v63, %v16548_v62  ;;  %v7388_v4 = vld [vmem:[#allocation2 + $0x98] sm:$0xff] }
 0x511   : > { %v16786_v12 = vadd.f32 %v6282_v16, %v6079_v42  ;;  %12147 = vmatprep.mubr.f32.mxu1 %v7387_v20  ;;  %12326 = vmatpush3.msra.mxu1 %v8265_v23  ;;  %v8262_v42 = vld [vmem:[#allocation8 + $0x410] sm:$0xff]  ;;  %v11733_v21 = vpop.f32.mrf.mxu1  ;;  %v19146_v16 = vld [vmem:[#allocation26_spill] sm:$0xff] }
 0x512   : > { %v11831_v1 = vpop.f32.mrf.mxu0  ;;  %12246 = vmatmul.mubr.f32.gmra.mxu0 %v19144_v40  ;;  %12327 = vmatprep.subr.mxu1 %v8264_v25  ;;  %v6086_v58 = vadd.f32 %v11733_v21, %v16552_v57  ;;  %v7391_v57 = vld [vmem:[#allocation2 + $0xb0] sm:$0xff] }
 0x513   : > { %v16790_v10 = vadd.f32 %v11831_v1, %v6082_v17  ;;  %12248 = vmatprep.mubr.f32.mxu0 %v19145_v22  ;;  %12328 = vmatpush3.msra.mxu1 %v8264_v25  ;;  %v8261_v17 = vld [vmem:[#allocation8 + $0x408] sm:$0xff]  ;;  %v5894_v28 = vpop.f32.mrf.mxu1  ;;  %v19147_v25 = vld [vmem:[#allocation20_spill] sm:$0xff]  ;;  %v7390_v1 = vld [vmem:[#allocation2 + $0xa8] sm:$0xff] }
 0x514   : > { %v6292_v60 = vpop.f32.mrf.mxu0  ;;  %12148 = vmatmul.mubr.f32.gmra.mxu1 %v7388_v4  ;;  %12329 = vmatprep.subr.mxu1 %v8263_v0  ;;  %v6085_v20 = vadd.f32 %v5894_v28, %v16560_v9  ;;  %v19148_v4 = vld [vmem:[#allocation38_spill] sm:$0xff] }
 0x515   : > { %v16794_v23 = vadd.f32 %v6292_v60, %v6081_v61  ;;  %12150 = vmatprep.mubr.f32.mxu1 %v7389_v26  ;;  %12330 = vmatpush3.msra.mxu1 %v8263_v0  ;;  %v8260_v61 = vld [vmem:[#allocation8 + $0x400] sm:$0xff]  ;;  %v11736_v63 = vpop.f32.mrf.mxu1 }
 0x516   : > { %v11834_v2 = vpop.f32.mrf.mxu0  ;;  %12249 = vmatmul.mubr.f32.gmra.mxu0 %v19146_v16  ;;  %12331 = vmatprep.subr.mxu1 %v8262_v42  ;;  %v6088_v22 = vadd.f32 %v11736_v63, %v16564_v43  ;;  %v7392_v26 = vld [vmem:[#allocation2 + $0xb8] sm:$0xff]  ;;  %v7393_v16 = vld [vmem:[#allocation2 + $0xc0] sm:$0xff] }
 0x517   : > { %v16798_v62 = vadd.f32 %v11834_v2, %v6084_v32  ;;  %12251 = vmatprep.mubr.f32.mxu0 %v19147_v25  ;;  %12332 = vmatpush3.msra.mxu1 %v8262_v42  ;;  %v5904_v60 = vpop.f32.mrf.mxu1  ;;  %v19149_v42 = vld [vmem:[#allocation60_spill] sm:$0xff]  ;;  %v19150_v25 = vld [vmem:[#allocation31_spill] sm:$0xff] }
 0x518   : > { %v6302_v40 = vpop.f32.mrf.mxu0  ;;  %12151 = vmatmul.mubr.f32.gmra.mxu1 %v7390_v1  ;;  %12333 = vmatprep.subr.mxu1 %v8261_v17  ;;  %v6087_v21 = vadd.f32 %v5904_v60, %v16572_v59  ;;  %v19152_v60 = vld [vmem:[#allocation67_spill] sm:$0xff] }
 0x519   : > { %v16802_v0 = vadd.f32 %v6302_v40, %v6083_v29  ;;  %12153 = vmatprep.mubr.f32.mxu1 %v7391_v57  ;;  %12334 = vmatpush3.msra.mxu1 %v8261_v17  ;;  %v11739_v29 = vpop.f32.mrf.mxu1  ;;  %v19151_v40 = vld [vmem:[#allocation21_spill] sm:$0xff] }
 0x51a   : > { %v11837_v32 = vpop.f32.mrf.mxu0  ;;  %12252 = vmatmul.mubr.f32.gmra.mxu0 %v19148_v4  ;;  %12335 = vmatprep.subr.mxu1 %v8260_v61  ;;  %v6090_v17 = vadd.f32 %v11739_v29, %v16576_v37 }
 0x51b   : > { %v16806_v9 = vadd.f32 %v11837_v32, %v6086_v58  ;;  %12254 = vmatprep.mubr.f32.mxu0 %v19149_v42  ;;  %12336 = vmatpush3.msra.mxu1 %v8260_v61  ;;  %v5914_v58 = vpop.f32.mrf.mxu1  ;;  %v7394_v61 = vld [vmem:[#allocation2 + $0xc8] sm:$0xff]  ;;  %v7395_v32 = vld [vmem:[#allocation2 + $0xd0] sm:$0xff] }
 0x51c   : > { %v6312_v2 = vpop.f32.mrf.mxu0  ;;  %12154 = vmatmul.mubr.f32.gmra.mxu1 %v7392_v26  ;;  %v6089_v59 = vadd.f32 %v5914_v58, %v16584_v39  ;;  %v19153_v26 = vld [vmem:[#allocation86_spill] sm:$0xff]  ;;  %v19154_v58 = vld [vmem:[#allocation33_spill] sm:$0xff] }
 0x51d   : > { %v16810_v43 = vadd.f32 %v6312_v2, %v6085_v20  ;;  %12156 = vmatprep.mubr.f32.mxu1 %v7393_v16  ;;  %v11742_v57 = vpop.f32.mrf.mxu1  ;;  %v7396_v2 = vld [vmem:[#allocation2 + $0xd8] sm:$0xff] }
 0x51e   : > { %v11840_v28 = vpop.f32.mrf.mxu0  ;;  %12255 = vmatmul.mubr.f32.gmra.mxu0 %v19150_v25  ;;  %v6092_v37 = vadd.f32 %v11742_v57, %v16588_v15 }
 0x51f   : > { %v16814_v1 = vadd.f32 %v11840_v28, %v6088_v22  ;;  %12257 = vmatprep.mubr.f32.mxu0 %v19151_v40  ;;  %v5924_v42 = vpop.f32.mrf.mxu1  ;;  %v7397_v28 = vld [vmem:[#allocation2 + $0xe0] sm:$0xff] }
 0x520   : > { %v6322_v63 = vpop.f32.mrf.mxu0  ;;  %12157 = vmatmul.mubr.f32.gmra.mxu1 %v7394_v61  ;;  %v6091_v39 = vadd.f32 %v5924_v42, %v16596_v8  ;;  %v19155_v61 = vld [vmem:[#allocation73_spill] sm:$0xff]  ;;  %v19156_v42 = vld [vmem:[#allocation76_spill] sm:$0xff] }
 0x521   : > { %v16818_v20 = vadd.f32 %v6322_v63, %v6087_v21  ;;  %12159 = vmatprep.mubr.f32.mxu1 %v7395_v32  ;;  %v11745_v16 = vpop.f32.mrf.mxu1  ;;  %v7398_v63 = vld [vmem:[#allocation2 + $0xe8] sm:$0xff] }
 0x522   : > { %v11843_v4 = vpop.f32.mrf.mxu0  ;;  %12258 = vmatmul.mubr.f32.gmra.mxu0 %v19152_v60  ;;  %v6094_v15 = vadd.f32 %v11745_v16, %v16600_v47 }
 0x523   : > { %v16822_v22 = vadd.f32 %v11843_v4, %v6090_v17  ;;  %12260 = vmatprep.mubr.f32.mxu0 %v19153_v26  ;;  %v5934_v40 = vpop.f32.mrf.mxu1  ;;  %v7399_v4 = vld [vmem:[#allocation2 + $0xf0] sm:$0xff] }
 0x524   : > { %v6332_v29 = vpop.f32.mrf.mxu0  ;;  %12160 = vmatmul.mubr.f32.gmra.mxu1 %v7396_v2  ;;  %v6093_v8 = vadd.f32 %v5934_v40, %v16608_v48  ;;  %v19157_v2 = vld [vmem:[#allocation54_spill] sm:$0xff] }
 0x525   : > { %v16826_v21 = vadd.f32 %v6332_v29, %v6089_v59  ;;  %12162 = vmatprep.mubr.f32.mxu1 %v7397_v28  ;;  %v11748_v32 = vpop.f32.mrf.mxu1  ;;  %v7400_v29 = vld [vmem:[#allocation2 + $0xf8] sm:$0xff] }
 0x526   : > { %v11846_v25 = vpop.f32.mrf.mxu0  ;;  %12261 = vmatmul.mubr.f32.gmra.mxu0 %v19154_v58  ;;  %v6096_v47 = vadd.f32 %v11748_v32, %v16612_v11 }
 0x527   : > { %v16830_v17 = vadd.f32 %v11846_v25, %v6092_v37  ;;  %12263 = vmatprep.mubr.f32.mxu0 %v19155_v61  ;;  %v5944_v26 = vpop.f32.mrf.mxu1  ;;  %v7401_v25 = vld [vmem:[#allocation2 + $0x100] sm:$0xff]  ;;  %v19158_v61 = vld [vmem:[#allocation53_spill] sm:$0xff] }
 0x528   : > { %v6342_v57 = vpop.f32.mrf.mxu0  ;;  %12163 = vmatmul.mubr.f32.gmra.mxu1 %v7398_v63  ;;  %v6095_v48 = vadd.f32 %v5944_v26, %v16620_v33  ;;  %v7402_v63 = vld [vmem:[#allocation2 + $0x108] sm:$0xff] }
 0x529   : > { %v16834_v59 = vadd.f32 %v6342_v57, %v6091_v39  ;;  %12165 = vmatprep.mubr.f32.mxu1 %v7399_v4  ;;  %v11751_v28 = vpop.f32.mrf.mxu1  ;;  %v7403_v4 = vld [vmem:[#allocation2 + $0x110] sm:$0xff]  ;;  %v19160_v26 = vld [vmem:[#allocation59_spill] sm:$0xff] }
 0x52a   : > { %v11849_v60 = vpop.f32.mrf.mxu0  ;;  %12264 = vmatmul.mubr.f32.gmra.mxu0 %v19156_v42  ;;  %v6098_v11 = vadd.f32 %v11751_v28, %v16624_v13  ;;  %v19159_v42 = vld [vmem:[#allocation58_spill] sm:$0xff] }
 0x52b   : > { %v16838_v37 = vadd.f32 %v11849_v60, %v6094_v15  ;;  %12266 = vmatprep.mubr.f32.mxu0 %v19157_v2  ;;  %v5954_v40 = vpop.f32.mrf.mxu1  ;;  %v7404_v2 = vld [vmem:[#allocation2 + $0x118] sm:$0xff]  ;;  %v7405_v28 = vld [vmem:[#allocation2 + $0x120] sm:$0xff] }
 0x52c   : > { %v6352_v16 = vpop.f32.mrf.mxu0  ;;  %12166 = vmatmul.mubr.f32.gmra.mxu1 %v7400_v29  ;;  %v6097_v33 = vadd.f32 %v5954_v40, %v16634_v19 }
 0x52d   : > { %v16842_v39 = vadd.f32 %v6352_v16, %v6093_v8  ;;  %12168 = vmatprep.mubr.f32.mxu1 %v7401_v25  ;;  %v11754_v32 = vpop.f32.mrf.mxu1 }
 0x52e   : > { %v11852_v58 = vpop.f32.mrf.mxu0  ;;  %12267 = vmatmul.mubr.f32.gmra.mxu0 %v16606_v7  ;;  %v6100_v13 = vadd.f32 %v11754_v32, %v16639_v34 }
 0x52f   : > { %v16846_v15 = vadd.f32 %v11852_v58, %v6096_v47  ;;  %12269 = vmatprep.mubr.f32.mxu0 %v19158_v61  ;;  %v5964_v7 = vpop.f32.mrf.mxu1  ;;  %v19161_v58 = vld [vmem:[#allocation15_spill] sm:$0xff] }
 0x530   : > { %v6362_v57 = vpop.f32.mrf.mxu0  ;;  %12169 = vmatmul.mubr.f32.gmra.mxu1 %v7402_v63  ;;  %v6099_v19 = vadd.f32 %v5964_v7, %v16647_v6  ;;  %v19162_v61 = vld [vmem:[#allocation39_spill] sm:$0xff] }
 0x531   : > { %v16850_v8 = vadd.f32 %v6362_v57, %v6095_v48  ;;  %12171 = vmatprep.mubr.f32.mxu1 %v7403_v4  ;;  %v11757_v16 = vpop.f32.mrf.mxu1  ;;  %v7406_v63 = vld [vmem:[#allocation2 + $0x128] sm:$0xff]  ;;  %v7407_v4 = vld [vmem:[#allocation2 + $0x130] sm:$0xff] }
 0x532   : > { %v11855_v60 = vpop.f32.mrf.mxu0  ;;  %12270 = vmatmul.mubr.f32.gmra.mxu0 %v19159_v42  ;;  %v6102_v34 = vadd.f32 %v11757_v16, %v16651_v44  ;;  %v19163_v7 = vld [vmem:[#allocation23_spill] sm:$0xff]  ;;  %v7409_v16 = vld [vmem:[#allocation2 + $0x140] sm:$0xff] }
 0x533   : > { %v16854_v47 = vadd.f32 %v11855_v60, %v6098_v11  ;;  %12272 = vmatprep.mubr.f32.mxu0 %v19160_v26  ;;  %v5974_v40 = vpop.f32.mrf.mxu1  ;;  %v7408_v26 = vld [vmem:[#allocation2 + $0x138] sm:$0xff] }
 0x534   : > { %v6372_v29 = vpop.f32.mrf.mxu0  ;;  %12172 = vmatmul.mubr.f32.gmra.mxu1 %v7404_v2  ;;  %v6101_v6 = vadd.f32 %v5974_v40, %v16659_v5  ;;  %v7410_v40 = vld [vmem:[#allocation2 + $0x148] sm:$0xff] }
 0x535   : > { %v16858_v48 = vadd.f32 %v6372_v29, %v6097_v33  ;;  %12174 = vmatprep.mubr.f32.mxu1 %v7405_v28  ;;  %v11760_v32 = vpop.f32.mrf.mxu1 }
 0x536   : > { %v11858_v25 = vpop.f32.mrf.mxu0  ;;  %12273 = vmatmul.mubr.f32.gmra.mxu0 %v19161_v58  ;;  %v6104_v44 = vadd.f32 %v11760_v32, %v16663_v35  ;;  %v19165_v58 = vld [vmem:[#allocation88_spill] sm:$0xff] }
 0x537   : > { %v16862_v11 = vadd.f32 %v11858_v25, %v6100_v13  ;;  %12275 = vmatprep.mubr.f32.mxu0 %v19162_v61  ;;  %v5984_v42 = vpop.f32.mrf.mxu1  ;;  %v19164_v25 = vld [vmem:[#allocation87_spill] sm:$0xff] }
 0x538   : > { %v6382_v57 = vpop.f32.mrf.mxu0  ;;  %12175 = vmatmul.mubr.f32.gmra.mxu1 %v7406_v63  ;;  %v6103_v5 = vadd.f32 %v5984_v42, %v16671_v56  ;;  %v19167_v42 = vld [vmem:[#allocation90_spill] sm:$0xff] }
 0x539   : > { %v16866_v33 = vadd.f32 %v6382_v57, %v6099_v19  ;;  %12177 = vmatprep.mubr.f32.mxu1 %v7407_v4  ;;  %v11763_v29 = vpop.f32.mrf.mxu1  ;;  %v7411_v57 = vld [vmem:[#allocation2 + $0x150] sm:$0xff]  ;;  %v19166_v4 = vld [vmem:[#allocation89_spill] sm:$0xff] }
 0x53a   : > { %v11861_v60 = vpop.f32.mrf.mxu0  ;;  %12276 = vmatmul.mubr.f32.gmra.mxu0 %v16645_v45  ;;  %v6106_v35 = vadd.f32 %v11763_v29, %v16675_v14  ;;  %v7413_v29 = vld [vmem:[#allocation2 + $0x160] sm:$0xff] }
 0x53b   : > { %v16870_v13 = vadd.f32 %v11861_v60, %v6102_v34  ;;  %12278 = vmatprep.mubr.f32.mxu0 %v19163_v7  ;;  %v5994_v45 = vpop.f32.mrf.mxu1  ;;  %v7412_v7 = vld [vmem:[#allocation2 + $0x158] sm:$0xff] }
 0x53c   : > { %v6392_v2 = vpop.f32.mrf.mxu0  ;;  %12178 = vmatmul.mubr.f32.gmra.mxu1 %v7408_v26  ;;  %v6105_v56 = vadd.f32 %v5994_v45, %v16683_v3  ;;  %v19169_v45 = vld [vmem:[#allocation92_spill] sm:$0xff] }
 0x53d   : > { %v16874_v19 = vadd.f32 %v6392_v2, %v6101_v6  ;;  %12180 = vmatprep.mubr.f32.mxu1 %v7409_v16  ;;  %v11766_v63 = vpop.f32.mrf.mxu1 }
 0x53e   : > { %v11864_v28 = vpop.f32.mrf.mxu0  ;;  %12279 = vmatmul.mubr.f32.gmra.mxu0 %v19164_v25  ;;  %v6108_v14 = vadd.f32 %v11766_v63, %v16687_v55  ;;  %v7415_v63 = vld [vmem:[#allocation2 + $0x170] sm:$0xff] }
 0x53f   : > { %v16878_v34 = vadd.f32 %v11864_v28, %v6104_v44  ;;  %12281 = vmatprep.mubr.f32.mxu0 %v19165_v58  ;;  %v6004_v60 = vpop.f32.mrf.mxu1  ;;  %v19168_v28 = vld [vmem:[#allocation91_spill] sm:$0xff] }
 0x540   : > { %v6402_v61 = vpop.f32.mrf.mxu0  ;;  %12181 = vmatmul.mubr.f32.gmra.mxu1 %v7410_v40  ;;  %v6107_v3 = vadd.f32 %v6004_v60, %v16695_v54  ;;  %v7414_v58 = vld [vmem:[#allocation2 + $0x168] sm:$0xff] }
 0x541   : > { %v16882_v6 = vadd.f32 %v6402_v61, %v6103_v5  ;;  %12183 = vmatprep.mubr.f32.mxu1 %v7411_v57  ;;  %v11769_v2 = vpop.f32.mrf.mxu1  ;;  %v19170_v57 = vld [vmem:[#allocation96_spill] sm:$0xff] }
 0x542   : > { %v11867_v32 = vpop.f32.mrf.mxu0  ;;  %12282 = vmatmul.mubr.f32.gmra.mxu0 %v19166_v4  ;;  %v6110_v55 = vadd.f32 %v11769_v2, %v16699_v18  ;;  %v19171_v4 = vld [vmem:[#allocation93_spill] sm:$0xff] }
 0x543   : > { %v16886_v44 = vadd.f32 %v11867_v32, %v6106_v35  ;;  %12284 = vmatprep.mubr.f32.mxu0 %v19167_v42  ;;  %v6014_v25 = vpop.f32.mrf.mxu1  ;;  %v19172_v42 = vld [vmem:[#allocation94_spill] sm:$0xff] }
 0x544   : > { %v6412_v26 = vpop.f32.mrf.mxu0  ;;  %12184 = vmatmul.mubr.f32.gmra.mxu1 %v7412_v7  ;;  %v6109_v54 = vadd.f32 %v6014_v25, %v16707_v50  ;;  %v19173_v7 = vld [vmem:[#allocation99_spill] sm:$0xff] }
 0x545   : > { %v16890_v5 = vadd.f32 %v6412_v26, %v6105_v56  ;;  %12186 = vmatprep.mubr.f32.mxu1 %v7413_v29  ;;  %v11772_v61 = vpop.f32.mrf.mxu1  ;;  %v7416_v26 = vld [vmem:[#allocation2 + $0x178] sm:$0xff] }
 0x546   : > { %v11870_v16 = vpop.f32.mrf.mxu0  ;;  %12285 = vmatmul.mubr.f32.gmra.mxu0 %v19168_v28  ;;  %v6112_v18 = vadd.f32 %v11772_v61, %v19170_v57  ;;  %v19174_v28 = vld [vmem:[#allocation100_spill] sm:$0xff]  ;;  %v19176_v61 = vld [vmem:[#allocation97_spill] sm:$0xff] }
 0x547   : > { %v16894_v35 = vadd.f32 %v11870_v16, %v6108_v14  ;;  %12287 = vmatprep.mubr.f32.mxu0 %v19169_v45  ;;  %v6024_v60 = vpop.f32.mrf.mxu1  ;;  %v7417_v16 = vld [vmem:[#allocation2 + $0x180] sm:$0xff] }
 0x548   : > { %v6422_v40 = vpop.f32.mrf.mxu0  ;;  %12187 = vmatmul.mubr.f32.gmra.mxu1 %v7414_v58  ;;  %v6111_v50 = vadd.f32 %v6024_v60, %v19173_v7  ;;  %v19175_v58 = vld [vmem:[#allocation95_spill] sm:$0xff]  ;;  %v19178_v7 = vld [vmem:[#allocation104_spill] sm:$0xff] }
 0x549   : > { %v16898_v56 = vadd.f32 %v6422_v40, %v6107_v3  ;;  %12189 = vmatprep.mubr.f32.mxu1 %v7415_v63  ;;  %v11775_v29 = vpop.f32.mrf.mxu1  ;;  %v19177_v63 = vld [vmem:[#allocation103_spill] sm:$0xff] }
 0x54a   : > { %v11873_v32 = vpop.f32.mrf.mxu0  ;;  %12288 = vmatmul.mubr.f32.gmra.mxu0 %v19171_v4  ;;  %v6114_v25 = vadd.f32 %v11775_v29, %v19174_v28  ;;  %v19179_v29 = vld [vmem:[#allocation98_spill] sm:$0xff] }
 0x54b   : > { %v16902_v14 = vadd.f32 %v11873_v32, %v6110_v55  ;;  %12290 = vmatprep.mubr.f32.mxu0 %v19172_v42  ;;  %v6034_v40 = vpop.f32.mrf.mxu1  ;;  %v7418_v32 = vld [vmem:[#allocation2 + $0x188] sm:$0xff]  ;;  %v7419_v42 = vld [vmem:[#allocation2 + $0x190] sm:$0xff] }
 0x54c   : > { %v6432_v2 = vpop.f32.mrf.mxu0  ;;  %12190 = vmatmul.mubr.f32.gmra.mxu1 %v7416_v26  ;;  %v6113_v57 = vadd.f32 %v6034_v40, %v19177_v63  ;;  %v7420_v40 = vld [vmem:[#allocation2 + $0x198] sm:$0xff] }
 0x54d   : > { %v16906_v3 = vadd.f32 %v6432_v2, %v6109_v54  ;;  %12192 = vmatprep.mubr.f32.mxu1 %v7417_v16  ;;  %v11778_v60 = vpop.f32.mrf.mxu1 }
 0x54e   : > { %v11876_v45 = vpop.f32.mrf.mxu0  ;;  %12291 = vmatmul.mubr.f32.gmra.mxu0 %v19175_v58  ;;  %v6116_v26 = vadd.f32 %v11778_v60, %v19178_v7 }
 0x54f   : > { %v16910_v55 = vadd.f32 %v11876_v45, %v6112_v18  ;;  %12293 = vmatprep.mubr.f32.mxu0 %v19176_v61  ;;  %v6044_v16 = vpop.f32.mrf.mxu1  ;;  %v7421_v18 = vld [vmem:[#allocation2 + $0x1a0] sm:$0xff]  ;;  %v19180_v45 = vld [vmem:[#allocation101_spill] sm:$0xff] }
 0x550   : > { %v6442_v4 = vpop.f32.mrf.mxu0  ;;  %12193 = vmatmul.mubr.f32.gmra.mxu1 %v7418_v32  ;;  %v6115_v58 = vadd.f32 %v6044_v16, %v16741_v51 }
 0x551   : > { %v16914_v54 = vadd.f32 %v6442_v4, %v6111_v50  ;;  %12195 = vmatprep.mubr.f32.mxu1 %v7419_v42  ;;  %v11781_v63 = vpop.f32.mrf.mxu1  ;;  %v7422_v4 = vld [vmem:[#allocation2 + $0x1a8] sm:$0xff]  ;;  %v19181_v42 = vld [vmem:[#allocation102_spill] sm:$0xff] }
 0x552   : > { %v11879_v2 = vpop.f32.mrf.mxu0  ;;  %12294 = vmatmul.mubr.f32.gmra.mxu0 %v19179_v29  ;;  %v6118_v32 = vadd.f32 %v11781_v63, %v16743_v38 }
 0x553   : > { %v16918_v28 = vadd.f32 %v11879_v2, %v6114_v25  ;;  %12296 = vmatprep.mubr.f32.mxu0 %v19180_v45  ;;  %v6054_v7 = vpop.f32.mrf.mxu1  ;;  %v19182_v2 = vld [vmem:[#allocation105_spill] sm:$0xff] }
 0x554   : > { %v6452_v61 = vpop.f32.mrf.mxu0  ;;  %12196 = vmatmul.mubr.f32.gmra.mxu1 %v7420_v40  ;;  %v6117_v51 = vadd.f32 %v6054_v7, %v16745_v31  ;;  %v8211_v45 = vld [vmem:[#allocation2 + $0x32] sm:$0xff] }
 0x555   : > { %v16922_v50 = vadd.f32 %v6452_v61, %v6113_v57  ;;  %12198 = vmatprep.mubr.f32.mxu1 %v7421_v18  ;;  %v11784_v16 = vpop.f32.mrf.mxu1  ;;  %v12493_v40 = vld [vmem:[#allocation2 + $0x1b9] sm:$0xff] }
 0x556   : > { %v11882_v60 = vpop.f32.mrf.mxu0  ;;  %12297 = vmatmul.mubr.f32.gmra.mxu0 %v19181_v42  ;;  %v6120_v38 = vadd.f32 %v11784_v16, %v16749_v52  ;;  %v8214_v16 = vld [vmem:[#allocation2 + $0x4a] sm:$0xff] }
 0x557   : > { %v16926_v25 = vadd.f32 %v11882_v60, %v6116_v26  ;;  %12299 = vmatprep.mubr.f32.mxu0 %v19182_v2  ;;  %v6064_v61 = vpop.f32.mrf.mxu1  ;;  %v8212_v60 = vld [vmem:[#allocation2 + $0x3a] sm:$0xff] }
 0x558   : > { %v6462_v29 = vpop.f32.mrf.mxu0  ;;  %12199 = vmatmul.mubr.f32.gmra.mxu1 %v7422_v4  ;;  %v6119_v26 = vadd.f32 %v6064_v61, %v16754_v24  ;;  %v8213_v4 = vld [vmem:[#allocation2 + $0x42] sm:$0xff] }
 0x559   : > { %v16930_v57 = vadd.f32 %v6462_v29, %v6115_v58  ;;  %12337 = vmatprep.mubr.f32.mxu1 %v8211_v45  ;;  %v11923_v42 = vpop.f32.mrf.mxu1 }
 0x55a   : > { %v11885_v18 = vpop.f32.mrf.mxu0  ;;  %12300 = vmatmul.mubr.f32.gmra.mxu0 %v12493_v40  ;;  %v6910_v58 = vadd.f32 %v11923_v42, %v16758_v49 }
 0x55b   : > { %v16933_v63 = vadd.f32 %v11885_v18, %v6118_v32  ;;  %12302 = vmatprep.mubr.f32.mxu0 %v12493_v40  ;;  %v6670_v2 = vpop.f32.mrf.mxu1  ;;  %v8215_v18 = vld [vmem:[#allocation2 + $0x52] sm:$0xff] }
 0x55c   : > { %v6472_v31 = vpop.f32.mrf.mxu0  ;;  %12338 = vmatmul.mubr.f32.vlgmr.msra.gmra.mxu1 %v8212_v60  ;;  %v6909_v32 = vadd.f32 %v6670_v2, %v16762_v41  ;;  %v8217_v41 = vld [vmem:[#allocation2 + $0x62] sm:$0xff] }
 0x55d   : > { %v16936_v7 = vadd.f32 %v6472_v31, %v6117_v51  ;;  %12340 = vmatprep.mubr.f32.mxu1 %v8213_v4  ;;  %v11926_v24 = vpop.f32.mrf.mxu1 }
 0x55e   : > { %v11888_v52 = vpop.f32.mrf.mxu0  ;;  %12303 = vmatmul.mubr.f32.gmra.mxu0 %v12493_v40  ;;  %v6912_v51 = vadd.f32 %v11926_v24, %v16766_v46 }
 0x55f   : > { %v16939_v29 = vadd.f32 %v11888_v52, %v6120_v38  ;;  %v6680_v49 = vpop.f32.mrf.mxu1  ;;  %v8216_v38 = vld [vmem:[#allocation2 + $0x5a] sm:$0xff] }
 0x560   : > { %v6482_v45 = vpop.f32.mrf.mxu0  ;;  %12341 = vmatmul.mubr.f32.gmra.mxu1 %v8214_v16  ;;  %v6911_v40 = vadd.f32 %v6680_v49, %v16770_v53  ;;  %v8219_v53 = vld [vmem:[#allocation2 + $0x72] sm:$0xff] }
 0x561   : > { %v16942_v61 = vadd.f32 %v6482_v45, %v6119_v26  ;;  %12343 = vmatprep.mubr.f32.mxu1 %v8215_v18  ;;  %v11929_v4 = vpop.f32.mrf.mxu1 }
 0x562   : > { %v12027_v60 = vpop.f32.mrf.mxu0  ;;  %v6914_v2 = vadd.f32 %v11929_v4, %v16774_v36 }
 0x563   : > { %v16945_v31 = vadd.f32 %v12027_v60, %v6910_v58  ;;  %v6690_v16 = vpop.f32.mrf.mxu1  ;;  %v8218_v58 = vld [vmem:[#allocation2 + $0x6a] sm:$0xff] }
 0x564   : > { %v7088_v42 = vpop.f32.mrf.mxu0  ;;  %12344 = vmatmul.mubr.f32.gmra.mxu1 %v8216_v38  ;;  %v6913_v45 = vadd.f32 %v6690_v16, %v16778_v30  ;;  %v8221_v30 = vld [vmem:[#allocation2 + $0x82] sm:$0xff] }
 0x565   : > { %v16948_v52 = vadd.f32 %v7088_v42, %v6909_v32  ;;  %12346 = vmatprep.mubr.f32.mxu1 %v8217_v41  ;;  %v11932_v18 = vpop.f32.mrf.mxu1 }
 0x566   : > { %v12030_v26 = vpop.f32.mrf.mxu0  ;;  %v6916_v49 = vadd.f32 %v11932_v18, %v16782_v27 }
 0x567   : > { %v16951_v46 = vadd.f32 %v12030_v26, %v6912_v51  ;;  %v6700_v38 = vpop.f32.mrf.mxu1  ;;  %v8220_v51 = vld [vmem:[#allocation2 + $0x7a] sm:$0xff] }
 0x568   : > { %v7098_v24 = vpop.f32.mrf.mxu0  ;;  %12347 = vmatmul.mubr.f32.gmra.mxu1 %v8218_v58  ;;  %v6915_v42 = vadd.f32 %v6700_v38, %v16786_v12  ;;  %v8223_v12 = vld [vmem:[#allocation2 + $0x92] sm:$0xff] }
 0x569   : > { %v16954_v60 = vadd.f32 %v7098_v24, %v6911_v40  ;;  %12349 = vmatprep.mubr.f32.mxu1 %v8219_v53  ;;  %v11935_v41 = vpop.f32.mrf.mxu1 }
 0x56a   : > { %v12033_v32 = vpop.f32.mrf.mxu0  ;;  %v6918_v16 = vadd.f32 %v11935_v41, %v16790_v10 }
 0x56b   : > { %v16957_v36 = vadd.f32 %v12033_v32, %v6914_v2  ;;  %v6710_v58 = vpop.f32.mrf.mxu1  ;;  %v8222_v2 = vld [vmem:[#allocation2 + $0x8a] sm:$0xff] }
 0x56c   : > { %v7108_v4 = vpop.f32.mrf.mxu0  ;;  %12350 = vmatmul.mubr.f32.gmra.mxu1 %v8220_v51  ;;  %v6917_v24 = vadd.f32 %v6710_v58, %v16794_v23  ;;  %v8225_v23 = vld [vmem:[#allocation2 + $0xa2] sm:$0xff] }
 0x56d   : > { %v16960_v26 = vadd.f32 %v7108_v4, %v6913_v45  ;;  %12352 = vmatprep.mubr.f32.mxu1 %v8221_v30  ;;  %v11938_v53 = vpop.f32.mrf.mxu1 }
 0x56e   : > { %v12036_v40 = vpop.f32.mrf.mxu0  ;;  %v6920_v38 = vadd.f32 %v11938_v53, %v16798_v62 }
 0x56f   : > { %v16963_v27 = vadd.f32 %v12036_v40, %v6916_v49  ;;  %v6720_v51 = vpop.f32.mrf.mxu1  ;;  %v8224_v49 = vld [vmem:[#allocation2 + $0x9a] sm:$0xff] }
 0x570   : > { %v7118_v18 = vpop.f32.mrf.mxu0  ;;  %12353 = vmatmul.mubr.f32.gmra.mxu1 %v8222_v2  ;;  %v6919_v4 = vadd.f32 %v6720_v51, %v16802_v0  ;;  %v8227_v0 = vld [vmem:[#allocation2 + $0xb2] sm:$0xff] }
 0x571   : > { %v16966_v32 = vadd.f32 %v7118_v18, %v6915_v42  ;;  %12355 = vmatprep.mubr.f32.mxu1 %v8223_v12  ;;  %v11941_v30 = vpop.f32.mrf.mxu1 }
 0x572   : > { %v12039_v45 = vpop.f32.mrf.mxu0  ;;  %v6922_v58 = vadd.f32 %v11941_v30, %v16806_v9 }
 0x573   : > { %v16969_v10 = vadd.f32 %v12039_v45, %v6918_v16  ;;  %v6730_v2 = vpop.f32.mrf.mxu1  ;;  %v8226_v16 = vld [vmem:[#allocation2 + $0xaa] sm:$0xff] }
 0x574   : > { %v7128_v41 = vpop.f32.mrf.mxu0  ;;  %12356 = vmatmul.mubr.f32.gmra.mxu1 %v8224_v49  ;;  %v6921_v18 = vadd.f32 %v6730_v2, %v16810_v43  ;;  %v8229_v43 = vld [vmem:[#allocation2 + $0xc2] sm:$0xff] }
 0x575   : > { %v16972_v40 = vadd.f32 %v7128_v41, %v6917_v24  ;;  %12358 = vmatprep.mubr.f32.mxu1 %v8225_v23  ;;  %v11944_v12 = vpop.f32.mrf.mxu1 }
 0x576   : > { %v12042_v42 = vpop.f32.mrf.mxu0  ;;  %v6924_v51 = vadd.f32 %v11944_v12, %v16814_v1 }
 0x577   : > { %v16975_v62 = vadd.f32 %v12042_v42, %v6920_v38  ;;  %v6740_v49 = vpop.f32.mrf.mxu1  ;;  %v8228_v38 = vld [vmem:[#allocation2 + $0xba] sm:$0xff] }
 0x578   : > { %v7138_v53 = vpop.f32.mrf.mxu0  ;;  %12359 = vmatmul.mubr.f32.gmra.mxu1 %v8226_v16  ;;  %v6923_v41 = vadd.f32 %v6740_v49, %v16818_v20  ;;  %v8231_v20 = vld [vmem:[#allocation2 + $0xd2] sm:$0xff] }
 0x579   : > { %v16978_v45 = vadd.f32 %v7138_v53, %v6919_v4  ;;  %12361 = vmatprep.mubr.f32.mxu1 %v8227_v0  ;;  %v11947_v23 = vpop.f32.mrf.mxu1 }
 0x57a   : > { %v12045_v24 = vpop.f32.mrf.mxu0  ;;  %v6926_v2 = vadd.f32 %v11947_v23, %v16822_v22 }
 0x57b   : > { %v16981_v9 = vadd.f32 %v12045_v24, %v6922_v58  ;;  %v6750_v16 = vpop.f32.mrf.mxu1  ;;  %v8230_v58 = vld [vmem:[#allocation2 + $0xca] sm:$0xff] }
 0x57c   : > { %v7148_v30 = vpop.f32.mrf.mxu0  ;;  %12362 = vmatmul.mubr.f32.gmra.mxu1 %v8228_v38  ;;  %v6925_v53 = vadd.f32 %v6750_v16, %v16826_v21  ;;  %v8233_v21 = vld [vmem:[#allocation2 + $0xe2] sm:$0xff] }
 0x57d   : > { %v16984_v42 = vadd.f32 %v7148_v30, %v6921_v18  ;;  %12364 = vmatprep.mubr.f32.mxu1 %v8229_v43  ;;  %v11950_v0 = vpop.f32.mrf.mxu1 }
 0x57e   : > { %v12048_v4 = vpop.f32.mrf.mxu0  ;;  %v6928_v49 = vadd.f32 %v11950_v0, %v16830_v17 }
 0x57f   : > { %v16987_v1 = vadd.f32 %v12048_v4, %v6924_v51  ;;  %v6760_v38 = vpop.f32.mrf.mxu1  ;;  %v8232_v51 = vld [vmem:[#allocation2 + $0xda] sm:$0xff] }
 0x580   : > { %v7158_v12 = vpop.f32.mrf.mxu0  ;;  %12365 = vmatmul.mubr.f32.gmra.mxu1 %v8230_v58  ;;  %v6927_v30 = vadd.f32 %v6760_v38, %v16834_v59  ;;  %v8235_v59 = vld [vmem:[#allocation2 + $0xf2] sm:$0xff] }
 0x581   : > { %v16990_v24 = vadd.f32 %v7158_v12, %v6923_v41  ;;  %12367 = vmatprep.mubr.f32.mxu1 %v8231_v20  ;;  %v11953_v43 = vpop.f32.mrf.mxu1 }
 0x582   : > { %v12051_v18 = vpop.f32.mrf.mxu0  ;;  %v6930_v16 = vadd.f32 %v11953_v43, %v16838_v37 }
 0x583   : > { %v16993_v22 = vadd.f32 %v12051_v18, %v6926_v2  ;;  %v6770_v58 = vpop.f32.mrf.mxu1  ;;  %v8234_v2 = vld [vmem:[#allocation2 + $0xea] sm:$0xff] }
 0x584   : > { %v7168_v23 = vpop.f32.mrf.mxu0  ;;  %12368 = vmatmul.mubr.f32.gmra.mxu1 %v8232_v51  ;;  %v6929_v12 = vadd.f32 %v6770_v58, %v16842_v39  ;;  %v8237_v39 = vld [vmem:[#allocation2 + $0x102] sm:$0xff] }
 0x585   : > { %v16996_v4 = vadd.f32 %v7168_v23, %v6925_v53  ;;  %12370 = vmatprep.mubr.f32.mxu1 %v8233_v21  ;;  %v11956_v20 = vpop.f32.mrf.mxu1 }
 0x586   : > { %v12054_v41 = vpop.f32.mrf.mxu0  ;;  %v6932_v38 = vadd.f32 %v11956_v20, %v16846_v15 }
 0x587   : > { %v16999_v17 = vadd.f32 %v12054_v41, %v6928_v49  ;;  %v6780_v51 = vpop.f32.mrf.mxu1  ;;  %v8236_v49 = vld [vmem:[#allocation2 + $0xfa] sm:$0xff] }
 0x588   : > { %v7178_v0 = vpop.f32.mrf.mxu0  ;;  %12371 = vmatmul.mubr.f32.gmra.mxu1 %v8234_v2  ;;  %v6931_v23 = vadd.f32 %v6780_v51, %v16850_v8  ;;  %v8239_v8 = vld [vmem:[#allocation2 + $0x112] sm:$0xff] }
 0x589   : > { %v17002_v18 = vadd.f32 %v7178_v0, %v6927_v30  ;;  %12373 = vmatprep.mubr.f32.mxu1 %v8235_v59  ;;  %v11959_v21 = vpop.f32.mrf.mxu1 }
 0x58a   : > { %v12057_v53 = vpop.f32.mrf.mxu0  ;;  %v6934_v58 = vadd.f32 %v11959_v21, %v16854_v47 }
 0x58b   : > { %v17005_v37 = vadd.f32 %v12057_v53, %v6930_v16  ;;  %v6790_v2 = vpop.f32.mrf.mxu1  ;;  %v8238_v16 = vld [vmem:[#allocation2 + $0x10a] sm:$0xff] }
 0x58c   : > { %v7188_v43 = vpop.f32.mrf.mxu0  ;;  %12374 = vmatmul.mubr.f32.gmra.mxu1 %v8236_v49  ;;  %v6933_v0 = vadd.f32 %v6790_v2, %v16858_v48  ;;  %v8241_v48 = vld [vmem:[#allocation2 + $0x122] sm:$0xff] }
 0x58d   : > { %v17008_v41 = vadd.f32 %v7188_v43, %v6929_v12  ;;  %12376 = vmatprep.mubr.f32.mxu1 %v8237_v39  ;;  %v11962_v59 = vpop.f32.mrf.mxu1 }
 0x58e   : > { %v12060_v30 = vpop.f32.mrf.mxu0  ;;  %v6936_v51 = vadd.f32 %v11962_v59, %v16862_v11 }
 0x58f   : > { %v17011_v15 = vadd.f32 %v12060_v30, %v6932_v38  ;;  %v6800_v49 = vpop.f32.mrf.mxu1  ;;  %v8240_v38 = vld [vmem:[#allocation2 + $0x11a] sm:$0xff] }
 0x590   : > { %v7198_v20 = vpop.f32.mrf.mxu0  ;;  %12377 = vmatmul.mubr.f32.gmra.mxu1 %v8238_v16  ;;  %v6935_v43 = vadd.f32 %v6800_v49, %v16866_v33  ;;  %v8243_v33 = vld [vmem:[#allocation2 + $0x132] sm:$0xff] }
 0x591   : > { %v17014_v53 = vadd.f32 %v7198_v20, %v6931_v23  ;;  %12379 = vmatprep.mubr.f32.mxu1 %v8239_v8  ;;  %v11965_v39 = vpop.f32.mrf.mxu1 }
 0x592   : > { %v12063_v12 = vpop.f32.mrf.mxu0  ;;  %v6938_v2 = vadd.f32 %v11965_v39, %v16870_v13 }
 0x593   : > { %v17017_v47 = vadd.f32 %v12063_v12, %v6934_v58  ;;  %v6810_v16 = vpop.f32.mrf.mxu1  ;;  %v8242_v58 = vld [vmem:[#allocation2 + $0x12a] sm:$0xff] }
 0x594   : > { %v7208_v21 = vpop.f32.mrf.mxu0  ;;  %12380 = vmatmul.mubr.f32.gmra.mxu1 %v8240_v38  ;;  %v6937_v20 = vadd.f32 %v6810_v16, %v16874_v19  ;;  %v8245_v19 = vld [vmem:[#allocation2 + $0x142] sm:$0xff] }
 0x595   : > { %v17020_v30 = vadd.f32 %v7208_v21, %v6933_v0  ;;  %12382 = vmatprep.mubr.f32.mxu1 %v8241_v48  ;;  %v11968_v8 = vpop.f32.mrf.mxu1 }
 0x596   : > { %v12066_v23 = vpop.f32.mrf.mxu0  ;;  %v6940_v49 = vadd.f32 %v11968_v8, %v16878_v34 }
 0x597   : > { %v17023_v11 = vadd.f32 %v12066_v23, %v6936_v51  ;;  %v6820_v38 = vpop.f32.mrf.mxu1  ;;  %v8244_v51 = vld [vmem:[#allocation2 + $0x13a] sm:$0xff] }
 0x598   : > { %v7218_v59 = vpop.f32.mrf.mxu0  ;;  %12383 = vmatmul.mubr.f32.gmra.mxu1 %v8242_v58  ;;  %v6939_v21 = vadd.f32 %v6820_v38, %v16882_v6  ;;  %v8247_v6 = vld [vmem:[#allocation2 + $0x152] sm:$0xff] }
 0x599   : > { %v17026_v12 = vadd.f32 %v7218_v59, %v6935_v43  ;;  %12385 = vmatprep.mubr.f32.mxu1 %v8243_v33  ;;  %v11971_v48 = vpop.f32.mrf.mxu1 }
 0x59a   : > { %v12069_v0 = vpop.f32.mrf.mxu0  ;;  %v6942_v16 = vadd.f32 %v11971_v48, %v16886_v44 }
 0x59b   : > { %v17029_v13 = vadd.f32 %v12069_v0, %v6938_v2  ;;  %v6830_v58 = vpop.f32.mrf.mxu1  ;;  %v8246_v2 = vld [vmem:[#allocation2 + $0x14a] sm:$0xff] }
 0x59c   : > { %v7228_v39 = vpop.f32.mrf.mxu0  ;;  %12386 = vmatmul.mubr.f32.gmra.mxu1 %v8244_v51  ;;  %v6941_v59 = vadd.f32 %v6830_v58, %v16890_v5  ;;  %v8249_v5 = vld [vmem:[#allocation2 + $0x162] sm:$0xff] }
 0x59d   : > { %v17032_v23 = vadd.f32 %v7228_v39, %v6937_v20  ;;  %12388 = vmatprep.mubr.f32.mxu1 %v8245_v19  ;;  %v11974_v33 = vpop.f32.mrf.mxu1 }
 0x59e   : > { %v12072_v43 = vpop.f32.mrf.mxu0  ;;  %v6944_v38 = vadd.f32 %v11974_v33, %v16894_v35 }
 0x59f   : > { %v17035_v34 = vadd.f32 %v12072_v43, %v6940_v49  ;;  %v6840_v51 = vpop.f32.mrf.mxu1  ;;  %v8248_v49 = vld [vmem:[#allocation2 + $0x15a] sm:$0xff] }
 0x5a0   : > { %v7238_v8 = vpop.f32.mrf.mxu0  ;;  %12389 = vmatmul.mubr.f32.gmra.mxu1 %v8246_v2  ;;  %v6943_v39 = vadd.f32 %v6840_v51, %v16898_v56  ;;  %v8251_v56 = vld [vmem:[#allocation2 + $0x172] sm:$0xff] }
 0x5a1   : > { %v17038_v0 = vadd.f32 %v7238_v8, %v6939_v21  ;;  %12391 = vmatprep.mubr.f32.mxu1 %v8247_v6  ;;  %v11977_v19 = vpop.f32.mrf.mxu1 }
 0x5a2   : > { %v12075_v20 = vpop.f32.mrf.mxu0  ;;  %v6946_v58 = vadd.f32 %v11977_v19, %v16902_v14 }
 0x5a3   : > { %v17041_v44 = vadd.f32 %v12075_v20, %v6942_v16  ;;  %v6850_v2 = vpop.f32.mrf.mxu1  ;;  %v8250_v16 = vld [vmem:[#allocation2 + $0x16a] sm:$0xff] }
 0x5a4   : > { %v7248_v48 = vpop.f32.mrf.mxu0  ;;  %12392 = vmatmul.mubr.f32.gmra.mxu1 %v8248_v49  ;;  %v6945_v8 = vadd.f32 %v6850_v2, %v16906_v3  ;;  %v8253_v3 = vld [vmem:[#allocation2 + $0x182] sm:$0xff] }
 0x5a5   : > { %v17044_v43 = vadd.f32 %v7248_v48, %v6941_v59  ;;  %12394 = vmatprep.mubr.f32.mxu1 %v8249_v5  ;;  %v11980_v6 = vpop.f32.mrf.mxu1 }
 0x5a6   : > { %v12078_v21 = vpop.f32.mrf.mxu0  ;;  %v6948_v51 = vadd.f32 %v11980_v6, %v16910_v55 }
 0x5a7   : > { %v17047_v35 = vadd.f32 %v12078_v21, %v6944_v38  ;;  %v6860_v49 = vpop.f32.mrf.mxu1  ;;  %v8252_v38 = vld [vmem:[#allocation2 + $0x17a] sm:$0xff] }
 0x5a8   : > { %v7258_v33 = vpop.f32.mrf.mxu0  ;;  %12395 = vmatmul.mubr.f32.gmra.mxu1 %v8250_v16  ;;  %v6947_v48 = vadd.f32 %v6860_v49, %v16914_v54  ;;  %v8255_v54 = vld [vmem:[#allocation2 + $0x192] sm:$0xff] }
 0x5a9   : > { %v17050_v20 = vadd.f32 %v7258_v33, %v6943_v39  ;;  %12397 = vmatprep.mubr.f32.mxu1 %v8251_v56  ;;  %v11983_v5 = vpop.f32.mrf.mxu1 }
 0x5aa   : > { %v12081_v59 = vpop.f32.mrf.mxu0  ;;  %v6950_v2 = vadd.f32 %v11983_v5, %v16918_v28 }
 0x5ab   : > { %v17053_v14 = vadd.f32 %v12081_v59, %v6946_v58  ;;  %v6870_v16 = vpop.f32.mrf.mxu1  ;;  %v8254_v58 = vld [vmem:[#allocation2 + $0x18a] sm:$0xff] }
 0x5ac   : > { %v7268_v19 = vpop.f32.mrf.mxu0  ;;  %12398 = vmatmul.mubr.f32.gmra.mxu1 %v8252_v38  ;;  %v6949_v33 = vadd.f32 %v6870_v16, %v16922_v50 }
 0x5ad   : > { %v17056_v21 = vadd.f32 %v7268_v19, %v6945_v8  ;;  %12400 = vmatprep.mubr.f32.mxu1 %v8253_v3  ;;  %v11986_v56 = vpop.f32.mrf.mxu1  ;;  %v8256_v8 = vld [vmem:[#allocation2 + $0x19a] sm:$0xff]  ;;  %v8257_v19 = vld [vmem:[#allocation2 + $0x1a2] sm:$0xff] }
 0x5ae   : > { %v12084_v39 = vpop.f32.mrf.mxu0  ;;  %v6952_v49 = vadd.f32 %v11986_v56, %v16926_v25 }
 0x5af   : > { %v17059_v55 = vadd.f32 %v12084_v39, %v6948_v51  ;;  %v6880_v28 = vpop.f32.mrf.mxu1 }
 0x5b0   : > { %v7278_v6 = vpop.f32.mrf.mxu0  ;;  %12401 = vmatmul.mubr.f32.gmra.mxu1 %v8254_v58  ;;  %v6951_v51 = vadd.f32 %v6880_v28, %v16930_v57 }
 0x5b1   : > { %v17062_v59 = vadd.f32 %v7278_v6, %v6947_v48  ;;  %12403 = vmatprep.mubr.f32.mxu1 %v8255_v54  ;;  %v11989_v50 = vpop.f32.mrf.mxu1  ;;  %v8258_v48 = vld [vmem:[#allocation2 + $0x1aa] sm:$0xff] }
 0x5b2   : > { %v12087_v38 = vpop.f32.mrf.mxu0  ;;  %v6954_v16 = vadd.f32 %v11989_v50, %v16933_v63 }
 0x5b3   : > { %v17065_v5 = vadd.f32 %v12087_v38, %v6950_v2  ;;  %v6890_v25 = vpop.f32.mrf.mxu1 }
 0x5b4   : > { %v7288_v3 = vpop.f32.mrf.mxu0  ;;  %12404 = vmatmul.mubr.f32.gmra.mxu1 %v8256_v8  ;;  %v6953_v56 = vadd.f32 %v6890_v25, %v16936_v7 }
 0x5b5   : > { %v17068_v39 = vadd.f32 %v7288_v3, %v6949_v33  ;;  %12406 = vmatprep.mubr.f32.mxu1 %v8257_v19  ;;  %v11992_v2 = vpop.f32.mrf.mxu1 }
 0x5b6   : > { %v12090_v58 = vpop.f32.mrf.mxu0  ;;  %v6956_v57 = vadd.f32 %v11992_v2, %v16939_v29 }
 0x5b7   : > { %v17071_v6 = vadd.f32 %v12090_v58, %v6952_v49  ;;  %v6900_v33 = vpop.f32.mrf.mxu1 }
 0x5b8   : > { %v7298_v54 = vpop.f32.mrf.mxu0  ;;  %12407 = vmatmul.mubr.f32.gmra.mxu1 %v8258_v48  ;;  %v6955_v63 = vadd.f32 %v6900_v33, %v16942_v61 }
 0x5b9   : > { %v17074_v38 = vadd.f32 %v7298_v54, %v6951_v51  ;;  %v12131_v3 = vpop.f32.mrf.mxu1 }
 0x5ba   : > { %v12093_v8 = vpop.f32.mrf.mxu0  ;;  %v17083_v49 = vadd.f32 %v12131_v3, %v16945_v31 }
 0x5bb   : > { %v17077_v28 = vadd.f32 %v12093_v8, %v6954_v16  ;;  %v7506_v58 = vpop.f32.mrf.mxu1 }
 0x5bc   : > { %v7308_v19 = vpop.f32.mrf.mxu0  ;;  %v17088_v51 = vadd.f32 %v7506_v58, %v16948_v52 }
 0x5bd   : > { %v17080_v50 = vadd.f32 %v7308_v19, %v6953_v56 }
 0x5be   : > { %v12096_v7 = vpop.f32.mrf.mxu0  ;;  %v12134_v25 = vpop.f32.mrf.mxu1 }
 0x5bf   : > { %v17085_v48 = vadd.f32 %v12096_v7, %v6956_v57  ;;  %v17093_v61 = vadd.f32 %v12134_v25, %v16951_v46 }
 0x5c0   : > { %v7318_v29 = vpop.f32.mrf.mxu0  ;;  %v7516_v56 = vpop.f32.mrf.mxu1 }
 0x5c1   : > { %v17090_v16 = vadd.f32 %v7318_v29, %v6955_v63  ;;  %v17098_v31 = vadd.f32 %v7516_v56, %v16954_v60 }
 0x5c2   : > { %v17095_v54 = vpop.f32.mrf.mxu0 }
 0x5c3   : > { %v12137_v57 = vpop.f32.mrf.mxu1 }
 0x5c4   : > { %v17100_v2 = vpop.f32.mrf.mxu0  ;;  %v17103_v8 = vadd.f32 %v12137_v57, %v16957_v36 }
 0x5c5   : > { %v7526_v33 = vpop.f32.mrf.mxu1 }
 0x5c6   : > { %v17105_v52 = vpop.f32.mrf.mxu0  ;;  %v17108_v63 = vadd.f32 %v7526_v33, %v16960_v26 }
 0x5c8   : > { %v17110_v46 = vpop.f32.mrf.mxu0  ;;  %v12140_v19 = vpop.f32.mrf.mxu1 }
 0x5c9   : > { %v17113_v3 = vadd.f32 %v12140_v19, %v16963_v27 }
 0x5ca   : > { %v17115_v60 = vpop.f32.mrf.mxu0  ;;  %v7536_v7 = vpop.f32.mrf.mxu1 }
 0x5cb   : > { %v17118_v58 = vadd.f32 %v7536_v7, %v16966_v32 }
 0x5cc   : > { %v12143_v36 = vpop.f32.mrf.mxu1  ;;  %v17123_v25 = vpop.f32.mrf.mxu0 }
 0x5cd   : > { %v17121_v29 = vadd.f32 %v12143_v36, %v16969_v10 }
 0x5ce   : > { %v7546_v26 = vpop.f32.mrf.mxu1  ;;  %v17131_v33 = vpop.f32.mrf.mxu0 }
 0x5cf   : > { %19183 = vst [vmem:[#allocation41_spill] sm:$0xff] %v17121_v29  ;;  %v17126_v56 = vadd.f32 %v7546_v26, %v16972_v40 }
 0x5d0   : > { %v12146_v57 = vpop.f32.mrf.mxu1  ;;  %v17139_v36 = vpop.f32.mrf.mxu0 }
 0x5d1   : > { %v17129_v27 = vadd.f32 %v12146_v57, %v16975_v62 }
 0x5d2   : > { %v7556_v19 = vpop.f32.mrf.mxu1  ;;  %v17147_v57 = vpop.f32.mrf.mxu0 }
 0x5d3   : > { %19184 = vst [vmem:[#allocation51_spill] sm:$0xff] %v17129_v27  ;;  %v17134_v32 = vadd.f32 %v7556_v19, %v16978_v45 }
 0x5d4   : > { %v12149_v7 = vpop.f32.mrf.mxu1 }
 0x5d5   : > { %v17137_v10 = vadd.f32 %v12149_v7, %v16981_v9  ;;  %v17155_v7 = vpop.f32.mrf.mxu0 }
 0x5d6   : > { %v7566_v29 = vpop.f32.mrf.mxu1 }
 0x5d7   : > { %19185 = vst [vmem:[#allocation16_spill] sm:$0xff] %v17137_v10  ;;  %v17142_v40 = vadd.f32 %v7566_v29, %v16984_v42 }
 0x5d8   : > { %v12152_v26 = vpop.f32.mrf.mxu1 }
 0x5d9   : > { %v17145_v62 = vadd.f32 %v12152_v26, %v16987_v1  ;;  %v17163_v26 = vpop.f32.mrf.mxu0 }
 0x5da   : > { %v7576_v27 = vpop.f32.mrf.mxu1 }
 0x5db   : > { %19186 = vst [vmem:[#allocation52_spill] sm:$0xff] %v17145_v62  ;;  %v17150_v45 = vadd.f32 %v7576_v27, %v16990_v24 }
 0x5dc   : > { %v12155_v19 = vpop.f32.mrf.mxu1 }
 0x5dd   : > { %v17153_v9 = vadd.f32 %v12155_v19, %v16993_v22  ;;  %v17171_v19 = vpop.f32.mrf.mxu0 }
 0x5de   : > { %v7586_v10 = vpop.f32.mrf.mxu1 }
 0x5df   : > { %19187 = vst [vmem:[#allocation50_spill] sm:$0xff] %v17153_v9  ;;  %v17158_v42 = vadd.f32 %v7586_v10, %v16996_v4 }
 0x5e0   : > { %v12158_v29 = vpop.f32.mrf.mxu1 }
 0x5e1   : > { %v17161_v1 = vadd.f32 %v12158_v29, %v16999_v17  ;;  %v17179_v29 = vpop.f32.mrf.mxu0 }
 0x5e2   : > { %v7596_v62 = vpop.f32.mrf.mxu1 }
 0x5e3   : > { %19188 = vst [vmem:[#allocation85_spill] sm:$0xff] %v17161_v1  ;;  %v17166_v24 = vadd.f32 %v7596_v62, %v17002_v18 }
 0x5e4   : > { %v12161_v27 = vpop.f32.mrf.mxu1 }
 0x5e5   : > { %v17169_v22 = vadd.f32 %v12161_v27, %v17005_v37  ;;  %v17187_v27 = vpop.f32.mrf.mxu0 }
 0x5e6   : > { %v7606_v9 = vpop.f32.mrf.mxu1 }
 0x5e7   : > { %19189 = vst [vmem:[#allocation84_spill] sm:$0xff] %v17169_v22  ;;  %v17174_v4 = vadd.f32 %v7606_v9, %v17008_v41 }
 0x5e8   : > { %v12164_v10 = vpop.f32.mrf.mxu1 }
 0x5e9   : > { %v17177_v17 = vadd.f32 %v12164_v10, %v17011_v15  ;;  %v17195_v10 = vpop.f32.mrf.mxu0 }
 0x5ea   : > { %v7616_v1 = vpop.f32.mrf.mxu1 }
 0x5eb   : > { %19190 = vst [vmem:[#allocation29_spill] sm:$0xff] %v17177_v17  ;;  %v17182_v18 = vadd.f32 %v7616_v1, %v17014_v53 }
 0x5ec   : > { %v12167_v62 = vpop.f32.mrf.mxu1 }
 0x5ed   : > { %v17185_v37 = vadd.f32 %v12167_v62, %v17017_v47  ;;  %v17203_v62 = vpop.f32.mrf.mxu0 }
 0x5ee   : > { %v7626_v22 = vpop.f32.mrf.mxu1 }
 0x5ef   : > { %19191 = vst [vmem:[#allocation26_spill] sm:$0xff] %v17185_v37  ;;  %v17190_v41 = vadd.f32 %v7626_v22, %v17020_v30 }
 0x5f0   : > { %v12170_v9 = vpop.f32.mrf.mxu1 }
 0x5f1   : > { %v17193_v15 = vadd.f32 %v12170_v9, %v17023_v11  ;;  %v17211_v9 = vpop.f32.mrf.mxu0 }
 0x5f2   : > { %v7636_v17 = vpop.f32.mrf.mxu1 }
 0x5f3   : > { %19192 = vst [vmem:[#allocation20_spill] sm:$0xff] %v17193_v15  ;;  %v17198_v53 = vadd.f32 %v7636_v17, %v17026_v12 }
 0x5f4   : > { %v12173_v1 = vpop.f32.mrf.mxu1 }
 0x5f5   : > { %v17201_v47 = vadd.f32 %v12173_v1, %v17029_v13  ;;  %v17219_v1 = vpop.f32.mrf.mxu0 }
 0x5f6   : > { %v7646_v37 = vpop.f32.mrf.mxu1 }
 0x5f7   : > { %19193 = vst [vmem:[#allocation38_spill] sm:$0xff] %v17201_v47  ;;  %v17206_v30 = vadd.f32 %v7646_v37, %v17032_v23 }
 0x5f8   : > { %v12176_v22 = vpop.f32.mrf.mxu1 }
 0x5f9   : > { %v17209_v11 = vadd.f32 %v12176_v22, %v17035_v34  ;;  %v17227_v22 = vpop.f32.mrf.mxu0 }
 0x5fa   : > { %v7656_v15 = vpop.f32.mrf.mxu1 }
 0x5fb   : > { %19194 = vst [vmem:[#allocation60_spill] sm:$0xff] %v17209_v11  ;;  %v17214_v12 = vadd.f32 %v7656_v15, %v17038_v0 }
 0x5fc   : > { %v12179_v17 = vpop.f32.mrf.mxu1 }
 0x5fd   : > { %v17217_v13 = vadd.f32 %v12179_v17, %v17041_v44  ;;  %v17235_v17 = vpop.f32.mrf.mxu0 }
 0x5fe   : > { %v7666_v47 = vpop.f32.mrf.mxu1 }
 0x5ff   : > { %19195 = vst [vmem:[#allocation31_spill] sm:$0xff] %v17217_v13  ;;  %v17222_v23 = vadd.f32 %v7666_v47, %v17044_v43 }
 0x600   : > { %v12182_v37 = vpop.f32.mrf.mxu1 }
 0x601   : > { %v17225_v34 = vadd.f32 %v12182_v37, %v17047_v35  ;;  %v17243_v37 = vpop.f32.mrf.mxu0 }
 0x602   : > { %v7676_v11 = vpop.f32.mrf.mxu1 }
 0x603   : > { %19196 = vst [vmem:[#allocation21_spill] sm:$0xff] %v17225_v34  ;;  %v17230_v0 = vadd.f32 %v7676_v11, %v17050_v20 }
 0x604   : > { %v12185_v15 = vpop.f32.mrf.mxu1 }
 0x605   : > { %v17233_v44 = vadd.f32 %v12185_v15, %v17053_v14  ;;  %v17251_v15 = vpop.f32.mrf.mxu0 }
 0x606   : > { %v7686_v13 = vpop.f32.mrf.mxu1 }
 0x607   : > { %19197 = vst [vmem:[#allocation67_spill] sm:$0xff] %v17233_v44  ;;  %v17238_v43 = vadd.f32 %v7686_v13, %v17056_v21 }
 0x608   : > { %v12188_v47 = vpop.f32.mrf.mxu1 }
 0x609   : > { %v17241_v35 = vadd.f32 %v12188_v47, %v17059_v55  ;;  %v17259_v47 = vpop.f32.mrf.mxu0 }
 0x60a   : > { %v7696_v34 = vpop.f32.mrf.mxu1 }
 0x60b   : > { %19198 = vst [vmem:[#allocation86_spill] sm:$0xff] %v17241_v35  ;;  %v17246_v20 = vadd.f32 %v7696_v34, %v17062_v59 }
 0x60c   : > { %v12191_v11 = vpop.f32.mrf.mxu1 }
 0x60d   : > { %v17249_v14 = vadd.f32 %v12191_v11, %v17065_v5  ;;  %v17267_v11 = vpop.f32.mrf.mxu0 }
 0x60e   : > { %v7706_v44 = vpop.f32.mrf.mxu1 }
 0x60f   : > { %19199 = vst [vmem:[#allocation33_spill] sm:$0xff] %v17249_v14  ;;  %v17254_v21 = vadd.f32 %v7706_v44, %v17068_v39 }
 0x610   : > { %v12194_v13 = vpop.f32.mrf.mxu1 }
 0x611   : > { %v17257_v55 = vadd.f32 %v12194_v13, %v17071_v6  ;;  %v17275_v13 = vpop.f32.mrf.mxu0 }
 0x612   : > { %v7716_v35 = vpop.f32.mrf.mxu1 }
 0x613   : > { %19200 = vst [vmem:[#allocation73_spill] sm:$0xff] %v17257_v55  ;;  %v17262_v59 = vadd.f32 %v7716_v35, %v17074_v38 }
 0x614   : > { %v12197_v34 = vpop.f32.mrf.mxu1 }
 0x615   : > { %v17265_v5 = vadd.f32 %v12197_v34, %v17077_v28  ;;  %v8164_v28 = vadd.f32 %v17095_v54, %v17083_v49  ;;  %v8163_v34 = vadd.f32 %v17100_v2, %v17088_v51  ;;  %v19207_v2 = vld [vmem:[#allocation25_spill] sm:$0xff] }
 0x616   : > { %v7726_v14 = vpop.f32.mrf.mxu1 }
 0x617   : > { %19201 = vst [vmem:[#allocation76_spill] sm:$0xff] %v17265_v5  ;;  %v17270_v39 = vadd.f32 %v7726_v14, %v17080_v50  ;;  %v17284_v5 = vpop.f32.mrf.mxu0 }
 0x618   : > { %v12200_v44 = vpop.f32.mrf.mxu1 }
 0x619   : > { %v17273_v6 = vadd.f32 %v12200_v44, %v17085_v48  ;;  %v17296_v54 = vpop.f32.mrf.mxu0 }
 0x61a   : > { %v7736_v55 = vpop.f32.mrf.mxu1 }
 0x61b   : > { %19202 = vst [vmem:[#allocation54_spill] sm:$0xff] %v17273_v6  ;;  %v17278_v38 = vadd.f32 %v7736_v55, %v17090_v16  ;;  %v8166_v6 = vadd.f32 %v17105_v52, %v17093_v61  ;;  %v8165_v16 = vadd.f32 %v17110_v46, %v17098_v31  ;;  %v19206_v55 = vld [vmem:[#allocation27_spill] sm:$0xff]  ;;  %v8168_v61 = vadd.f32 %v17115_v60, %v17103_v8  ;;  %v19208_v46 = vld [vmem:[#allocation69_spill] sm:$0xff]  ;;  %v19210_v60 = vld [vmem:[#allocation72_spill] sm:$0xff] }
 0x61c   : > { %v12339_v35 = vpop.f32.mrf.mxu1  ;;  %v8167_v31 = vadd.f32 %v17123_v25, %v17108_v63  ;;  %v8170_v8 = vadd.f32 %v17131_v33, %v17113_v3  ;;  %v8169_v63 = vadd.f32 %v17139_v36, %v17118_v58  ;;  %v19212_v3 = vld [vmem:[#allocation41_spill] sm:$0xff]  ;;  %v8171_v58 = vadd.f32 %v17155_v7, %v17126_v56  ;;  %v19213_v36 = vld [vmem:[#allocation75_spill] sm:$0xff]  ;;  %v19216_v7 = vld [vmem:[#allocation78_spill] sm:$0xff] }
 0x61d   : > { %19203 = vst [vmem:[#allocation53_spill] sm:$0xff] %v17278_v38  ;;  %v17286_v14 = vadd.f32 %v12339_v35, %v8164_v28  ;;  %v8172_v33 = vadd.f32 %v17147_v57, %v19212_v3  ;;  %v19215_v57 = vld [vmem:[#allocation51_spill] sm:$0xff]  ;;  %v8173_v56 = vadd.f32 %v17171_v19, %v17134_v32  ;;  %v8175_v32 = vadd.f32 %v17187_v27, %v17142_v40  ;;  %v19222_v27 = vld [vmem:[#allocation57_spill] sm:$0xff] }
 0x61e   : > { %v8342_v50 = vpop.f32.mrf.mxu1  ;;  %v8174_v3 = vadd.f32 %v17163_v26, %v19215_v57  ;;  %v19218_v26 = vld [vmem:[#allocation16_spill] sm:$0xff]  ;;  %v19219_v19 = vld [vmem:[#allocation55_spill] sm:$0xff]  ;;  %v8177_v40 = vadd.f32 %v17203_v62, %v17150_v45  ;;  %v8179_v45 = vadd.f32 %v17219_v1, %v17158_v42  ;;  %v19225_v62 = vld [vmem:[#allocation65_spill] sm:$0xff]  ;;  %v8181_v42 = vadd.f32 %v17235_v17, %v17166_v24 }
 0x61f   : > { %19204 = vst [vmem:[#allocation58_spill] sm:$0xff] %v17286_v14  ;;  %v17288_v48 = vadd.f32 %v8342_v50, %v8163_v34  ;;  %v8726_v38 = vmul.f32 %v19207_v2, %v17286_v14  ;;  %v19209_v2 = vld [vmem:[#allocation30_spill] sm:$0xff]  ;;  %v8176_v57 = vadd.f32 %v17179_v29, %v19218_v26  ;;  %v19221_v29 = vld [vmem:[#allocation52_spill] sm:$0xff]  ;;  %v8183_v24 = vadd.f32 %v17251_v15, %v17174_v4  ;;  %v19231_v17 = vld [vmem:[#allocation17_spill] sm:$0xff] }
 0x620   : > { %v12342_v44 = vpop.f32.mrf.mxu1  ;;  %v8178_v26 = vadd.f32 %v17195_v10, %v19221_v29  ;;  %v19224_v10 = vld [vmem:[#allocation50_spill] sm:$0xff]  ;;  %v19228_v1 = vld [vmem:[#allocation68_spill] sm:$0xff]  ;;  %v8185_v4 = vadd.f32 %v17267_v11, %v17182_v18  ;;  %v8187_v18 = vadd.f32 %v17284_v5, %v17190_v41 }
 0x621   : > { %19205 = vst [vmem:[#allocation59_spill] sm:$0xff] %v17288_v48  ;;  %v8725_v49 = vmul.f32 %v19206_v55, %v17288_v48  ;;  %v17300_v35 = vadd.f32 %v12342_v44, %v8166_v6  ;;  %v17310_v55 = vpop.f32.mrf.mxu0  ;;  %v8180_v29 = vadd.f32 %v17211_v9, %v19224_v10  ;;  %v19227_v9 = vld [vmem:[#allocation85_spill] sm:$0xff]  ;;  %v19234_v15 = vld [vmem:[#allocation82_spill] sm:$0xff]  ;;  %v19244_v5 = vld [vmem:[#allocation36_spill] sm:$0xff] }
 0x622   : > { %v8352_v51 = vpop.f32.mrf.mxu1  ;;  %v8182_v10 = vadd.f32 %v17227_v22, %v19227_v9  ;;  %v19230_v22 = vld [vmem:[#allocation84_spill] sm:$0xff]  ;;  %v19239_v11 = vld [vmem:[#allocation18_spill] sm:$0xff]  ;;  %v8189_v41 = vadd.f32 %v17310_v55, %v17198_v53 }
 0x623   : > { %v17302_v28 = vadd.f32 %v8352_v51, %v8165_v16  ;;  %v8773_v52 = vadd.f32 %v8726_v38, %v8725_v49  ;;  %v8728_v6 = vmul.f32 %v19209_v2, %v17300_v35  ;;  %v17324_v49 = vpop.f32.mrf.mxu0  ;;  %v8184_v9 = vadd.f32 %v17243_v37, %v19230_v22  ;;  %v19233_v37 = vld [vmem:[#allocation29_spill] sm:$0xff]  ;;  %v19249_v55 = vld [vmem:[#allocation42_spill] sm:$0xff] }
 0x624   : > { %v12345_v34 = vpop.f32.mrf.mxu1  ;;  %v8186_v22 = vadd.f32 %v17259_v47, %v19233_v37  ;;  %v19238_v47 = vld [vmem:[#allocation26_spill] sm:$0xff] }
 0x625   : > { %v8727_v50 = vmul.f32 %v19208_v46, %v17302_v28  ;;  %v17314_v16 = vadd.f32 %v12345_v34, %v8168_v61  ;;  %v8188_v37 = vadd.f32 %v17275_v13, %v19238_v47  ;;  %v19243_v13 = vld [vmem:[#allocation20_spill] sm:$0xff] }
 0x626   : > { %v8362_v48 = vpop.f32.mrf.mxu1  ;;  %v8190_v47 = vadd.f32 %v17296_v54, %v19243_v13 }
 0x627   : > { %v8774_v44 = vadd.f32 %v8773_v52, %v8727_v50  ;;  %v17316_v51 = vadd.f32 %v8362_v48, %v8167_v31  ;;  %v19211_v52 = vld [vmem:[#allocation71_spill] sm:$0xff] }
 0x628   : > { %v12348_v14 = vpop.f32.mrf.mxu1  ;;  %v8730_v34 = vmul.f32 %v19211_v52, %v17314_v16 }
 0x629   : > { %v8729_v25 = vmul.f32 %v19210_v60, %v17316_v51  ;;  %v8775_v38 = vadd.f32 %v8774_v44, %v8728_v6  ;;  %v17328_v48 = vadd.f32 %v12348_v14, %v8170_v8  ;;  %v17338_v60 = vpop.f32.mrf.mxu0 }
 0x62a   : > { %v8372_v46 = vpop.f32.mrf.mxu1  ;;  %v8191_v53 = vadd.f32 %v17338_v60, %v17206_v30  ;;  %v19253_v60 = vld [vmem:[#allocation22_spill] sm:$0xff] }
 0x62b   : > { %v8776_v61 = vadd.f32 %v8775_v38, %v8729_v25  ;;  %v17330_v31 = vadd.f32 %v8372_v46, %v8169_v63  ;;  %v19214_v25 = vld [vmem:[#allocation74_spill] sm:$0xff] }
 0x62c   : > { %v12351_v50 = vpop.f32.mrf.mxu1  ;;  %v8732_v14 = vmul.f32 %v19214_v25, %v17328_v48 }
 0x62d   : > { %v8731_v6 = vmul.f32 %v19213_v36, %v17330_v31  ;;  %v8777_v44 = vadd.f32 %v8776_v61, %v8730_v34  ;;  %v17342_v46 = vadd.f32 %v12351_v50, %v8172_v33  ;;  %v17352_v36 = vpop.f32.mrf.mxu0 }
 0x62e   : > { %v8382_v2 = vpop.f32.mrf.mxu1 }
 0x62f   : > { %v8778_v8 = vadd.f32 %v8777_v44, %v8731_v6  ;;  %v17344_v63 = vadd.f32 %v8382_v2, %v8171_v58  ;;  %v19217_v6 = vld [vmem:[#allocation77_spill] sm:$0xff] }
 0x630   : > { %v12354_v38 = vpop.f32.mrf.mxu1  ;;  %v8734_v50 = vmul.f32 %v19217_v6, %v17342_v46 }
 0x631   : > { %v8733_v34 = vmul.f32 %v19216_v7, %v17344_v63  ;;  %v8779_v61 = vadd.f32 %v8778_v8, %v8732_v14  ;;  %v17356_v2 = vadd.f32 %v12354_v38, %v8174_v3  ;;  %v17366_v7 = vpop.f32.mrf.mxu0 }
 0x632   : > { %v8392_v52 = vpop.f32.mrf.mxu1  ;;  %v8193_v30 = vadd.f32 %v17366_v7, %v17214_v12  ;;  %v19256_v7 = vld [vmem:[#allocation24_spill] sm:$0xff] }
 0x633   : > { %v8780_v33 = vadd.f32 %v8779_v61, %v8733_v34  ;;  %v17358_v58 = vadd.f32 %v8392_v52, %v8173_v56  ;;  %v19220_v34 = vld [vmem:[#allocation80_spill] sm:$0xff] }
 0x634   : > { %v12357_v44 = vpop.f32.mrf.mxu1  ;;  %v8736_v38 = vmul.f32 %v19220_v34, %v17356_v2 }
 0x635   : > { %v8735_v14 = vmul.f32 %v19219_v19, %v17358_v58  ;;  %v8781_v8 = vadd.f32 %v8780_v33, %v8734_v50  ;;  %v17370_v52 = vadd.f32 %v12357_v44, %v8176_v57  ;;  %v17380_v19 = vpop.f32.mrf.mxu0 }
 0x636   : > { %v8402_v25 = vpop.f32.mrf.mxu1 }
 0x637   : > { %v8782_v3 = vadd.f32 %v8781_v8, %v8735_v14  ;;  %v17372_v56 = vadd.f32 %v8402_v25, %v8175_v32  ;;  %v19223_v14 = vld [vmem:[#allocation56_spill] sm:$0xff] }
 0x638   : > { %v12360_v61 = vpop.f32.mrf.mxu1  ;;  %v8738_v44 = vmul.f32 %v19223_v14, %v17370_v52 }
 0x639   : > { %v8737_v50 = vmul.f32 %v19222_v27, %v17372_v56  ;;  %v8783_v33 = vadd.f32 %v8782_v3, %v8736_v38  ;;  %v17384_v25 = vadd.f32 %v12360_v61, %v8178_v26  ;;  %v17394_v27 = vpop.f32.mrf.mxu0 }
 0x63a   : > { %v8412_v6 = vpop.f32.mrf.mxu1  ;;  %v8195_v12 = vadd.f32 %v17394_v27, %v17222_v23  ;;  %v19259_v27 = vld [vmem:[#allocation35_spill] sm:$0xff] }
 0x63b   : > { %v8784_v57 = vadd.f32 %v8783_v33, %v8737_v50  ;;  %v17386_v32 = vadd.f32 %v8412_v6, %v8177_v40  ;;  %v19226_v50 = vld [vmem:[#allocation62_spill] sm:$0xff] }
 0x63c   : > { %v12363_v8 = vpop.f32.mrf.mxu1  ;;  %v8740_v61 = vmul.f32 %v19226_v50, %v17384_v25 }
 0x63d   : > { %v8739_v38 = vmul.f32 %v19225_v62, %v17386_v32  ;;  %v8785_v3 = vadd.f32 %v8784_v57, %v8738_v44  ;;  %v17398_v6 = vadd.f32 %v12363_v8, %v8180_v29  ;;  %v17408_v62 = vpop.f32.mrf.mxu0 }
 0x63e   : > { %v8422_v34 = vpop.f32.mrf.mxu1 }
 0x63f   : > { %v8786_v26 = vadd.f32 %v8785_v3, %v8739_v38  ;;  %v17400_v40 = vadd.f32 %v8422_v34, %v8179_v45  ;;  %v19229_v38 = vld [vmem:[#allocation43_spill] sm:$0xff] }
 0x640   : > { %v12366_v33 = vpop.f32.mrf.mxu1  ;;  %v8742_v8 = vmul.f32 %v19229_v38, %v17398_v6 }
 0x641   : > { %v8741_v44 = vmul.f32 %v19228_v1, %v17400_v40  ;;  %v8787_v57 = vadd.f32 %v8786_v26, %v8740_v61  ;;  %v17412_v34 = vadd.f32 %v12366_v33, %v8182_v10  ;;  %v17422_v1 = vpop.f32.mrf.mxu0 }
 0x642   : > { %v8432_v14 = vpop.f32.mrf.mxu1  ;;  %v8197_v23 = vadd.f32 %v17422_v1, %v17230_v0  ;;  %v19262_v1 = vld [vmem:[#allocation37_spill] sm:$0xff] }
 0x643   : > { %v8788_v29 = vadd.f32 %v8787_v57, %v8741_v44  ;;  %v17414_v45 = vadd.f32 %v8432_v14, %v8181_v42  ;;  %v19232_v44 = vld [vmem:[#allocation14_spill] sm:$0xff] }
 0x644   : > { %v12369_v3 = vpop.f32.mrf.mxu1  ;;  %v8744_v33 = vmul.f32 %v19232_v44, %v17412_v34 }
 0x645   : > { %v8743_v61 = vmul.f32 %v19231_v17, %v17414_v45  ;;  %v8789_v26 = vadd.f32 %v8788_v29, %v8742_v8  ;;  %v17426_v14 = vadd.f32 %v12369_v3, %v8184_v9  ;;  %v17436_v17 = vpop.f32.mrf.mxu0 }
 0x646   : > { %v8442_v50 = vpop.f32.mrf.mxu1 }
 0x647   : > { %v8790_v10 = vadd.f32 %v8789_v26, %v8743_v61  ;;  %v17428_v42 = vadd.f32 %v8442_v50, %v8183_v24  ;;  %v19235_v61 = vld [vmem:[#allocation81_spill] sm:$0xff] }
 0x648   : > { %v12372_v57 = vpop.f32.mrf.mxu1  ;;  %v8746_v3 = vmul.f32 %v19235_v61, %v17426_v14 }
 0x649   : > { %v8745_v8 = vmul.f32 %v19234_v15, %v17428_v42  ;;  %v8791_v29 = vadd.f32 %v8790_v10, %v8744_v33  ;;  %v17440_v50 = vadd.f32 %v12372_v57, %v8186_v22  ;;  %v17450_v15 = vpop.f32.mrf.mxu0 }
 0x64a   : > { %v8452_v38 = vpop.f32.mrf.mxu1  ;;  %v8199_v0 = vadd.f32 %v17450_v15, %v17238_v43  ;;  %v19265_v43 = vld [vmem:[#allocation40_spill] sm:$0xff] }
 0x64b   : > { %v8792_v9 = vadd.f32 %v8791_v29, %v8745_v8  ;;  %19236 = vst [vmem:[#allocation15_spill] sm:$0xff] %v17440_v50  ;;  %v17442_v24 = vadd.f32 %v8452_v38, %v8185_v4  ;;  %v19240_v8 = vld [vmem:[#allocation83_spill] sm:$0xff] }
 0x64c   : > { %v12375_v26 = vpop.f32.mrf.mxu1  ;;  %v8748_v57 = vmul.f32 %v19240_v8, %v17440_v50  ;;  %v19245_v8 = vld [vmem:[#allocation19_spill] sm:$0xff] }
 0x64d   : > { %19237 = vst [vmem:[#allocation39_spill] sm:$0xff] %v17442_v24  ;;  %v8747_v33 = vmul.f32 %v19239_v11, %v17442_v24  ;;  %v8793_v10 = vadd.f32 %v8792_v9, %v8746_v3  ;;  %v17454_v38 = vadd.f32 %v12375_v26, %v8188_v37  ;;  %v12292_v11 = vpop.f32.mrf.mxu0 }
 0x64e   : > { %v8462_v44 = vpop.f32.mrf.mxu1 }
 0x64f   : > { %v8794_v22 = vadd.f32 %v8793_v10, %v8747_v33  ;;  %19241 = vst [vmem:[#allocation23_spill] sm:$0xff] %v17454_v38  ;;  %v17456_v4 = vadd.f32 %v8462_v44, %v8187_v18  ;;  %v8750_v33 = vmul.f32 %v19245_v8, %v17454_v38  ;;  %v19248_v10 = vld [vmem:[#allocation38_spill] sm:$0xff]  ;;  %v8114_v13 = vpop.f32.mrf.mxu0 }
 0x650   : > { %v12378_v29 = vpop.f32.mrf.mxu1  ;;  %v8192_v54 = vadd.f32 %v17324_v49, %v19248_v10  ;;  %v19250_v8 = vld [vmem:[#allocation70_spill] sm:$0xff] }
 0x651   : > { %19242 = vst [vmem:[#allocation87_spill] sm:$0xff] %v17456_v4  ;;  %v8749_v3 = vmul.f32 %v19244_v5, %v17456_v4  ;;  %v8795_v9 = vadd.f32 %v8794_v22, %v8748_v57  ;;  %v17466_v37 = vadd.f32 %v12378_v29, %v8190_v47  ;;  %v12295_v10 = vpop.f32.mrf.mxu0 }
 0x652   : > { %v8472_v61 = vpop.f32.mrf.mxu1 }
 0x653   : > { %v8796_v26 = vadd.f32 %v8795_v9, %v8749_v3  ;;  %19246 = vst [vmem:[#allocation88_spill] sm:$0xff] %v17466_v37  ;;  %v17468_v44 = vadd.f32 %v8472_v61, %v8189_v41  ;;  %v8752_v3 = vmul.f32 %v19250_v8, %v17466_v37  ;;  %v19252_v9 = vld [vmem:[#allocation60_spill] sm:$0xff] }
 0x654   : > { %v12381_v18 = vpop.f32.mrf.mxu1  ;;  %v8194_v49 = vadd.f32 %v17352_v36, %v19252_v9  ;;  %v19254_v8 = vld [vmem:[#allocation32_spill] sm:$0xff]  ;;  %v8124_v9 = vpop.f32.mrf.mxu0 }
 0x655   : > { %19247 = vst [vmem:[#allocation89_spill] sm:$0xff] %v17468_v44  ;;  %v8751_v57 = vmul.f32 %v19249_v55, %v17468_v44  ;;  %v8797_v22 = vadd.f32 %v8796_v26, %v8750_v33  ;;  %v17478_v47 = vadd.f32 %v12381_v18, %v8192_v54 }
 0x656   : > { %v8482_v5 = vpop.f32.mrf.mxu1 }
 0x657   : > { %v8798_v29 = vadd.f32 %v8797_v22, %v8751_v57  ;;  %19251 = vst [vmem:[#allocation90_spill] sm:$0xff] %v17478_v47  ;;  %v17480_v61 = vadd.f32 %v8482_v5, %v8191_v53  ;;  %v8754_v57 = vmul.f32 %v19254_v8, %v17478_v47  ;;  %v19255_v22 = vld [vmem:[#allocation31_spill] sm:$0xff]  ;;  %v19257_v8 = vld [vmem:[#allocation34_spill] sm:$0xff]  ;;  %v19266_v47 = vld [vmem:[#allocation61_spill] sm:$0xff] }
 0x658   : > { %v12384_v41 = vpop.f32.mrf.mxu1  ;;  %v8196_v36 = vadd.f32 %v17380_v19, %v19255_v22  ;;  %v12298_v22 = vpop.f32.mrf.mxu0 }
 0x659   : > { %v8753_v33 = vmul.f32 %v19253_v60, %v17480_v61  ;;  %v8799_v26 = vadd.f32 %v8798_v29, %v8752_v3  ;;  %v17490_v54 = vadd.f32 %v12384_v41, %v8194_v49 }
 0x65a   : > { %v8492_v55 = vpop.f32.mrf.mxu1 }
 0x65b   : > { %v8800_v18 = vadd.f32 %v8799_v26, %v8753_v33  ;;  %v17492_v5 = vadd.f32 %v8492_v55, %v8193_v30  ;;  %v8756_v33 = vmul.f32 %v19257_v8, %v17490_v54  ;;  %v19258_v26 = vld [vmem:[#allocation21_spill] sm:$0xff]  ;;  %v19260_v8 = vld [vmem:[#allocation79_spill] sm:$0xff] }
 0x65c   : > { %v12387_v53 = vpop.f32.mrf.mxu1  ;;  %v8198_v19 = vadd.f32 %v17408_v62, %v19258_v26  ;;  %v8134_v26 = vpop.f32.mrf.mxu0 }
 0x65d   : > { %v8755_v3 = vmul.f32 %v19256_v7, %v17492_v5  ;;  %v8801_v29 = vadd.f32 %v8800_v18, %v8754_v57  ;;  %v17502_v49 = vadd.f32 %v12387_v53, %v8196_v36 }
 0x65e   : > { %v8502_v60 = vpop.f32.mrf.mxu1 }
 0x65f   : > { %v8802_v41 = vadd.f32 %v8801_v29, %v8755_v3  ;;  %v17504_v55 = vadd.f32 %v8502_v60, %v8195_v12  ;;  %v8758_v3 = vmul.f32 %v19260_v8, %v17502_v49  ;;  %v19261_v29 = vld [vmem:[#allocation67_spill] sm:$0xff]  ;;  %v19263_v8 = vld [vmem:[#allocation28_spill] sm:$0xff] }
 0x660   : > { %v12390_v30 = vpop.f32.mrf.mxu1  ;;  %v8200_v62 = vadd.f32 %v17436_v17, %v19261_v29  ;;  %v8201_v29 = vadd.f32 %v8114_v13, %v17246_v20  ;;  %v19268_v20 = vld [vmem:[#allocation46_spill] sm:$0xff] }
 0x661   : > { %v8757_v57 = vmul.f32 %v19259_v27, %v17504_v55  ;;  %v8803_v18 = vadd.f32 %v8802_v41, %v8756_v33  ;;  %v17514_v36 = vadd.f32 %v12390_v30, %v8198_v19 }
 0x662   : > { %v8512_v7 = vpop.f32.mrf.mxu1 }
 0x663   : > { %v8804_v53 = vadd.f32 %v8803_v18, %v8757_v57  ;;  %v17516_v60 = vadd.f32 %v8512_v7, %v8197_v23  ;;  %v8760_v57 = vmul.f32 %v19263_v8, %v17514_v36  ;;  %v19264_v18 = vld [vmem:[#allocation86_spill] sm:$0xff] }
 0x664   : > { %v12393_v12 = vpop.f32.mrf.mxu1  ;;  %v8202_v17 = vadd.f32 %v12292_v11, %v19264_v18  ;;  %v8203_v11 = vadd.f32 %v8124_v9, %v17254_v21  ;;  %v19269_v18 = vld [vmem:[#allocation64_spill] sm:$0xff] }
 0x665   : > { %v8759_v33 = vmul.f32 %v19262_v1, %v17516_v60  ;;  %v8805_v41 = vadd.f32 %v8804_v53, %v8758_v3  ;;  %v17526_v19 = vadd.f32 %v12393_v12, %v8200_v62  ;;  %v12301_v3 = vpop.f32.mrf.mxu0  ;;  %v19267_v62 = vld [vmem:[#allocation33_spill] sm:$0xff] }
 0x666   : > { %v8522_v27 = vpop.f32.mrf.mxu1 }
 0x667   : > { %v8806_v30 = vadd.f32 %v8805_v41, %v8759_v33  ;;  %v17528_v7 = vadd.f32 %v8522_v27, %v8199_v0  ;;  %v8762_v37 = vmul.f32 %v19266_v47, %v17526_v19  ;;  %v8204_v0 = vadd.f32 %v12295_v10, %v19267_v62  ;;  %v19271_v10 = vld [vmem:[#allocation13_spill] sm:$0xff] }
 0x668   : > { %v12396_v23 = vpop.f32.mrf.mxu1 }
 0x669   : > { %v8761_v15 = vmul.f32 %v19265_v43, %v17528_v7  ;;  %v8807_v1 = vadd.f32 %v8806_v30, %v8760_v57  ;;  %v17536_v33 = vadd.f32 %v12396_v23, %v8202_v17  ;;  %v8144_v57 = vpop.f32.mrf.mxu0 }
 0x66a   : > { %v8532_v53 = vpop.f32.mrf.mxu1 }
 0x66b   : > { %v8808_v8 = vadd.f32 %v8807_v1, %v8761_v15  ;;  %v17538_v12 = vadd.f32 %v8532_v53, %v8201_v29  ;;  %v8764_v43 = vmul.f32 %v19269_v18, %v17536_v33  ;;  %v19270_v29 = vld [vmem:[#allocation73_spill] sm:$0xff]  ;;  %v8205_v53 = vadd.f32 %v8134_v26, %v17262_v59  ;;  %v12304_v9 = vpop.f32.mrf.mxu0  ;;  %v19273_v18 = vld [vmem:[#allocation76_spill] sm:$0xff]  ;;  %v19275_v26 = vld [vmem:[#allocation66_spill] sm:$0xff] }
 0x66c   : > { %v12399_v27 = vpop.f32.mrf.mxu1  ;;  %v8206_v15 = vadd.f32 %v12298_v22, %v19270_v29 }
 0x66d   : > { %v8763_v13 = vmul.f32 %v19268_v20, %v17538_v12  ;;  %v8809_v41 = vadd.f32 %v8808_v8, %v8762_v37  ;;  %v8622_v1 = vadd.f32 %v12399_v27, %v8204_v0  ;;  %v19272_v20 = vld [vmem:[#allocation63_spill] sm:$0xff]  ;;  %v8207_v27 = vadd.f32 %v8144_v57, %v17270_v39  ;;  %v19279_v39 = vld [vmem:[#allocation48_spill] sm:$0xff] }
 0x66e   : > { %v8542_v30 = vpop.f32.mrf.mxu1  ;;  %v19274_v0 = vld [vmem:[#allocation47_spill] sm:$0xff] }
 0x66f   : > { %v8810_v47 = vadd.f32 %v8809_v41, %v8763_v13  ;;  %v8621_v23 = vadd.f32 %v8542_v30, %v8203_v11  ;;  %v8766_v8 = vmul.f32 %v19272_v20, %v8622_v1  ;;  %v8208_v13 = vadd.f32 %v12301_v3, %v19273_v18  ;;  %v8154_v41 = vpop.f32.mrf.mxu0  ;;  %v19276_v20 = vld [vmem:[#allocation54_spill] sm:$0xff] }
 0x670   : > { %v12402_v17 = vpop.f32.mrf.mxu1 }
 0x671   : > { %v8765_v62 = vmul.f32 %v19271_v10, %v8621_v23  ;;  %v8811_v21 = vadd.f32 %v8810_v47, %v8764_v43  ;;  %v8624_v38 = vadd.f32 %v12402_v17, %v8206_v15  ;;  %v19277_v17 = vld [vmem:[#allocation53_spill] sm:$0xff]  ;;  %v19278_v15 = vld [vmem:[#allocation44_spill] sm:$0xff] }
 0x672   : > { %v8552_v44 = vpop.f32.mrf.mxu1 }
 0x673   : > { %v8812_v37 = vadd.f32 %v8811_v21, %v8765_v62  ;;  %v8623_v4 = vadd.f32 %v8552_v44, %v8205_v53  ;;  %v8768_v30 = vmul.f32 %v19275_v26, %v8624_v38  ;;  %v8210_v62 = vadd.f32 %v12304_v9, %v19276_v20 }
 0x674   : > { %v12405_v50 = vpop.f32.mrf.mxu1  ;;  %v8209_v44 = vadd.f32 %v8154_v41, %v19277_v17 }
 0x675   : > { %v8767_v11 = vmul.f32 %v19274_v0, %v8623_v4  ;;  %v8813_v22 = vadd.f32 %v8812_v37, %v8766_v8  ;;  %v8626_v43 = vadd.f32 %v12405_v50, %v8208_v13  ;;  %v19280_v0 = vld [vmem:[#allocation45_spill] sm:$0xff] }
 0x676   : > { %v8562_v59 = vpop.f32.mrf.mxu1 }
 0x677   : > { %v8814_v47 = vadd.f32 %v8813_v22, %v8767_v11  ;;  %v8625_v29 = vadd.f32 %v8562_v59, %v8207_v27  ;;  %v8770_v57 = vmul.f32 %v19279_v39, %v8626_v43  ;;  %v19281_v11 = vld [vmem:[#allocation49_spill] sm:$0xff] }
 0x678   : > { %v12408_v10 = vpop.f32.mrf.mxu1 }
 0x679   : > { %v8769_v53 = vmul.f32 %v19278_v15, %v8625_v29  ;;  %v8815_v3 = vadd.f32 %v8814_v47, %v8768_v30  ;;  %v8628_v8 = vadd.f32 %v12408_v10, %v8210_v62 }
 0x67a   : > { %v8572_v18 = vpop.f32.mrf.mxu1 }
 0x67b   : > { %v8816_v21 = vadd.f32 %v8815_v3, %v8769_v53  ;;  %v8627_v37 = vadd.f32 %v8572_v18, %v8209_v44  ;;  %v8772_v50 = vmul.f32 %v19281_v11, %v8628_v8 }
 0x67d   : > { %v8771_v24 = vmul.f32 %v19280_v0, %v8627_v37  ;;  %v8817_v26 = vadd.f32 %v8816_v21, %v8770_v57  ;;  %v19285_v57 = vld [vmem:[#allocation25_spill] sm:$0xff] }
 0x67f   : > { %v8818_v13 = vadd.f32 %v8817_v26, %v8771_v24 }
 0x681   : > { %v8819_v27 = vadd.f32 %v8818_v13, %v8772_v50  ;;  %v19286_v50 = vld [vmem:[#allocation69_spill] sm:$0xff] }
 0x683   : > { %v8820_v22 = vrot.slane %v8819_v27, 4 }
 0x685   : > { %v8821_v20 = vadd.f32 %v8820_v22, %v8819_v27 }
 0x687   : > { %v8822_v9 = vrot.slane %v8821_v20, 2 }
 0x689   : > { %v8823_v41 = vadd.f32 %v8822_v9, %v8821_v20  ;;  %v19287_v20 = vld [vmem:[#allocation30_spill] sm:$0xff] }
 0x68b   : > { %v8824_v59 = vrot.slane %v8823_v41, 1 }
 0x68d   : > { %v8825_v17 = vadd.f32 %v8824_v59, %v8823_v41  ;;  %v19288_v41 = vld [vmem:[#allocation72_spill] sm:$0xff] }
 0x68f   : > { %v17560_v30 = vmul.f32 0.00390625, %v8825_v17 }
 0x691   : > { %v17564_v47 = vsub.f32 %v17480_v61, %v17560_v30  ;;  %v17568_v10 = vsub.f32 %v17492_v5, %v17560_v30  ;;  %v17572_v24 = vsub.f32 %v17490_v54, %v17560_v30  ;;  %v17576_v26 = vsub.f32 %v17504_v55, %v17560_v30 }
 0x692   : > { %v17580_v62 = vsub.f32 %v17502_v49, %v17560_v30  ;;  %v17584_v61 = vsub.f32 %v17516_v60, %v17560_v30  ;;  %v17588_v5 = vsub.f32 %v17514_v36, %v17560_v30  ;;  %v17592_v54 = vsub.f32 %v17528_v7, %v17560_v30 }
 0x693   : > { %v17596_v55 = vsub.f32 %v17526_v19, %v17560_v30  ;;  %v17600_v49 = vsub.f32 %v17538_v12, %v17560_v30  ;;  %v17604_v60 = vsub.f32 %v17536_v33, %v17560_v30  ;;  %v17607_v44 = vsub.f32 %v8621_v23, %v17560_v30 }
 0x694   : > { %v17610_v36 = vsub.f32 %v8622_v1, %v17560_v30  ;;  %v17613_v7 = vsub.f32 %v8623_v4, %v17560_v30  ;;  %v17616_v19 = vsub.f32 %v8624_v38, %v17560_v30  ;;  %v17619_v53 = vsub.f32 %v8625_v29, %v17560_v30  ;;  %v19282_v1 = vld [vmem:[#allocation59_spill] sm:$0xff]  ;;  %v19283_v4 = vld [vmem:[#allocation58_spill] sm:$0xff] }
 0x695   : > { %v17622_v12 = vsub.f32 %v8626_v43, %v17560_v30  ;;  %v17625_v33 = vsub.f32 %v8627_v37, %v17560_v30  ;;  %v17628_v23 = vsub.f32 %v8628_v8, %v17560_v30  ;;  %v17632_v3 = vsub.f32 %v19282_v1, %v17560_v30  ;;  %v19284_v43 = vld [vmem:[#allocation27_spill] sm:$0xff] }
 0x696   : > { %v17636_v38 = vsub.f32 %v19283_v4, %v17560_v30  ;;  %v17640_v29 = vsub.f32 %v17302_v28, %v17560_v30  ;;  %v17648_v8 = vsub.f32 %v17300_v35, %v17560_v30  ;;  %v17652_v37 = vsub.f32 %v17316_v51, %v17560_v30  ;;  %v19289_v4 = vld [vmem:[#allocation71_spill] sm:$0xff] }
 0x697   : > { %v8875_v18 = vmul.f32 %v19284_v43, %v17632_v3  ;;  %v17658_v22 = vsub.f32 %v17314_v16, %v17560_v30  ;;  %v17664_v35 = vsub.f32 %v17330_v31, %v17560_v30  ;;  %v17670_v1 = vsub.f32 %v17328_v48, %v17560_v30  ;;  %v19290_v31 = vld [vmem:[#allocation75_spill] sm:$0xff]  ;;  %v19291_v48 = vld [vmem:[#allocation74_spill] sm:$0xff] }
 0x698   : > { %v8876_v21 = vmul.f32 %v19285_v57, %v17636_v38  ;;  %v8877_v13 = vmul.f32 %v19286_v50, %v17640_v29  ;;  %v8878_v9 = vmul.f32 %v19287_v20, %v17648_v8  ;;  %v8879_v51 = vmul.f32 %v19288_v41, %v17652_v37 }
 0x699   : > { %v8923_v27 = vmul.f32 %v8875_v18, %v8875_v18  ;;  %v8880_v16 = vmul.f32 %v19289_v4, %v17658_v22  ;;  %v17676_v57 = vsub.f32 %v17344_v63, %v17560_v30  ;;  %v19292_v63 = vld [vmem:[#allocation78_spill] sm:$0xff] }
 0x69a   : > { %v8924_v28 = vmul.f32 %v8876_v21, %v8876_v21  ;;  %v8925_v59 = vmul.f32 %v8877_v13, %v8877_v13  ;;  %v8926_v43 = vmul.f32 %v8878_v9, %v8878_v9  ;;  %v8881_v21 = vmul.f32 %v19290_v31, %v17664_v35 }
 0x69b   : > { %v8927_v50 = vmul.f32 %v8879_v51, %v8879_v51  ;;  %v17682_v13 = vsub.f32 %v17342_v46, %v17560_v30  ;;  %v17688_v9 = vsub.f32 %v17358_v58, %v17560_v30  ;;  %v17694_v51 = vsub.f32 %v17356_v2, %v17560_v30  ;;  %v19293_v46 = vld [vmem:[#allocation77_spill] sm:$0xff]  ;;  %v19294_v58 = vld [vmem:[#allocation55_spill] sm:$0xff]  ;;  %v19295_v2 = vld [vmem:[#allocation80_spill] sm:$0xff] }
 0x69c   : > { %v8971_v17 = vadd.f32 %v8924_v28, %v8923_v27  ;;  %v8882_v27 = vmul.f32 %v19291_v48, %v17670_v1  ;;  %v8928_v28 = vmul.f32 %v8880_v16, %v8880_v16  ;;  %v17700_v16 = vsub.f32 %v17372_v56, %v17560_v30  ;;  %v19296_v56 = vld [vmem:[#allocation57_spill] sm:$0xff] }
 0x69e   : > { %v8972_v18 = vadd.f32 %v8971_v17, %v8925_v59  ;;  %v8883_v59 = vmul.f32 %v19292_v63, %v17676_v57  ;;  %v8929_v17 = vmul.f32 %v8881_v21, %v8881_v21  ;;  %v17706_v21 = vsub.f32 %v17370_v52, %v17560_v30  ;;  %v19297_v52 = vld [vmem:[#allocation56_spill] sm:$0xff] }
 0x6a0   : > { %v8973_v20 = vadd.f32 %v8972_v18, %v8926_v43  ;;  %v8884_v43 = vmul.f32 %v19293_v46, %v17682_v13  ;;  %v8930_v18 = vmul.f32 %v8882_v27, %v8882_v27  ;;  %v17712_v27 = vsub.f32 %v17386_v32, %v17560_v30  ;;  %v19298_v32 = vld [vmem:[#allocation65_spill] sm:$0xff] }
 0x6a2   : > { %v8974_v41 = vadd.f32 %v8973_v20, %v8927_v50  ;;  %v8885_v50 = vmul.f32 %v19294_v58, %v17688_v9  ;;  %v8931_v20 = vmul.f32 %v8883_v59, %v8883_v59  ;;  %v17718_v59 = vsub.f32 %v17384_v25, %v17560_v30  ;;  %v19300_v25 = vld [vmem:[#allocation62_spill] sm:$0xff] }
 0x6a4   : > { %v8975_v4 = vadd.f32 %v8974_v41, %v8928_v28  ;;  %v8886_v28 = vmul.f32 %v19295_v2, %v17694_v51  ;;  %v8932_v41 = vmul.f32 %v8884_v43, %v8884_v43  ;;  %v17724_v43 = vsub.f32 %v17400_v40, %v17560_v30  ;;  %v19302_v40 = vld [vmem:[#allocation68_spill] sm:$0xff] }
 0x6a6   : > { %v8976_v31 = vadd.f32 %v8975_v4, %v8929_v17  ;;  %v8887_v17 = vmul.f32 %v19296_v56, %v17700_v16  ;;  %v8933_v4 = vmul.f32 %v8885_v50, %v8885_v50  ;;  %v17730_v50 = vsub.f32 %v17398_v6, %v17560_v30  ;;  %v19304_v6 = vld [vmem:[#allocation43_spill] sm:$0xff] }
 0x6a8   : > { %v8977_v48 = vadd.f32 %v8976_v31, %v8930_v18  ;;  %v8888_v18 = vmul.f32 %v19297_v52, %v17706_v21  ;;  %v8934_v31 = vmul.f32 %v8886_v28, %v8886_v28  ;;  %19299 = vst [vmem:[#allocation91_spill] sm:$0xff] %v17730_v50  ;;  %v17736_v28 = vsub.f32 %v17414_v45, %v17560_v30  ;;  %v19306_v45 = vld [vmem:[#allocation17_spill] sm:$0xff] }
 0x6aa   : > { %v8978_v63 = vadd.f32 %v8977_v48, %v8931_v20  ;;  %v8889_v20 = vmul.f32 %v19298_v32, %v17712_v27  ;;  %v8935_v48 = vmul.f32 %v8887_v17, %v8887_v17  ;;  %19301 = vst [vmem:[#allocation92_spill] sm:$0xff] %v17736_v28  ;;  %v17742_v17 = vsub.f32 %v17412_v34, %v17560_v30  ;;  %v19308_v34 = vld [vmem:[#allocation14_spill] sm:$0xff] }
 0x6ac   : > { %v8979_v46 = vadd.f32 %v8978_v63, %v8932_v41  ;;  %v8890_v41 = vmul.f32 %v19300_v25, %v17718_v59  ;;  %v8936_v63 = vmul.f32 %v8888_v18, %v8888_v18  ;;  %19303 = vst [vmem:[#allocation96_spill] sm:$0xff] %v17742_v17  ;;  %v17748_v18 = vsub.f32 %v17428_v42, %v17560_v30  ;;  %v19311_v42 = vld [vmem:[#allocation82_spill] sm:$0xff] }
 0x6ae   : > { %v8980_v58 = vadd.f32 %v8979_v46, %v8933_v4  ;;  %v8891_v4 = vmul.f32 %v19302_v40, %v17724_v43  ;;  %v8937_v46 = vmul.f32 %v8889_v20, %v8889_v20  ;;  %19305 = vst [vmem:[#allocation93_spill] sm:$0xff] %v17748_v18  ;;  %v17754_v20 = vsub.f32 %v17426_v14, %v17560_v30  ;;  %v19314_v14 = vld [vmem:[#allocation81_spill] sm:$0xff] }
 0x6b0   : > { %v8981_v2 = vadd.f32 %v8980_v58, %v8934_v31  ;;  %v8892_v31 = vmul.f32 %v19304_v6, %v17730_v50  ;;  %v8938_v58 = vmul.f32 %v8890_v41, %v8890_v41  ;;  %19307 = vst [vmem:[#allocation94_spill] sm:$0xff] %v17754_v20  ;;  %v19309_v41 = vld [vmem:[#allocation39_spill] sm:$0xff] }
 0x6b2   : > { %v8982_v56 = vadd.f32 %v8981_v2, %v8935_v48  ;;  %v8893_v48 = vmul.f32 %v19306_v45, %v17736_v28  ;;  %v8939_v2 = vmul.f32 %v8891_v4, %v8891_v4  ;;  %v19312_v4 = vld [vmem:[#allocation15_spill] sm:$0xff] }
 0x6b4   : > { %v8983_v52 = vadd.f32 %v8982_v56, %v8936_v63  ;;  %v8894_v63 = vmul.f32 %v19308_v34, %v17742_v17  ;;  %v8940_v56 = vmul.f32 %v8892_v31, %v8892_v31  ;;  %v8941_v6 = vmul.f32 %v8893_v48, %v8893_v48  ;;  %v19315_v31 = vld [vmem:[#allocation87_spill] sm:$0xff] }
 0x6b5   : > { %v19318_v48 = vld [vmem:[#allocation23_spill] sm:$0xff] }
 0x6b6   : > { %v8984_v32 = vadd.f32 %v8983_v52, %v8937_v46  ;;  %v17760_v46 = vsub.f32 %v19309_v41, %v17560_v30  ;;  %v8895_v52 = vmul.f32 %v19311_v42, %v17748_v18  ;;  %v8942_v28 = vmul.f32 %v8894_v63, %v8894_v63  ;;  %v19320_v63 = vld [vmem:[#allocation89_spill] sm:$0xff] }
 0x6b8   : > { %v8985_v25 = vadd.f32 %v8984_v32, %v8938_v58  ;;  %19310 = vst [vmem:[#allocation99_spill] sm:$0xff] %v17760_v46  ;;  %v17766_v58 = vsub.f32 %v19312_v4, %v17560_v30  ;;  %v8896_v32 = vmul.f32 %v19314_v14, %v17754_v20  ;;  %v8943_v17 = vmul.f32 %v8895_v52, %v8895_v52 }
 0x6ba   : > { %v8986_v40 = vadd.f32 %v8985_v25, %v8939_v2  ;;  %19313 = vst [vmem:[#allocation100_spill] sm:$0xff] %v17766_v58  ;;  %v17772_v2 = vsub.f32 %v19315_v31, %v17560_v30  ;;  %v19317_v25 = vld [vmem:[#allocation18_spill] sm:$0xff]  ;;  %v8944_v18 = vmul.f32 %v8896_v32, %v8896_v32 }
 0x6bb   : > { %v8897_v41 = vmul.f32 %v19317_v25, %v17760_v46 }
 0x6bc   : > { %v8987_v45 = vadd.f32 %v8986_v40, %v8940_v56  ;;  %19316 = vst [vmem:[#allocation95_spill] sm:$0xff] %v17772_v2  ;;  %v17778_v56 = vsub.f32 %v19318_v48, %v17560_v30  ;;  %v19319_v40 = vld [vmem:[#allocation83_spill] sm:$0xff] }
 0x6bd   : > { %v8898_v4 = vmul.f32 %v19319_v40, %v17766_v58  ;;  %v8945_v20 = vmul.f32 %v8897_v41, %v8897_v41  ;;  %v19326_v58 = vld [vmem:[#allocation90_spill] sm:$0xff] }
 0x6be   : > { %v8988_v34 = vadd.f32 %v8987_v45, %v8941_v6  ;;  %v17784_v6 = vsub.f32 %v19320_v63, %v17560_v30  ;;  %v19322_v45 = vld [vmem:[#allocation36_spill] sm:$0xff]  ;;  %v17798_v50 = vsub.f32 %v19326_v58, %v17560_v30 }
 0x6bf   : > { %v8899_v31 = vmul.f32 %v19322_v45, %v17772_v2  ;;  %v8946_v46 = vmul.f32 %v8898_v4, %v8898_v4 }
 0x6c0   : > { %v8989_v42 = vadd.f32 %v8988_v34, %v8942_v28  ;;  %19321 = vst [vmem:[#allocation97_spill] sm:$0xff] %v17784_v6  ;;  %v19323_v28 = vld [vmem:[#allocation88_spill] sm:$0xff]  ;;  %v19324_v34 = vld [vmem:[#allocation19_spill] sm:$0xff] }
 0x6c1   : > { %v17790_v52 = vsub.f32 %v19323_v28, %v17560_v30  ;;  %v8900_v48 = vmul.f32 %v19324_v34, %v17778_v56  ;;  %v19328_v28 = vld [vmem:[#allocation22_spill] sm:$0xff] }
 0x6c2   : > { %v8990_v14 = vadd.f32 %v8989_v42, %v8943_v17  ;;  %v19325_v17 = vld [vmem:[#allocation42_spill] sm:$0xff]  ;;  %v8947_v42 = vmul.f32 %v8899_v31, %v8899_v31  ;;  %v8903_v2 = vmul.f32 %v19328_v28, %v17564_v47 }
 0x6c3   : > { %v8901_v32 = vmul.f32 %v19325_v17, %v17784_v6  ;;  %v19331_v6 = vld [vmem:[#allocation34_spill] sm:$0xff] }
 0x6c4   : > { %v8991_v25 = vadd.f32 %v8990_v14, %v8944_v18  ;;  %v19327_v18 = vld [vmem:[#allocation70_spill] sm:$0xff]  ;;  %v8948_v14 = vmul.f32 %v8900_v48, %v8900_v48  ;;  %v8951_v30 = vmul.f32 %v8903_v2, %v8903_v2 }
 0x6c5   : > { %v8902_v41 = vmul.f32 %v19327_v18, %v17790_v52  ;;  %v8949_v34 = vmul.f32 %v8901_v32, %v8901_v32  ;;  %v8906_v18 = vmul.f32 %v19331_v6, %v17572_v24 }
 0x6c6   : > { %v8992_v40 = vadd.f32 %v8991_v25, %v8945_v20  ;;  %v19329_v20 = vld [vmem:[#allocation32_spill] sm:$0xff] }
 0x6c7   : > { %v8904_v25 = vmul.f32 %v19329_v20, %v17798_v50  ;;  %v8950_v17 = vmul.f32 %v8902_v41, %v8902_v41  ;;  %v8954_v41 = vmul.f32 %v8906_v18, %v8906_v18 }
 0x6c8   : > { %v8993_v63 = vadd.f32 %v8992_v40, %v8946_v46  ;;  %v19330_v46 = vld [vmem:[#allocation24_spill] sm:$0xff] }
 0x6c9   : > { %v8905_v40 = vmul.f32 %v19330_v46, %v17568_v10  ;;  %v8952_v48 = vmul.f32 %v8904_v25, %v8904_v25 }
 0x6ca   : > { %v8994_v45 = vadd.f32 %v8993_v63, %v8947_v42  ;;  %v19332_v63 = vld [vmem:[#allocation35_spill] sm:$0xff] }
 0x6cb   : > { %v8907_v28 = vmul.f32 %v19332_v63, %v17576_v26  ;;  %v8953_v32 = vmul.f32 %v8905_v40, %v8905_v40 }
 0x6cc   : > { %v8995_v4 = vadd.f32 %v8994_v45, %v8948_v14  ;;  %v19333_v45 = vld [vmem:[#allocation79_spill] sm:$0xff] }
 0x6cd   : > { %v8908_v20 = vmul.f32 %v19333_v45, %v17580_v62  ;;  %v8955_v2 = vmul.f32 %v8907_v28, %v8907_v28 }
 0x6ce   : > { %v8996_v31 = vadd.f32 %v8995_v4, %v8949_v34  ;;  %v19334_v4 = vld [vmem:[#allocation37_spill] sm:$0xff] }
 0x6cf   : > { %v8909_v46 = vmul.f32 %v19334_v4, %v17584_v61  ;;  %v8956_v25 = vmul.f32 %v8908_v20, %v8908_v20 }
 0x6d0   : > { %v8997_v58 = vadd.f32 %v8996_v31, %v8950_v17  ;;  %v19335_v31 = vld [vmem:[#allocation28_spill] sm:$0xff] }
 0x6d1   : > { %v8910_v6 = vmul.f32 %v19335_v31, %v17588_v5  ;;  %v8957_v40 = vmul.f32 %v8909_v46, %v8909_v46 }
 0x6d2   : > { %v8998_v42 = vadd.f32 %v8997_v58, %v8951_v30  ;;  %v19336_v58 = vld [vmem:[#allocation40_spill] sm:$0xff] }
 0x6d3   : > { %v8911_v63 = vmul.f32 %v19336_v58, %v17592_v54  ;;  %v8958_v18 = vmul.f32 %v8910_v6, %v8910_v6 }
 0x6d4   : > { %v8999_v14 = vadd.f32 %v8998_v42, %v8952_v48  ;;  %v19337_v42 = vld [vmem:[#allocation61_spill] sm:$0xff] }
 0x6d5   : > { %v8912_v45 = vmul.f32 %v19337_v42, %v17596_v55  ;;  %v8959_v28 = vmul.f32 %v8911_v63, %v8911_v63 }
 0x6d6   : > { %v9000_v34 = vadd.f32 %v8999_v14, %v8953_v32  ;;  %v19338_v14 = vld [vmem:[#allocation46_spill] sm:$0xff] }
 0x6d7   : > { %v8913_v4 = vmul.f32 %v19338_v14, %v17600_v49  ;;  %v8960_v20 = vmul.f32 %v8912_v45, %v8912_v45 }
 0x6d8   : > { %v9001_v17 = vadd.f32 %v9000_v34, %v8954_v41  ;;  %v19339_v34 = vld [vmem:[#allocation64_spill] sm:$0xff] }
 0x6d9   : > { %v8914_v31 = vmul.f32 %v19339_v34, %v17604_v60  ;;  %v8961_v46 = vmul.f32 %v8913_v4, %v8913_v4 }
 0x6da   : > { %v9002_v30 = vadd.f32 %v9001_v17, %v8955_v2  ;;  %v19340_v17 = vld [vmem:[#allocation13_spill] sm:$0xff] }
 0x6db   : > { %v8915_v58 = vmul.f32 %v19340_v17, %v17607_v44  ;;  %v8962_v6 = vmul.f32 %v8914_v31, %v8914_v31 }
 0x6dc   : > { %v9003_v48 = vadd.f32 %v9002_v30, %v8956_v25  ;;  %v19341_v30 = vld [vmem:[#allocation63_spill] sm:$0xff] }
 0x6dd   : > { %v8916_v42 = vmul.f32 %v19341_v30, %v17610_v36  ;;  %v8963_v63 = vmul.f32 %v8915_v58, %v8915_v58  ;;  %v8922_v30 = vmul.f32 %v19281_v11, %v17628_v23 }
 0x6de   : > { %v9004_v32 = vadd.f32 %v9003_v48, %v8957_v40  ;;  %v19342_v48 = vld [vmem:[#allocation47_spill] sm:$0xff] }
 0x6df   : > { %v8917_v14 = vmul.f32 %v19342_v48, %v17613_v7  ;;  %v8964_v45 = vmul.f32 %v8916_v42, %v8916_v42  ;;  %v8970_v48 = vmul.f32 %v8922_v30, %v8922_v30 }
 0x6e0   : > { %v9005_v41 = vadd.f32 %v9004_v32, %v8958_v18  ;;  %v19343_v32 = vld [vmem:[#allocation66_spill] sm:$0xff] }
 0x6e1   : > { %v8918_v34 = vmul.f32 %v19343_v32, %v17616_v19  ;;  %v8965_v4 = vmul.f32 %v8917_v14, %v8917_v14 }
 0x6e2   : > { %v9006_v2 = vadd.f32 %v9005_v41, %v8959_v28  ;;  %v8919_v41 = vmul.f32 %v19278_v15, %v17619_v53 }
 0x6e3   : > { %v8966_v31 = vmul.f32 %v8918_v34, %v8918_v34 }
 0x6e4   : > { %v9007_v25 = vadd.f32 %v9006_v2, %v8960_v20  ;;  %v8920_v2 = vmul.f32 %v19279_v39, %v17622_v12  ;;  %v8967_v58 = vmul.f32 %v8919_v41, %v8919_v41 }
 0x6e6   : > { %v9008_v40 = vadd.f32 %v9007_v25, %v8961_v46  ;;  %v8921_v46 = vmul.f32 %v19280_v0, %v17625_v33  ;;  %v8968_v42 = vmul.f32 %v8920_v2, %v8920_v2 }
 0x6e8   : > { %v9009_v18 = vadd.f32 %v9008_v40, %v8962_v6  ;;  %v8969_v40 = vmul.f32 %v8921_v46, %v8921_v46 }
 0x6ea   : > { %v9010_v28 = vadd.f32 %v9009_v18, %v8963_v63 }
 0x6ec   : > { %v9011_v20 = vadd.f32 %v9010_v28, %v8964_v45 }
 0x6ee   : > { %v9012_v17 = vadd.f32 %v9011_v20, %v8965_v4  ;;  %v9073_v4 = vld [vmem:[%s12813_s9 + $0x189] sm:$0xff] }
 0x6f0   : > { %v9013_v25 = vadd.f32 %v9012_v17, %v8966_v31 }
 0x6f2   : > { %v9014_v6 = vadd.f32 %v9013_v25, %v8967_v58  ;;  %v19345_v25 = vld [vmem:[#allocation92_spill] sm:$0xff] }
 0x6f4   : > { %v9015_v15 = vadd.f32 %v9014_v6, %v8968_v42  ;;  %v19348_v6 = vld [vmem:[#allocation94_spill] sm:$0xff] }
 0x6f6   : > { %v9016_v14 = vadd.f32 %v9015_v15, %v8969_v40  ;;  %v19349_v15 = vld [vmem:[#allocation99_spill] sm:$0xff] }
 0x6f8   : > { %v9017_v63 = vadd.f32 %v9016_v14, %v8970_v48  ;;  %v19350_v14 = vld [vmem:[#allocation100_spill] sm:$0xff] }
 0x6fa   : > { %v9018_v39 = vrot.slane %v9017_v63, 4 }
 0x6fc   : > { %v9019_v18 = vadd.f32 %v9018_v39, %v9017_v63  ;;  %v19351_v39 = vld [vmem:[#allocation95_spill] sm:$0xff] }
 0x6fe   : > { %v9020_v32 = vrot.slane %v9019_v18, 2 }
 0x700   : > { %v9021_v34 = vadd.f32 %v9020_v32, %v9019_v18 }
 0x702   : > { %v9022_v45 = vrot.slane %v9021_v34, 1 }
 0x704   : > { %v9023_v0 = vadd.f32 %v9022_v45, %v9021_v34  ;;  %v9028_v34 = vld [vmem:[%s12813_s9 + $0x21] sm:$0xff]  ;;  %v9027_v45 = vld [vmem:[%s12813_s9 + $0x19] sm:$0xff] }
 0x706   : > { %v9024_v28 = vmul.f32 0.00390625, %v9023_v0  ;;  %v19352_v0 = vld [vmem:[#allocation97_spill] sm:$0xff] }
 0x708   : > { %v9025_v41 = vadd.f32 1e-05, %v9024_v28 }
 0x70a   : > { %12488 = vrsqrt.f32 %v9025_v41 }
 0x717   : > { %v17843_v11 = vpop.eup %12488 }
 0x718   : > { %v9121_v20 = vmul.f32 %v17843_v11, %v17625_v33  ;;  %v17850_v2 = vmul.f32 %v17843_v11, %v17632_v3  ;;  %v17854_v31 = vmul.f32 %v17843_v11, %v17636_v38  ;;  %v17858_v17 = vmul.f32 %v17843_v11, %v17640_v29 }
 0x719   : > { %v17862_v46 = vmul.f32 %v17843_v11, %v17648_v8  ;;  %v17866_v58 = vmul.f32 %v17843_v11, %v17652_v37  ;;  %v17870_v33 = vmul.f32 %v17843_v11, %v17658_v22  ;;  %v17874_v3 = vmul.f32 %v17843_v11, %v17664_v35 }
 0x71a   : > { %v9169_v38 = vadd.f32 %v9121_v20, %v9073_v4  ;;  %v17878_v29 = vmul.f32 %v17843_v11, %v17670_v1  ;;  %v17882_v8 = vmul.f32 %v17843_v11, %v17676_v57  ;;  %v17886_v37 = vmul.f32 %v17843_v11, %v17682_v13  ;;  %v9030_v20 = vld [vmem:[%s12813_s9 + $0x31] sm:$0xff] }
 0x71b   : > { %v17890_v22 = vmul.f32 %v17843_v11, %v17688_v9  ;;  %v17894_v35 = vmul.f32 %v17843_v11, %v17694_v51  ;;  %v17898_v1 = vmul.f32 %v17843_v11, %v17700_v16  ;;  %v17902_v57 = vmul.f32 %v17843_v11, %v17706_v21  ;;  %v19344_v16 = vld [vmem:[#allocation91_spill] sm:$0xff] }
 0x71c   : > { %9217 = vst [vmem:[%s17904_s20 + $0x170] sm:$0xff] %v9169_v38  ;;  %v17909_v13 = vmul.f32 %v17843_v11, %v17712_v27  ;;  %v17913_v9 = vmul.f32 %v17843_v11, %v17718_v59  ;;  %v17917_v51 = vmul.f32 %v17843_v11, %v17724_v43  ;;  %v17921_v21 = vmul.f32 %v17843_v11, %v19344_v16  ;;  %v19346_v27 = vld [vmem:[#allocation96_spill] sm:$0xff]  ;;  %v19347_v59 = vld [vmem:[#allocation93_spill] sm:$0xff] }
 0x71d   : > { %v17925_v30 = vmul.f32 %v17843_v11, %v19345_v25  ;;  %v17929_v42 = vmul.f32 %v17843_v11, %v19346_v27  ;;  %v17933_v43 = vmul.f32 %v17843_v11, %v19347_v59  ;;  %v17937_v40 = vmul.f32 %v17843_v11, %v19348_v6  ;;  %v9029_v38 = vld [vmem:[%s12813_s9 + $0x29] sm:$0xff]  ;;  %v9032_v16 = vld [vmem:[%s12813_s9 + $0x41] sm:$0xff]  ;;  %v9031_v25 = vld [vmem:[%s12813_s9 + $0x39] sm:$0xff] }
 0x71e   : > { %v17941_v48 = vmul.f32 %v17843_v11, %v19349_v15  ;;  %v17945_v63 = vmul.f32 %v17843_v11, %v19350_v14  ;;  %v17949_v18 = vmul.f32 %v17843_v11, %v19351_v39  ;;  %v17953_v32 = vmul.f32 %v17843_v11, %v17778_v56  ;;  %v9034_v59 = vld [vmem:[%s12813_s9 + $0x51] sm:$0xff]  ;;  %v9033_v6 = vld [vmem:[%s12813_s9 + $0x49] sm:$0xff]  ;;  %v9036_v15 = vld [vmem:[%s12813_s9 + $0x61] sm:$0xff] }
 0x71f   : > { %v17959_v28 = vmul.f32 %v17843_v11, %v19352_v0  ;;  %v17963_v41 = vmul.f32 %v17843_v11, %v17790_v52  ;;  %v17967_v4 = vmul.f32 %v17843_v11, %v17564_v47  ;;  %v17971_v56 = vmul.f32 %v17843_v11, %v17798_v50  ;;  %v9038_v39 = vld [vmem:[%s12813_s9 + $0x71] sm:$0xff]  ;;  %v9037_v0 = vld [vmem:[%s12813_s9 + $0x69] sm:$0xff] }
 0x720   : > { %v17979_v52 = vmul.f32 %v17843_v11, %v17568_v10  ;;  %v17983_v47 = vmul.f32 %v17843_v11, %v17572_v24  ;;  %v17987_v50 = vmul.f32 %v17843_v11, %v17576_v26  ;;  %v17991_v27 = vmul.f32 %v17843_v11, %v17580_v62  ;;  %v9035_v10 = vld [vmem:[%s12813_s9 + $0x59] sm:$0xff] }
 0x721   : > { %v17999_v24 = vmul.f32 %v17843_v11, %v17584_v61  ;;  %v18003_v26 = vmul.f32 %v17843_v11, %v17588_v5  ;;  %v18007_v62 = vmul.f32 %v17843_v11, %v17592_v54  ;;  %v18011_v14 = vmul.f32 %v17843_v11, %v17596_v55  ;;  %v9039_v61 = vld [vmem:[%s12813_s9 + $0x79] sm:$0xff] }
 0x722   : > { %19353 = vst [vmem:[#allocation103_spill] sm:$0xff] %v17983_v47  ;;  %19354 = vst [vmem:[#allocation104_spill] sm:$0xff] %v17987_v50  ;;  %v18019_v5 = vmul.f32 %v17843_v11, %v17600_v49  ;;  %v18023_v54 = vmul.f32 %v17843_v11, %v17604_v60  ;;  %v18027_v55 = vmul.f32 %v17843_v11, %v17607_v44  ;;  %v9043_v49 = vld [vmem:[%s12813_s9 + $0x99] sm:$0xff] }
 0x723   : > { %19355 = vst [vmem:[#allocation98_spill] sm:$0xff] %v17991_v27  ;;  %19356 = vst [vmem:[#allocation101_spill] sm:$0xff] %v17999_v24  ;;  %v9040_v27 = vld [vmem:[%s12813_s9 + $0x81] sm:$0xff]  ;;  %v18039_v60 = vmul.f32 %v17843_v11, %v17613_v7  ;;  %v18043_v44 = vmul.f32 %v17843_v11, %v17616_v19  ;;  %v9047_v7 = vld [vmem:[%s12813_s9 + $0xb9] sm:$0xff]  ;;  %v9123_v19 = vadd.f32 %v17850_v2, %v9027_v45 }
 0x724   : > { %19357 = vst [vmem:[#allocation102_spill] sm:$0xff] %v18003_v26  ;;  %19358 = vst [vmem:[#allocation105_spill] sm:$0xff] %v18007_v62  ;;  %v9042_v62 = vld [vmem:[%s12813_s9 + $0x91] sm:$0xff]  ;;  %v9041_v26 = vld [vmem:[%s12813_s9 + $0x89] sm:$0xff]  ;;  %v9126_v47 = vadd.f32 %v17862_v46, %v9030_v20  ;;  %v9129_v2 = vadd.f32 %v17874_v3, %v9033_v6  ;;  %v9130_v45 = vadd.f32 %v17878_v29, %v9034_v59 }
 0x725   : > { %19359 = vst [vmem:[#allocation41_spill] sm:$0xff] %v18011_v14  ;;  %19360 = vst [vmem:[#allocation51_spill] sm:$0xff] %v18019_v5  ;;  %v18031_v14 = vmul.f32 %v17843_v11, %v17610_v36  ;;  %v9044_v24 = vld [vmem:[%s12813_s9 + $0xa1] sm:$0xff]  ;;  %v18047_v36 = vmul.f32 %v17843_v11, %v17619_v53  ;;  %v9124_v53 = vadd.f32 %v17854_v31, %v9028_v34  ;;  %v9051_v50 = vld [vmem:[%s12813_s9 + $0xd9] sm:$0xff] }
 0x726   : > { %19361 = vst [vmem:[#allocation16_spill] sm:$0xff] %v18023_v54  ;;  %19362 = vst [vmem:[#allocation52_spill] sm:$0xff] %v18027_v55  ;;  %v9046_v55 = vld [vmem:[%s12813_s9 + $0xb1] sm:$0xff]  ;;  %v9045_v54 = vld [vmem:[%s12813_s9 + $0xa9] sm:$0xff]  ;;  %v9132_v46 = vadd.f32 %v17886_v37, %v9036_v15  ;;  %v9134_v29 = vadd.f32 %v17894_v35, %v9038_v39  ;;  %v9136_v37 = vadd.f32 %v17902_v57, %v9040_v27 }
 0x727   : > { %19363 = vst [vmem:[#allocation50_spill] sm:$0xff] %v18031_v14  ;;  %19364 = vst [vmem:[#allocation85_spill] sm:$0xff] %v18039_v60  ;;  %v18051_v14 = vmul.f32 %v17843_v11, %v17622_v12  ;;  %v9048_v5 = vld [vmem:[%s12813_s9 + $0xc1] sm:$0xff]  ;;  %v18059_v60 = vmul.f32 %v17843_v11, %v17628_v23  ;;  %v9050_v12 = vld [vmem:[%s12813_s9 + $0xd1] sm:$0xff]  ;;  %v9127_v23 = vadd.f32 %v17866_v58, %v9031_v25 }
 0x728   : > { %19365 = vst [vmem:[#allocation84_spill] sm:$0xff] %v18043_v44  ;;  %19366 = vst [vmem:[#allocation29_spill] sm:$0xff] %v18047_v36  ;;  %v9125_v36 = vadd.f32 %v17858_v17, %v9029_v38  ;;  %v9052_v44 = vld [vmem:[%s12813_s9 + $0xe1] sm:$0xff]  ;;  %v9128_v11 = vadd.f32 %v17870_v33, %v9032_v16  ;;  %v9054_v31 = vld [vmem:[%s12813_s9 + $0xf1] sm:$0xff]  ;;  %v9131_v38 = vadd.f32 %v17882_v8, %v9035_v10 }
 0x729   : > { %19367 = vst [vmem:[#allocation26_spill] sm:$0xff] %v18051_v14  ;;  %v9049_v14 = vld [vmem:[%s12813_s9 + $0xc9] sm:$0xff]  ;;  %v9056_v34 = vld [vmem:[%s12813_s9 + $0x101] sm:$0xff]  ;;  %v9133_v58 = vadd.f32 %v17890_v22, %v9037_v0  ;;  %9171 = vst [vmem:[%s17904_s20] sm:$0xff] %v9123_v19  ;;  %v9135_v8 = vadd.f32 %v17898_v1, %v9039_v61  ;;  %v9137_v22 = vadd.f32 %v17909_v13, %v9041_v26 }
 0x72a   : > { %v9053_v17 = vld [vmem:[%s12813_s9 + $0xe9] sm:$0xff]  ;;  %9172 = vst [vmem:[%s17904_s20 + $0x8] sm:$0xff] %v9124_v53  ;;  %9173 = vst [vmem:[%s17904_s20 + $0x10] sm:$0xff] %v9125_v36  ;;  %v9055_v33 = vld [vmem:[%s12813_s9 + $0xf9] sm:$0xff]  ;;  %v9138_v35 = vadd.f32 %v17913_v9, %v9042_v62  ;;  %v9139_v1 = vadd.f32 %v17917_v51, %v9043_v49  ;;  %v9140_v57 = vadd.f32 %v17921_v21, %v9044_v24 }
 0x72b   : > { %v9058_v3 = vld [vmem:[%s12813_s9 + $0x111] sm:$0xff]  ;;  %v9057_v20 = vld [vmem:[%s12813_s9 + $0x109] sm:$0xff]  ;;  %9174 = vst [vmem:[%s17904_s20 + $0x18] sm:$0xff] %v9126_v47  ;;  %9175 = vst [vmem:[%s17904_s20 + $0x20] sm:$0xff] %v9127_v23  ;;  %v9141_v13 = vadd.f32 %v17925_v30, %v9045_v54  ;;  %v9142_v9 = vadd.f32 %v17929_v42, %v9046_v55  ;;  %v9143_v51 = vadd.f32 %v17933_v43, %v9047_v7 }
 0x72c   : > { %9176 = vst [vmem:[%s17904_s20 + $0x28] sm:$0xff] %v9128_v11  ;;  %9177 = vst [vmem:[%s17904_s20 + $0x30] sm:$0xff] %v9129_v2  ;;  %v9060_v16 = vld [vmem:[%s12813_s9 + $0x121] sm:$0xff]  ;;  %v9059_v25 = vld [vmem:[%s12813_s9 + $0x119] sm:$0xff]  ;;  %v9144_v21 = vadd.f32 %v17937_v40, %v9048_v5  ;;  %v9145_v30 = vadd.f32 %v17941_v48, %v9049_v14  ;;  %v9146_v24 = vadd.f32 %v17945_v63, %v9050_v12 }
 0x72d   : > { %v9062_v59 = vld [vmem:[%s12813_s9 + $0x131] sm:$0xff]  ;;  %9178 = vst [vmem:[%s17904_s20 + $0x38] sm:$0xff] %v9130_v45  ;;  %9179 = vst [vmem:[%s17904_s20 + $0x40] sm:$0xff] %v9131_v38  ;;  %v9061_v47 = vld [vmem:[%s12813_s9 + $0x129] sm:$0xff]  ;;  %v9147_v43 = vadd.f32 %v17949_v18, %v9051_v50  ;;  %v9148_v40 = vadd.f32 %v17953_v32, %v9052_v44  ;;  %v9149_v48 = vadd.f32 %v17959_v28, %v9053_v17 }
 0x72e   : > { %9180 = vst [vmem:[%s17904_s20 + $0x48] sm:$0xff] %v9132_v46  ;;  %9181 = vst [vmem:[%s17904_s20 + $0x50] sm:$0xff] %v9133_v58  ;;  %v9064_v27 = vld [vmem:[%s12813_s9 + $0x141] sm:$0xff]  ;;  %v9063_v6 = vld [vmem:[%s12813_s9 + $0x139] sm:$0xff]  ;;  %v9150_v18 = vadd.f32 %v17963_v41, %v9054_v31  ;;  %v9151_v32 = vadd.f32 %v17967_v4, %v9055_v33  ;;  %v9152_v28 = vadd.f32 %v17971_v56, %v9056_v34 }
 0x72f   : > { %9182 = vst [vmem:[%s17904_s20 + $0x58] sm:$0xff] %v9134_v29  ;;  %9183 = vst [vmem:[%s17904_s20 + $0x60] sm:$0xff] %v9135_v8  ;;  %v9066_v15 = vld [vmem:[%s12813_s9 + $0x151] sm:$0xff]  ;;  %v9065_v10 = vld [vmem:[%s12813_s9 + $0x149] sm:$0xff]  ;;  %v9153_v50 = vadd.f32 %v17979_v52, %v9057_v20 }
 0x730   : > { %9184 = vst [vmem:[%s17904_s20 + $0x68] sm:$0xff] %v9136_v37  ;;  %9185 = vst [vmem:[%s17904_s20 + $0x70] sm:$0xff] %v9137_v22  ;;  %v9068_v42 = vld [vmem:[%s12813_s9 + $0x161] sm:$0xff]  ;;  %v9067_v26 = vld [vmem:[%s12813_s9 + $0x159] sm:$0xff] }
 0x731   : > { %9186 = vst [vmem:[%s17904_s20 + $0x78] sm:$0xff] %v9138_v35  ;;  %9187 = vst [vmem:[%s17904_s20 + $0x80] sm:$0xff] %v9139_v1  ;;  %v9070_v63 = vld [vmem:[%s12813_s9 + $0x171] sm:$0xff]  ;;  %v9069_v62 = vld [vmem:[%s12813_s9 + $0x169] sm:$0xff] }
 0x732   : > { %9188 = vst [vmem:[%s17904_s20 + $0x88] sm:$0xff] %v9140_v57  ;;  %9189 = vst [vmem:[%s17904_s20 + $0x90] sm:$0xff] %v9141_v13  ;;  %v9072_v14 = vld [vmem:[%s12813_s9 + $0x181] sm:$0xff]  ;;  %v9071_v39 = vld [vmem:[%s12813_s9 + $0x179] sm:$0xff] }
 0x733   : > { %9190 = vst [vmem:[%s17904_s20 + $0x98] sm:$0xff] %v9142_v9  ;;  %9191 = vst [vmem:[%s17904_s20 + $0xa0] sm:$0xff] %v9143_v51  ;;  %v9074_v0 = vld [vmem:[%s12813_s9 + $0x191] sm:$0xff]  ;;  %v19369_v4 = vld [vmem:[#allocation104_spill] sm:$0xff] }
 0x734   : > { %9192 = vst [vmem:[%s17904_s20 + $0xa8] sm:$0xff] %v9144_v21  ;;  %9193 = vst [vmem:[%s17904_s20 + $0xb0] sm:$0xff] %v9145_v30  ;;  %v19368_v41 = vld [vmem:[#allocation103_spill] sm:$0xff]  ;;  %v9155_v5 = vadd.f32 %v19369_v4, %v9059_v25  ;;  %v19370_v56 = vld [vmem:[#allocation98_spill] sm:$0xff]  ;;  %v9170_v37 = vadd.f32 %v18059_v60, %v9074_v0 }
 0x735   : > { %v9154_v61 = vadd.f32 %v19368_v41, %v9058_v3  ;;  %v9156_v54 = vadd.f32 %v19370_v56, %v9060_v16  ;;  %v19371_v55 = vld [vmem:[#allocation101_spill] sm:$0xff]  ;;  %9194 = vst [vmem:[%s17904_s20 + $0xb8] sm:$0xff] %v9146_v24  ;;  %9195 = vst [vmem:[%s17904_s20 + $0xc0] sm:$0xff] %v9147_v43  ;;  %v19372_v49 = vld [vmem:[#allocation102_spill] sm:$0xff] }
 0x736   : > { %v9157_v52 = vadd.f32 %v19371_v55, %v9061_v47  ;;  %9196 = vst [vmem:[%s17904_s20 + $0xc8] sm:$0xff] %v9148_v40  ;;  %9197 = vst [vmem:[%s17904_s20 + $0xd0] sm:$0xff] %v9149_v48  ;;  %v9158_v44 = vadd.f32 %v19372_v49, %v9062_v59  ;;  %v19373_v36 = vld [vmem:[#allocation105_spill] sm:$0xff]  ;;  %v19375_v12 = vld [vmem:[#allocation51_spill] sm:$0xff] }
 0x737   : > { %v9159_v7 = vadd.f32 %v19373_v36, %v9063_v6  ;;  %v19374_v19 = vld [vmem:[#allocation41_spill] sm:$0xff]  ;;  %v9161_v23 = vadd.f32 %v19375_v12, %v9065_v10  ;;  %9198 = vst [vmem:[%s17904_s20 + $0xd8] sm:$0xff] %v9150_v18  ;;  %9199 = vst [vmem:[%s17904_s20 + $0xe0] sm:$0xff] %v9151_v32  ;;  %v19376_v11 = vld [vmem:[#allocation16_spill] sm:$0xff] }
 0x738   : > { %v9160_v53 = vadd.f32 %v19374_v19, %v9064_v27  ;;  %9200 = vst [vmem:[%s17904_s20 + $0xe8] sm:$0xff] %v9152_v28  ;;  %9201 = vst [vmem:[%s17904_s20 + $0xf0] sm:$0xff] %v9153_v50  ;;  %v9162_v2 = vadd.f32 %v19376_v11, %v9066_v15  ;;  %v19377_v31 = vld [vmem:[#allocation52_spill] sm:$0xff]  ;;  %v19378_v34 = vld [vmem:[#allocation50_spill] sm:$0xff] }
 0x739   : > { %v9163_v17 = vadd.f32 %v19377_v31, %v9067_v26  ;;  %v9164_v45 = vadd.f32 %v19378_v34, %v9068_v42  ;;  %v19379_v38 = vld [vmem:[#allocation85_spill] sm:$0xff]  ;;  %9202 = vst [vmem:[%s17904_s20 + $0xf8] sm:$0xff] %v9154_v61  ;;  %9203 = vst [vmem:[%s17904_s20 + $0x100] sm:$0xff] %v9155_v5  ;;  %v19380_v58 = vld [vmem:[#allocation84_spill] sm:$0xff] }
 0x73a   : > { %v9165_v46 = vadd.f32 %v19379_v38, %v9069_v62  ;;  %9204 = vst [vmem:[%s17904_s20 + $0x108] sm:$0xff] %v9156_v54  ;;  %9205 = vst [vmem:[%s17904_s20 + $0x110] sm:$0xff] %v9157_v52  ;;  %v9166_v33 = vadd.f32 %v19380_v58, %v9070_v63  ;;  %v19381_v3 = vld [vmem:[#allocation29_spill] sm:$0xff]  ;;  %v19382_v29 = vld [vmem:[#allocation26_spill] sm:$0xff] }
 0x73b   : > { %v9167_v20 = vadd.f32 %v19381_v3, %v9071_v39  ;;  %v9168_v8 = vadd.f32 %v19382_v29, %v9072_v14  ;;  %9206 = vst [vmem:[%s17904_s20 + $0x118] sm:$0xff] %v9158_v44  ;;  %9207 = vst [vmem:[%s17904_s20 + $0x120] sm:$0xff] %v9159_v7 }
 0x73c   : > { %9208 = vst [vmem:[%s17904_s20 + $0x128] sm:$0xff] %v9160_v53  ;;  %9209 = vst [vmem:[%s17904_s20 + $0x130] sm:$0xff] %v9161_v23 }
 0x73d   : > { %9210 = vst [vmem:[%s17904_s20 + $0x138] sm:$0xff] %v9162_v2  ;;  %9211 = vst [vmem:[%s17904_s20 + $0x140] sm:$0xff] %v9163_v17 }
 0x73e   : > { %9212 = vst [vmem:[%s17904_s20 + $0x148] sm:$0xff] %v9164_v45  ;;  %9213 = vst [vmem:[%s17904_s20 + $0x150] sm:$0xff] %v9165_v46 }
 0x73f   : > { %9214 = vst [vmem:[%s17904_s20 + $0x158] sm:$0xff] %v9166_v33  ;;  %9215 = vst [vmem:[%s17904_s20 + $0x160] sm:$0xff] %v9167_v20 }
 0x740   : > { %9216 = vst [vmem:[%s17904_s20 + $0x168] sm:$0xff] %v9168_v8  ;;  %9218 = vst [vmem:[%s17904_s20 + $0x178] sm:$0xff] %v9170_v37 }
 0x741   : > { %12587 = shalt.err (!%p12584_p3)
}
 0x742   : > { %s12588_s21 = scalar_lea.hbm %s18171_s30, 6144  ;;  %s12592_s6 = scalar_lea.hbm %s18235_s3, 12288 }
 0x743   : > { %p12589_p2 = scmp.ne.s32.totalorder %s18171_s30, %s12588_s21  ;;  %p12593_p4 = scmp.lt.s32.totalorder %s18171_s30, %s18235_s3 }
 0x744   : > { %p12594_p6 = scmp.lt.s32.totalorder %s12592_s6, %s12588_s21 }
 0x745   : > { %p12590_p9 = pnand %p12589_p2, %p19383_p11 }
 0x746   : > { %p12595_p8 = por %p12594_p6, %p12593_p4 }
 0x747   : > { %p12591_p1 = pneg %p12590_p9 }
 0x749   : > { %p12596_p5 = pnand %p12595_p8, %p12591_p1 }
 0x74b   : > { %12599 = shalt.err (!%p12596_p5)
}
 0x74c   : > { %s12651_s18 = smov 128   ;;  %s12652_s20 = smov 8  }
 0x74d   : > { %12424 = dma.vmem_to_hbm [thread:$0]  (%p19383_p11), %s18181_s28, 6144, %s18171_s30, %s9220_s16, %s12651_s18, %s12651_s18, %s12652_s20  }
 0x74e PF: > { %s9248_s27 = sand.u32 1, %s12630_s12   ;;  %p19384_p7 = scmp.ne.s32.totalorder %s18442_s19, 0 }
 0x74f   : > { %p19385_p12 = scmp.ge.s32.totalorder %s12642_s15, 2  ;;  %s9249_s23 = scalar_lea.sflag [#allocation5], %s9248_s27 }
 0x751   : > { %p12438_p13 = pnand %p19385_p12, %p19384_p7 }
 0x753   : > { %p12439_p0 = pneg %p12438_p13 }
 0x755   : > { %12625 = dma.done.wait (%p12439_p0), %s9249_s23, 6144  }
 0x756   : > { %12627 = vsyncadd (%p12439_p0), %s9249_s23, 4294961152  ;;  %p17_p10 = scmp.ge.s32.totalorder %s12751_s7, 4   ;;  %s19386_s12 = smov %s12634_s13 }
 0x757   : > { %s19387_s13 = smov %s12638_s14  ;;  %s19388_s14 = smov %s12767_s11 }
 0x758   : > { %s19389_s15 = smov %s12751_s7  ;;  %19 = sbr.rel (!%p17_p10) target bundleno = 6 (0x6), region = 101 }
 0x75d   :  { %9254 = vsyncpa [#allocation4], 1 }
 0x75e   :  { %9256 = vsyncpa [#allocation4 + $0x1], 1 }
 0x75f   :  { %9257 = vsyncpa [#allocation7], 1 }
 0x760   :  { %9258 = vsyncpa [#allocation5], 1 }
 0x761   :  { %9260 = vsyncpa [#allocation5 + $0x1], 1 }

</bundles_post_ra>
